<compile_context>
chip_gen: v7x
topology: tpu7x:2x2x1
jax: 0.10.0
libtpu: 0.0.40
codegen_flags: <defaults>
</compile_context>

<pallas_src>
import jax
import jax.numpy as jnp
from jax.experimental import pallas as pl
from jax.experimental.pallas import tpu as pltpu


def bottleneck_kernel(x_ref, w1_ref, b1_ref, w2_ref, b2_ref, w3_ref, b3_ref,
                      out_ref, pad_ref):
    Nb, H, W, Cp = x_ref.shape
    Wp = w1_ref.shape[1]
    M = Nb * H * W

    # --- conv1block: 1x1 conv (BN scale folded into weights) + bias, ReLU ----
    x2d = x_ref[...].reshape(M, Cp)                         # bf16, loaded once
    y1 = jnp.dot(x2d, w1_ref[...], preferred_element_type=jnp.float32)
    y1 = jnp.maximum(y1 + b1_ref[...], 0.0)                 # (M, Wp) f32

    # --- conv2block: 3x3 conv (pad=1, stride=1) as 9 accumulated matmuls -----
    # Zero only the 1-wide halo border of the pad scratch; the interior is
    # fully rewritten every step, so no cross-step state is carried
    # (megacore-safe).  Scratch is uninitialized, so the border must be
    # written every step (cannot rely on a "first step" flag per core).
    pad_ref[:, 0:1, :, :] = jnp.zeros((Nb, 1, W + 2, Wp), pad_ref.dtype)
    pad_ref[:, H + 1:H + 2, :, :] = jnp.zeros((Nb, 1, W + 2, Wp), pad_ref.dtype)
    pad_ref[:, :, 0:1, :] = jnp.zeros((Nb, H + 2, 1, Wp), pad_ref.dtype)
    pad_ref[:, :, W + 1:W + 2, :] = jnp.zeros((Nb, H + 2, 1, Wp), pad_ref.dtype)
    pad_ref[:, 1:H + 1, 1:W + 1, :] = (
        y1.reshape(Nb, H, W, Wp).astype(pad_ref.dtype))

    # out[h, w] = sum_{dy,dx} pad[h+dy, w+dx] @ w2[dy, dx]  (f32 accumulator).
    y2 = jnp.zeros((M, Wp), jnp.float32)
    for dy in range(3):
        for dx in range(3):
            t = dy * 3 + dx
            tap = pad_ref[:, dy:dy + H, dx:dx + W, :].reshape(M, Wp)
            y2 = y2 + jnp.dot(tap, w2_ref[t],
                              preferred_element_type=jnp.float32)
    y2 = jnp.maximum(y2 + b2_ref[...], 0.0)                  # (M, Wp) f32

    # --- conv3block: 1x1 conv + bias, ReLU ------------------------------------
    y3 = jnp.dot(y2.astype(jnp.bfloat16), w3_ref[...],
                 preferred_element_type=jnp.float32)
    y3 = jnp.maximum(y3 + b3_ref[...], 0.0)                  # (M, Cp) f32

    # --- residual add + final ReLU (reuse x2d loaded above) -------------------
    out = jnp.maximum(y3 + x2d.astype(jnp.float32), 0.0)
    out_ref[...] = out.reshape(Nb, H, W, Cp).astype(out_ref.dtype)


def _round_up(c, m=128):
    return ((c + m - 1) // m) * m


def bottleneck_pallas(x, w1, s1, b1, w2, s2, b2, w3, s3, b3):
    """x: (N,H,W,Cin) f32; w1:(Cin,width); w2:(3,3,width,width) HWIO;
    w3:(width,Cout); s*/b* folded-BN scale/bias of shape (1,C).
    Returns bf16 (N,H,W,Cout)."""
    N, H, W, Cin = x.shape
    width = w1.shape[1]
    Cout = w3.shape[1]
    if Cin != Cout:
        raise ValueError("identity skip requires Cin == Cout (no downsample)")

    Cp = _round_up(Cin)
    Wp = _round_up(width)

    # Fold BN scale into conv weights (eval BN: y = conv(x) * s + b).
    w1f = (w1 * s1).astype(jnp.bfloat16)                          # (Cin, width)
    w2f = (w2 * s2.reshape(1, 1, 1, width)).astype(jnp.bfloat16)  # HWIO
    w3f = (w3 * s3).astype(jnp.bfloat16)                          # (width, Cout)

    # Lane-dense channel padding (zeros stay exactly zero through every stage);
    # skipped entirely when the channel count is already a multiple of 128.
    if Cin == Cp:
        xp = x.astype(jnp.bfloat16)
    else:
        xp = jnp.zeros((N, H, W, Cp), jnp.bfloat16).at[..., :Cin].set(
            x.astype(jnp.bfloat16))
    w1p = jnp.zeros((Cp, Wp), jnp.bfloat16).at[:Cin, :width].set(w1f)
    b1p = jnp.zeros((1, Wp), jnp.float32).at[:, :width].set(b1)
    w2p = jnp.zeros((3, 3, Wp, Wp), jnp.bfloat16).at[:, :, :width, :width].set(
        w2f).reshape(9, Wp, Wp)
    b2p = jnp.zeros((1, Wp), jnp.float32).at[:, :width].set(b2)
    w3p = jnp.zeros((Wp, Cp), jnp.bfloat16).at[:width, :Cout].set(w3f)
    b3p = jnp.zeros((1, Cp), jnp.float32).at[:, :Cout].set(b3)

    # ---- generation-aware VMEM budget and per-step tile size ----------------
    try:
        vmem_cap = int(pltpu.get_tpu_info().vmem_capacity_bytes)
    except Exception:
        vmem_cap = 64 * 1024 * 1024            # v7x-safe fallback
    vmem_limit = min((3 * vmem_cap) // 4, 112 * 1024 * 1024)
    budget = vmem_limit // 2                   # 2x headroom for compiler temps

    hw = H * W
    weight_bytes = (Cp * Wp + 9 * Wp * Wp + Wp * Cp) * 2 + (2 * Wp + Cp) * 4

    def est(nb):
        act = nb * hw * Cp * 2                      # bf16 activation tile
        pad = nb * (H + 2) * (W + 2) * Wp * 2       # halo scratch (bf16)
        f32_tmp = 3 * nb * hw * max(Wp, Cp) * 4     # y1/y2/y3-sized f32 temps
        return 2 * act + 2 * act + pad + weight_bytes + f32_tmp

    # Largest divisor of N that keeps >= 2 grid steps (when N >= 2), fits the
    # VMEM budget, and keeps M = nb*H*W bounded.
    cap = N // 2 if N >= 2 else 1
    nb = 1
    for cand in range(1, cap + 1):
        if N % cand:
            continue
        if cand * hw > 8192 or est(cand) > budget:
            break
        nb = cand

    def const_spec(shape):
        # Grid-invariant operands: single-buffer to save VMEM.
        return pl.BlockSpec(shape, lambda n, _r=len(shape): (0,) * _r,
                            pipeline_mode=pl.Buffered(1))

    def plain_spec(shape):
        return pl.BlockSpec(shape, lambda n, _r=len(shape): (0,) * _r)

    def build(single_buffer_weights):
        wspec = const_spec if single_buffer_weights else plain_spec
        return pl.pallas_call(
            bottleneck_kernel,
            out_shape=jax.ShapeDtypeStruct((N, H, W, Cp), jnp.bfloat16),
            grid_spec=pltpu.PrefetchScalarGridSpec(
                num_scalar_prefetch=0,
                grid=(N // nb,),
                in_specs=[
                    pl.BlockSpec((nb, H, W, Cp), lambda n: (n, 0, 0, 0)),
                    wspec(w1p.shape), wspec(b1p.shape),
                    wspec(w2p.shape), wspec(b2p.shape),
                    wspec(w3p.shape), wspec(b3p.shape),
                ],
                out_specs=pl.BlockSpec((nb, H, W, Cp), lambda n: (n, 0, 0, 0)),
                scratch_shapes=[
                    pltpu.VMEM((nb, H + 2, W + 2, Wp), jnp.bfloat16),  # halo
                ],
            ),
            compiler_params=pltpu.CompilerParams(
                dimension_semantics=("parallel",),
                vmem_limit_bytes=int(vmem_limit)),
        )

    try:
        out = build(True)(xp, w1p, b1p, w2p, b2p, w3p, b3p)
    except Exception:
        # Fallback if pipeline_mode=pl.Buffered(1) is unsupported here.
        out = build(False)(xp, w1p, b1p, w2p, b2p, w3p, b3p)

    if Cout != Cp:
        out = out[..., :Cout]
    return out


def bottleneck_reference(x, w1, s1, b1, w2, s2, b2, w3, s3, b3):
    dn = ('NHWC', 'HWIO', 'NHWC')
    y = jax.lax.conv_general_dilated(
        x, w1.reshape(1, 1, *w1.shape), (1, 1), 'VALID', dimension_numbers=dn)
    y = jnp.maximum(y * s1 + b1, 0.0)
    y = jax.lax.conv_general_dilated(
        y, w2, (1, 1), 'SAME', dimension_numbers=dn)
    y = jnp.maximum(y * s2 + b2, 0.0)
    y = jax.lax.conv_general_dilated(
        y, w3.reshape(1, 1, *w3.shape), (1, 1), 'VALID', dimension_numbers=dn)
    y = jnp.maximum(y * s3 + b3, 0.0)
    return jnp.maximum(y + x, 0.0)


def fold_bn(key, c, eps=1e-5):
    k1, k2, k3, k4 = jax.random.split(key, 4)
    gamma = 1.0 + 0.1 * jax.random.normal(k1, (c,), jnp.float32)
    beta = 0.1 * jax.random.normal(k2, (c,), jnp.float32)
    mean = 0.1 * jax.random.normal(k3, (c,), jnp.float32)
    var = jnp.abs(jax.random.normal(k4, (c,), jnp.float32)) + 0.5
    scale = gamma / jnp.sqrt(var + eps)
    bias = beta - mean * scale
    return scale.reshape(1, c), bias.reshape(1, c)


if __name__ == "__main__":
    # Bottleneck(inplanes=16, planes=4) -> width=4, out_channels=16 (=inplanes,
    # so the identity skip is valid without a downsample).
    N, H, W = 8, 8, 8
    inplanes, planes = 16, 4
    width = planes
    cout = planes * 4  # expansion = 4

    key = jax.random.PRNGKey(0)
    kx, kw1, kw2, kw3, kb1, kb2, kb3 = jax.random.split(key, 7)

    x = jax.random.normal(kx, (N, H, W, inplanes), jnp.float32)

    w1 = 0.2 * jax.random.normal(kw1, (inplanes, width), jnp.float32)     # 1x1
    w2 = 0.2 * jax.random.normal(kw2, (3, 3, width, width), jnp.float32)  # 3x3
    w3 = 0.2 * jax.random.normal(kw3, (width, cout), jnp.float32)         # 1x1

    s1, b1 = fold_bn(kb1, width)
    s2, b2 = fold_bn(kb2, width)
    s3, b3 = fold_bn(kb3, cout)

    out = bottleneck_pallas(x, w1, s1, b1, w2, s2, b2, w3, s3, b3)
    out = jax.block_until_ready(out)

    ref = bottleneck_reference(x, w1, s1, b1, w2, s2, b2, w3, s3, b3)
    assert out.shape == (N, H, W, cout)
    # bf16 activations/weights/output in the kernel vs f32 reference.
    assert jnp.allclose(out.astype(jnp.float32), ref, atol=8e-2, rtol=8e-2), \
        "mismatch vs reference"

    print("KERNEL_OK")
</pallas_src>

<mosaic_0001>
module attributes {stable_mosaic.version = 11 : i64} {
  func.func @bottleneck_kernel(%arg0: i32, %arg1: memref<4x8x8x128xbf16, #tpu.memory_space<vmem>>, %arg2: memref<128x128xbf16, #tpu.memory_space<vmem>>, %arg3: memref<1x128xf32, #tpu.memory_space<vmem>>, %arg4: memref<9x128x128xbf16, #tpu.memory_space<vmem>>, %arg5: memref<1x128xf32, #tpu.memory_space<vmem>>, %arg6: memref<128x128xbf16, #tpu.memory_space<vmem>>, %arg7: memref<1x128xf32, #tpu.memory_space<vmem>>, %arg8: memref<4x8x8x128xbf16, #tpu.memory_space<vmem>>, %arg9: memref<4x10x10x128xbf16, #tpu.memory_space<vmem>>) attributes {dimension_semantics = [#tpu.dimension_semantics<parallel>], iteration_bounds = array<i64: 2>, scalar_prefetch = 0 : i64, scratch_operands = 1 : i64, tpu.core_type = #tpu.core_type<tc>, window_params = [{transform_indices = @transform_0, window_bounds = array<i64: 4, 8, 8, 128>}, {pipeline_mode = #tpu.pipeline_mode<synchronous>, transform_indices = @transform_1, window_bounds = array<i64: 128, 128>}, {pipeline_mode = #tpu.pipeline_mode<synchronous>, transform_indices = @transform_2, window_bounds = array<i64: 1, 128>}, {pipeline_mode = #tpu.pipeline_mode<synchronous>, transform_indices = @transform_3, window_bounds = array<i64: 9, 128, 128>}, {pipeline_mode = #tpu.pipeline_mode<synchronous>, transform_indices = @transform_4, window_bounds = array<i64: 1, 128>}, {pipeline_mode = #tpu.pipeline_mode<synchronous>, transform_indices = @transform_5, window_bounds = array<i64: 128, 128>}, {pipeline_mode = #tpu.pipeline_mode<synchronous>, transform_indices = @transform_6, window_bounds = array<i64: 1, 128>}, {transform_indices = @transform_7, window_bounds = array<i64: 4, 8, 8, 128>}]} {
    %c0 = arith.constant 0 : index
    %c0_0 = arith.constant 0 : index
    %c0_1 = arith.constant 0 : index
    %c0_2 = arith.constant 0 : index
    %0 = vector.load %arg1[%c0, %c0_0, %c0_1, %c0_2] : memref<4x8x8x128xbf16, #tpu.memory_space<vmem>>, vector<4x8x8x128xbf16>
    %1 = vector.shape_cast %0 : vector<4x8x8x128xbf16> to vector<256x128xbf16>
    %c0_3 = arith.constant 0 : index
    %c0_4 = arith.constant 0 : index
    %2 = vector.load %arg2[%c0_3, %c0_4] : memref<128x128xbf16, #tpu.memory_space<vmem>>, vector<128x128xbf16>
    %cst = arith.constant dense<0.000000e+00> : vector<256x128xf32>
    %3 = tpu.matmul %1, %2, %cst {dimension_numbers = #tpu.dot_dimension_numbers<[1], [0], [0], [1], [0, 0, 1, 1], [], []>} : vector<256x128xbf16>, vector<128x128xbf16>, vector<256x128xf32> -> vector<256x128xf32>
    %c0_5 = arith.constant 0 : index
    %c0_6 = arith.constant 0 : index
    %4 = vector.load %arg3[%c0_5, %c0_6] : memref<1x128xf32, #tpu.memory_space<vmem>>, vector<1x128xf32>
    %5 = vector.broadcast %4 : vector<1x128xf32> to vector<256x128xf32>
    %6 = arith.addf %3, %5 : vector<256x128xf32>
    %cst_7 = arith.constant 0.000000e+00 : f32
    %7 = vector.broadcast %cst_7 : f32 to vector<256x128xf32>
    %8 = arith.maximumf %6, %7 : vector<256x128xf32>
    %cst_8 = arith.constant 0.000000e+00 : bf16
    %9 = vector.broadcast %cst_8 : bf16 to vector<4x1x10x128xbf16>
    %c0_9 = arith.constant 0 : index
    %c0_10 = arith.constant 0 : index
    %c0_11 = arith.constant 0 : index
    %c0_12 = arith.constant 0 : index
    %10 = vector.load %arg9[%c0_9, %c0_10, %c0_11, %c0_12] : memref<4x10x10x128xbf16, #tpu.memory_space<vmem>>, vector<4x1x10x128xbf16>
    tpu.vector_store %arg9[%c0_9, %c0_10, %c0_11, %c0_12], %9 {strides = array<i32>} : memref<4x10x10x128xbf16, #tpu.memory_space<vmem>>, vector<4x1x10x128xbf16>,
    %cst_13 = arith.constant 0.000000e+00 : bf16
    %11 = vector.broadcast %cst_13 : bf16 to vector<4x1x10x128xbf16>
    %c0_14 = arith.constant 0 : index
    %c9 = arith.constant 9 : index
    %c0_15 = arith.constant 0 : index
    %c0_16 = arith.constant 0 : index
    %12 = vector.load %arg9[%c0_14, %c9, %c0_15, %c0_16] : memref<4x10x10x128xbf16, #tpu.memory_space<vmem>>, vector<4x1x10x128xbf16>
    tpu.vector_store %arg9[%c0_14, %c9, %c0_15, %c0_16], %11 {strides = array<i32>} : memref<4x10x10x128xbf16, #tpu.memory_space<vmem>>, vector<4x1x10x128xbf16>,
    %cst_17 = arith.constant 0.000000e+00 : bf16
    %13 = vector.broadcast %cst_17 : bf16 to vector<4x10x1x128xbf16>
    %c0_18 = arith.constant 0 : index
    %c0_19 = arith.constant 0 : index
    %c0_20 = arith.constant 0 : index
    %c0_21 = arith.constant 0 : index
    %14 = vector.load %arg9[%c0_18, %c0_19, %c0_20, %c0_21] : memref<4x10x10x128xbf16, #tpu.memory_space<vmem>>, vector<4x10x1x128xbf16>
    tpu.vector_store %arg9[%c0_18, %c0_19, %c0_20, %c0_21], %13 {strides = array<i32>} : memref<4x10x10x128xbf16, #tpu.memory_space<vmem>>, vector<4x10x1x128xbf16>,
    %cst_22 = arith.constant 0.000000e+00 : bf16
    %15 = vector.broadcast %cst_22 : bf16 to vector<4x10x1x128xbf16>
    %c0_23 = arith.constant 0 : index
    %c0_24 = arith.constant 0 : index
    %c9_25 = arith.constant 9 : index
    %c0_26 = arith.constant 0 : index
    %16 = vector.load %arg9[%c0_23, %c0_24, %c9_25, %c0_26] : memref<4x10x10x128xbf16, #tpu.memory_space<vmem>>, vector<4x10x1x128xbf16>
    tpu.vector_store %arg9[%c0_23, %c0_24, %c9_25, %c0_26], %15 {strides = array<i32>} : memref<4x10x10x128xbf16, #tpu.memory_space<vmem>>, vector<4x10x1x128xbf16>,
    %17 = vector.shape_cast %8 : vector<256x128xf32> to vector<4x8x8x128xf32>
    %18 = arith.truncf %17 : vector<4x8x8x128xf32> to vector<4x8x8x128xbf16>
    %c0_27 = arith.constant 0 : index
    %c1 = arith.constant 1 : index
    %c1_28 = arith.constant 1 : index
    %c0_29 = arith.constant 0 : index
    %19 = vector.load %arg9[%c0_27, %c1, %c1_28, %c0_29] : memref<4x10x10x128xbf16, #tpu.memory_space<vmem>>, vector<4x8x8x128xbf16>
    tpu.vector_store %arg9[%c0_27, %c1, %c1_28, %c0_29], %18 {strides = array<i32>} : memref<4x10x10x128xbf16, #tpu.memory_space<vmem>>, vector<4x8x8x128xbf16>,
    %cst_30 = arith.constant 0.000000e+00 : f32
    %20 = vector.broadcast %cst_30 : f32 to vector<256x128xf32>
    %c0_31 = arith.constant 0 : index
    %c0_32 = arith.constant 0 : index
    %c0_33 = arith.constant 0 : index
    %c0_34 = arith.constant 0 : index
    %21 = vector.load %arg9[%c0_31, %c0_32, %c0_33, %c0_34] : memref<4x10x10x128xbf16, #tpu.memory_space<vmem>>, vector<4x8x8x128xbf16>
    %22 = vector.shape_cast %21 : vector<4x8x8x128xbf16> to vector<256x128xbf16>
    %c0_35 = arith.constant 0 : index
    %c0_36 = arith.constant 0 : index
    %c0_37 = arith.constant 0 : index
    %23 = vector.load %arg4[%c0_35, %c0_36, %c0_37] : memref<9x128x128xbf16, #tpu.memory_space<vmem>>, vector<1x128x128xbf16>
    %24 = vector.shape_cast %23 : vector<1x128x128xbf16> to vector<128x128xbf16>
    %cst_38 = arith.constant dense<0.000000e+00> : vector<256x128xf32>
    %25 = tpu.matmul %22, %24, %cst_38 {dimension_numbers = #tpu.dot_dimension_numbers<[1], [0], [0], [1], [0, 0, 1, 1], [], []>} : vector<256x128xbf16>, vector<128x128xbf16>, vector<256x128xf32> -> vector<256x128xf32>
    %26 = arith.addf %20, %25 : vector<256x128xf32>
    %c0_39 = arith.constant 0 : index
    %c0_40 = arith.constant 0 : index
    %c1_41 = arith.constant 1 : index
    %c0_42 = arith.constant 0 : index
    %27 = vector.load %arg9[%c0_39, %c0_40, %c1_41, %c0_42] : memref<4x10x10x128xbf16, #tpu.memory_space<vmem>>, vector<4x8x8x128xbf16>
    %28 = vector.shape_cast %27 : vector<4x8x8x128xbf16> to vector<256x128xbf16>
    %c1_43 = arith.constant 1 : index
    %c0_44 = arith.constant 0 : index
    %c0_45 = arith.constant 0 : index
    %29 = vector.load %arg4[%c1_43, %c0_44, %c0_45] : memref<9x128x128xbf16, #tpu.memory_space<vmem>>, vector<1x128x128xbf16>
    %30 = vector.shape_cast %29 : vector<1x128x128xbf16> to vector<128x128xbf16>
    %cst_46 = arith.constant dense<0.000000e+00> : vector<256x128xf32>
    %31 = tpu.matmul %28, %30, %cst_46 {dimension_numbers = #tpu.dot_dimension_numbers<[1], [0], [0], [1], [0, 0, 1, 1], [], []>} : vector<256x128xbf16>, vector<128x128xbf16>, vector<256x128xf32> -> vector<256x128xf32>
    %32 = arith.addf %26, %31 : vector<256x128xf32>
    %c0_47 = arith.constant 0 : index
    %c0_48 = arith.constant 0 : index
    %c2 = arith.constant 2 : index
    %c0_49 = arith.constant 0 : index
    %33 = vector.load %arg9[%c0_47, %c0_48, %c2, %c0_49] : memref<4x10x10x128xbf16, #tpu.memory_space<vmem>>, vector<4x8x8x128xbf16>
    %34 = vector.shape_cast %33 : vector<4x8x8x128xbf16> to vector<256x128xbf16>
    %c2_50 = arith.constant 2 : index
    %c0_51 = arith.constant 0 : index
    %c0_52 = arith.constant 0 : index
    %35 = vector.load %arg4[%c2_50, %c0_51, %c0_52] : memref<9x128x128xbf16, #tpu.memory_space<vmem>>, vector<1x128x128xbf16>
    %36 = vector.shape_cast %35 : vector<1x128x128xbf16> to vector<128x128xbf16>
    %cst_53 = arith.constant dense<0.000000e+00> : vector<256x128xf32>
    %37 = tpu.matmul %34, %36, %cst_53 {dimension_numbers = #tpu.dot_dimension_numbers<[1], [0], [0], [1], [0, 0, 1, 1], [], []>} : vector<256x128xbf16>, vector<128x128xbf16>, vector<256x128xf32> -> vector<256x128xf32>
    %38 = arith.addf %32, %37 : vector<256x128xf32>
    %c0_54 = arith.constant 0 : index
    %c1_55 = arith.constant 1 : index
    %c0_56 = arith.constant 0 : index
    %c0_57 = arith.constant 0 : index
    %39 = vector.load %arg9[%c0_54, %c1_55, %c0_56, %c0_57] : memref<4x10x10x128xbf16, #tpu.memory_space<vmem>>, vector<4x8x8x128xbf16>
    %40 = vector.shape_cast %39 : vector<4x8x8x128xbf16> to vector<256x128xbf16>
    %c3 = arith.constant 3 : index
    %c0_58 = arith.constant 0 : index
    %c0_59 = arith.constant 0 : index
    %41 = vector.load %arg4[%c3, %c0_58, %c0_59] : memref<9x128x128xbf16, #tpu.memory_space<vmem>>, vector<1x128x128xbf16>
    %42 = vector.shape_cast %41 : vector<1x128x128xbf16> to vector<128x128xbf16>
    %cst_60 = arith.constant dense<0.000000e+00> : vector<256x128xf32>
    %43 = tpu.matmul %40, %42, %cst_60 {dimension_numbers = #tpu.dot_dimension_numbers<[1], [0], [0], [1], [0, 0, 1, 1], [], []>} : vector<256x128xbf16>, vector<128x128xbf16>, vector<256x128xf32> -> vector<256x128xf32>
    %44 = arith.addf %38, %43 : vector<256x128xf32>
    %c0_61 = arith.constant 0 : index
    %c1_62 = arith.constant 1 : index
    %c1_63 = arith.constant 1 : index
    %c0_64 = arith.constant 0 : index
    %45 = vector.load %arg9[%c0_61, %c1_62, %c1_63, %c0_64] : memref<4x10x10x128xbf16, #tpu.memory_space<vmem>>, vector<4x8x8x128xbf16>
    %46 = vector.shape_cast %45 : vector<4x8x8x128xbf16> to vector<256x128xbf16>
    %c4 = arith.constant 4 : index
    %c0_65 = arith.constant 0 : index
    %c0_66 = arith.constant 0 : index
    %47 = vector.load %arg4[%c4, %c0_65, %c0_66] : memref<9x128x128xbf16, #tpu.memory_space<vmem>>, vector<1x128x128xbf16>
    %48 = vector.shape_cast %47 : vector<1x128x128xbf16> to vector<128x128xbf16>
    %cst_67 = arith.constant dense<0.000000e+00> : vector<256x128xf32>
    %49 = tpu.matmul %46, %48, %cst_67 {dimension_numbers = #tpu.dot_dimension_numbers<[1], [0], [0], [1], [0, 0, 1, 1], [], []>} : vector<256x128xbf16>, vector<128x128xbf16>, vector<256x128xf32> -> vector<256x128xf32>
    %50 = arith.addf %44, %49 : vector<256x128xf32>
    %c0_68 = arith.constant 0 : index
    %c1_69 = arith.constant 1 : index
    %c2_70 = arith.constant 2 : index
    %c0_71 = arith.constant 0 : index
    %51 = vector.load %arg9[%c0_68, %c1_69, %c2_70, %c0_71] : memref<4x10x10x128xbf16, #tpu.memory_space<vmem>>, vector<4x8x8x128xbf16>
    %52 = vector.shape_cast %51 : vector<4x8x8x128xbf16> to vector<256x128xbf16>
    %c5 = arith.constant 5 : index
    %c0_72 = arith.constant 0 : index
    %c0_73 = arith.constant 0 : index
    %53 = vector.load %arg4[%c5, %c0_72, %c0_73] : memref<9x128x128xbf16, #tpu.memory_space<vmem>>, vector<1x128x128xbf16>
    %54 = vector.shape_cast %53 : vector<1x128x128xbf16> to vector<128x128xbf16>
    %cst_74 = arith.constant dense<0.000000e+00> : vector<256x128xf32>
    %55 = tpu.matmul %52, %54, %cst_74 {dimension_numbers = #tpu.dot_dimension_numbers<[1], [0], [0], [1], [0, 0, 1, 1], [], []>} : vector<256x128xbf16>, vector<128x128xbf16>, vector<256x128xf32> -> vector<256x128xf32>
    %56 = arith.addf %50, %55 : vector<256x128xf32>
    %c0_75 = arith.constant 0 : index
    %c2_76 = arith.constant 2 : index
    %c0_77 = arith.constant 0 : index
    %c0_78 = arith.constant 0 : index
    %57 = vector.load %arg9[%c0_75, %c2_76, %c0_77, %c0_78] : memref<4x10x10x128xbf16, #tpu.memory_space<vmem>>, vector<4x8x8x128xbf16>
    %58 = vector.shape_cast %57 : vector<4x8x8x128xbf16> to vector<256x128xbf16>
    %c6 = arith.constant 6 : index
    %c0_79 = arith.constant 0 : index
    %c0_80 = arith.constant 0 : index
    %59 = vector.load %arg4[%c6, %c0_79, %c0_80] : memref<9x128x128xbf16, #tpu.memory_space<vmem>>, vector<1x128x128xbf16>
    %60 = vector.shape_cast %59 : vector<1x128x128xbf16> to vector<128x128xbf16>
    %cst_81 = arith.constant dense<0.000000e+00> : vector<256x128xf32>
    %61 = tpu.matmul %58, %60, %cst_81 {dimension_numbers = #tpu.dot_dimension_numbers<[1], [0], [0], [1], [0, 0, 1, 1], [], []>} : vector<256x128xbf16>, vector<128x128xbf16>, vector<256x128xf32> -> vector<256x128xf32>
    %62 = arith.addf %56, %61 : vector<256x128xf32>
    %c0_82 = arith.constant 0 : index
    %c2_83 = arith.constant 2 : index
    %c1_84 = arith.constant 1 : index
    %c0_85 = arith.constant 0 : index
    %63 = vector.load %arg9[%c0_82, %c2_83, %c1_84, %c0_85] : memref<4x10x10x128xbf16, #tpu.memory_space<vmem>>, vector<4x8x8x128xbf16>
    %64 = vector.shape_cast %63 : vector<4x8x8x128xbf16> to vector<256x128xbf16>
    %c7 = arith.constant 7 : index
    %c0_86 = arith.constant 0 : index
    %c0_87 = arith.constant 0 : index
    %65 = vector.load %arg4[%c7, %c0_86, %c0_87] : memref<9x128x128xbf16, #tpu.memory_space<vmem>>, vector<1x128x128xbf16>
    %66 = vector.shape_cast %65 : vector<1x128x128xbf16> to vector<128x128xbf16>
    %cst_88 = arith.constant dense<0.000000e+00> : vector<256x128xf32>
    %67 = tpu.matmul %64, %66, %cst_88 {dimension_numbers = #tpu.dot_dimension_numbers<[1], [0], [0], [1], [0, 0, 1, 1], [], []>} : vector<256x128xbf16>, vector<128x128xbf16>, vector<256x128xf32> -> vector<256x128xf32>
    %68 = arith.addf %62, %67 : vector<256x128xf32>
    %c0_89 = arith.constant 0 : index
    %c2_90 = arith.constant 2 : index
    %c2_91 = arith.constant 2 : index
    %c0_92 = arith.constant 0 : index
    %69 = vector.load %arg9[%c0_89, %c2_90, %c2_91, %c0_92] : memref<4x10x10x128xbf16, #tpu.memory_space<vmem>>, vector<4x8x8x128xbf16>
    %70 = vector.shape_cast %69 : vector<4x8x8x128xbf16> to vector<256x128xbf16>
    %c8 = arith.constant 8 : index
    %c0_93 = arith.constant 0 : index
    %c0_94 = arith.constant 0 : index
    %71 = vector.load %arg4[%c8, %c0_93, %c0_94] : memref<9x128x128xbf16, #tpu.memory_space<vmem>>, vector<1x128x128xbf16>
    %72 = vector.shape_cast %71 : vector<1x128x128xbf16> to vector<128x128xbf16>
    %cst_95 = arith.constant dense<0.000000e+00> : vector<256x128xf32>
    %73 = tpu.matmul %70, %72, %cst_95 {dimension_numbers = #tpu.dot_dimension_numbers<[1], [0], [0], [1], [0, 0, 1, 1], [], []>} : vector<256x128xbf16>, vector<128x128xbf16>, vector<256x128xf32> -> vector<256x128xf32>
    %74 = arith.addf %68, %73 : vector<256x128xf32>
    %c0_96 = arith.constant 0 : index
    %c0_97 = arith.constant 0 : index
    %75 = vector.load %arg5[%c0_96, %c0_97] : memref<1x128xf32, #tpu.memory_space<vmem>>, vector<1x128xf32>
    %76 = vector.broadcast %75 : vector<1x128xf32> to vector<256x128xf32>
    %77 = arith.addf %74, %76 : vector<256x128xf32>
    %cst_98 = arith.constant 0.000000e+00 : f32
    %78 = vector.broadcast %cst_98 : f32 to vector<256x128xf32>
    %79 = arith.maximumf %77, %78 : vector<256x128xf32>
    %80 = arith.truncf %79 : vector<256x128xf32> to vector<256x128xbf16>
    %c0_99 = arith.constant 0 : index
    %c0_100 = arith.constant 0 : index
    %81 = vector.load %arg6[%c0_99, %c0_100] : memref<128x128xbf16, #tpu.memory_space<vmem>>, vector<128x128xbf16>
    %cst_101 = arith.constant dense<0.000000e+00> : vector<256x128xf32>
    %82 = tpu.matmul %80, %81, %cst_101 {dimension_numbers = #tpu.dot_dimension_numbers<[1], [0], [0], [1], [0, 0, 1, 1], [], []>} : vector<256x128xbf16>, vector<128x128xbf16>, vector<256x128xf32> -> vector<256x128xf32>
    %c0_102 = arith.constant 0 : index
    %c0_103 = arith.constant 0 : index
    %83 = vector.load %arg7[%c0_102, %c0_103] : memref<1x128xf32, #tpu.memory_space<vmem>>, vector<1x128xf32>
    %84 = vector.broadcast %83 : vector<1x128xf32> to vector<256x128xf32>
    %85 = arith.addf %82, %84 : vector<256x128xf32>
    %cst_104 = arith.constant 0.000000e+00 : f32
    %86 = vector.broadcast %cst_104 : f32 to vector<256x128xf32>
    %87 = arith.maximumf %85, %86 : vector<256x128xf32>
    %88 = arith.extf %1 : vector<256x128xbf16> to vector<256x128xf32>
    %89 = arith.addf %87, %88 : vector<256x128xf32>
    %cst_105 = arith.constant 0.000000e+00 : f32
    %90 = vector.broadcast %cst_105 : f32 to vector<256x128xf32>
    %91 = arith.maximumf %89, %90 : vector<256x128xf32>
    %92 = vector.shape_cast %91 : vector<256x128xf32> to vector<4x8x8x128xf32>
    %93 = arith.truncf %92 : vector<4x8x8x128xf32> to vector<4x8x8x128xbf16>
    %c0_106 = arith.constant 0 : index
    %c0_107 = arith.constant 0 : index
    %c0_108 = arith.constant 0 : index
    %c0_109 = arith.constant 0 : index
    %94 = vector.load %arg8[%c0_106, %c0_107, %c0_108, %c0_109] : memref<4x8x8x128xbf16, #tpu.memory_space<vmem>>, vector<4x8x8x128xbf16>
    tpu.vector_store %arg8[%c0_106, %c0_107, %c0_108, %c0_109], %93 {strides = array<i32>} : memref<4x8x8x128xbf16, #tpu.memory_space<vmem>>, vector<4x8x8x128xbf16>,
    return
  }
  func.func @transform_0(%arg0: i32) -> (i32, i32, i32, i32) {
    %c0_i32 = arith.constant 0 : i32
    %c0_i32_0 = arith.constant 0 : i32
    %c0_i32_1 = arith.constant 0 : i32
    %c0_i32_2 = arith.constant 0 : i32
    return %arg0, %c0_i32, %c0_i32_0, %c0_i32_1 : i32, i32, i32, i32
  }
  func.func @transform_1(%arg0: i32) -> (i32, i32) {
    %c0_i32 = arith.constant 0 : i32
    %c0_i32_0 = arith.constant 0 : i32
    %c0_i32_1 = arith.constant 0 : i32
    return %c0_i32, %c0_i32_0 : i32, i32
  }
  func.func @transform_2(%arg0: i32) -> (i32, i32) {
    %c0_i32 = arith.constant 0 : i32
    %c0_i32_0 = arith.constant 0 : i32
    %c0_i32_1 = arith.constant 0 : i32
    return %c0_i32, %c0_i32_0 : i32, i32
  }
  func.func @transform_3(%arg0: i32) -> (i32, i32, i32) {
    %c0_i32 = arith.constant 0 : i32
    %c0_i32_0 = arith.constant 0 : i32
    %c0_i32_1 = arith.constant 0 : i32
    %c0_i32_2 = arith.constant 0 : i32
    return %c0_i32, %c0_i32_0, %c0_i32_1 : i32, i32, i32
  }
  func.func @transform_4(%arg0: i32) -> (i32, i32) {
    %c0_i32 = arith.constant 0 : i32
    %c0_i32_0 = arith.constant 0 : i32
    %c0_i32_1 = arith.constant 0 : i32
    return %c0_i32, %c0_i32_0 : i32, i32
  }
  func.func @transform_5(%arg0: i32) -> (i32, i32) {
    %c0_i32 = arith.constant 0 : i32
    %c0_i32_0 = arith.constant 0 : i32
    %c0_i32_1 = arith.constant 0 : i32
    return %c0_i32, %c0_i32_0 : i32, i32
  }
  func.func @transform_6(%arg0: i32) -> (i32, i32) {
    %c0_i32 = arith.constant 0 : i32
    %c0_i32_0 = arith.constant 0 : i32
    %c0_i32_1 = arith.constant 0 : i32
    return %c0_i32, %c0_i32_0 : i32, i32
  }
  func.func @transform_7(%arg0: i32) -> (i32, i32, i32, i32) {
    %c0_i32 = arith.constant 0 : i32
    %c0_i32_0 = arith.constant 0 : i32
    %c0_i32_1 = arith.constant 0 : i32
    %c0_i32_2 = arith.constant 0 : i32
    return %arg0, %c0_i32, %c0_i32_0, %c0_i32_1 : i32, i32, i32, i32
  }
}

module attributes {stable_mosaic.version = 11 : i64} {
  func.func @bottleneck_kernel(%arg0: i32, %arg1: memref<4x8x8x128xbf16, #tpu.memory_space<vmem>>, %arg2: memref<128x128xbf16, #tpu.memory_space<vmem>>, %arg3: memref<1x128xf32, #tpu.memory_space<vmem>>, %arg4: memref<9x128x128xbf16, #tpu.memory_space<vmem>>, %arg5: memref<1x128xf32, #tpu.memory_space<vmem>>, %arg6: memref<128x128xbf16, #tpu.memory_space<vmem>>, %arg7: memref<1x128xf32, #tpu.memory_space<vmem>>, %arg8: memref<4x8x8x128xbf16, #tpu.memory_space<vmem>>, %arg9: memref<4x10x10x128xbf16, #tpu.memory_space<vmem>>) attributes {dimension_semantics = [#tpu.dimension_semantics<parallel>], iteration_bounds = array<i64: 2>, scalar_prefetch = 0 : i64, scratch_operands = 1 : i64, tpu.core_type = #tpu.core_type<tc>, window_params = [{transform_indices = @transform_0, window_bounds = array<i64: 4, 8, 8, 128>}, {pipeline_mode = #tpu.pipeline_mode<synchronous>, transform_indices = @transform_1, window_bounds = array<i64: 128, 128>}, {pipeline_mode = #tpu.pipeline_mode<synchronous>, transform_indices = @transform_2, window_bounds = array<i64: 1, 128>}, {pipeline_mode = #tpu.pipeline_mode<synchronous>, transform_indices = @transform_3, window_bounds = array<i64: 9, 128, 128>}, {pipeline_mode = #tpu.pipeline_mode<synchronous>, transform_indices = @transform_4, window_bounds = array<i64: 1, 128>}, {pipeline_mode = #tpu.pipeline_mode<synchronous>, transform_indices = @transform_5, window_bounds = array<i64: 128, 128>}, {pipeline_mode = #tpu.pipeline_mode<synchronous>, transform_indices = @transform_6, window_bounds = array<i64: 1, 128>}, {transform_indices = @transform_7, window_bounds = array<i64: 4, 8, 8, 128>}]} {
    %c0 = arith.constant 0 : index
    %c0_0 = arith.constant 0 : index
    %c0_1 = arith.constant 0 : index
    %c0_2 = arith.constant 0 : index
    %0 = vector.load %arg1[%c0, %c0_0, %c0_1, %c0_2] : memref<4x8x8x128xbf16, #tpu.memory_space<vmem>>, vector<4x8x8x128xbf16>
    %1 = vector.shape_cast %0 : vector<4x8x8x128xbf16> to vector<256x128xbf16>
    %c0_3 = arith.constant 0 : index
    %c0_4 = arith.constant 0 : index
    %2 = vector.load %arg2[%c0_3, %c0_4] : memref<128x128xbf16, #tpu.memory_space<vmem>>, vector<128x128xbf16>
    %cst = arith.constant dense<0.000000e+00> : vector<256x128xf32>
    %3 = tpu.matmul %1, %2, %cst {dimension_numbers = #tpu.dot_dimension_numbers<[1], [0], [0], [1], [0, 0, 1, 1], [], []>} : vector<256x128xbf16>, vector<128x128xbf16>, vector<256x128xf32> -> vector<256x128xf32>
    %c0_5 = arith.constant 0 : index
    %c0_6 = arith.constant 0 : index
    %4 = vector.load %arg3[%c0_5, %c0_6] : memref<1x128xf32, #tpu.memory_space<vmem>>, vector<1x128xf32>
    %5 = vector.broadcast %4 : vector<1x128xf32> to vector<256x128xf32>
    %6 = arith.addf %3, %5 : vector<256x128xf32>
    %cst_7 = arith.constant 0.000000e+00 : f32
    %7 = vector.broadcast %cst_7 : f32 to vector<256x128xf32>
    %8 = arith.maximumf %6, %7 : vector<256x128xf32>
    %cst_8 = arith.constant 0.000000e+00 : bf16
    %9 = vector.broadcast %cst_8 : bf16 to vector<4x1x10x128xbf16>
    %c0_9 = arith.constant 0 : index
    %c0_10 = arith.constant 0 : index
    %c0_11 = arith.constant 0 : index
    %c0_12 = arith.constant 0 : index
    %10 = vector.load %arg9[%c0_9, %c0_10, %c0_11, %c0_12] : memref<4x10x10x128xbf16, #tpu.memory_space<vmem>>, vector<4x1x10x128xbf16>
    tpu.vector_store %arg9[%c0_9, %c0_10, %c0_11, %c0_12], %9 {strides = array<i32>} : memref<4x10x10x128xbf16, #tpu.memory_space<vmem>>, vector<4x1x10x128xbf16>,
    %cst_13 = arith.constant 0.000000e+00 : bf16
    %11 = vector.broadcast %cst_13 : bf16 to vector<4x1x10x128xbf16>
    %c0_14 = arith.constant 0 : index
    %c9 = arith.constant 9 : index
    %c0_15 = arith.constant 0 : index
    %c0_16 = arith.constant 0 : index
    %12 = vector.load %arg9[%c0_14, %c9, %c0_15, %c0_16] : memref<4x10x10x128xbf16, #tpu.memory_space<vmem>>, vector<4x1x10x128xbf16>
    tpu.vector_store %arg9[%c0_14, %c9, %c0_15, %c0_16], %11 {strides = array<i32>} : memref<4x10x10x128xbf16, #tpu.memory_space<vmem>>, vector<4x1x10x128xbf16>,
    %cst_17 = arith.constant 0.000000e+00 : bf16
    %13 = vector.broadcast %cst_17 : bf16 to vector<4x10x1x128xbf16>
    %c0_18 = arith.constant 0 : index
    %c0_19 = arith.constant 0 : index
    %c0_20 = arith.constant 0 : index
    %c0_21 = arith.constant 0 : index
    %14 = vector.load %arg9[%c0_18, %c0_19, %c0_20, %c0_21] : memref<4x10x10x128xbf16, #tpu.memory_space<vmem>>, vector<4x10x1x128xbf16>
    tpu.vector_store %arg9[%c0_18, %c0_19, %c0_20, %c0_21], %13 {strides = array<i32>} : memref<4x10x10x128xbf16, #tpu.memory_space<vmem>>, vector<4x10x1x128xbf16>,
    %cst_22 = arith.constant 0.000000e+00 : bf16
    %15 = vector.broadcast %cst_22 : bf16 to vector<4x10x1x128xbf16>
    %c0_23 = arith.constant 0 : index
    %c0_24 = arith.constant 0 : index
    %c9_25 = arith.constant 9 : index
    %c0_26 = arith.constant 0 : index
    %16 = vector.load %arg9[%c0_23, %c0_24, %c9_25, %c0_26] : memref<4x10x10x128xbf16, #tpu.memory_space<vmem>>, vector<4x10x1x128xbf16>
    tpu.vector_store %arg9[%c0_23, %c0_24, %c9_25, %c0_26], %15 {strides = array<i32>} : memref<4x10x10x128xbf16, #tpu.memory_space<vmem>>, vector<4x10x1x128xbf16>,
    %17 = vector.shape_cast %8 : vector<256x128xf32> to vector<4x8x8x128xf32>
    %18 = arith.truncf %17 : vector<4x8x8x128xf32> to vector<4x8x8x128xbf16>
    %c0_27 = arith.constant 0 : index
    %c1 = arith.constant 1 : index
    %c1_28 = arith.constant 1 : index
    %c0_29 = arith.constant 0 : index
    %19 = vector.load %arg9[%c0_27, %c1, %c1_28, %c0_29] : memref<4x10x10x128xbf16, #tpu.memory_space<vmem>>, vector<4x8x8x128xbf16>
    tpu.vector_store %arg9[%c0_27, %c1, %c1_28, %c0_29], %18 {strides = array<i32>} : memref<4x10x10x128xbf16, #tpu.memory_space<vmem>>, vector<4x8x8x128xbf16>,
    %cst_30 = arith.constant 0.000000e+00 : f32
    %20 = vector.broadcast %cst_30 : f32 to vector<256x128xf32>
    %c0_31 = arith.constant 0 : index
    %c0_32 = arith.constant 0 : index
    %c0_33 = arith.constant 0 : index
    %c0_34 = arith.constant 0 : index
    %21 = vector.load %arg9[%c0_31, %c0_32, %c0_33, %c0_34] : memref<4x10x10x128xbf16, #tpu.memory_space<vmem>>, vector<4x8x8x128xbf16>
    %22 = vector.shape_cast %21 : vector<4x8x8x128xbf16> to vector<256x128xbf16>
    %c0_35 = arith.constant 0 : index
    %c0_36 = arith.constant 0 : index
    %c0_37 = arith.constant 0 : index
    %23 = vector.load %arg4[%c0_35, %c0_36, %c0_37] : memref<9x128x128xbf16, #tpu.memory_space<vmem>>, vector<1x128x128xbf16>
    %24 = vector.shape_cast %23 : vector<1x128x128xbf16> to vector<128x128xbf16>
    %cst_38 = arith.constant dense<0.000000e+00> : vector<256x128xf32>
    %25 = tpu.matmul %22, %24, %cst_38 {dimension_numbers = #tpu.dot_dimension_numbers<[1], [0], [0], [1], [0, 0, 1, 1], [], []>} : vector<256x128xbf16>, vector<128x128xbf16>, vector<256x128xf32> -> vector<256x128xf32>
    %26 = arith.addf %20, %25 : vector<256x128xf32>
    %c0_39 = arith.constant 0 : index
    %c0_40 = arith.constant 0 : index
    %c1_41 = arith.constant 1 : index
    %c0_42 = arith.constant 0 : index
    %27 = vector.load %arg9[%c0_39, %c0_40, %c1_41, %c0_42] : memref<4x10x10x128xbf16, #tpu.memory_space<vmem>>, vector<4x8x8x128xbf16>
    %28 = vector.shape_cast %27 : vector<4x8x8x128xbf16> to vector<256x128xbf16>
    %c1_43 = arith.constant 1 : index
    %c0_44 = arith.constant 0 : index
    %c0_45 = arith.constant 0 : index
    %29 = vector.load %arg4[%c1_43, %c0_44, %c0_45] : memref<9x128x128xbf16, #tpu.memory_space<vmem>>, vector<1x128x128xbf16>
    %30 = vector.shape_cast %29 : vector<1x128x128xbf16> to vector<128x128xbf16>
    %cst_46 = arith.constant dense<0.000000e+00> : vector<256x128xf32>
    %31 = tpu.matmul %28, %30, %cst_46 {dimension_numbers = #tpu.dot_dimension_numbers<[1], [0], [0], [1], [0, 0, 1, 1], [], []>} : vector<256x128xbf16>, vector<128x128xbf16>, vector<256x128xf32> -> vector<256x128xf32>
    %32 = arith.addf %26, %31 : vector<256x128xf32>
    %c0_47 = arith.constant 0 : index
    %c0_48 = arith.constant 0 : index
    %c2 = arith.constant 2 : index
    %c0_49 = arith.constant 0 : index
    %33 = vector.load %arg9[%c0_47, %c0_48, %c2, %c0_49] : memref<4x10x10x128xbf16, #tpu.memory_space<vmem>>, vector<4x8x8x128xbf16>
    %34 = vector.shape_cast %33 : vector<4x8x8x128xbf16> to vector<256x128xbf16>
    %c2_50 = arith.constant 2 : index
    %c0_51 = arith.constant 0 : index
    %c0_52 = arith.constant 0 : index
    %35 = vector.load %arg4[%c2_50, %c0_51, %c0_52] : memref<9x128x128xbf16, #tpu.memory_space<vmem>>, vector<1x128x128xbf16>
    %36 = vector.shape_cast %35 : vector<1x128x128xbf16> to vector<128x128xbf16>
    %cst_53 = arith.constant dense<0.000000e+00> : vector<256x128xf32>
    %37 = tpu.matmul %34, %36, %cst_53 {dimension_numbers = #tpu.dot_dimension_numbers<[1], [0], [0], [1], [0, 0, 1, 1], [], []>} : vector<256x128xbf16>, vector<128x128xbf16>, vector<256x128xf32> -> vector<256x128xf32>
    %38 = arith.addf %32, %37 : vector<256x128xf32>
    %c0_54 = arith.constant 0 : index
    %c1_55 = arith.constant 1 : index
    %c0_56 = arith.constant 0 : index
    %c0_57 = arith.constant 0 : index
    %39 = vector.load %arg9[%c0_54, %c1_55, %c0_56, %c0_57] : memref<4x10x10x128xbf16, #tpu.memory_space<vmem>>, vector<4x8x8x128xbf16>
    %40 = vector.shape_cast %39 : vector<4x8x8x128xbf16> to vector<256x128xbf16>
    %c3 = arith.constant 3 : index
    %c0_58 = arith.constant 0 : index
    %c0_59 = arith.constant 0 : index
    %41 = vector.load %arg4[%c3, %c0_58, %c0_59] : memref<9x128x128xbf16, #tpu.memory_space<vmem>>, vector<1x128x128xbf16>
    %42 = vector.shape_cast %41 : vector<1x128x128xbf16> to vector<128x128xbf16>
    %cst_60 = arith.constant dense<0.000000e+00> : vector<256x128xf32>
    %43 = tpu.matmul %40, %42, %cst_60 {dimension_numbers = #tpu.dot_dimension_numbers<[1], [0], [0], [1], [0, 0, 1, 1], [], []>} : vector<256x128xbf16>, vector<128x128xbf16>, vector<256x128xf32> -> vector<256x128xf32>
    %44 = arith.addf %38, %43 : vector<256x128xf32>
    %c0_61 = arith.constant 0 : index
    %c1_62 = arith.constant 1 : index
    %c1_63 = arith.constant 1 : index
    %c0_64 = arith.constant 0 : index
    %45 = vector.load %arg9[%c0_61, %c1_62, %c1_63, %c0_64] : memref<4x10x10x128xbf16, #tpu.memory_space<vmem>>, vector<4x8x8x128xbf16>
    %46 = vector.shape_cast %45 : vector<4x8x8x128xbf16> to vector<256x128xbf16>
    %c4 = arith.constant 4 : index
    %c0_65 = arith.constant 0 : index
    %c0_66 = arith.constant 0 : index
    %47 = vector.load %arg4[%c4, %c0_65, %c0_66] : memref<9x128x128xbf16, #tpu.memory_space<vmem>>, vector<1x128x128xbf16>
    %48 = vector.shape_cast %47 : vector<1x128x128xbf16> to vector<128x128xbf16>
    %cst_67 = arith.constant dense<0.000000e+00> : vector<256x128xf32>
    %49 = tpu.matmul %46, %48, %cst_67 {dimension_numbers = #tpu.dot_dimension_numbers<[1], [0], [0], [1], [0, 0, 1, 1], [], []>} : vector<256x128xbf16>, vector<128x128xbf16>, vector<256x128xf32> -> vector<256x128xf32>
    %50 = arith.addf %44, %49 : vector<256x128xf32>
    %c0_68 = arith.constant 0 : index
    %c1_69 = arith.constant 1 : index
    %c2_70 = arith.constant 2 : index
    %c0_71 = arith.constant 0 : index
    %51 = vector.load %arg9[%c0_68, %c1_69, %c2_70, %c0_71] : memref<4x10x10x128xbf16, #tpu.memory_space<vmem>>, vector<4x8x8x128xbf16>
    %52 = vector.shape_cast %51 : vector<4x8x8x128xbf16> to vector<256x128xbf16>
    %c5 = arith.constant 5 : index
    %c0_72 = arith.constant 0 : index
    %c0_73 = arith.constant 0 : index
    %53 = vector.load %arg4[%c5, %c0_72, %c0_73] : memref<9x128x128xbf16, #tpu.memory_space<vmem>>, vector<1x128x128xbf16>
    %54 = vector.shape_cast %53 : vector<1x128x128xbf16> to vector<128x128xbf16>
    %cst_74 = arith.constant dense<0.000000e+00> : vector<256x128xf32>
    %55 = tpu.matmul %52, %54, %cst_74 {dimension_numbers = #tpu.dot_dimension_numbers<[1], [0], [0], [1], [0, 0, 1, 1], [], []>} : vector<256x128xbf16>, vector<128x128xbf16>, vector<256x128xf32> -> vector<256x128xf32>
    %56 = arith.addf %50, %55 : vector<256x128xf32>
    %c0_75 = arith.constant 0 : index
    %c2_76 = arith.constant 2 : index
    %c0_77 = arith.constant 0 : index
    %c0_78 = arith.constant 0 : index
    %57 = vector.load %arg9[%c0_75, %c2_76, %c0_77, %c0_78] : memref<4x10x10x128xbf16, #tpu.memory_space<vmem>>, vector<4x8x8x128xbf16>
    %58 = vector.shape_cast %57 : vector<4x8x8x128xbf16> to vector<256x128xbf16>
    %c6 = arith.constant 6 : index
    %c0_79 = arith.constant 0 : index
    %c0_80 = arith.constant 0 : index
    %59 = vector.load %arg4[%c6, %c0_79, %c0_80] : memref<9x128x128xbf16, #tpu.memory_space<vmem>>, vector<1x128x128xbf16>
    %60 = vector.shape_cast %59 : vector<1x128x128xbf16> to vector<128x128xbf16>
    %cst_81 = arith.constant dense<0.000000e+00> : vector<256x128xf32>
    %61 = tpu.matmul %58, %60, %cst_81 {dimension_numbers = #tpu.dot_dimension_numbers<[1], [0], [0], [1], [0, 0, 1, 1], [], []>} : vector<256x128xbf16>, vector<128x128xbf16>, vector<256x128xf32> -> vector<256x128xf32>
    %62 = arith.addf %56, %61 : vector<256x128xf32>
    %c0_82 = arith.constant 0 : index
    %c2_83 = arith.constant 2 : index
    %c1_84 = arith.constant 1 : index
    %c0_85 = arith.constant 0 : index
    %63 = vector.load %arg9[%c0_82, %c2_83, %c1_84, %c0_85] : memref<4x10x10x128xbf16, #tpu.memory_space<vmem>>, vector<4x8x8x128xbf16>
    %64 = vector.shape_cast %63 : vector<4x8x8x128xbf16> to vector<256x128xbf16>
    %c7 = arith.constant 7 : index
    %c0_86 = arith.constant 0 : index
    %c0_87 = arith.constant 0 : index
    %65 = vector.load %arg4[%c7, %c0_86, %c0_87] : memref<9x128x128xbf16, #tpu.memory_space<vmem>>, vector<1x128x128xbf16>
    %66 = vector.shape_cast %65 : vector<1x128x128xbf16> to vector<128x128xbf16>
    %cst_88 = arith.constant dense<0.000000e+00> : vector<256x128xf32>
    %67 = tpu.matmul %64, %66, %cst_88 {dimension_numbers = #tpu.dot_dimension_numbers<[1], [0], [0], [1], [0, 0, 1, 1], [], []>} : vector<256x128xbf16>, vector<128x128xbf16>, vector<256x128xf32> -> vector<256x128xf32>
    %68 = arith.addf %62, %67 : vector<256x128xf32>
    %c0_89 = arith.constant 0 : index
    %c2_90 = arith.constant 2 : index
    %c2_91 = arith.constant 2 : index
    %c0_92 = arith.constant 0 : index
    %69 = vector.load %arg9[%c0_89, %c2_90, %c2_91, %c0_92] : memref<4x10x10x128xbf16, #tpu.memory_space<vmem>>, vector<4x8x8x128xbf16>
    %70 = vector.shape_cast %69 : vector<4x8x8x128xbf16> to vector<256x128xbf16>
    %c8 = arith.constant 8 : index
    %c0_93 = arith.constant 0 : index
    %c0_94 = arith.constant 0 : index
    %71 = vector.load %arg4[%c8, %c0_93, %c0_94] : memref<9x128x128xbf16, #tpu.memory_space<vmem>>, vector<1x128x128xbf16>
    %72 = vector.shape_cast %71 : vector<1x128x128xbf16> to vector<128x128xbf16>
    %cst_95 = arith.constant dense<0.000000e+00> : vector<256x128xf32>
    %73 = tpu.matmul %70, %72, %cst_95 {dimension_numbers = #tpu.dot_dimension_numbers<[1], [0], [0], [1], [0, 0, 1, 1], [], []>} : vector<256x128xbf16>, vector<128x128xbf16>, vector<256x128xf32> -> vector<256x128xf32>
    %74 = arith.addf %68, %73 : vector<256x128xf32>
    %c0_96 = arith.constant 0 : index
    %c0_97 = arith.constant 0 : index
    %75 = vector.load %arg5[%c0_96, %c0_97] : memref<1x128xf32, #tpu.memory_space<vmem>>, vector<1x128xf32>
    %76 = vector.broadcast %75 : vector<1x128xf32> to vector<256x128xf32>
    %77 = arith.addf %74, %76 : vector<256x128xf32>
    %cst_98 = arith.constant 0.000000e+00 : f32
    %78 = vector.broadcast %cst_98 : f32 to vector<256x128xf32>
    %79 = arith.maximumf %77, %78 : vector<256x128xf32>
    %80 = arith.truncf %79 : vector<256x128xf32> to vector<256x128xbf16>
    %c0_99 = arith.constant 0 : index
    %c0_100 = arith.constant 0 : index
    %81 = vector.load %arg6[%c0_99, %c0_100] : memref<128x128xbf16, #tpu.memory_space<vmem>>, vector<128x128xbf16>
    %cst_101 = arith.constant dense<0.000000e+00> : vector<256x128xf32>
    %82 = tpu.matmul %80, %81, %cst_101 {dimension_numbers = #tpu.dot_dimension_numbers<[1], [0], [0], [1], [0, 0, 1, 1], [], []>} : vector<256x128xbf16>, vector<128x128xbf16>, vector<256x128xf32> -> vector<256x128xf32>
    %c0_102 = arith.constant 0 : index
    %c0_103 = arith.constant 0 : index
    %83 = vector.load %arg7[%c0_102, %c0_103] : memref<1x128xf32, #tpu.memory_space<vmem>>, vector<1x128xf32>
    %84 = vector.broadcast %83 : vector<1x128xf32> to vector<256x128xf32>
    %85 = arith.addf %82, %84 : vector<256x128xf32>
    %cst_104 = arith.constant 0.000000e+00 : f32
    %86 = vector.broadcast %cst_104 : f32 to vector<256x128xf32>
    %87 = arith.maximumf %85, %86 : vector<256x128xf32>
    %88 = arith.extf %1 : vector<256x128xbf16> to vector<256x128xf32>
    %89 = arith.addf %87, %88 : vector<256x128xf32>
    %cst_105 = arith.constant 0.000000e+00 : f32
    %90 = vector.broadcast %cst_105 : f32 to vector<256x128xf32>
    %91 = arith.maximumf %89, %90 : vector<256x128xf32>
    %92 = vector.shape_cast %91 : vector<256x128xf32> to vector<4x8x8x128xf32>
    %93 = arith.truncf %92 : vector<4x8x8x128xf32> to vector<4x8x8x128xbf16>
    %c0_106 = arith.constant 0 : index
    %c0_107 = arith.constant 0 : index
    %c0_108 = arith.constant 0 : index
    %c0_109 = arith.constant 0 : index
    %94 = vector.load %arg8[%c0_106, %c0_107, %c0_108, %c0_109] : memref<4x8x8x128xbf16, #tpu.memory_space<vmem>>, vector<4x8x8x128xbf16>
    tpu.vector_store %arg8[%c0_106, %c0_107, %c0_108, %c0_109], %93 {strides = array<i32>} : memref<4x8x8x128xbf16, #tpu.memory_space<vmem>>, vector<4x8x8x128xbf16>,
    return
  }
  func.func @transform_0(%arg0: i32) -> (i32, i32, i32, i32) {
    %c0_i32 = arith.constant 0 : i32
    %c0_i32_0 = arith.constant 0 : i32
    %c0_i32_1 = arith.constant 0 : i32
    %c0_i32_2 = arith.constant 0 : i32
    return %arg0, %c0_i32, %c0_i32_0, %c0_i32_1 : i32, i32, i32, i32
  }
  func.func @transform_1(%arg0: i32) -> (i32, i32) {
    %c0_i32 = arith.constant 0 : i32
    %c0_i32_0 = arith.constant 0 : i32
    %c0_i32_1 = arith.constant 0 : i32
    return %c0_i32, %c0_i32_0 : i32, i32
  }
  func.func @transform_2(%arg0: i32) -> (i32, i32) {
    %c0_i32 = arith.constant 0 : i32
    %c0_i32_0 = arith.constant 0 : i32
    %c0_i32_1 = arith.constant 0 : i32
    return %c0_i32, %c0_i32_0 : i32, i32
  }
  func.func @transform_3(%arg0: i32) -> (i32, i32, i32) {
    %c0_i32 = arith.constant 0 : i32
    %c0_i32_0 = arith.constant 0 : i32
    %c0_i32_1 = arith.constant 0 : i32
    %c0_i32_2 = arith.constant 0 : i32
    return %c0_i32, %c0_i32_0, %c0_i32_1 : i32, i32, i32
  }
  func.func @transform_4(%arg0: i32) -> (i32, i32) {
    %c0_i32 = arith.constant 0 : i32
    %c0_i32_0 = arith.constant 0 : i32
    %c0_i32_1 = arith.constant 0 : i32
    return %c0_i32, %c0_i32_0 : i32, i32
  }
  func.func @transform_5(%arg0: i32) -> (i32, i32) {
    %c0_i32 = arith.constant 0 : i32
    %c0_i32_0 = arith.constant 0 : i32
    %c0_i32_1 = arith.constant 0 : i32
    return %c0_i32, %c0_i32_0 : i32, i32
  }
  func.func @transform_6(%arg0: i32) -> (i32, i32) {
    %c0_i32 = arith.constant 0 : i32
    %c0_i32_0 = arith.constant 0 : i32
    %c0_i32_1 = arith.constant 0 : i32
    return %c0_i32, %c0_i32_0 : i32, i32
  }
  func.func @transform_7(%arg0: i32) -> (i32, i32, i32, i32) {
    %c0_i32 = arith.constant 0 : i32
    %c0_i32_0 = arith.constant 0 : i32
    %c0_i32_1 = arith.constant 0 : i32
    %c0_i32_2 = arith.constant 0 : i32
    return %arg0, %c0_i32, %c0_i32_0, %c0_i32_1 : i32, i32, i32, i32
  }
}

</mosaic_0001>

<bundles_post_ra>
// kernel: tpu_custom_call.1
= control target key start
LH: loop header
LB: loop body
LE: loop exit
PB: predicated region body
PF: predicated region fallthrough
CT: control target
= control target key end

     0   :  { %12 = vsyncpa [#allocation4], 0  ;;  %s11562_s0 = inlined_call_operand.hbm [shape: bf16[8,8,8,128], index: 0, kind: input, shape index: {}]   ;;  %s11563_s1 = inlined_call_operand.hbm [shape: bf16[128,128], index: 1, kind: input, shape index: {}]   ;;  %s11564_s2 = inlined_call_operand.vmem [shape: f32[1,128], index: 2, kind: input, shape index: {}]   ;;  %s11565_s3 = inlined_call_operand.hbm [shape: bf16[9,128,128], index: 3, kind: input, shape index: {}]   ;;  %s11566_s4 = inlined_call_operand.vmem [shape: f32[1,128], index: 4, kind: input, shape index: {}]   ;;  %s11567_s5 = inlined_call_operand.hbm [shape: bf16[128,128], index: 5, kind: input, shape index: {}]   ;;  %s11568_s6 = inlined_call_operand.vmem [shape: f32[1,128], index: 6, kind: input, shape index: {}]   ;;  %s11569_s7 = inlined_call_operand.hbm [shape: bf16[8,8,8,128], index: 7, kind: output, shape index: {}]  }
   0x1   :  { %14 = vsyncpa [#allocation4 + $0x1], 0 }
   0x2   :  { %15 = vsyncpa [#allocation7], 0 }
   0x3   :  { %16 = vsyncpa [#allocation10], 0 }
   0x4   :  { %17 = vsyncpa [#allocation5], 0 }
   0x5   :  { %19 = vsyncpa [#allocation5 + $0x1], 0  ;;  %s9661_s24 = smov 0   ;;  %s9663_s25 = smov 0  }
   0x6   :  { %s9665_s26 = smov 0   ;;  %s9667_s27 = smov 0  }
   0x7 LB: > { %s9682_s28 = sadd.s32 4294967295, %s9609_s27   ;;  %s7478_s29 = sadd.s32 4294967294, %s9609_s27   ;;  %s9609_s27 = sphi %s9667_s27, %s11656_s27   ;;  %s9605_s26 = sphi %s9665_s26, %s11655_s26   ;;  %s9601_s25 = sphi %s9663_s25, %s11654_s25   ;;  %s9597_s24 = sphi %s9661_s24, %s11653_s24  }
   0x8   : > { %p45_p0 = scmp.ne.s32.totalorder %s9601_s25, %s9597_s24  ;;  %p11570_p1 = scmp.eq.s32.totalorder %s9682_s28, 0 }
   0x9   : > { %p201_p3 = scmp.eq.s32.totalorder %s7478_s29, 1  ;;  %p7479_p5 = scmp.ge.s32.totalorder %s9609_s27, 1 }
   0xa   : > { %p9691_p4 = por %p11570_p1, %p45_p0  ;;  %p208_p7 = scmp.lt.s32.totalorder %s9609_s27, 3 }
   0xb   : > { %p9696_p6 = por %p201_p3, %p45_p0  ;;  %s9611_s10 = smov [#allocation6]  }
   0xc   : > { %s11584_s30 = scalar_select %p9691_p4, 1, 0 }
   0xd   : > { %s11585_s8 = scalar_select %p9696_p6, 1, 0 }
   0xe   : > { %p9701_p8 = pnand %p7479_p5, %p208_p7  ;;  %s220_s11 = sshll.u32 %s9611_s10, 4  ;;  %s9705_s11 = int_to_ptr.vmem [resolvable:$true] %s220_s11 }
   0xf   : > { %11586 = sst [smem:[#allocation16_spill]] %s11585_s8  ;;  %s9612_s13 = smov [#allocation8]  }
  0x10   : > { %s11587_s9 = scalar_select %p9701_p8, 1, 0 }
  0x11   : > { %p9090_p9 = pneg %p9701_p8  ;;  %s236_s14 = sshll.u32 %s9612_s13, 4  ;;  %s9716_s14 = int_to_ptr.vmem [resolvable:$true] %s236_s14 }
  0x12   : > { %s9613_s15 = smov [#allocation9]   ;;  %s9421_s19 = scalar_lea.hbm %s11563_s1, 1024 }
  0x13   : > { %p9712_p11 = pnand %p9090_p9, %p11570_p1  ;;  %s9718_s16 = sshll.u32 %s9613_s15, 4  ;;  %s253_s16 = int_to_ptr.vmem [resolvable:$true] %s9718_s16 }
  0x14   : > { %p9422_p12 = scmp.ne.s32.totalorder %s11563_s1, %s9421_s19  ;;  %p9428_p5 = scmp.lt.u32.totalorder %s9421_s19, %s11563_s1 }
  0x15   : > { %p9728_p13 = pneg %p9712_p11 }
  0x17   : > { %p9424_p0 = pnand %p9728_p13, %p9422_p12 }
  0x19   : > { %p9425_p3 = pneg %p9424_p0 }
  0x1b   : > { %p9430_p7 = pnand %p9428_p5, %p9425_p3 }
  0x1d   : > { %9433 = shalt.err (!%p9430_p7)
}
  0x1e   : > { %s9434_s10 = scalar_lea.vmem %s9705_s11, 1024  ;;  %p9442_p2 = scmp.lt.s32.totalorder %s9705_s11, %s9705_s11 }
  0x1f   : > { %p9435_p9 = scmp.ne.s32.totalorder %s9705_s11, %s9434_s10  ;;  %p9443_p6 = scmp.lt.s32.totalorder %s9434_s10, %s9434_s10 }
  0x21   : > { %p9437_p10 = pnand %p9435_p9, %p9728_p13  ;;  %p9444_p12 = por %p9443_p6, %p9442_p2 }
  0x23   : > { %p9438_p1 = pneg %p9437_p10 }
  0x25   : > { %p9445_p0 = pnand %p9444_p12, %p9438_p1 }
  0x27   : > { %9448 = shalt.err (!%p9445_p0)
}
  0x28   : > { %s9614_s13 = smov 64   ;;  %s9615_s15 = smov 4  }
  0x29   : > { %9093 = dma.hbm_to_vmem [thread:$0]  (!%p9712_p11), %s11563_s1, 1024, %s9705_s11, [#allocation7], %s9614_s13, %s9614_s13, %s9615_s15  }
  0x2a   : > { %s9449_s21 = scalar_lea.hbm %s11565_s3, 9216 }
  0x2b   : > { %p9450_p1 = scmp.ne.s32.totalorder %s11565_s3, %s9449_s21  ;;  %p9456_p10 = scmp.lt.u32.totalorder %s9449_s21, %s11565_s3 }
  0x2d   : > { %p9452_p2 = pnand %p9450_p1, %p9728_p13 }
  0x2f   : > { %p9453_p6 = pneg %p9452_p2 }
  0x31   : > { %p9458_p3 = pnand %p9456_p10, %p9453_p6 }
  0x33   : > { %9461 = shalt.err (!%p9458_p3)
}
  0x34   : > { %s9462_s11 = scalar_lea.vmem %s9716_s14, 9216  ;;  %p9470_p12 = scmp.lt.s32.totalorder %s9716_s14, %s9716_s14 }
  0x35   : > { %p9463_p5 = scmp.ne.s32.totalorder %s9716_s14, %s9462_s11  ;;  %p9471_p0 = scmp.lt.s32.totalorder %s9462_s11, %s9462_s11 }
  0x37   : > { %p9465_p7 = pnand %p9463_p5, %p9728_p13  ;;  %p9472_p1 = por %p9471_p0, %p9470_p12 }
  0x39   : > { %p9466_p9 = pneg %p9465_p7 }
  0x3b   : > { %p9473_p2 = pnand %p9472_p1, %p9466_p9 }
  0x3d   : > { %9476 = shalt.err (!%p9473_p2)
}
  0x3e   : > { %9096 = dma.hbm_to_vmem [thread:$0]  (!%p9712_p11), %s11565_s3, 9216, %s9716_s14, [#allocation7], %s9614_s13, %s9614_s13, %s9615_s15  }
  0x3f   : > { %s9477_s20 = scalar_lea.hbm %s11567_s5, 1024 }
  0x40   : > { %p9478_p6 = scmp.ne.s32.totalorder %s11567_s5, %s9477_s20  ;;  %p9484_p5 = scmp.lt.u32.totalorder %s9477_s20, %s11567_s5 }
  0x42   : > { %p9480_p10 = pnand %p9478_p6, %p9728_p13 }
  0x44   : > { %p9481_p3 = pneg %p9480_p10 }
  0x46   : > { %p9486_p7 = pnand %p9484_p5, %p9481_p3 }
  0x48   : > { %9489 = shalt.err (!%p9486_p7)
}
  0x49   : > { %s9490_s11 = scalar_lea.vmem %s253_s16, 1024  ;;  %p9498_p1 = scmp.lt.s32.totalorder %s253_s16, %s253_s16 }
  0x4a   : > { %p9491_p9 = scmp.ne.s32.totalorder %s253_s16, %s9490_s11  ;;  %p9499_p2 = scmp.lt.s32.totalorder %s9490_s11, %s9490_s11 }
  0x4c   : > { %p9493_p12 = pnand %p9491_p9, %p9728_p13  ;;  %p9500_p4 = por %p9499_p2, %p9498_p1 }
  0x4e   : > { %p9494_p0 = pneg %p9493_p12 }
  0x50   : > { %p9501_p8 = pnand %p9500_p4, %p9494_p0 }
  0x52   : > { %9504 = shalt.err (!%p9501_p8)
}
  0x53   : > { %9099 = dma.hbm_to_vmem [thread:$0]  (!%p9712_p11), %s11567_s5, 1024, %s253_s16, [#allocation10], %s9614_s13, %s9614_s13, %s9615_s15  }
  0x54   : > { %s9801_s22 = sadd.s32 1, %s9609_s27   ;;  %s32_s17 = sadd.s32 1, %s9605_s26 }
  0x55   : > { %s29_s12 = ssub.s32 %s9609_s27, %s9801_s22  ;;  %p39_p8 = scmp.ne.s32.totalorder %s9605_s26, %s9601_s25 }
  0x56   : > { %p30_p4 = scmp.eq.s32.totalorder %s29_s12, 0  ;;  %p40_p13 = scmp.eq.s32.totalorder %s9609_s27, 0 }
  0x57   : > { %p9111_p6 = scmp.lt.s32.totalorder %s9609_s27, 2  ;;  %p11590_p3 = scmp.eq.s32.totalorder %s9682_s28, 1 }
  0x58   : > { %s9811_s18 = scalar_select %p30_p4, %s9605_s26, %s32_s17  }
  0x59   : > { %p41_p10 = por %p40_p13, %p39_p8  ;;  %p9815_p5 = por %p11590_p3, %p39_p8 }
  0x5a   : > { %s269_s20 = sand.u32 1, %s9605_s26   ;;  %s7880_s21 = sshll.u32 %s9609_s27, 11 }
  0x5b   : > { %s7484_s16 = sshll.u32 %s269_s20, 7  ;;  %s9824_s10 = scalar_lea.hbm %s11562_s0, %s7880_s21 }
  0x5c   : > { %s273_s11 = scalar_lea.vmem [#allocation3], %s7484_s16  ;;  %p9826_p11 = pnand %p9111_p6, %p41_p10 }
  0x5d   : > { %s281_s14 = sshll.u32 %s273_s11, 4  ;;  %s9832_s12 = scalar_lea.sflag [#allocation4], %s269_s20  ;;  %s9830_s14 = int_to_ptr.vmem [resolvable:$true] %s281_s14 }
  0x5e   : > { %s9505_s17 = scalar_lea.hbm %s9824_s10, 2048  ;;  %p9507_p9 = pneg %p9826_p11 }
  0x5f   : > { %p9506_p7 = scmp.ne.s32.totalorder %s9824_s10, %s9505_s17  ;;  %s9510_s23 = scalar_lea.hbm %s11562_s0, 4096 }
  0x60   : > { %p9511_p1 = scmp.lt.u32.totalorder %s9824_s10, %s11562_s0  ;;  %p9512_p2 = scmp.lt.u32.totalorder %s9510_s23, %s9505_s17 }
  0x61   : > { %p9508_p12 = pnand %p9507_p9, %p9506_p7  ;;  %p9514_p8 = scmp.lt.u32.totalorder %s9505_s17, %s9824_s10 }
  0x62   : > { %p9513_p4 = por %p9512_p2, %p9511_p1 }
  0x63   : > { %p9509_p0 = pneg %p9508_p12 }
  0x64   : > { %p9515_p13 = por %p9514_p8, %p9513_p4 }
  0x66   : > { %p9516_p6 = pnand %p9515_p13, %p9509_p0 }
  0x68   : > { %9519 = shalt.err (!%p9516_p6)
}
  0x69   : > { %s9520_s20 = scalar_lea.vmem %s9830_s14, 2048  ;;  %s9616_s21 = smov [#allocation3]  }
  0x6a   : > { %p9521_p10 = scmp.ne.s32.totalorder %s9830_s14, %s9520_s20  ;;  %s9525_s16 = sshll.u32 %s9616_s21, 4  ;;  %s9526_s16 = int_to_ptr.vmem [resolvable:$false] %s9525_s16 }
  0x6b   : > { %s9527_s29 = scalar_lea.vmem %s9526_s16, 4096  ;;  %p9528_p12 = scmp.lt.s32.totalorder %s9830_s14, %s9526_s16 }
  0x6c   : > { %p9523_p3 = pnand %p9521_p10, %p9507_p9  ;;  %p9529_p1 = scmp.lt.s32.totalorder %s9527_s29, %s9520_s20 }
  0x6e   : > { %p9524_p7 = pneg %p9523_p3  ;;  %p9530_p2 = por %p9529_p1, %p9528_p12 }
  0x70   : > { %p9531_p4 = pnand %p9530_p2, %p9524_p7 }
  0x72   : > { %9534 = shalt.err (!%p9531_p4)
}
  0x73   : > { %9103 = dma.hbm_to_vmem [thread:$0]  (!%p9826_p11), %s9824_s10, 2048, %s9830_s14, %s9832_s12, %s9614_s13, %s9614_s13, %s9615_s15  }
  0x74   : > { %p11593_p9 = scmp.ne.s32.totalorder %s11587_s9, 0 }
  0x76   : > { %293 = sbr.rel (%p11593_p9) target bundleno = 1344 (0x540), region = 48 }
  0x7d   : > { %s9866_s17 = sand.u32 1, %s9601_s25   ;;  %p11594_p0 = scmp.ne.s32.totalorder %s11584_s30, 0 }
  0x7e   : > { %s7489_s23 = sshll.u32 %s9866_s17, 7  ;;  %s296_s11 = scalar_lea.sflag [#allocation4], %s9866_s17 }
  0x7f   : > { %s9872_s8 = scalar_lea.vmem [#allocation3], %s7489_s23 }
  0x80   : > { %9580 = dma.done.wait (%p11594_p0), %s296_s11, 2048  }
  0x81   : > { %9582 = vsyncadd (%p11594_p0), %s296_s11, 4294965248  ;;  %p11595_p11 = scmp.eq.s32.totalorder %s9682_s28, 0 }
  0x83   : > { %9584 = dma.done.wait (%p11595_p11), [#allocation7], 10240   ;;  %p11596_p8 = pmov %p11595_p11 }
  0x85   : > { %9586 = vsyncadd (%p11596_p8), [#allocation7], 4294957056  ;;  %p11597_p13 = pmov %p11596_p8 }
  0x86   : > { %p11598_p6 = pmov %p11596_p8 }
  0x87   : > { %9588 = dma.done.wait (%p11597_p13), [#allocation10], 1024  }
  0x88   : > { %9590 = vsyncadd (%p11598_p6), [#allocation10], 4294966272  ;;  %v9156_v0 = vld [vmem:[#allocation6] sm:$0xff]   ;;  %v9157_v1 = vld [vmem:[#allocation6 + $0x8] sm:$0xff]   ;;  %vm754_vm0 = vcmask 1040384   ;;  %v9617_v53 = vmov 0  }
  0x89   : > { %8274 = vmatprep.subr.bf16.mxu0 %v9156_v0  ;;  %v9158_v2 = vld [vmem:[#allocation6 + $0x10] sm:$0xff]   ;;  %v9159_v3 = vld [vmem:[#allocation6 + $0x18] sm:$0xff]   ;;  %v345_v4 = vld [vmem:[%s9872_s8] sm:$0xff]   ;;  %vm755_vm1 = vsmask.f32 256  ;;  %vm1448_vm8 = vcmask 1043456  }
  0x8a   : > { %8275 = vmatpush3.bf16.msra.mxu0 %v9156_v0  ;;  %8290 = vmatprep.mubr.bf16.mxu0 %v345_v4  ;;  %v9160_v5 = vld [vmem:[#allocation6 + $0x20] sm:$0xff]   ;;  %v9161_v6 = vld [vmem:[#allocation6 + $0x28] sm:$0xff]   ;;  %v9162_v7 = vld [vmem:[#allocation6 + $0x30] sm:$0xff]   ;;  %vm877_vm2 = vsmask.f32 7938  ;;  %vm2864_vm10 = vcmask 1042432  }
  0x8b   : > { %8276 = vmatprep.subr.bf16.mxu0 %v9157_v1  ;;  %v9163_v8 = vld [vmem:[#allocation6 + $0x38] sm:$0xff]   ;;  %v347_v9 = vld [vmem:[%s9872_s8 + $0x8] sm:$0xff]   ;;  %v349_v10 = vld [vmem:[%s9872_s8 + $0x10] sm:$0xff]   ;;  %737 = vst [vmem:[#allocation2] sm:$0xf] %v9617_v53  ;;  %vm2865_vm11 = vcmask 1046532  }
  0x8c   : > { %v351_v11 = vld [vmem:[%s9872_s8 + $0x18] sm:$0xff]   ;;  %v353_v12 = vld [vmem:[%s9872_s8 + $0x20] sm:$0xff]   ;;  %v355_v13 = vld [vmem:[%s9872_s8 + $0x28] sm:$0xff]   ;;  %738 = vst [vmem:[#allocation2 + $0x4] sm:$0x1] %v9617_v53  ;;  %s11457_s21 = scalar_lea.vmem [#allocation11], %s7489_s23 }
  0x8d   : > { %v357_v14 = vld [vmem:[%s9872_s8 + $0x30] sm:$0xff]   ;;  %v359_v15 = vld [vmem:[%s9872_s8 + $0x38] sm:$0xff]   ;;  %v361_v16 = vld [vmem:[%s9872_s8 + $0x40] sm:$0xff]   ;;  %739 = vst [vmem:[#allocation2 + $0x50] sm:$0xf] %v9617_v53  ;;  %s7914_s16 = sshll.u32 %s9682_s28, 11 }
  0x8e   : > { %8277 = vmatpush3.bf16.msra.mxu0 %v9157_v1  ;;  %v363_v17 = vld [vmem:[%s9872_s8 + $0x48] sm:$0xff]   ;;  %v365_v18 = vld [vmem:[%s9872_s8 + $0x50] sm:$0xff]   ;;  %v367_v19 = vld [vmem:[%s9872_s8 + $0x58] sm:$0xff]   ;;  %740 = vst [vmem:[#allocation2 + $0x54] sm:$0x1] %v9617_v53  ;;  %s7376_s29 = sshll.u32 %s11457_s21, 4  ;;  %s11516_s29 = int_to_ptr.vmem [resolvable:$true] %s7376_s29 }
  0x8f   : > { %8278 = vmatprep.subr.bf16.mxu0 %v9158_v2  ;;  %v369_v20 = vld [vmem:[%s9872_s8 + $0x60] sm:$0xff]   ;;  %v371_v21 = vld [vmem:[%s9872_s8 + $0x68] sm:$0xff]   ;;  %v373_v22 = vld [vmem:[%s9872_s8 + $0x70] sm:$0xff]   ;;  %741 = vst [vmem:[#allocation2 + $0xa0] sm:$0xf] %v9617_v53  ;;  %s7362_s28 = scalar_lea.sflag [#allocation5], %s9866_s17 }
  0x90   : > { %v375_v23 = vld [vmem:[%s9872_s8 + $0x78] sm:$0xff]   ;;  %v9180_v24 = vld [vmem:[#allocation8 + $0x40] sm:$0xff]   ;;  %vm9902_vm3 = vmand %vm754_vm0, %vm755_vm1  ;;  %742 = vst [vmem:[#allocation2 + $0xa4] sm:$0x1] %v9617_v53  ;;  %vm1722_vm5 = vsmask.f32 3328 }
  0x91   : > { %v766_v26 = vld [vmem:[#allocation2 + $0x18] sm:$0x1]  ;;  %v888_v27 = vld [vmem:[#allocation2 + $0x1c] sm:$0x1]  ;;  %vm9909_vm4 = vmand %vm754_vm0, %vm877_vm2  ;;  %743 = vst [vmem:[#allocation2 + $0xf0] sm:$0xf] %v9617_v53 }
  0x92   : > { %8279 = vmatpush3.bf16.msra.mxu0 %v9158_v2  ;;  %v767_v28 = vsel %vm9902_vm3, 0, %v766_v26  ;;  %v760_v30 = vld [vmem:[#allocation2 + $0x8] sm:$0x1]  ;;  %v882_v31 = vld [vmem:[#allocation2 + $0xc] sm:$0x1]  ;;  %v889_v32 = vsel %vm9909_vm4, 0, %v888_v27  ;;  %vm10103_vm9 = vmand %vm1448_vm8, %vm877_vm2 }
  0x93   : > { %8280 = vmatprep.subr.bf16.mxu0 %v9159_v3  ;;  %768 = vst [vmem:[#allocation2 + $0x18] sm:$0x1] %v767_v28  ;;  %v761_v33 = vsel %vm9902_vm3, 0, %v760_v30  ;;  %v883_v34 = vsel %vm9909_vm4, 0, %v882_v31  ;;  %v769_v35 = vld [vmem:[#allocation2 + $0x20] sm:$0x1]  ;;  %vm10586_vm12 = vmor %vm2864_vm10, %vm2865_vm11 }
  0x94   : > { %890 = vst [vmem:[#allocation2 + $0x1c] sm:$0x1] %v889_v32  ;;  %762 = vst [vmem:[#allocation2 + $0x8] sm:$0x1] %v761_v33  ;;  %v770_v36 = vsel %vm9902_vm3, 0, %v769_v35  ;;  %v9181_v43 = vld [vmem:[#allocation8 + $0x48] sm:$0xff]  }
  0x95   : > { %884 = vst [vmem:[#allocation2 + $0xc] sm:$0x1] %v883_v34  ;;  %v891_v37 = vld [vmem:[#allocation2 + $0x24] sm:$0x1]  ;;  %v763_v38 = vld [vmem:[#allocation2 + $0x10] sm:$0x1] }
  0x96   : > { %8281 = vmatpush3.bf16.msra.mxu0 %v9159_v3  ;;  %771 = vst [vmem:[#allocation2 + $0x20] sm:$0x1] %v770_v36  ;;  %v892_v39 = vsel %vm9909_vm4, 0, %v891_v37  ;;  %v764_v40 = vsel %vm9902_vm3, 0, %v763_v38  ;;  %v885_v41 = vld [vmem:[#allocation2 + $0x14] sm:$0x1] }
  0x97   : > { %8282 = vmatprep.subr.bf16.mxu0 %v9160_v5  ;;  %893 = vst [vmem:[#allocation2 + $0x24] sm:$0x1] %v892_v39  ;;  %765 = vst [vmem:[#allocation2 + $0x10] sm:$0x1] %v764_v40  ;;  %v886_v42 = vsel %vm9909_vm4, 0, %v885_v41  ;;  %v9182_v52 = vld [vmem:[#allocation8 + $0x50] sm:$0xff]  }
  0x98   : > { %887 = vst [vmem:[#allocation2 + $0x14] sm:$0x1] %v886_v42  ;;  %v778_v44 = vld [vmem:[#allocation2 + $0x38] sm:$0x1]  ;;  %v900_v45 = vld [vmem:[#allocation2 + $0x3c] sm:$0x1] }
  0x99   : > { %v779_v46 = vsel %vm9902_vm3, 0, %v778_v44  ;;  %v901_v47 = vsel %vm9909_vm4, 0, %v900_v45  ;;  %v772_v48 = vld [vmem:[#allocation2 + $0x28] sm:$0x1]  ;;  %v894_v49 = vld [vmem:[#allocation2 + $0x2c] sm:$0x1] }
  0x9a   : > { %8283 = vmatpush3.bf16.msra.mxu0 %v9160_v5  ;;  %780 = vst [vmem:[#allocation2 + $0x38] sm:$0x1] %v779_v46  ;;  %902 = vst [vmem:[#allocation2 + $0x3c] sm:$0x1] %v901_v47  ;;  %v773_v50 = vsel %vm9902_vm3, 0, %v772_v48  ;;  %v895_v51 = vsel %vm9909_vm4, 0, %v894_v49 }
  0x9b   : > { %8284 = vmatprep.subr.bf16.mxu0 %v9161_v6  ;;  %774 = vst [vmem:[#allocation2 + $0x28] sm:$0x1] %v773_v50  ;;  %896 = vst [vmem:[#allocation2 + $0x2c] sm:$0x1] %v895_v51  ;;  %v781_v54 = vld [vmem:[#allocation2 + $0x40] sm:$0x1] }
  0x9c   : > { %744 = vst [vmem:[#allocation2 + $0xf4] sm:$0x1] %v9617_v53  ;;  %746 = vst [vmem:[#allocation2 + $0x48] sm:$0xf] %v9617_v53  ;;  %v903_v55 = vld [vmem:[#allocation2 + $0x44] sm:$0x1] }
  0x9d   : > { %747 = vst [vmem:[#allocation2 + $0x4c] sm:$0x1] %v9617_v53  ;;  %748 = vst [vmem:[#allocation2 + $0x98] sm:$0xf] %v9617_v53  ;;  %v782_v56 = vsel %vm9902_vm3, 0, %v781_v54  ;;  %v904_v57 = vsel %vm9909_vm4, 0, %v903_v55 }
  0x9e   : > { %8285 = vmatpush3.bf16.msra.mxu0 %v9161_v6  ;;  %749 = vst [vmem:[#allocation2 + $0x9c] sm:$0x1] %v9617_v53  ;;  %750 = vst [vmem:[#allocation2 + $0xe8] sm:$0xf] %v9617_v53  ;;  %v775_v58 = vld [vmem:[#allocation2 + $0x30] sm:$0x1] }
  0x9f   : > { %8286 = vmatprep.subr.bf16.mxu0 %v9162_v7  ;;  %751 = vst [vmem:[#allocation2 + $0xec] sm:$0x1] %v9617_v53  ;;  %752 = vst [vmem:[#allocation2 + $0x138] sm:$0xf] %v9617_v53  ;;  %v897_v59 = vld [vmem:[#allocation2 + $0x34] sm:$0x1] }
  0xa0   : > { %753 = vst [vmem:[#allocation2 + $0x13c] sm:$0x1] %v9617_v53  ;;  %783 = vst [vmem:[#allocation2 + $0x40] sm:$0x1] %v782_v56  ;;  %v776_v60 = vsel %vm9902_vm3, 0, %v775_v58  ;;  %v898_v61 = vsel %vm9909_vm4, 0, %v897_v59 }
  0xa1   : > { %905 = vst [vmem:[#allocation2 + $0x44] sm:$0x1] %v904_v57  ;;  %v9183_v62 = vld [vmem:[#allocation8 + $0x58] sm:$0xff]   ;;  %777 = vst [vmem:[#allocation2 + $0x30] sm:$0x1] %v776_v60  ;;  %v9188_v32 = vld [vmem:[#allocation8 + $0xc8] sm:$0xff]  }
  0xa2   : > { %8287 = vmatpush3.bf16.msra.mxu0 %v9162_v7  ;;  %899 = vst [vmem:[#allocation2 + $0x34] sm:$0x1] %v898_v61  ;;  %v796_v63 = vld [vmem:[#allocation2 + $0x68] sm:$0x1]  ;;  %v918_v0 = vld [vmem:[#allocation2 + $0x6c] sm:$0x1] }
  0xa3   : > { %8288 = vmatprep.subr.bf16.mxu0 %v9163_v8  ;;  %v757_v1 = vld [vmem:[#allocation2] sm:$0x1]  ;;  %v797_v2 = vsel %vm9902_vm3, 0, %v796_v63  ;;  %v919_v3 = vsel %vm9909_vm4, 0, %v918_v0  ;;  %v790_v4 = vld [vmem:[#allocation2 + $0x58] sm:$0x1] }
  0xa4   : > { %v912_v5 = vld [vmem:[#allocation2 + $0x5c] sm:$0x1]  ;;  %798 = vst [vmem:[#allocation2 + $0x68] sm:$0x1] %v797_v2  ;;  %920 = vst [vmem:[#allocation2 + $0x6c] sm:$0x1] %v919_v3 }
  0xa5   : > { %v791_v6 = vsel %vm9902_vm3, 0, %v790_v4  ;;  %v913_v7 = vsel %vm9909_vm4, 0, %v912_v5  ;;  %v802_v28 = vld [vmem:[#allocation2 + $0x78] sm:$0x1]  ;;  %v924_v31 = vld [vmem:[#allocation2 + $0x7c] sm:$0x1] }
  0xa6   : > { %8289 = vmatpush3.bf16.msra.mxu0 %v9163_v8  ;;  %v799_v8 = vld [vmem:[#allocation2 + $0x70] sm:$0x1]  ;;  %792 = vst [vmem:[#allocation2 + $0x58] sm:$0x1] %v791_v6  ;;  %914 = vst [vmem:[#allocation2 + $0x5c] sm:$0x1] %v913_v7 }
  0xa7   : > { %8322 = vmatprep.subr.bf16.mxu0 %v9180_v24  ;;  %v803_v30 = vsel %vm9902_vm3, 0, %v802_v28  ;;  %v925_v33 = vsel %vm9909_vm4, 0, %v924_v31  ;;  %v811_v34 = vld [vmem:[#allocation2 + $0x90] sm:$0x1]  ;;  %v933_v35 = vld [vmem:[#allocation2 + $0x94] sm:$0x1] }
  0xa8   : > { %804 = vst [vmem:[#allocation2 + $0x78] sm:$0x1] %v803_v30  ;;  %v9189_v36 = vld [vmem:[#allocation8 + $0x78] sm:$0xff]   ;;  %926 = vst [vmem:[#allocation2 + $0x7c] sm:$0x1] %v925_v33  ;;  %v812_v37 = vsel %vm9902_vm3, 0, %v811_v34 }
  0xa9   : > { %8291 = vmatmul.mubr.bf16.vlgmr.msra.gmra.mrb[0].mxu0 %v347_v9  ;;  %v921_v9 = vld [vmem:[#allocation2 + $0x74] sm:$0x1]  ;;  %v934_v38 = vsel %vm9909_vm4, 0, %v933_v35  ;;  %813 = vst [vmem:[#allocation2 + $0x90] sm:$0x1] %v812_v37  ;;  %v9191_v60 = vld [vmem:[#allocation8 + $0xd8] sm:$0xff]  }
  0xaa   : > { %8294 = vmatprep.mubr.bf16.mxu0 %v349_v10  ;;  %8323 = vmatpush3.bf16.msra.mxu0 %v9180_v24  ;;  %v800_v10 = vsel %vm9902_vm3, 0, %v799_v8  ;;  %v930_v24 = vld [vmem:[#allocation2 + $0x8c] sm:$0x1]  ;;  %935 = vst [vmem:[#allocation2 + $0x94] sm:$0x1] %v934_v38  ;;  %v9190_v55 = vld [vmem:[#allocation8 + $0xd0] sm:$0xff]  }
  0xab   : > { %8324 = vmatprep.subr.bf16.mxu0 %v9181_v43  ;;  %801 = vst [vmem:[#allocation2 + $0x70] sm:$0x1] %v800_v10  ;;  %v931_v27 = vsel %vm9909_vm4, 0, %v930_v24  ;;  %v805_v39 = vld [vmem:[#allocation2 + $0x80] sm:$0x1]  ;;  %v9195_v38 = vld [vmem:[#allocation8 + $0xf8] sm:$0xff]  }
  0xac   : > { %932 = vst [vmem:[#allocation2 + $0x8c] sm:$0x1] %v931_v27  ;;  %v927_v40 = vld [vmem:[#allocation2 + $0x84] sm:$0x1]  ;;  %v806_v41 = vsel %vm9902_vm3, 0, %v805_v39  ;;  %s9535_s30 = scalar_lea.vmem %s11516_s29, 2048 }
  0xad   : > { %v928_v42 = vsel %vm9909_vm4, 0, %v927_v40  ;;  %807 = vst [vmem:[#allocation2 + $0x80] sm:$0x1] %v806_v41  ;;  %v948_v44 = vld [vmem:[#allocation2 + $0xbc] sm:$0x1]  ;;  %p9536_p10 = scmp.ne.s32.totalorder %s11516_s29, %s9535_s30  ;;  %s9618_s9 = smov [#allocation11]  }
  0xae   : > { %8325 = vmatpush3.bf16.msra.mxu0 %v9181_v43  ;;  %929 = vst [vmem:[#allocation2 + $0x84] sm:$0x1] %v928_v42  ;;  %v826_v43 = vld [vmem:[#allocation2 + $0xb8] sm:$0x1]  ;;  %v949_v46 = vsel %vm9909_vm4, 0, %v948_v44  ;;  %s9539_s13 = sshll.u32 %s9618_s9, 4  ;;  %s9540_s13 = int_to_ptr.vmem [resolvable:$false] %s9539_s13 }
  0xaf   : > { %8326 = vmatprep.subr.bf16.mxu0 %v9182_v52  ;;  %v827_v45 = vsel %vm9902_vm3, 0, %v826_v43  ;;  %950 = vst [vmem:[#allocation2 + $0xbc] sm:$0x1] %v949_v46  ;;  %v820_v47 = vld [vmem:[#allocation2 + $0xa8] sm:$0x1]  ;;  %p9537_p3 = pnand %p9536_p10, %p9815_p5  ;;  %s9541_s15 = scalar_lea.vmem %s9540_s13, 4096 }
  0xb0   : > { %828 = vst [vmem:[#allocation2 + $0xb8] sm:$0x1] %v827_v45  ;;  %v942_v48 = vld [vmem:[#allocation2 + $0xac] sm:$0x1]  ;;  %v821_v49 = vsel %vm9902_vm3, 0, %v820_v47  ;;  %p9542_p12 = scmp.lt.s32.totalorder %s11516_s29, %s9540_s13  ;;  %p9543_p1 = scmp.lt.s32.totalorder %s9541_s15, %s9535_s30 }
  0xb1   : > { %8295 = vmatmul.mubr.bf16.gmra.mrb[4].mxu0 %v351_v11  ;;  %v922_v11 = vsel %vm9909_vm4, 0, %v921_v9  ;;  %v943_v50 = vsel %vm9909_vm4, 0, %v942_v48  ;;  %822 = vst [vmem:[#allocation2 + $0xa8] sm:$0x1] %v821_v49  ;;  %v829_v51 = vld [vmem:[#allocation2 + $0xc0] sm:$0x1]  ;;  %p9538_p7 = pneg %p9537_p3 }
  0xb2   : > { %8298 = vmatprep.mubr.bf16.mxu0 %v353_v12  ;;  %8327 = vmatpush3.bf16.msra.mxu0 %v9182_v52  ;;  %923 = vst [vmem:[#allocation2 + $0x74] sm:$0x1] %v922_v11  ;;  %v9184_v12 = vld [vmem:[#allocation8 + $0x60] sm:$0xff]   ;;  %944 = vst [vmem:[#allocation2 + $0xac] sm:$0x1] %v943_v50  ;;  %v830_v52 = vsel %vm9902_vm3, 0, %v829_v51  ;;  %p9544_p2 = por %p9543_p1, %p9542_p12 }
  0xb3   : > { %8328 = vmatprep.subr.bf16.mxu0 %v9183_v62  ;;  %v951_v53 = vld [vmem:[#allocation2 + $0xc4] sm:$0x1]  ;;  %831 = vst [vmem:[#allocation2 + $0xc0] sm:$0x1] %v830_v52  ;;  %v823_v56 = vld [vmem:[#allocation2 + $0xb0] sm:$0x1] }
  0xb4   : > { %v952_v54 = vsel %vm9909_vm4, 0, %v951_v53  ;;  %v945_v57 = vld [vmem:[#allocation2 + $0xb4] sm:$0x1]  ;;  %v824_v58 = vsel %vm9902_vm3, 0, %v823_v56  ;;  %v838_v61 = vld [vmem:[#allocation2 + $0xd8] sm:$0x1]  ;;  %p9545_p4 = pnand %p9544_p2, %p9538_p7 }
  0xb5   : > { %953 = vst [vmem:[#allocation2 + $0xc4] sm:$0x1] %v952_v54  ;;  %v946_v59 = vsel %vm9909_vm4, 0, %v945_v57  ;;  %825 = vst [vmem:[#allocation2 + $0xb0] sm:$0x1] %v824_v58  ;;  %v839_v63 = vsel %vm9902_vm3, 0, %v838_v61 }
  0xb6   : > { %8329 = vmatpush3.bf16.msra.mxu0 %v9183_v62  ;;  %947 = vst [vmem:[#allocation2 + $0xb4] sm:$0x1] %v946_v59  ;;  %v960_v62 = vld [vmem:[#allocation2 + $0xdc] sm:$0x1]  ;;  %840 = vst [vmem:[#allocation2 + $0xd8] sm:$0x1] %v839_v63 }
  0xb7   : > { %8330 = vmatprep.subr.bf16.mxu0 %v9184_v12  ;;  %v961_v0 = vsel %vm9909_vm4, 0, %v960_v62  ;;  %v954_v2 = vld [vmem:[#allocation2 + $0xcc] sm:$0x1]  ;;  %v841_v3 = vld [vmem:[#allocation2 + $0xe0] sm:$0x1] }
  0xb8   : > { %962 = vst [vmem:[#allocation2 + $0xdc] sm:$0x1] %v961_v0  ;;  %v955_v5 = vsel %vm9909_vm4, 0, %v954_v2  ;;  %v842_v6 = vsel %vm9902_vm3, 0, %v841_v3  ;;  %v963_v7 = vld [vmem:[#allocation2 + $0xe4] sm:$0x1] }
  0xb9   : > { %8299 = vmatmul.mubr.bf16.gmra.mrb[8].mxu0 %v355_v13  ;;  %v758_v13 = vsel %vm9902_vm3, 0, %v757_v1  ;;  %v832_v1 = vld [vmem:[#allocation2 + $0xc8] sm:$0x1]  ;;  %956 = vst [vmem:[#allocation2 + $0xcc] sm:$0x1] %v955_v5  ;;  %v964_v8 = vsel %vm9909_vm4, 0, %v963_v7 }
  0xba   : > { %8302 = vmatprep.mubr.bf16.mxu0 %v357_v14  ;;  %v793_v14 = vld [vmem:[#allocation2 + $0x60] sm:$0x1]  ;;  %759 = vst [vmem:[#allocation2] sm:$0x1] %v758_v13  ;;  %8331 = vmatpush3.bf16.msra.mxu0 %v9184_v12  ;;  %v833_v4 = vsel %vm9902_vm3, 0, %v832_v1 }
  0xbb   : > { %834 = vst [vmem:[#allocation2 + $0xc8] sm:$0x1] %v833_v4  ;;  %843 = vst [vmem:[#allocation2 + $0xe0] sm:$0x1] %v842_v6  ;;  %v787_v9 = vld [vmem:[#allocation2 + $0x50] sm:$0x1] }
  0xbc   : > { %965 = vst [vmem:[#allocation2 + $0xe4] sm:$0x1] %v964_v8  ;;  %v909_v10 = vld [vmem:[#allocation2 + $0x54] sm:$0x1]  ;;  %v788_v11 = vsel %vm9902_vm3, 0, %v787_v9  ;;  %v10051_v1 = vld [vmem:[#allocation8 + $0x100] sm:$0xff]  }
  0xbd   : > { %v910_v12 = vsel %vm9909_vm4, 0, %v909_v10  ;;  %789 = vst [vmem:[#allocation2 + $0x50] sm:$0x1] %v788_v11  ;;  %v835_v13 = vld [vmem:[#allocation2 + $0xd0] sm:$0x1] }
  0xbe   : > { %911 = vst [vmem:[#allocation2 + $0x54] sm:$0x1] %v910_v12  ;;  %v859_v27 = vld [vmem:[#allocation2 + $0x110] sm:$0x1]  ;;  %v981_v31 = vld [vmem:[#allocation2 + $0x114] sm:$0x1] }
  0xbf   : > { %v860_v30 = vsel %vm9902_vm3, 0, %v859_v27  ;;  %v853_v33 = vld [vmem:[#allocation2 + $0x100] sm:$0x1]  ;;  %v975_v35 = vld [vmem:[#allocation2 + $0x104] sm:$0x1] }
  0xc0   : > { %861 = vst [vmem:[#allocation2 + $0x110] sm:$0x1] %v860_v30  ;;  %v854_v34 = vsel %vm9902_vm3, 0, %v853_v33  ;;  %v976_v37 = vsel %vm9909_vm4, 0, %v975_v35  ;;  %v868_v39 = vld [vmem:[#allocation2 + $0x128] sm:$0x1] }
  0xc1   : > { %8303 = vmatmul.mubr.bf16.gmra.mrb[12].mxu0 %v359_v15  ;;  %v915_v15 = vld [vmem:[#allocation2 + $0x64] sm:$0x1]  ;;  %855 = vst [vmem:[#allocation2 + $0x100] sm:$0x1] %v854_v34  ;;  %977 = vst [vmem:[#allocation2 + $0x104] sm:$0x1] %v976_v37 }
  0xc2   : > { %8306 = vmatprep.mubr.bf16.mxu0 %v361_v16  ;;  %v879_v16 = vld [vmem:[#allocation2 + $0x4] sm:$0x1]  ;;  %v869_v40 = vsel %vm9902_vm3, 0, %v868_v39  ;;  %v990_v41 = vld [vmem:[#allocation2 + $0x12c] sm:$0x1] }
  0xc3   : > { %870 = vst [vmem:[#allocation2 + $0x128] sm:$0x1] %v869_v40  ;;  %v991_v42 = vsel %vm9909_vm4, 0, %v990_v41  ;;  %v862_v43 = vld [vmem:[#allocation2 + $0x118] sm:$0x1] }
  0xc4   : > { %992 = vst [vmem:[#allocation2 + $0x12c] sm:$0x1] %v991_v42  ;;  %v984_v44 = vld [vmem:[#allocation2 + $0x11c] sm:$0x1]  ;;  %v871_v45 = vld [vmem:[#allocation2 + $0x130] sm:$0x1] }
  0xc5   : > { %v863_v46 = vsel %vm9902_vm3, 0, %v862_v43  ;;  %v985_v47 = vsel %vm9909_vm4, 0, %v984_v44  ;;  %v872_v48 = vsel %vm9902_vm3, 0, %v871_v45  ;;  %v993_v49 = vld [vmem:[#allocation2 + $0x134] sm:$0x1]  ;;  %v10083_v45 = vld [vmem:[#allocation8] sm:$0xff]  }
  0xc6   : > { %864 = vst [vmem:[#allocation2 + $0x118] sm:$0x1] %v863_v46  ;;  %986 = vst [vmem:[#allocation2 + $0x11c] sm:$0x1] %v985_v47  ;;  %v994_v50 = vsel %vm9909_vm4, 0, %v993_v49 }
  0xc7   : > { %873 = vst [vmem:[#allocation2 + $0x130] sm:$0x1] %v872_v48  ;;  %995 = vst [vmem:[#allocation2 + $0x134] sm:$0x1] %v994_v50  ;;  %v1642_v51 = vld [vmem:[#allocation2] sm:$0xf] }
  0xc8   : > { %v1650_v52 = vld [vmem:[#allocation2 + $0x50] sm:$0xf]  ;;  %v817_v53 = vld [vmem:[#allocation2 + $0xa0] sm:$0x1]  ;;  %v939_v54 = vld [vmem:[#allocation2 + $0xa4] sm:$0x1] }
  0xc9   : > { %8307 = vmatmul.mubr.bf16.gmra.mrb[16].mxu0 %v363_v17  ;;  %v794_v17 = vsel %vm9902_vm3, 0, %v793_v14  ;;  %v957_v14 = vld [vmem:[#allocation2 + $0xd4] sm:$0x1]  ;;  %v940_v56 = vsel %vm9909_vm4, 0, %v939_v54  ;;  %v1726_v57 = vshrl.u32 %v1642_v51, 16  ;;  %v1729_v58 = vshll.u32 %v1642_v51, 16 }
  0xca   : > { %8310 = vmatprep.mubr.bf16.mxu0 %v365_v18  ;;  %v916_v18 = vsel %vm9909_vm4, 0, %v915_v15  ;;  %795 = vst [vmem:[#allocation2 + $0x60] sm:$0x1] %v794_v17  ;;  %v836_v15 = vsel %vm9902_vm3, 0, %v835_v13  ;;  %v9192_v17 = vld [vmem:[#allocation8 + $0xe0] sm:$0xff]   ;;  %v1838_v59 = vshrl.u32 %v1650_v52, 16 }
  0xcb   : > { %917 = vst [vmem:[#allocation2 + $0x64] sm:$0x1] %v916_v18  ;;  %837 = vst [vmem:[#allocation2 + $0xd0] sm:$0x1] %v836_v15  ;;  %v9193_v18 = vld [vmem:[#allocation8 + $0xe8] sm:$0xff]   ;;  %v1728_v2 = vrot.slane %v1726_v57, 4 }
  0xcc   : > { %941 = vst [vmem:[#allocation2 + $0xa4] sm:$0x1] %v940_v56  ;;  %v865_v61 = vld [vmem:[#allocation2 + $0x120] sm:$0x1]  ;;  %v987_v62 = vld [vmem:[#allocation2 + $0x124] sm:$0x1] }
  0xcd   : > { %v866_v63 = vsel %vm9902_vm3, 0, %v865_v61  ;;  %v988_v0 = vsel %vm9909_vm4, 0, %v987_v62  ;;  %v1731_v3 = vrot.slane %v1729_v58, 5  ;;  %v1840_v4 = vrot.slane %v1838_v59, 4  ;;  %v1698_v12 = vld [vmem:[#allocation2 + $0x54] sm:$0x1] }
  0xce   : > { %867 = vst [vmem:[#allocation2 + $0x120] sm:$0x1] %v866_v63  ;;  %989 = vst [vmem:[#allocation2 + $0x124] sm:$0x1] %v988_v0  ;;  %v10057_v15 = vld [vmem:[%s11564_s2] ss:$0 sm:$0xff] }
  0xcf   : > { %v1732_v10 = vor.u32 %v1731_v3, %v1728_v2  ;;  %vm1723_vm6 = vsmask.f32 7440  ;;  %v969_v39 = vld [vmem:[#allocation2 + $0xf4] sm:$0x1]  ;;  %v1465_v56 = vld [vmem:[#allocation2 + $0x1c] sm:$0x1] }
  0xd0   : > { %vm10076_vm7 = vmor %vm1722_vm5, %vm1723_vm6  ;;  %v970_v46 = vsel %vm9909_vm4, 0, %v969_v39  ;;  %v1450_v62 = vld [vmem:[#allocation2 + $0x8] sm:$0xf] }
  0xd1   : > { %8311 = vmatmul.mubr.bf16.gmra.mrb[20].mxu0 %v367_v19  ;;  %v9185_v19 = vld [vmem:[#allocation8 + $0x68] sm:$0xff]   ;;  %971 = vst [vmem:[#allocation2 + $0xf4] sm:$0x1] %v970_v46 }
  0xd2   : > { %8314 = vmatprep.mubr.bf16.mxu0 %v369_v20  ;;  %v880_v20 = vsel %vm9909_vm4, 0, %v879_v16  ;;  %8332 = vmatprep.subr.bf16.mxu0 %v9185_v19  ;;  %v958_v16 = vsel %vm9909_vm4, 0, %v957_v14 }
  0xd3   : > { %881 = vst [vmem:[#allocation2 + $0x4] sm:$0x1] %v880_v20  ;;  %8333 = vmatpush3.bf16.msra.mxu0 %v9185_v19  ;;  %959 = vst [vmem:[#allocation2 + $0xd4] sm:$0x1] %v958_v16  ;;  %v856_v19 = vld [vmem:[#allocation2 + $0x108] sm:$0x1] }
  0xd4   : > { %v978_v20 = vld [vmem:[#allocation2 + $0x10c] sm:$0x1]  ;;  %v1706_v14 = vld [vmem:[#allocation2 + $0xa4] sm:$0x1]  ;;  %v1847_v16 = vshll.u32 %v1698_v12, 16 }
  0xd9   : > { %8315 = vmatmul.mubr.bf16.gmra.mrb[24].mxu0 %v371_v21  ;;  %v9186_v21 = vld [vmem:[#allocation8 + $0xc0] sm:$0xff]  }
  0xda   : > { %8318 = vmatprep.mubr.bf16.mxu0 %v373_v22  ;;  %v9187_v22 = vld [vmem:[#allocation8 + $0x70] sm:$0xff]   ;;  %8802 = vmatprep.subr.bf16.mxu1 %v9186_v21  ;;  %v1690_v7 = vld [vmem:[#allocation2 + $0x4] sm:$0x1] }
  0xdb   : > { %8334 = vmatprep.subr.bf16.mxu0 %v9187_v22  ;;  %8810 = vmatpush3.bf16.msra.mxu1 %v9186_v21  ;;  %v857_v21 = vsel %vm9902_vm3, 0, %v856_v19  ;;  %v1735_v11 = vshll.u32 %v1690_v7, 16  ;;  %v1959_v19 = vshll.u32 %v1706_v14, 16  ;;  %v1468_v14 = vld [vmem:[#allocation2 + $0x20] sm:$0xf] }
  0xdc   : > { %8335 = vmatpush3.bf16.msra.mxu0 %v9187_v22  ;;  %8803 = vmatprep.subr.bf16.mxu1 %v9188_v32  ;;  %v979_v22 = vsel %vm9909_vm4, 0, %v978_v20  ;;  %858 = vst [vmem:[#allocation2 + $0x108] sm:$0x1] %v857_v21 }
  0xdd   : > { %8336 = vmatprep.subr.bf16.mxu0 %v9189_v36  ;;  %980 = vst [vmem:[#allocation2 + $0x10c] sm:$0x1] %v979_v22  ;;  %v10071_v33 = vrot.slane %v1959_v19, 5 }
  0xdf   : > { %8811 = vmatpush3.bf16.msra.mxu1 %v9188_v32  ;;  %v982_v32 = vsel %vm9909_vm4, 0, %v981_v31  ;;  %v10067_v31 = vrot.slane %v1847_v16, 5 }
  0xe0   : > { %8337 = vmatpush3.bf16.msra.mxu0 %v9189_v36  ;;  %8804 = vmatprep.subr.bf16.mxu1 %v9190_v55  ;;  %983 = vst [vmem:[#allocation2 + $0x114] sm:$0x1] %v982_v32  ;;  %v9194_v36 = vld [vmem:[#allocation8 + $0xf0] sm:$0xff]  }
  0xe1   : > { %8319 = vmatmul.mubr.bf16.gmra.mrb[28].mxu0 %v375_v23  ;;  %v808_v23 = vld [vmem:[#allocation2 + $0x88] sm:$0x1]  ;;  %8370 = vmatprep.subr.bf16.mxu0 %v10083_v45 }
  0xe2   : > { %v809_v26 = vsel %vm9902_vm3, 0, %v808_v23  ;;  %v850_v23 = vld [vmem:[#allocation2 + $0xf8] sm:$0x1] }
  0xe3   : > { %810 = vst [vmem:[#allocation2 + $0x88] sm:$0x1] %v809_v26  ;;  %8812 = vmatpush3.bf16.msra.mxu1 %v9190_v55  ;;  %v851_v24 = vsel %vm9902_vm3, 0, %v850_v23  ;;  %v972_v26 = vld [vmem:[#allocation2 + $0xfc] sm:$0x1]  ;;  %v818_v55 = vsel %vm9902_vm3, 0, %v817_v53 }
  0xe4   : > { %8805 = vmatprep.subr.bf16.mxu1 %v9191_v60  ;;  %852 = vst [vmem:[#allocation2 + $0xf8] sm:$0x1] %v851_v24  ;;  %v973_v28 = vsel %vm9909_vm4, 0, %v972_v26  ;;  %819 = vst [vmem:[#allocation2 + $0xa0] sm:$0x1] %v818_v55  ;;  %v10060_v24 = vrot.slane %v1732_v10, 4 }
  0xe5   : > { %974 = vst [vmem:[#allocation2 + $0xfc] sm:$0x1] %v973_v28  ;;  %v10062_v26 = vrot.slane %v1735_v11, 5  ;;  %v1462_v55 = vld [vmem:[#allocation2 + $0x18] sm:$0xf] }
  0xe7   : > { %8813 = vmatpush3.bf16.msra.mxu1 %v9191_v60  ;;  %v1841_v60 = vshll.u32 %v1650_v52, 16  ;;  %v1738_v49 = vsel %vm10076_vm7, %v10060_v24, %v10062_v26 }
  0xe8   : > { %8806 = vmatprep.subr.bf16.mxu1 %v9192_v17 }
  0xe9   : > { %v1843_v5 = vrot.slane %v1841_v60, 5 }
  0xeb   : > { %8814 = vmatpush3.bf16.msra.mxu1 %v9192_v17  ;;  %v1658_v6 = vld [vmem:[#allocation2 + $0xa0] sm:$0xf]  ;;  %v1844_v13 = vor.u32 %v1843_v5, %v1840_v4 }
  0xec   : > { %8807 = vmatprep.subr.bf16.mxu1 %v9193_v18  ;;  %v1950_v8 = vshrl.u32 %v1658_v6, 16  ;;  %v1953_v9 = vshll.u32 %v1658_v6, 16  ;;  %v1453_v6 = vld [vmem:[#allocation2 + $0xc] sm:$0x1] }
  0xed   : > { %v10064_v27 = vrot.slane %v1844_v13, 4 }
  0xee   : > { %v1952_v17 = vrot.slane %v1950_v8, 4 }
  0xef   : > { %8815 = vmatpush3.bf16.msra.mxu1 %v9193_v18  ;;  %v1955_v18 = vrot.slane %v1953_v9, 5  ;;  %v1850_v52 = vsel %vm10076_vm7, %v10064_v27, %v10067_v31 }
  0xf0   : > { %8808 = vmatprep.subr.bf16.mxu1 %v9194_v36 }
  0xf1   : > { %v1956_v21 = vor.u32 %v1955_v18, %v1952_v17 }
  0xf3   : > { %8816 = vmatpush3.bf16.msra.mxu1 %v9194_v36  ;;  %v10069_v32 = vrot.slane %v1956_v21, 4 }
  0xf4   : > { %8809 = vmatprep.subr.bf16.mxu1 %v9195_v38 }
  0xf5   : > { %v1962_v53 = vsel %vm10076_vm7, %v10069_v32, %v10071_v33 }
  0xf7   : > { %8817 = vmatpush3.bf16.msra.mxu1 %v9195_v38  ;;  %v847_v38 = vld [vmem:[#allocation2 + $0xf0] sm:$0x1] }
  0xf8   : > { %8514 = vmatprep.subr.bf16.mxu1 %v10051_v1  ;;  %v848_v42 = vsel %vm9902_vm3, 0, %v847_v38 }
  0xf9   : > { %849 = vst [vmem:[#allocation2 + $0xf0] sm:$0x1] %v848_v42 }
 0x17c   : > { %v8292_v20 = vpop.f32.mrb[0].mxu0 }
 0x17d   : > { %v587_v22 = vadd.f32 %v8292_v20, %v10057_v15  ;;  %v578_v23 = vpop.f32.mrb[1].mxu0  ;;  %v1471_v20 = vld [vmem:[#allocation2 + $0x24] sm:$0x1] }
 0x17e   : > { %v579_v28 = vadd.f32 %v10057_v15, %v578_v23  ;;  %v8293_v30 = vpop.f32.mrb[2].mxu0 }
 0x17f   : > { %v707_v34 = vmax.f32 %v587_v22, 0.0  ;;  %v590_v35 = vadd.f32 %v8293_v30, %v10057_v15  ;;  %v581_v36 = vpop.f32.mrb[3].mxu0 }
 0x180   : > { %v705_v40 = vmax.f32 %v579_v28, 0.0  ;;  %v582_v41 = vadd.f32 %v10057_v15, %v581_v36  ;;  %v1459_v36 = vld [vmem:[#allocation2 + $0x14] sm:$0x1] }
 0x181   : > { %v7883_v43 = vpack.c.bf16 %v707_v34, %v707_v34  ;;  %v708_v44 = vmax.f32 %v590_v35, 0.0  ;;  %v1456_v35 = vld [vmem:[#allocation2 + $0x10] sm:$0xf] }
 0x182   : > { %v7881_v47 = vpack.c.bf16 %v705_v40, %v705_v40  ;;  %v706_v48 = vmax.f32 %v582_v41, 0.0 }
 0x183   : > { %v1144_v50 = vshrl.u32 %v7883_v43, 16  ;;  %v7884_v51 = vpack.c.bf16 %v708_v44, %v708_v44  ;;  %v1147_v54 = vshll.u32 %v7883_v43, 16 }
 0x184   : > { %v1128_v57 = vshrl.u32 %v7881_v47, 16  ;;  %v1131_v58 = vshll.u32 %v7881_v47, 16  ;;  %v7882_v59 = vpack.c.bf16 %v706_v48, %v706_v48  ;;  %v8296_v60 = vpop.f32.mrb[4].mxu0 }
 0x185   : > { %v1146_v61 = vrot.slane %v1144_v50, 7  ;;  %v1152_v63 = vshrl.u32 %v7884_v51, 16  ;;  %v1155_v0 = vshll.u32 %v7884_v51, 16  ;;  %v603_v2 = vadd.f32 %v8296_v60, %v10057_v15  ;;  %v594_v3 = vpop.f32.mrb[5].mxu0 }
 0x186   : > { %v1130_v5 = vrot.slane %v1128_v57, 7  ;;  %v1136_v7 = vshrl.u32 %v7882_v59, 16  ;;  %v1139_v8 = vshll.u32 %v7882_v59, 16  ;;  %v595_v9 = vadd.f32 %v10057_v15, %v594_v3  ;;  %v8297_v10 = vpop.f32.mrb[6].mxu0 }
 0x187   : > { %v1149_v11 = vor.u32 %v1147_v54, %v1146_v61  ;;  %v1150_v12 = vrot.slane %v1146_v61, 4  ;;  %v1154_v13 = vrot.slane %v1152_v63, 7  ;;  %v711_v16 = vmax.f32 %v603_v2, 0.0  ;;  %v597_v17 = vpop.f32.mrb[7].mxu0  ;;  %v1486_v61 = vld [vmem:[#allocation2 + $0x38] sm:$0xf] }
 0x188   : > { %v1133_v18 = vor.u32 %v1131_v58, %v1130_v5  ;;  %v1134_v19 = vrot.slane %v1130_v5, 4  ;;  %v1138_v21 = vrot.slane %v1136_v7, 7  ;;  %v709_v22 = vmax.f32 %v595_v9, 0.0 }
 0x189   : > { %v1463_v23 = vsel %vm10103_vm9, %v1149_v11, %v1462_v55  ;;  %v1466_v28 = vsel %vm9902_vm3, %v1150_v12, %v1465_v56  ;;  %v1157_v30 = vor.u32 %v1155_v0, %v1154_v13  ;;  %v1158_v34 = vrot.slane %v1154_v13, 4  ;;  %v10126_v55 = vld [vmem:[#allocation2 + $0xf0] sm:$0xf]  ;;  %v1474_v11 = vld [vmem:[#allocation2 + $0x28] sm:$0xf] }
 0x18a   : > { %1464 = vst [vmem:[#allocation2 + $0x18] sm:$0xf] %v1463_v23  ;;  %1467 = vst [vmem:[#allocation2 + $0x1c] sm:$0x1] %v1466_v28  ;;  %v1451_v38 = vsel %vm10103_vm9, %v1133_v18, %v1450_v62  ;;  %v1454_v39 = vsel %vm9902_vm3, %v1134_v19, %v1453_v6  ;;  %v1141_v40 = vor.u32 %v1139_v8, %v1138_v21  ;;  %v1142_v41 = vrot.slane %v1138_v21, 4 }
 0x18b   : > { %1452 = vst [vmem:[#allocation2 + $0x8] sm:$0xf] %v1451_v38  ;;  %1455 = vst [vmem:[#allocation2 + $0xc] sm:$0x1] %v1454_v39  ;;  %v1469_v42 = vsel %vm10103_vm9, %v1157_v30, %v1468_v14  ;;  %v1472_v43 = vsel %vm9902_vm3, %v1158_v34, %v1471_v20  ;;  %v7887_v44 = vpack.c.bf16 %v711_v16, %v711_v16  ;;  %v1489_v6 = vld [vmem:[#allocation2 + $0x3c] sm:$0x1] }
 0x18c   : > { %v7885_v46 = vpack.c.bf16 %v709_v22, %v709_v22  ;;  %1470 = vst [vmem:[#allocation2 + $0x20] sm:$0xf] %v1469_v42  ;;  %1473 = vst [vmem:[#allocation2 + $0x24] sm:$0x1] %v1472_v43  ;;  %v1457_v47 = vsel %vm10103_vm9, %v1141_v40, %v1456_v35  ;;  %v1460_v48 = vsel %vm9902_vm3, %v1142_v41, %v1459_v36  ;;  %v8300_v54 = vpop.f32.mrb[8].mxu0 }
 0x18d   : > { %v606_v50 = vadd.f32 %v8297_v10, %v10057_v15  ;;  %v598_v51 = vadd.f32 %v10057_v15, %v597_v17  ;;  %1458 = vst [vmem:[#allocation2 + $0x10] sm:$0xf] %v1457_v47  ;;  %1461 = vst [vmem:[#allocation2 + $0x14] sm:$0x1] %v1460_v48  ;;  %v1176_v56 = vshrl.u32 %v7887_v44, 16  ;;  %v1179_v57 = vshll.u32 %v7887_v44, 16 }
 0x18e   : > { %v1160_v58 = vshrl.u32 %v7885_v46, 16  ;;  %v1163_v59 = vshll.u32 %v7885_v46, 16  ;;  %v610_v60 = vpop.f32.mrb[9].mxu0  ;;  %v619_v0 = vadd.f32 %v8300_v54, %v10057_v15  ;;  %v2062_v10 = vshrl.u32 %v10126_v55, 16  ;;  %v1477_v12 = vld [vmem:[#allocation2 + $0x2c] sm:$0x1] }
 0x18f   : > { %v712_v62 = vmax.f32 %v606_v50, 0.0  ;;  %v710_v63 = vmax.f32 %v598_v51, 0.0  ;;  %v611_v2 = vadd.f32 %v10057_v15, %v610_v60  ;;  %v8301_v3 = vpop.f32.mrb[10].mxu0  ;;  %v1178_v5 = vrot.slane %v1176_v56, 7  ;;  %v1492_v40 = vld [vmem:[#allocation2 + $0x40] sm:$0xf] }
 0x190   : > { %v1162_v7 = vrot.slane %v1160_v58, 7  ;;  %v10131_v8 = vadd.f32 %v8301_v3, %v10057_v15  ;;  %v613_v9 = vpop.f32.mrb[11].mxu0  ;;  %v715_v16 = vmax.f32 %v619_v0, 0.0  ;;  %v1495_v41 = vld [vmem:[#allocation2 + $0x44] sm:$0x1] }
 0x191   : > { %v7888_v13 = vpack.c.bf16 %v712_v62, %v712_v62  ;;  %v7886_v14 = vpack.c.bf16 %v710_v63, %v710_v63  ;;  %v713_v17 = vmax.f32 %v611_v2, 0.0  ;;  %v1181_v18 = vor.u32 %v1179_v57, %v1178_v5  ;;  %v1480_v44 = vld [vmem:[#allocation2 + $0x30] sm:$0xf]  ;;  %v1483_v50 = vld [vmem:[#allocation2 + $0x34] sm:$0x1] }
 0x192   : > { %v1182_v19 = vrot.slane %v1178_v5, 4  ;;  %v1165_v20 = vor.u32 %v1163_v59, %v1162_v7  ;;  %v1166_v21 = vrot.slane %v1162_v7, 4  ;;  %v10134_v34 = vld [vmem:[#allocation2 + $0x8] sm:$0xf]  ;;  %v7891_v46 = vpack.c.bf16 %v715_v16, %v715_v16 }
 0x193   : > { %v1184_v22 = vshrl.u32 %v7888_v13, 16  ;;  %v1187_v23 = vshll.u32 %v7888_v13, 16  ;;  %v1168_v28 = vshrl.u32 %v7886_v14, 16  ;;  %v1171_v30 = vshll.u32 %v7886_v14, 16  ;;  %v1513_v14 = vld [vmem:[#allocation2 + $0x6c] sm:$0x1] }
 0x194   : > { %v1487_v35 = vsel %vm10103_vm9, %v1181_v18, %v1486_v61  ;;  %v1490_v36 = vsel %vm9902_vm3, %v1182_v19, %v1489_v6  ;;  %v1475_v38 = vsel %vm10103_vm9, %v1165_v20, %v1474_v11  ;;  %v1478_v39 = vsel %vm9902_vm3, %v1166_v21, %v1477_v12  ;;  %v8304_v48 = vpop.f32.mrb[12].mxu0  ;;  %v1510_v12 = vld [vmem:[#allocation2 + $0x68] sm:$0xf]  ;;  %v1498_v19 = vld [vmem:[#allocation2 + $0x58] sm:$0xf] }
 0x195   : > { %1488 = vst [vmem:[#allocation2 + $0x38] sm:$0xf] %v1487_v35  ;;  %1491 = vst [vmem:[#allocation2 + $0x3c] sm:$0x1] %v1490_v36  ;;  %v1186_v42 = vrot.slane %v1184_v22, 7  ;;  %v1170_v43 = vrot.slane %v1168_v28, 7  ;;  %v7889_v47 = vpack.c.bf16 %v713_v17, %v713_v17  ;;  %v614_v54 = vadd.f32 %v10057_v15, %v613_v9 }
 0x196   : > { %1476 = vst [vmem:[#allocation2 + $0x28] sm:$0xf] %v1475_v38  ;;  %1479 = vst [vmem:[#allocation2 + $0x2c] sm:$0x1] %v1478_v39  ;;  %v716_v51 = vmax.f32 %v10131_v8, 0.0  ;;  %v635_v56 = vadd.f32 %v8304_v48, %v10057_v15  ;;  %v626_v57 = vpop.f32.mrb[13].mxu0 }
 0x197   : > { %v1740_v58 = vshrl.u32 %v10134_v34, 16  ;;  %v1189_v59 = vor.u32 %v1187_v23, %v1186_v42  ;;  %v1190_v60 = vrot.slane %v1186_v42, 4  ;;  %v1173_v61 = vor.u32 %v1171_v30, %v1170_v43  ;;  %v8305_v63 = vpop.f32.mrb[14].mxu0  ;;  %v1501_v20 = vld [vmem:[#allocation2 + $0x5c] sm:$0x1] }
 0x198   : > { %v1174_v62 = vrot.slane %v1170_v43, 4  ;;  %v1208_v0 = vshrl.u32 %v7891_v46, 16  ;;  %v1211_v2 = vshll.u32 %v7891_v46, 16  ;;  %v1192_v3 = vshrl.u32 %v7889_v47, 16  ;;  %v629_v6 = vpop.f32.mrb[15].mxu0 }
 0x199   : > { %v1195_v5 = vshll.u32 %v7889_v47, 16  ;;  %v1493_v7 = vsel %vm10103_vm9, %v1189_v59, %v1492_v40  ;;  %v1496_v8 = vsel %vm9902_vm3, %v1190_v60, %v1495_v41  ;;  %v1481_v9 = vsel %vm10103_vm9, %v1173_v61, %v1480_v44 }
 0x19a   : > { %v1484_v11 = vsel %vm9902_vm3, %v1174_v62, %v1483_v50  ;;  %1494 = vst [vmem:[#allocation2 + $0x40] sm:$0xf] %v1493_v7  ;;  %1497 = vst [vmem:[#allocation2 + $0x44] sm:$0x1] %v1496_v8  ;;  %v1210_v13 = vrot.slane %v1208_v0, 7  ;;  %v1194_v16 = vrot.slane %v1192_v3, 7  ;;  %v7892_v17 = vpack.c.bf16 %v716_v51, %v716_v51 }
 0x19b   : > { %1482 = vst [vmem:[#allocation2 + $0x30] sm:$0xf] %v1481_v9  ;;  %1485 = vst [vmem:[#allocation2 + $0x34] sm:$0x1] %v1484_v11  ;;  %v714_v18 = vmax.f32 %v614_v54, 0.0  ;;  %v719_v21 = vmax.f32 %v635_v56, 0.0  ;;  %v627_v22 = vadd.f32 %v10057_v15, %v626_v57  ;;  %v638_v23 = vadd.f32 %v8305_v63, %v10057_v15 }
 0x19c   : > { %v630_v28 = vadd.f32 %v10057_v15, %v629_v6  ;;  %v1213_v30 = vor.u32 %v1211_v2, %v1210_v13  ;;  %v1214_v35 = vrot.slane %v1210_v13, 4  ;;  %v1197_v36 = vor.u32 %v1195_v5, %v1194_v16  ;;  %v8308_v43 = vpop.f32.mrb[16].mxu0  ;;  %v1516_v50 = vld [vmem:[#allocation2 + $0x70] sm:$0xf]  ;;  %v1519_v51 = vld [vmem:[#allocation2 + $0x74] sm:$0x1] }
 0x19d   : > { %v1198_v38 = vrot.slane %v1194_v16, 4  ;;  %v1216_v39 = vshrl.u32 %v7892_v17, 16  ;;  %v1219_v40 = vshll.u32 %v7892_v17, 16  ;;  %v7890_v41 = vpack.c.bf16 %v714_v18, %v714_v18  ;;  %v642_v54 = vpop.f32.mrb[17].mxu0  ;;  %v1504_v62 = vld [vmem:[#allocation2 + $0x60] sm:$0xf] }
 0x19e   : > { %v7895_v42 = vpack.c.bf16 %v719_v21, %v719_v21  ;;  %v1511_v44 = vsel %vm10103_vm9, %v1213_v30, %v1510_v12  ;;  %v1514_v46 = vsel %vm9902_vm3, %v1214_v35, %v1513_v14  ;;  %v1499_v47 = vsel %vm10103_vm9, %v1197_v36, %v1498_v19  ;;  %v8309_v61 = vpop.f32.mrb[18].mxu0  ;;  %v1507_v9 = vld [vmem:[#allocation2 + $0x64] sm:$0x1]  ;;  %v1534_v12 = vld [vmem:[#allocation2 + $0x88] sm:$0xf] }
 0x19f   : > { %v1502_v48 = vsel %vm9902_vm3, %v1198_v38, %v1501_v20  ;;  %1512 = vst [vmem:[#allocation2 + $0x68] sm:$0xf] %v1511_v44  ;;  %1515 = vst [vmem:[#allocation2 + $0x6c] sm:$0x1] %v1514_v46  ;;  %v1218_v56 = vrot.slane %v1216_v39, 7  ;;  %v1200_v57 = vshrl.u32 %v7890_v41, 16  ;;  %v651_v18 = vadd.f32 %v8308_v43, %v10057_v15 }
 0x1a0   : > { %1500 = vst [vmem:[#allocation2 + $0x58] sm:$0xf] %v1499_v47  ;;  %1503 = vst [vmem:[#allocation2 + $0x5c] sm:$0x1] %v1502_v48  ;;  %v1203_v59 = vshll.u32 %v7890_v41, 16  ;;  %v1240_v60 = vshrl.u32 %v7895_v42, 16 }
 0x1a1   : > { %v1243_v63 = vshll.u32 %v7895_v42, 16  ;;  %v717_v0 = vmax.f32 %v627_v22, 0.0  ;;  %v720_v2 = vmax.f32 %v638_v23, 0.0  ;;  %v718_v3 = vmax.f32 %v630_v28, 0.0  ;;  %v10167_v5 = vpop.f32.mrb[19].mxu0 }
 0x1a2   : > { %v1221_v6 = vor.u32 %v1219_v40, %v1218_v56  ;;  %v1222_v7 = vrot.slane %v1218_v56, 4  ;;  %v1202_v8 = vrot.slane %v1200_v57, 7  ;;  %v1242_v11 = vrot.slane %v1240_v60, 7  ;;  %v1537_v13 = vld [vmem:[#allocation2 + $0x8c] sm:$0x1] }
 0x1a3   : > { %v7893_v14 = vpack.c.bf16 %v717_v0, %v717_v0  ;;  %v7896_v16 = vpack.c.bf16 %v720_v2, %v720_v2  ;;  %v7894_v17 = vpack.c.bf16 %v718_v3, %v718_v3  ;;  %v1522_v39 = vld [vmem:[#allocation2 + $0x78] sm:$0xf]  ;;  %v1525_v47 = vld [vmem:[#allocation2 + $0x7c] sm:$0x1]  ;;  %v1540_v56 = vld [vmem:[#allocation2 + $0x90] sm:$0xf]  ;;  %v643_v60 = vadd.f32 %v10057_v15, %v642_v54 }
 0x1a4   : > { %v1517_v19 = vsel %vm10103_vm9, %v1221_v6, %v1516_v50  ;;  %v1520_v20 = vsel %vm9902_vm3, %v1222_v7, %v1519_v51  ;;  %v1205_v21 = vor.u32 %v1203_v59, %v1202_v8  ;;  %v1206_v22 = vrot.slane %v1202_v8, 4  ;;  %v10178_v42 = vpop.f32.mrb[20].mxu0  ;;  %v1543_v2 = vld [vmem:[#allocation2 + $0x94] sm:$0x1] }
 0x1a5   : > { %1518 = vst [vmem:[#allocation2 + $0x70] sm:$0xf] %v1517_v19  ;;  %1521 = vst [vmem:[#allocation2 + $0x74] sm:$0x1] %v1520_v20  ;;  %v1245_v23 = vor.u32 %v1243_v63, %v1242_v11  ;;  %v1246_v28 = vrot.slane %v1242_v11, 4  ;;  %v1224_v30 = vshrl.u32 %v7893_v14, 16  ;;  %v654_v6 = vadd.f32 %v8309_v61, %v10057_v15 }
 0x1a6   : > { %v1227_v35 = vshll.u32 %v7893_v14, 16  ;;  %v1505_v36 = vsel %vm10103_vm9, %v1205_v21, %v1504_v62  ;;  %v1508_v38 = vsel %vm9902_vm3, %v1206_v22, %v1507_v9  ;;  %v1248_v40 = vshrl.u32 %v7896_v16, 16  ;;  %v10184_v50 = vpop.f32.mrb[21].mxu0  ;;  %v1528_v11 = vld [vmem:[#allocation2 + $0x80] sm:$0xf] }
 0x1a7   : > { %v1251_v41 = vshll.u32 %v7896_v16, 16  ;;  %1506 = vst [vmem:[#allocation2 + $0x60] sm:$0xf] %v1505_v36  ;;  %1509 = vst [vmem:[#allocation2 + $0x64] sm:$0x1] %v1508_v38  ;;  %v1535_v43 = vsel %vm10103_vm9, %v1245_v23, %v1534_v12  ;;  %v1538_v44 = vsel %vm9902_vm3, %v1246_v28, %v1537_v13  ;;  %v1226_v46 = vrot.slane %v1224_v30, 7 }
 0x1a8   : > { %v1232_v48 = vshrl.u32 %v7894_v17, 16  ;;  %1536 = vst [vmem:[#allocation2 + $0x88] sm:$0xf] %v1535_v43  ;;  %1539 = vst [vmem:[#allocation2 + $0x8c] sm:$0x1] %v1538_v44  ;;  %v1250_v51 = vrot.slane %v1248_v40, 7  ;;  %v659_v24 = vadd.f32 %v10057_v15, %v10184_v50 }
 0x1a9   : > { %v1235_v57 = vshll.u32 %v7894_v17, 16  ;;  %v723_v59 = vmax.f32 %v651_v18, 0.0  ;;  %v10187_v62 = vpop.f32.mrb[22].mxu0  ;;  %v1229_v63 = vor.u32 %v1227_v35, %v1226_v46  ;;  %v1230_v0 = vrot.slane %v1226_v46, 4  ;;  %v1531_v12 = vld [vmem:[#allocation2 + $0x84] sm:$0x1] }
 0x1aa   : > { %v1234_v3 = vrot.slane %v1232_v48, 7  ;;  %v10190_v7 = vpop.f32.mrb[23].mxu0  ;;  %v1253_v8 = vor.u32 %v1251_v41, %v1250_v51  ;;  %v1254_v9 = vrot.slane %v1250_v51, 4  ;;  %v721_v14 = vmax.f32 %v643_v60, 0.0  ;;  %v1691_v19 = vld [vmem:[#allocation2 + $0xc] sm:$0x1] }
 0x1ab   : > { %v7899_v13 = vpack.c.bf16 %v723_v59, %v723_v59  ;;  %v1523_v16 = vsel %vm10103_vm9, %v1229_v63, %v1522_v39  ;;  %v1526_v54 = vsel %vm9902_vm3, %v1230_v0, %v1525_v47  ;;  %v1558_v30 = vld [vmem:[#allocation2 + $0xb8] sm:$0xf]  ;;  %v1561_v35 = vld [vmem:[#allocation2 + $0xbc] sm:$0x1]  ;;  %v724_v38 = vmax.f32 %v654_v6, 0.0 }
 0x1ac   : > { %v1237_v17 = vor.u32 %v1235_v57, %v1234_v3  ;;  %v1238_v18 = vrot.slane %v1234_v3, 4  ;;  %1524 = vst [vmem:[#allocation2 + $0x78] sm:$0xf] %v1523_v16  ;;  %1527 = vst [vmem:[#allocation2 + $0x7c] sm:$0x1] %v1526_v54  ;;  %v1541_v61 = vsel %vm10103_vm9, %v1253_v8, %v1540_v56  ;;  %v1544_v20 = vsel %vm9902_vm3, %v1254_v9, %v1543_v2  ;;  %v10207_v44 = vpop.f32.mrb[24].mxu0 }
 0x1ad   : > { %v1272_v21 = vshrl.u32 %v7899_v13, 16  ;;  %v1275_v22 = vshll.u32 %v7899_v13, 16  ;;  %1542 = vst [vmem:[#allocation2 + $0x90] sm:$0xf] %v1541_v61  ;;  %1545 = vst [vmem:[#allocation2 + $0x94] sm:$0x1] %v1544_v20  ;;  %v7897_v36 = vpack.c.bf16 %v721_v14, %v721_v14  ;;  %v7900_v48 = vpack.c.bf16 %v724_v38, %v724_v38 }
 0x1ae   : > { %v1529_v23 = vsel %vm10103_vm9, %v1237_v17, %v1528_v11  ;;  %v1532_v28 = vsel %vm9902_vm3, %v1238_v18, %v1531_v12  ;;  %v1742_v40 = vrot.slane %v1740_v58, 4  ;;  %v1743_v41 = vshll.u32 %v10134_v34, 16  ;;  %v1644_v56 = vld [vmem:[#allocation2 + $0x10] sm:$0xf]  ;;  %v10211_v57 = vpop.f32.mrb[25].mxu0 }
 0x1af   : > { %1530 = vst [vmem:[#allocation2 + $0x80] sm:$0xf] %v1529_v23  ;;  %1533 = vst [vmem:[#allocation2 + $0x84] sm:$0x1] %v1532_v28  ;;  %v1274_v39 = vrot.slane %v1272_v21, 7  ;;  %v1749_v43 = vshll.u32 %v1691_v19, 16  ;;  %v646_v51 = vadd.f32 %v10057_v15, %v10167_v5  ;;  %v670_v26 = vadd.f32 %v10187_v62, %v10057_v15 }
 0x1b0   : > { %v1256_v46 = vshrl.u32 %v7897_v36, 16  ;;  %v1259_v47 = vshll.u32 %v7897_v36, 16  ;;  %v1745_v63 = vrot.slane %v1743_v41, 5  ;;  %v1692_v2 = vld [vmem:[#allocation2 + $0x14] sm:$0x1]  ;;  %v10213_v58 = vpop.f32.mrb[26].mxu0 }
 0x1b1   : > { %v1277_v59 = vor.u32 %v1275_v22, %v1274_v39  ;;  %v1278_v60 = vrot.slane %v1274_v39, 4  ;;  %v1751_v0 = vrot.slane %v1749_v43, 5  ;;  %v1280_v3 = vshrl.u32 %v7900_v48, 16  ;;  %v10215_v9 = vpop.f32.mrb[27].mxu0  ;;  %v1546_v12 = vld [vmem:[#allocation2 + $0xa8] sm:$0xf] }
 0x1b2   : > { %v1258_v34 = vrot.slane %v1256_v46, 7  ;;  %v1283_v6 = vshll.u32 %v7900_v48, 16  ;;  %v722_v8 = vmax.f32 %v646_v51, 0.0  ;;  %v1549_v13 = vld [vmem:[#allocation2 + $0xac] sm:$0x1]  ;;  %v1746_v14 = vor.u32 %v1745_v63, %v1742_v40 }
 0x1b3   : > { %v1559_v11 = vsel %vm10103_vm9, %v1277_v59, %v1558_v30  ;;  %v1562_v5 = vsel %vm9902_vm3, %v1278_v60, %v1561_v35  ;;  %v1754_v16 = vshrl.u32 %v1644_v56, 16  ;;  %v1282_v18 = vrot.slane %v1280_v3, 7  ;;  %v1564_v19 = vld [vmem:[#allocation2 + $0xc0] sm:$0xf]  ;;  %v1567_v20 = vld [vmem:[#allocation2 + $0xc4] sm:$0x1] }
 0x1b4   : > { %1560 = vst [vmem:[#allocation2 + $0xb8] sm:$0xf] %v1559_v11  ;;  %1563 = vst [vmem:[#allocation2 + $0xbc] sm:$0x1] %v1562_v5  ;;  %v1261_v54 = vor.u32 %v1259_v47, %v1258_v34  ;;  %v1262_v17 = vrot.slane %v1258_v34, 4  ;;  %v7898_v61 = vpack.c.bf16 %v722_v8, %v722_v8  ;;  %v1747_v21 = vrot.slane %v1746_v14, 4 }
 0x1b5   : > { %v1756_v22 = vrot.slane %v1754_v16, 4  ;;  %v1757_v23 = vshll.u32 %v1644_v56, 16  ;;  %v1763_v28 = vshll.u32 %v1692_v2, 16  ;;  %v1285_v36 = vor.u32 %v1283_v6, %v1282_v18  ;;  %v1645_v39 = vld [vmem:[#allocation2 + $0x18] sm:$0xf]  ;;  %v10227_v48 = vpop.f32.mrb[28].mxu0 }
 0x1b6   : > { %v1547_v30 = vsel %vm10103_vm9, %v1261_v54, %v1546_v12  ;;  %v1550_v35 = vsel %vm9902_vm3, %v1262_v17, %v1549_v13  ;;  %v1286_v38 = vrot.slane %v1282_v18, 4  ;;  %v1752_v40 = vsel %vm10076_vm7, %v1747_v21, %v1751_v0  ;;  %v1693_v46 = vld [vmem:[#allocation2 + $0x1c] sm:$0x1]  ;;  %v1552_v60 = vld [vmem:[#allocation2 + $0xb0] sm:$0xf]  ;;  %v10238_v0 = vpop.f32.mrb[29].mxu0 }
 0x1b7   : > { %1548 = vst [vmem:[#allocation2 + $0xa8] sm:$0xf] %v1547_v30  ;;  %1551 = vst [vmem:[#allocation2 + $0xac] sm:$0x1] %v1550_v35  ;;  %v1264_v41 = vshrl.u32 %v7898_v61, 16  ;;  %v1267_v43 = vshll.u32 %v7898_v61, 16  ;;  %v1565_v51 = vsel %vm10103_vm9, %v1285_v36, %v1564_v19  ;;  %v7551_v59 = vcombine.low %v1738_v49, %v1752_v40 }
 0x1b8   : > { %v1759_v47 = vrot.slane %v1757_v23, 5  ;;  %v1568_v56 = vsel %vm9902_vm3, %v1286_v38, %v1567_v20  ;;  %v1765_v63 = vrot.slane %v1763_v28, 5  ;;  %1566 = vst [vmem:[#allocation2 + $0xc0] sm:$0xf] %v1565_v51  ;;  %v1555_v34 = vld [vmem:[#allocation2 + $0xb4] sm:$0x1]  ;;  %v667_v12 = vadd.f32 %v10178_v42, %v10057_v15 }
 0x1b9   : > { %1569 = vst [vmem:[#allocation2 + $0xc4] sm:$0x1] %v1568_v56  ;;  %v1266_v2 = vrot.slane %v1264_v41, 7  ;;  %v1768_v6 = vshrl.u32 %v1645_v39, 16  ;;  %v1771_v8 = vshll.u32 %v1645_v39, 16  ;;  %v10240_v11 = vpop.f32.mrb[30].mxu0  ;;  %8338 = vmatprep.mubr.bf16.mxu0 %v7551_v59 }
 0x1ba   : > { %v1760_v3 = vor.u32 %v1759_v47, %v1756_v22  ;;  %v1777_v5 = vshll.u32 %v1693_v46, 16  ;;  %v1646_v49 = vld [vmem:[#allocation2 + $0x20] sm:$0xf]  ;;  %v1694_v13 = vld [vmem:[#allocation2 + $0x24] sm:$0x1]  ;;  %v10248_v14 = vpop.f32.mrb[31].mxu0 }
 0x1bb   : > { %v1269_v16 = vor.u32 %v1267_v43, %v1266_v2  ;;  %v1270_v54 = vrot.slane %v1266_v2, 4  ;;  %v1770_v18 = vrot.slane %v1768_v6, 4  ;;  %v1773_v19 = vrot.slane %v1771_v8, 5  ;;  %v10250_v22 = vld [vmem:[#allocation2 + $0x28] sm:$0xf] }
 0x1bc   : > { %v1761_v17 = vrot.slane %v1760_v3, 4  ;;  %v1779_v61 = vrot.slane %v1777_v5, 5  ;;  %v727_v20 = vmax.f32 %v667_v12, 0.0  ;;  %v725_v21 = vmax.f32 %v659_v24, 0.0  ;;  %v1582_v56 = vld [vmem:[#allocation2 + $0xd8] sm:$0xf] }
 0x1bd   : > { %v1553_v42 = vsel %vm10103_vm9, %v1269_v16, %v1552_v60  ;;  %v1556_v50 = vsel %vm9902_vm3, %v1270_v54, %v1555_v34  ;;  %v728_v23 = vmax.f32 %v670_v26, 0.0  ;;  %v1774_v28 = vor.u32 %v1773_v19, %v1770_v18  ;;  %v1585_v59 = vld [vmem:[#allocation2 + $0xdc] sm:$0x1]  ;;  %v1573_v2 = vld [vmem:[#allocation2 + $0xcc] sm:$0x1] }
 0x1be   : > { %v1766_v62 = vsel %vm10076_vm7, %v1761_v17, %v1765_v63  ;;  %1554 = vst [vmem:[#allocation2 + $0xb0] sm:$0xf] %v1553_v42  ;;  %1557 = vst [vmem:[#allocation2 + $0xb4] sm:$0x1] %v1556_v50  ;;  %v7903_v30 = vpack.c.bf16 %v727_v20, %v727_v20  ;;  %v7901_v35 = vpack.c.bf16 %v725_v21, %v725_v21  ;;  %v1782_v36 = vshrl.u32 %v1646_v49, 16  ;;  %v9205_v18 = vld [vmem:[#allocation8 + $0x8] sm:$0xff]  }
 0x1bf   : > { %v7904_v38 = vpack.c.bf16 %v728_v23, %v728_v23  ;;  %v1785_v39 = vshll.u32 %v1646_v49, 16  ;;  %v1791_v40 = vshll.u32 %v1694_v13, 16  ;;  %v1796_v41 = vshrl.u32 %v10250_v22, 16  ;;  %v1570_v63 = vld [vmem:[#allocation2 + $0xc8] sm:$0xf] }
 0x1c0   : > { %v1775_v43 = vrot.slane %v1774_v28, 4  ;;  %v1304_v46 = vshrl.u32 %v7903_v30, 16  ;;  %v1307_v47 = vshll.u32 %v7903_v30, 16  ;;  %v1288_v51 = vshrl.u32 %v7901_v35, 16  ;;  %v1588_v24 = vld [vmem:[#allocation2 + $0xe0] sm:$0xf] }
 0x1c1   : > { %v1291_v60 = vshll.u32 %v7901_v35, 16  ;;  %v1312_v34 = vshrl.u32 %v7904_v38, 16  ;;  %v1315_v3 = vshll.u32 %v7904_v38, 16  ;;  %v1784_v6 = vrot.slane %v1782_v36, 4  ;;  %v1591_v16 = vld [vmem:[#allocation2 + $0xe4] sm:$0x1] }
 0x1c2   : > { %v1780_v8 = vsel %vm10076_vm7, %v1775_v43, %v1779_v61  ;;  %v1306_v5 = vrot.slane %v1304_v46, 7  ;;  %v1290_v12 = vrot.slane %v1288_v51, 7  ;;  %v1787_v26 = vrot.slane %v1785_v39, 5  ;;  %v1695_v50 = vld [vmem:[#allocation2 + $0x2c] sm:$0x1] }
 0x1c3   : > { %v7552_v49 = vcombine.low %v1766_v62, %v1780_v8  ;;  %v1314_v13 = vrot.slane %v1312_v34, 7  ;;  %v10261_v54 = vrot.slane %v1791_v40, 5  ;;  %v1798_v17 = vrot.slane %v1796_v41, 4  ;;  %v1648_v23 = vld [vmem:[#allocation2 + $0x30] sm:$0xf]  ;;  %v9199_v28 = vld [vmem:[#allocation8 + $0x108] sm:$0xff]  }
 0x1c4   : > { %v1309_v19 = vor.u32 %v1307_v47, %v1306_v5  ;;  %v1310_v20 = vrot.slane %v1306_v5, 4  ;;  %v1293_v21 = vor.u32 %v1291_v60, %v1290_v12  ;;  %v1294_v42 = vrot.slane %v1290_v12, 4  ;;  %v1649_v43 = vld [vmem:[#allocation2 + $0x38] sm:$0xf]  ;;  %v1696_v46 = vld [vmem:[#allocation2 + $0x34] sm:$0x1] }
 0x1c5   : > { %8339 = vmatmul.mubr.bf16.vlgmr.msra.gmra.mrb[32].mxu0 %v7552_v49  ;;  %v1317_v61 = vor.u32 %v1315_v3, %v1314_v13  ;;  %v1318_v30 = vrot.slane %v1314_v13, 4  ;;  %v1788_v35 = vor.u32 %v1787_v26, %v1784_v6  ;;  %v1799_v36 = vshll.u32 %v10250_v22, 16  ;;  %v9196_v62 = vld [vmem:[#allocation2 + $0xa8] ss:$8 sps:$4 sm:$0xff]   ;;  %v9198_v47 = vld [vmem:[#allocation2 + $0xb8] ss:$8 sps:$4 sm:$0xff]  }
 0x1c6   : > { %v1583_v38 = vsel %vm10103_vm9, %v1309_v19, %v1582_v56  ;;  %v1586_v39 = vsel %vm9902_vm3, %v1310_v20, %v1585_v59  ;;  %v1571_v40 = vsel %vm10103_vm9, %v1293_v21, %v1570_v63  ;;  %v1574_v41 = vsel %vm9902_vm3, %v1294_v42, %v1573_v2  ;;  %8371 = vmatpush3.bf16.msra.mxu0 %v10083_v45  ;;  %v9208_v60 = vld [vmem:[#allocation8 + $0x10] sm:$0xff]   ;;  %v1697_v8 = vld [vmem:[#allocation2 + $0x3c] sm:$0x1] }
 0x1c7   : > { %1584 = vst [vmem:[#allocation2 + $0xd8] sm:$0xf] %v1583_v38  ;;  %1587 = vst [vmem:[#allocation2 + $0xdc] sm:$0x1] %v1586_v39  ;;  %v1589_v22 = vsel %vm10103_vm9, %v1317_v61, %v1588_v24  ;;  %v1592_v51 = vsel %vm9902_vm3, %v1318_v30, %v1591_v16  ;;  %v1789_v56 = vrot.slane %v1788_v35, 4  ;;  %v1801_v59 = vrot.slane %v1799_v36, 5  ;;  %8498 = vmatprep.mubr.bf16.mxu1 %v9196_v62 }
 0x1c8   : > { %1572 = vst [vmem:[#allocation2 + $0xc8] sm:$0xf] %v1571_v40  ;;  %1575 = vst [vmem:[#allocation2 + $0xcc] sm:$0x1] %v1574_v41  ;;  %8372 = vmatprep.subr.bf16.mxu0 %v9205_v18  ;;  %v1805_v63 = vshll.u32 %v1695_v50, 16  ;;  %v662_v45 = vadd.f32 %v10057_v15, %v10190_v7  ;;  %v1810_v2 = vshrl.u32 %v1648_v23, 16  ;;  %8499 = vmatmul.mubr.bf16.vlgmr.msra.gmra.mrb[0].mxu1 %v9198_v47 }
 0x1c9   : > { %1590 = vst [vmem:[#allocation2 + $0xe0] sm:$0xf] %v1589_v22  ;;  %1593 = vst [vmem:[#allocation2 + $0xe4] sm:$0x1] %v1592_v51  ;;  %v1813_v34 = vshll.u32 %v1648_v23, 16  ;;  %v1794_v3 = vsel %vm10076_vm7, %v1789_v56, %v10261_v54  ;;  %v1802_v6 = vor.u32 %v1801_v59, %v1798_v17  ;;  %v1819_v5 = vshll.u32 %v1696_v46, 16  ;;  %8515 = vmatpush3.bf16.msra.mxu1 %v10051_v1 }
 0x1ca   : > { %v1824_v12 = vshrl.u32 %v1649_v43, 16  ;;  %v1807_v24 = vrot.slane %v1805_v63, 5  ;;  %v726_v26 = vmax.f32 %v662_v45, 0.0  ;;  %v1812_v49 = vrot.slane %v1810_v2, 4  ;;  %8516 = vmatprep.subr.bf16.mxu1 %v9199_v28  ;;  %v9201_v16 = vld [vmem:[#allocation8 + $0x110] sm:$0xff]   ;;  %8373 = vmatpush3.bf16.msra.mxu0 %v9205_v18  ;;  %v9211_v42 = vld [vmem:[#allocation8 + $0x18] sm:$0xff]  }
 0x1cb   : > { %v1815_v13 = vrot.slane %v1813_v34, 5  ;;  %v1803_v7 = vrot.slane %v1802_v6, 4  ;;  %v1821_v19 = vrot.slane %v1819_v5, 5  ;;  %v1827_v21 = vshll.u32 %v1649_v43, 16  ;;  %8374 = vmatprep.subr.bf16.mxu0 %v9208_v60  ;;  %v1651_v35 = vld [vmem:[#allocation2 + $0x58] sm:$0xf] }
 0x1cc   : > { %v1826_v20 = vrot.slane %v1824_v12, 4  ;;  %v7902_v54 = vpack.c.bf16 %v726_v26, %v726_v26  ;;  %v1833_v50 = vshll.u32 %v1697_v8, 16  ;;  %v683_v23 = vadd.f32 %v10207_v44, %v10057_v15  ;;  %v9204_v40 = vld [vmem:[#allocation8 + $0x118] sm:$0xff]   ;;  %v9214_v47 = vld [vmem:[#allocation8 + $0x20] sm:$0xff]   ;;  %v1576_v22 = vld [vmem:[#allocation2 + $0xd0] sm:$0xf] }
 0x1cd   : > { %v1816_v17 = vor.u32 %v1815_v13, %v1812_v49  ;;  %v1808_v1 = vsel %vm10076_vm7, %v1803_v7, %v1807_v24  ;;  %v1829_v61 = vrot.slane %v1827_v21, 5  ;;  %v675_v30 = vadd.f32 %v10057_v15, %v10211_v57  ;;  %8517 = vmatpush3.bf16.msra.mxu1 %v9199_v28  ;;  %v1579_v51 = vld [vmem:[#allocation2 + $0xd4] sm:$0x1]  ;;  %v9207_v8 = vld [vmem:[#allocation8 + $0x120] sm:$0xff]  }
 0x1ce   : > { %v686_v18 = vadd.f32 %v10213_v58, %v10057_v15  ;;  %v7553_v36 = vcombine.low %v1794_v3, %v1808_v1  ;;  %v1296_v62 = vshrl.u32 %v7902_v54, 16  ;;  %v1299_v38 = vshll.u32 %v7902_v54, 16  ;;  %8518 = vmatprep.subr.bf16.mxu1 %v9201_v16  ;;  %8375 = vmatpush3.bf16.msra.mxu0 %v9208_v60  ;;  %v1699_v3 = vld [vmem:[#allocation2 + $0x5c] sm:$0x1]  ;;  %v10295_v49 = vld [vmem:[#allocation2 + $0x60] sm:$0xf] }
 0x1cf   : > { %v1817_v39 = vrot.slane %v1816_v17, 4  ;;  %v1830_v44 = vor.u32 %v1829_v61, %v1826_v20  ;;  %v1835_v41 = vrot.slane %v1833_v50, 5  ;;  %v731_v43 = vmax.f32 %v683_v23, 0.0  ;;  %8376 = vmatprep.subr.bf16.mxu0 %v9211_v42  ;;  %v1609_v20 = vld [vmem:[#allocation2 + $0x10c] sm:$0x1] }
 0x1d0   : > { %v729_v46 = vmax.f32 %v675_v30, 0.0  ;;  %8342 = vmatprep.mubr.bf16.mxu0 %v7553_v36  ;;  %v1298_v57 = vrot.slane %v1296_v62, 7  ;;  %v732_v58 = vmax.f32 %v686_v18, 0.0  ;;  %v1852_v28 = vshrl.u32 %v1651_v35, 16  ;;  %v1594_v50 = vld [vmem:[#allocation2 + $0xf8] sm:$0xf] }
 0x1d1   : > { %v1822_v15 = vsel %vm10076_vm7, %v1817_v39, %v1821_v19  ;;  %v1831_v56 = vrot.slane %v1830_v44, 4  ;;  %v7907_v59 = vpack.c.bf16 %v731_v43, %v731_v43  ;;  %v1855_v45 = vshll.u32 %v1651_v35, 16  ;;  %8519 = vmatpush3.bf16.msra.mxu1 %v9201_v16  ;;  %v1606_v19 = vld [vmem:[#allocation2 + $0x108] sm:$0xf]  ;;  %v1597_v61 = vld [vmem:[#allocation2 + $0xfc] sm:$0x1] }
 0x1d2   : > { %v7905_v63 = vpack.c.bf16 %v729_v46, %v729_v46  ;;  %v1301_v60 = vor.u32 %v1299_v38, %v1298_v57  ;;  %v1302_v2 = vrot.slane %v1298_v57, 4  ;;  %v7908_v34 = vpack.c.bf16 %v732_v58, %v732_v58  ;;  %8520 = vmatprep.subr.bf16.mxu1 %v9204_v40  ;;  %8377 = vmatpush3.bf16.msra.mxu0 %v9211_v42  ;;  %v9217_v42 = vld [vmem:[#allocation8 + $0x28] sm:$0xff]   ;;  %v10304_v35 = vld [vmem:[%s11564_s2] ss:$0 sm:$0xff] }
 0x1d3   : > { %v1854_v6 = vrot.slane %v1852_v28, 4  ;;  %v1836_v5 = vsel %vm10076_vm7, %v1831_v56, %v1835_v41  ;;  %v1336_v12 = vshrl.u32 %v7907_v59, 16  ;;  %v1339_v24 = vshll.u32 %v7907_v59, 16  ;;  %8378 = vmatprep.subr.bf16.mxu0 %v9214_v47  ;;  %v9210_v38 = vld [vmem:[#allocation8 + $0x128] sm:$0xff]   ;;  %v1700_v28 = vld [vmem:[#allocation2 + $0x64] sm:$0x1] }
 0x1d4   : > { %v1320_v26 = vshrl.u32 %v7905_v63, 16  ;;  %v1577_v13 = vsel %vm10103_vm9, %v1301_v60, %v1576_v22  ;;  %v1580_v16 = vsel %vm9902_vm3, %v1302_v2, %v1579_v51  ;;  %v7554_v7 = vcombine.low %v1822_v15, %v1836_v5  ;;  %v10309_v43 = vld [vmem:[#allocation2 + $0x68] sm:$0xf]  ;;  %v9219_v22 = vld [vmem:[#allocation8 + $0x30] sm:$0xff]  }
 0x1d5   : > { %v1323_v21 = vshll.u32 %v7905_v63, 16  ;;  %1578 = vst [vmem:[#allocation2 + $0xd0] sm:$0xf] %v1577_v13  ;;  %1581 = vst [vmem:[#allocation2 + $0xd4] sm:$0x1] %v1580_v16  ;;  %v1338_v54 = vrot.slane %v1336_v12, 7  ;;  %8521 = vmatpush3.bf16.msra.mxu1 %v9204_v40  ;;  %v678_v36 = vadd.f32 %v10304_v35, %v10215_v9  ;;  %v699_v31 = vadd.f32 %v10304_v35, %v10227_v48 }
 0x1d6   : > { %v1322_v17 = vrot.slane %v1320_v26, 7  ;;  %v1344_v23 = vshrl.u32 %v7908_v34, 16  ;;  %v1347_v1 = vshll.u32 %v7908_v34, 16  ;;  %8343 = vmatmul.mubr.bf16.gmra.mrb[36].mxu0 %v7554_v7  ;;  %v1857_v30 = vrot.slane %v1855_v45, 5  ;;  %8522 = vmatprep.subr.bf16.mxu1 %v9207_v8  ;;  %v1615_v63 = vld [vmem:[#allocation2 + $0x114] sm:$0x1] }
 0x1d7   : > { %v1861_v18 = vshll.u32 %v1699_v3, 16  ;;  %v1866_v62 = vshrl.u32 %v10295_v49, 16  ;;  %v1341_v39 = vor.u32 %v1339_v24, %v1338_v54  ;;  %v1342_v44 = vrot.slane %v1338_v54, 4  ;;  %8379 = vmatpush3.bf16.msra.mxu0 %v9214_v47  ;;  %v1612_v47 = vld [vmem:[#allocation2 + $0x110] sm:$0xf] }
 0x1d8   : > { %v1325_v41 = vor.u32 %v1323_v21, %v1322_v17  ;;  %v1326_v40 = vrot.slane %v1322_v17, 4  ;;  %v1346_v46 = vrot.slane %v1344_v23, 7  ;;  %v1858_v57 = vor.u32 %v1857_v30, %v1854_v6  ;;  %8380 = vmatprep.subr.bf16.mxu0 %v9217_v42  ;;  %v1701_v3 = vld [vmem:[#allocation2 + $0x6c] sm:$0x1]  ;;  %v9213_v6 = vld [vmem:[#allocation8 + $0x130] sm:$0xff]   ;;  %v9221_v23 = vld [vmem:[#allocation8 + $0x38] sm:$0xff]  }
 0x1d9   : > { %v1863_v15 = vrot.slane %v1861_v18, 5  ;;  %v730_v58 = vmax.f32 %v678_v36, 0.0  ;;  %v1607_v9 = vsel %vm10103_vm9, %v1341_v39, %v1606_v19  ;;  %v1610_v51 = vsel %vm9902_vm3, %v1342_v44, %v1609_v20  ;;  %8523 = vmatpush3.bf16.msra.mxu1 %v9207_v8  ;;  %v1600_v21 = vld [vmem:[#allocation2 + $0x100] sm:$0xf]  ;;  %v1702_v39 = vld [vmem:[#allocation2 + $0x74] sm:$0x1] }
 0x1da   : > { %v1595_v56 = vsel %vm10103_vm9, %v1325_v41, %v1594_v50  ;;  %v1598_v59 = vsel %vm9902_vm3, %v1326_v40, %v1597_v61  ;;  %1608 = vst [vmem:[#allocation2 + $0x108] sm:$0xf] %v1607_v9  ;;  %1611 = vst [vmem:[#allocation2 + $0x10c] sm:$0x1] %v1610_v51  ;;  %v1349_v45 = vor.u32 %v1347_v1, %v1346_v46  ;;  %v1350_v60 = vrot.slane %v1346_v46, 4  ;;  %v9216_v50 = vld [vmem:[#allocation8 + $0x138] sm:$0xff]  }
 0x1db   : > { %1596 = vst [vmem:[#allocation2 + $0xf8] sm:$0xf] %v1595_v56  ;;  %1599 = vst [vmem:[#allocation2 + $0xfc] sm:$0x1] %v1598_v59  ;;  %v1859_v2 = vrot.slane %v1858_v57, 4  ;;  %v7906_v34 = vpack.c.bf16 %v730_v58, %v730_v58  ;;  %8524 = vmatprep.subr.bf16.mxu1 %v9210_v38  ;;  %v1868_v5 = vrot.slane %v1866_v62, 4  ;;  %8381 = vmatpush3.bf16.msra.mxu0 %v9217_v42 }
 0x1dc   : > { %v1869_v12 = vshll.u32 %v10295_v49, 16  ;;  %v1875_v24 = vshll.u32 %v1700_v28, 16  ;;  %v1880_v26 = vshrl.u32 %v10309_v43, 16  ;;  %v1613_v8 = vsel %vm10103_vm9, %v1349_v45, %v1612_v47  ;;  %v9200_v19 = vld [vmem:[#allocation2 + $0xc8] ss:$8 sps:$4 sm:$0xff]   ;;  %8382 = vmatprep.subr.bf16.mxu0 %v9219_v22  ;;  %v10341_v46 = vld [vmem:[#allocation8 + $0x80] sm:$0xff]  }
 0x1dd   : > { %v1616_v13 = vsel %vm9902_vm3, %v1350_v60, %v1615_v63  ;;  %v1864_v16 = vsel %vm10076_vm7, %v1859_v2, %v1863_v15  ;;  %v1328_v7 = vshrl.u32 %v7906_v34, 16  ;;  %1614 = vst [vmem:[#allocation2 + $0x110] sm:$0xf] %v1613_v8  ;;  %v1331_v20 = vshll.u32 %v7906_v34, 16  ;;  %v1603_v42 = vld [vmem:[#allocation2 + $0x104] sm:$0x1]  ;;  %8525 = vmatpush3.bf16.msra.mxu1 %v9210_v38  ;;  %8502 = vmatprep.mubr.bf16.mxu1 %v9200_v19 }
 0x1de   : > { %1617 = vst [vmem:[#allocation2 + $0x114] sm:$0x1] %v1616_v13  ;;  %v7555_v49 = vcombine.low %v1850_v52, %v1864_v16  ;;  %v1871_v54 = vrot.slane %v1869_v12, 5  ;;  %v10332_v17 = vrot.slane %v1875_v24, 5  ;;  %v1882_v61 = vrot.slane %v1880_v26, 4  ;;  %8526 = vmatprep.subr.bf16.mxu1 %v9213_v6  ;;  %v10347_v51 = vld [vmem:[#allocation8 + $0x140] sm:$0xff]  }
 0x1df   : > { %v1330_v1 = vrot.slane %v1328_v7, 7  ;;  %v1883_v30 = vshll.u32 %v10309_v43, 16  ;;  %v1889_v18 = vshll.u32 %v1701_v3, 16  ;;  %v9203_v36 = vld [vmem:[#allocation2 + $0xd8] ss:$8 sps:$4 sm:$0xff]   ;;  %v691_v52 = vadd.f32 %v10304_v35, %v10238_v0  ;;  %8383 = vmatpush3.bf16.msra.mxu0 %v9219_v22 }
 0x1e0   : > { %8346 = vmatprep.mubr.bf16.mxu0 %v7555_v49  ;;  %v1872_v27 = vor.u32 %v1871_v54, %v1868_v5  ;;  %v702_v62 = vadd.f32 %v10304_v35, %v10240_v11  ;;  %v1654_v38 = vld [vmem:[#allocation2 + $0x70] sm:$0xf]  ;;  %8503 = vmatmul.mubr.bf16.gmra.mrb[4].mxu1 %v9203_v36  ;;  %v735_v15 = vmax.f32 %v699_v31, 0.0  ;;  %v1903_v2 = vshll.u32 %v1702_v39, 16  ;;  %v1655_v12 = vld [vmem:[#allocation2 + $0x78] sm:$0xf] }
 0x1e1   : > { %v1333_v44 = vor.u32 %v1331_v20, %v1330_v1  ;;  %v1334_v41 = vrot.slane %v1330_v1, 4  ;;  %v1885_v40 = vrot.slane %v1883_v30, 5  ;;  %v1891_v43 = vrot.slane %v1889_v18, 5  ;;  %8527 = vmatpush3.bf16.msra.mxu1 %v9213_v6  ;;  %8384 = vmatprep.subr.bf16.mxu0 %v9221_v23  ;;  %v1630_v26 = vld [vmem:[#allocation2 + $0x128] sm:$0xf] }
 0x1e2   : > { %v1873_v57 = vrot.slane %v1872_v27, 4  ;;  %v733_v58 = vmax.f32 %v691_v52, 0.0  ;;  %v736_v48 = vmax.f32 %v702_v62, 0.0  ;;  %v1894_v9 = vshrl.u32 %v1654_v38, 16  ;;  %8528 = vmatprep.subr.bf16.mxu1 %v9216_v50  ;;  %v1633_v8 = vld [vmem:[#allocation2 + $0x12c] sm:$0x1] }
 0x1e3   : > { %v1601_v0 = vsel %vm10103_vm9, %v1333_v44, %v1600_v21  ;;  %v1604_v11 = vsel %vm9902_vm3, %v1334_v41, %v1603_v42  ;;  %v1886_v28 = vor.u32 %v1885_v40, %v1882_v61  ;;  %v7911_v56 = vpack.c.bf16 %v735_v15, %v735_v15  ;;  %8385 = vmatpush3.bf16.msra.mxu0 %v9221_v23  ;;  %v1618_v13 = vld [vmem:[#allocation2 + $0x118] sm:$0xf]  ;;  %v1621_v16 = vld [vmem:[#allocation2 + $0x11c] sm:$0x1]  ;;  %v1636_v54 = vld [vmem:[#allocation2 + $0x130] sm:$0xf] }
 0x1e4   : > { %1602 = vst [vmem:[#allocation2 + $0x100] sm:$0xf] %v1601_v0  ;;  %1605 = vst [vmem:[#allocation2 + $0x104] sm:$0x1] %v1604_v11  ;;  %v1878_v22 = vsel %vm10076_vm7, %v1873_v57, %v10332_v17  ;;  %v7909_v59 = vpack.c.bf16 %v733_v58, %v733_v58  ;;  %v7912_v47 = vpack.c.bf16 %v736_v48, %v736_v48  ;;  %v1896_v45 = vrot.slane %v1894_v9, 4 }
 0x1e5   : > { %v1887_v63 = vrot.slane %v1886_v28, 4  ;;  %v1897_v60 = vshll.u32 %v1654_v38, 16  ;;  %v1368_v34 = vshrl.u32 %v7911_v56, 16  ;;  %v1371_v3 = vshll.u32 %v7911_v56, 16  ;;  %8529 = vmatpush3.bf16.msra.mxu1 %v9216_v50  ;;  %8418 = vmatprep.subr.bf16.mxu0 %v10341_v46  ;;  %v1639_v23 = vld [vmem:[#allocation2 + $0x134] sm:$0x1] }
 0x1e6   : > { %v1352_v6 = vshrl.u32 %v7909_v59, 16  ;;  %v1355_v5 = vshll.u32 %v7909_v59, 16  ;;  %v1376_v7 = vshrl.u32 %v7912_v47, 16  ;;  %v1379_v19 = vshll.u32 %v7912_v47, 16  ;;  %8562 = vmatprep.subr.bf16.mxu1 %v10347_v51  ;;  %v1703_v52 = vld [vmem:[#allocation2 + $0x7c] sm:$0x1] }
 0x1e7   : > { %v1892_v24 = vsel %vm10076_vm7, %v1887_v63, %v1891_v43  ;;  %v1899_v49 = vrot.slane %v1897_v60, 5  ;;  %v1370_v21 = vrot.slane %v1368_v34, 7  ;;  %v10356_v17 = vrot.slane %v1903_v2, 5  ;;  %v1656_v62 = vld [vmem:[#allocation2 + $0x80] sm:$0xf] }
 0x1e8   : > { %v7556_v20 = vcombine.low %v1878_v22, %v1892_v24  ;;  %v1354_v42 = vrot.slane %v1352_v6, 7  ;;  %v1378_v50 = vrot.slane %v1376_v7, 7  ;;  %v1908_v61 = vshrl.u32 %v1655_v12, 16  ;;  %v1657_v58 = vld [vmem:[#allocation2 + $0x88] sm:$0xf] }
 0x1e9   : > { %v1900_v1 = vor.u32 %v1899_v49, %v1896_v45  ;;  %v1911_v30 = vshll.u32 %v1655_v12, 16  ;;  %v1373_v18 = vor.u32 %v1371_v3, %v1370_v21  ;;  %v1374_v36 = vrot.slane %v1370_v21, 4  ;;  %v1704_v48 = vld [vmem:[#allocation2 + $0x84] sm:$0x1]  ;;  %v9209_v56 = vld [vmem:[#allocation2 + $0x108] ss:$8 sps:$4 sm:$0xff]  }
 0x1ea   : > { %8347 = vmatmul.mubr.bf16.gmra.mrb[40].mxu0 %v7556_v20  ;;  %v1357_v27 = vor.u32 %v1355_v5, %v1354_v42  ;;  %v1358_v31 = vrot.slane %v1354_v42, 4  ;;  %v1381_v38 = vor.u32 %v1379_v19, %v1378_v50  ;;  %v1382_v39 = vrot.slane %v1378_v50, 4  ;;  %v1705_v63 = vld [vmem:[#allocation2 + $0x8c] sm:$0x1]  ;;  %v1659_v5 = vld [vmem:[#allocation2 + $0xa8] sm:$0xf] }
 0x1eb   : > { %v1901_v44 = vrot.slane %v1900_v1, 4  ;;  %v1910_v41 = vrot.slane %v1908_v61, 4  ;;  %v1631_v40 = vsel %vm10103_vm9, %v1373_v18, %v1630_v26  ;;  %v1634_v43 = vsel %vm9902_vm3, %v1374_v36, %v1633_v8  ;;  %v9206_v0 = vld [vmem:[#allocation2 + $0xf8] ss:$8 sps:$4 sm:$0xff]   ;;  %v1708_v1 = vld [vmem:[#allocation2 + $0xb4] sm:$0x1] }
 0x1ec   : > { %v1619_v57 = vsel %vm10103_vm9, %v1357_v27, %v1618_v13  ;;  %v1622_v15 = vsel %vm9902_vm3, %v1358_v31, %v1621_v16  ;;  %1632 = vst [vmem:[#allocation2 + $0x128] sm:$0xf] %v1631_v40  ;;  %1635 = vst [vmem:[#allocation2 + $0x12c] sm:$0x1] %v1634_v43  ;;  %v1637_v11 = vsel %vm10103_vm9, %v1381_v38, %v1636_v54  ;;  %v1913_v22 = vrot.slane %v1911_v30, 5 }
 0x1ed   : > { %1620 = vst [vmem:[#allocation2 + $0x118] sm:$0xf] %v1619_v57  ;;  %1623 = vst [vmem:[#allocation2 + $0x11c] sm:$0x1] %v1622_v15  ;;  %v1640_v28 = vsel %vm9902_vm3, %v1382_v39, %v1639_v23  ;;  %v1906_v9 = vsel %vm10076_vm7, %v1901_v44, %v10356_v17  ;;  %v1917_v59 = vshll.u32 %v1703_v52, 16  ;;  %v694_v47 = vadd.f32 %v10304_v35, %v10248_v14 }
 0x1ee   : > { %1638 = vst [vmem:[#allocation2 + $0x130] sm:$0xf] %v1637_v11  ;;  %1641 = vst [vmem:[#allocation2 + $0x134] sm:$0x1] %v1640_v28  ;;  %v1922_v45 = vshrl.u32 %v1656_v62, 16  ;;  %v1925_v60 = vshll.u32 %v1656_v62, 16  ;;  %8506 = vmatprep.mubr.bf16.mxu1 %v9206_v0  ;;  %v1914_v2 = vor.u32 %v1913_v22, %v1910_v41 }
 0x1ef   : > { %v1931_v34 = vshll.u32 %v1704_v48, 16  ;;  %v1936_v3 = vshrl.u32 %v1657_v58, 16  ;;  %v1939_v6 = vshll.u32 %v1657_v58, 16  ;;  %8507 = vmatmul.mubr.bf16.gmra.mrb[8].mxu1 %v9209_v56  ;;  %v1919_v12 = vrot.slane %v1917_v59, 5  ;;  %v1707_v13 = vld [vmem:[#allocation2 + $0xac] sm:$0x1] }
 0x1f0   : > { %v734_v24 = vmax.f32 %v694_v47, 0.0  ;;  %v1924_v26 = vrot.slane %v1922_v45, 4  ;;  %v1927_v8 = vrot.slane %v1925_v60, 5  ;;  %v1915_v16 = vrot.slane %v1914_v2, 4  ;;  %v1660_v23 = vld [vmem:[#allocation2 + $0xb0] sm:$0xf] }
 0x1f1   : > { %v1933_v7 = vrot.slane %v1931_v34, 5  ;;  %v1938_v19 = vrot.slane %v1936_v3, 4  ;;  %v1941_v49 = vrot.slane %v1939_v6, 5  ;;  %v1945_v20 = vshll.u32 %v1705_v63, 16  ;;  %v1661_v27 = vld [vmem:[#allocation2 + $0xb8] sm:$0xf] }
 0x1f2   : > { %v7910_v14 = vpack.c.bf16 %v734_v24, %v734_v24  ;;  %v1928_v35 = vor.u32 %v1927_v8, %v1924_v26  ;;  %v1964_v21 = vshrl.u32 %v1659_v5, 16  ;;  %v1920_v42 = vsel %vm10076_vm7, %v1915_v16, %v1919_v12  ;;  %v1624_v31 = vld [vmem:[#allocation2 + $0x120] sm:$0xf]  ;;  %v1627_v57 = vld [vmem:[#allocation2 + $0x124] sm:$0x1] }
 0x1f3   : > { %v1942_v54 = vor.u32 %v1941_v49, %v1938_v19  ;;  %v1967_v17 = vshll.u32 %v1659_v5, 16  ;;  %v1973_v50 = vshll.u32 %v1707_v13, 16  ;;  %v7557_v61 = vcombine.low %v1906_v9, %v1920_v42  ;;  %v1709_v48 = vld [vmem:[#allocation2 + $0xbc] sm:$0x1]  ;;  %v1662_v59 = vld [vmem:[#allocation2 + $0xc0] sm:$0xf] }
 0x1f4   : > { %v1360_v30 = vshrl.u32 %v7910_v14, 16  ;;  %v1363_v18 = vshll.u32 %v7910_v14, 16  ;;  %v1929_v36 = vrot.slane %v1928_v35, 4  ;;  %v1947_v62 = vrot.slane %v1945_v20, 5  ;;  %v1663_v5 = vld [vmem:[#allocation2 + $0xc8] sm:$0xf] }
 0x1f5   : > { %v1943_v52 = vrot.slane %v1942_v54, 4  ;;  %v1966_v38 = vrot.slane %v1964_v21, 4  ;;  %v1969_v39 = vrot.slane %v1967_v17, 5  ;;  %8350 = vmatprep.mubr.bf16.mxu0 %v7557_v61  ;;  %v1975_v40 = vrot.slane %v1973_v50, 5  ;;  %v1710_v12 = vld [vmem:[#allocation2 + $0xc4] sm:$0x1] }
 0x1f6   : > { %v1362_v44 = vrot.slane %v1360_v30, 7  ;;  %v1934_v41 = vsel %vm10076_vm7, %v1929_v36, %v1933_v7  ;;  %v1978_v43 = vshrl.u32 %v1660_v23, 16  ;;  %v1981_v0 = vshll.u32 %v1660_v23, 16  ;;  %v1711_v13 = vld [vmem:[#allocation2 + $0xcc] sm:$0x1] }
 0x1f7   : > { %v1948_v15 = vsel %vm10076_vm7, %v1943_v52, %v1947_v62  ;;  %v1970_v58 = vor.u32 %v1969_v39, %v1966_v38  ;;  %v1987_v11 = vshll.u32 %v1708_v1, 16  ;;  %v1992_v60 = vshrl.u32 %v1661_v27, 16  ;;  %v1664_v14 = vld [vmem:[#allocation2 + $0xd0] sm:$0xf]  ;;  %v1665_v54 = vld [vmem:[#allocation2 + $0xd8] sm:$0xf] }
 0x1f8   : > { %v1365_v28 = vor.u32 %v1363_v18, %v1362_v44  ;;  %v1366_v9 = vrot.slane %v1362_v44, 4  ;;  %v7558_v22 = vcombine.low %v1934_v41, %v1948_v15  ;;  %v1980_v56 = vrot.slane %v1978_v43, 4  ;;  %v1712_v61 = vld [vmem:[#allocation2 + $0xd4] sm:$0x1]  ;;  %v1713_v52 = vld [vmem:[#allocation2 + $0xdc] sm:$0x1] }
 0x1f9   : > { %v1971_v47 = vrot.slane %v1970_v58, 4  ;;  %v1983_v63 = vrot.slane %v1981_v0, 5  ;;  %v1989_v45 = vrot.slane %v1987_v11, 5  ;;  %v1995_v3 = vshll.u32 %v1661_v27, 16  ;;  %v1667_v41 = vld [vmem:[#allocation2 + $0xf8] sm:$0xf] }
 0x1fa   : > { %v1625_v2 = vsel %vm10103_vm9, %v1365_v28, %v1624_v31  ;;  %v1628_v34 = vsel %vm9902_vm3, %v1366_v9, %v1627_v57  ;;  %8351 = vmatmul.mubr.bf16.gmra.mrb[44].mxu0 %v7558_v22  ;;  %v2001_v6 = vshll.u32 %v1709_v48, 16  ;;  %v1994_v8 = vrot.slane %v1992_v60, 4  ;;  %v9215_v9 = vld [vmem:[#allocation2 + $0x128] ss:$8 sps:$4 sm:$0xff]   ;;  %v1715_v60 = vld [vmem:[#allocation2 + $0xfc] sm:$0x1] }
 0x1fb   : > { %1626 = vst [vmem:[#allocation2 + $0x120] sm:$0xf] %v1625_v2  ;;  %1629 = vst [vmem:[#allocation2 + $0x124] sm:$0x1] %v1628_v34  ;;  %v1976_v24 = vsel %vm10076_vm7, %v1971_v47, %v1975_v40  ;;  %v1984_v26 = vor.u32 %v1983_v63, %v1980_v56  ;;  %v2006_v16 = vshrl.u32 %v1662_v59, 16  ;;  %v1997_v7 = vrot.slane %v1995_v3, 5 }
 0x1fc   : > { %v7559_v4 = vcombine.low %v1962_v53, %v1976_v24  ;;  %v2003_v19 = vrot.slane %v2001_v6, 5  ;;  %v2009_v49 = vshll.u32 %v1662_v59, 16  ;;  %v2015_v21 = vshll.u32 %v1710_v12, 16  ;;  %v1714_v63 = vld [vmem:[#allocation2 + $0xf4] sm:$0x1] }
 0x1fd   : > { %v1985_v35 = vrot.slane %v1984_v26, 4  ;;  %v2008_v20 = vrot.slane %v2006_v16, 4  ;;  %v2020_v42 = vshrl.u32 %v1663_v5, 16  ;;  %v1998_v17 = vor.u32 %v1997_v7, %v1994_v8  ;;  %v9325_v34 = vld [vmem:[#allocation2 + $0xf0] sm:$0xf] }
 0x1fe   : > { %8354 = vmatprep.mubr.bf16.mxu0 %v7559_v4  ;;  %v2011_v50 = vrot.slane %v2009_v49, 5  ;;  %v2023_v23 = vshll.u32 %v1663_v5, 16  ;;  %v2029_v1 = vshll.u32 %v1711_v13, 16  ;;  %v2017_v32 = vrot.slane %v2015_v21, 5  ;;  %v1668_v8 = vld [vmem:[#allocation2 + $0x100] sm:$0xf] }
 0x1ff   : > { %v1990_v30 = vsel %vm10076_vm7, %v1985_v35, %v1989_v45  ;;  %v2022_v33 = vrot.slane %v2020_v42, 4  ;;  %v2034_v53 = vshrl.u32 %v1664_v14, 16  ;;  %v1999_v18 = vrot.slane %v1998_v17, 4  ;;  %v1669_v21 = vld [vmem:[#allocation2 + $0x108] sm:$0xf] }
 0x200   : > { %v2012_v36 = vor.u32 %v2011_v50, %v2008_v20  ;;  %v2025_v27 = vrot.slane %v2023_v23, 5  ;;  %v2031_v31 = vrot.slane %v2029_v1, 5  ;;  %v2037_v38 = vshll.u32 %v1664_v14, 16  ;;  %v1717_v23 = vld [vmem:[#allocation2 + $0x10c] sm:$0x1] }
 0x201   : > { %v2036_v62 = vrot.slane %v2034_v53, 4  ;;  %v2043_v39 = vshll.u32 %v1712_v61, 16  ;;  %v2048_v44 = vshrl.u32 %v1665_v54, 16  ;;  %v2004_v40 = vsel %vm10076_vm7, %v1999_v18, %v2003_v19  ;;  %v1716_v19 = vld [vmem:[#allocation2 + $0x104] sm:$0x1] }
 0x202   : > { %v2013_v43 = vrot.slane %v2012_v36, 4  ;;  %v2026_v57 = vor.u32 %v2025_v27, %v2022_v33  ;;  %v2051_v15 = vshll.u32 %v1665_v54, 16  ;;  %v9212_v58 = vld [vmem:[#allocation2 + $0x118] ss:$8 sps:$4 sm:$0xff]   ;;  %v7560_v48 = vcombine.low %v1990_v30, %v2004_v40  ;;  %v3703_v61 = vld [vmem:[#allocation2 + $0x8] sm:$0xf] }
 0x203   : > { %v2039_v0 = vrot.slane %v2037_v38, 5  ;;  %v2045_v11 = vrot.slane %v2043_v39, 5  ;;  %v2050_v28 = vrot.slane %v2048_v44, 4  ;;  %v2057_v47 = vshll.u32 %v1713_v52, 16  ;;  %8510 = vmatprep.mubr.bf16.mxu1 %v9212_v58  ;;  %v3705_v39 = vld [vmem:[#allocation2 + $0x10] sm:$0xf] }
 0x204   : > { %v2018_v22 = vsel %vm10076_vm7, %v2013_v43, %v2017_v32  ;;  %v2027_v56 = vrot.slane %v2026_v57, 4  ;;  %v2053_v59 = vrot.slane %v2051_v15, 5  ;;  %8355 = vmatmul.mubr.bf16.gmra.mrb[48].mxu0 %v7560_v48  ;;  %v2064_v2 = vrot.slane %v2062_v10, 4  ;;  %8511 = vmatmul.mubr.bf16.gmra.mrb[12].mxu1 %v9215_v9  ;;  %v3704_v57 = vld [vmem:[#allocation2 + $0xc] sm:$0x1] }
 0x205   : > { %v2040_v45 = vor.u32 %v2039_v0, %v2036_v62  ;;  %v2065_v3 = vshll.u32 %v9325_v34, 16  ;;  %v2071_v6 = vshll.u32 %v1714_v63, 16  ;;  %v2059_v24 = vrot.slane %v2057_v47, 5  ;;  %v1670_v47 = vld [vmem:[#allocation2 + $0x110] sm:$0xf] }
 0x206   : > { %v2032_v5 = vsel %vm10076_vm7, %v2027_v56, %v2031_v31  ;;  %v2054_v12 = vor.u32 %v2053_v59, %v2050_v28  ;;  %v2076_v26 = vshrl.u32 %v1667_v41, 16  ;;  %v2079_v55 = vshll.u32 %v1667_v41, 16  ;;  %v1671_v34 = vld [vmem:[#allocation2 + $0x118] sm:$0xf] }
 0x207   : > { %v7561_v13 = vcombine.low %v2018_v22, %v2032_v5  ;;  %v2041_v16 = vrot.slane %v2040_v45, 4  ;;  %v2067_v4 = vrot.slane %v2065_v3, 5  ;;  %v2073_v7 = vrot.slane %v2071_v6, 5  ;;  %v1718_v3 = vld [vmem:[#allocation2 + $0x114] sm:$0x1] }
 0x208   : > { %v2055_v49 = vrot.slane %v2054_v12, 4  ;;  %v2078_v14 = vrot.slane %v2076_v26, 4  ;;  %v2085_v10 = vshll.u32 %v1715_v60, 16  ;;  %v2090_v42 = vshrl.u32 %v1668_v8, 16 }
 0x209   : > { %8358 = vmatprep.mubr.bf16.mxu0 %v7561_v13  ;;  %v2046_v35 = vsel %vm10076_vm7, %v2041_v16, %v2045_v11  ;;  %v2068_v20 = vor.u32 %v2067_v4, %v2064_v2  ;;  %v2093_v54 = vshll.u32 %v1668_v8, 16  ;;  %v2081_v50 = vrot.slane %v2079_v55, 5  ;;  %v3706_v11 = vld [vmem:[#allocation2 + $0x14] sm:$0x1]  ;;  %v1719_v8 = vld [vmem:[#allocation2 + $0x11c] sm:$0x1] }
 0x20a   : > { %v2060_v17 = vsel %vm10076_vm7, %v2055_v49, %v2059_v24  ;;  %v2099_v1 = vshll.u32 %v1716_v19, 16  ;;  %v2092_v33 = vrot.slane %v2090_v42, 4  ;;  %v2087_v36 = vrot.slane %v2085_v10, 5 }
 0x20b   : > { %v7562_v30 = vcombine.low %v2046_v35, %v2060_v17  ;;  %v2069_v32 = vrot.slane %v2068_v20, 4  ;;  %v2095_v53 = vrot.slane %v2093_v54, 5  ;;  %v2082_v18 = vor.u32 %v2081_v50, %v2078_v14  ;;  %v1672_v14 = vld [vmem:[#allocation2 + $0x120] sm:$0xf] }
 0x20c   : > { %v2104_v27 = vshrl.u32 %v1669_v21, 16  ;;  %v2107_v31 = vshll.u32 %v1669_v21, 16  ;;  %v2113_v38 = vshll.u32 %v1717_v23, 16  ;;  %v3768_v44 = vshrl.u32 %v3703_v61, 16  ;;  %v1673_v21 = vld [vmem:[#allocation2 + $0x128] sm:$0xf] }
 0x20d   : > { %8359 = vmatmul.mubr.bf16.gmra.mrb[52].mxu0 %v7562_v30  ;;  %v2074_v52 = vsel %vm10076_vm7, %v2069_v32, %v2073_v7  ;;  %v2096_v62 = vor.u32 %v2095_v53, %v2092_v33  ;;  %v2083_v41 = vrot.slane %v2082_v18, 4  ;;  %v3771_v15 = vshll.u32 %v3703_v61, 16  ;;  %v1720_v30 = vld [vmem:[#allocation2 + $0x124] sm:$0x1]  ;;  %v1721_v18 = vld [vmem:[#allocation2 + $0x12c] sm:$0x1] }
 0x20e   : > { %v2106_v40 = vrot.slane %v2104_v27, 4  ;;  %v2109_v43 = vrot.slane %v2107_v31, 5  ;;  %v2101_v48 = vrot.slane %v2099_v1, 5  ;;  %v2115_v0 = vrot.slane %v2113_v38, 5 }
 0x20f   : > { %v2097_v58 = vrot.slane %v2096_v62, 4  ;;  %v3770_v28 = vrot.slane %v3768_v44, 4  ;;  %v2088_v9 = vsel %vm10076_vm7, %v2083_v41, %v2087_v36  ;;  %v3773_v56 = vrot.slane %v3771_v15, 5  ;;  %v3709_v15 = vld [vmem:[#allocation2 + $0x20] sm:$0xf] }
 0x210   : > { %v2110_v22 = vor.u32 %v2109_v43, %v2106_v40  ;;  %v3782_v59 = vshrl.u32 %v3705_v39, 16  ;;  %v7563_v63 = vcombine.low %v2074_v52, %v2088_v9  ;;  %v3777_v60 = vshll.u32 %v3704_v57, 16  ;;  %v10418_v57 = vld [vmem:[#allocation2 + $0x1c] sm:$0x1] }
 0x211   : > { %v2102_v45 = vsel %vm10076_vm7, %v2097_v58, %v2101_v48  ;;  %v3785_v2 = vshll.u32 %v3705_v39, 16  ;;  %v3774_v5 = vor.u32 %v3773_v56, %v3770_v28  ;;  %v3791_v24 = vshll.u32 %v3706_v11, 16  ;;  %v3707_v39 = vld [vmem:[#allocation2 + $0x18] sm:$0xf] }
 0x212   : > { %v2111_v6 = vrot.slane %v2110_v22, 4  ;;  %v3784_v12 = vrot.slane %v3782_v59, 4  ;;  %8362 = vmatprep.mubr.bf16.mxu0 %v7563_v63  ;;  %v2118_v13 = vshrl.u32 %v1670_v47, 16  ;;  %v2121_v16 = vshll.u32 %v1670_v47, 16  ;;  %v10422_v63 = vld [vmem:[#allocation2 + $0x24] sm:$0x1] }
 0x213   : > { %v3787_v26 = vrot.slane %v3785_v2, 5  ;;  %v3775_v7 = vrot.slane %v3774_v5, 4  ;;  %v2127_v19 = vshll.u32 %v1718_v3, 16  ;;  %v2132_v49 = vshrl.u32 %v1671_v34, 16  ;;  %v3711_v5 = vld [vmem:[#allocation2 + $0x28] sm:$0xf] }
 0x214   : > { %v2116_v4 = vsel %vm10076_vm7, %v2111_v6, %v2115_v0  ;;  %v2120_v35 = vrot.slane %v2118_v13, 4  ;;  %v2123_v20 = vrot.slane %v2121_v16, 5  ;;  %v3779_v42 = vrot.slane %v3777_v60, 5  ;;  %v10427_v13 = vld [vmem:[#allocation2 + $0x2c] sm:$0x1] }
 0x215   : > { %v7564_v55 = vcombine.low %v2102_v45, %v2116_v4  ;;  %v3788_v10 = vor.u32 %v3787_v26, %v3784_v12  ;;  %v3793_v54 = vrot.slane %v3791_v24, 5  ;;  %v2134_v17 = vrot.slane %v2132_v49, 4  ;;  %v3713_v49 = vld [vmem:[#allocation2 + $0x30] sm:$0xf] }
 0x216   : > { %v2135_v50 = vshll.u32 %v1671_v34, 16  ;;  %v2124_v1 = vor.u32 %v2123_v20, %v2120_v35  ;;  %v2141_v61 = vshll.u32 %v1719_v8, 16  ;;  %v2146_v32 = vshrl.u32 %v1672_v14, 16 }
 0x217   : > { %8363 = vmatmul.mubr.bf16.gmra.mrb[56].mxu0 %v7564_v55  ;;  %v3789_v23 = vrot.slane %v3788_v10, 4  ;;  %v3780_v33 = vsel %vm10076_vm7, %v3775_v7, %v3779_v42  ;;  %v2149_v36 = vshll.u32 %v1672_v14, 16  ;;  %v2160_v27 = vshrl.u32 %v1673_v21, 16 }
 0x218   : > { %v2137_v53 = vrot.slane %v2135_v50, 5  ;;  %v2125_v52 = vrot.slane %v2124_v1, 4  ;;  %v2129_v62 = vrot.slane %v2127_v19, 5  ;;  %v2148_v38 = vrot.slane %v2146_v32, 4 }
 0x219   : > { %v3794_v31 = vsel %vm10076_vm7, %v3789_v23, %v3793_v54  ;;  %v2151_v40 = vrot.slane %v2149_v36, 5  ;;  %v2155_v43 = vshll.u32 %v1720_v30, 16  ;;  %v2143_v58 = vrot.slane %v2141_v61, 5  ;;  %v10432_v54 = vld [vmem:[#allocation2 + $0x34] sm:$0x1] }
 0x21a   : > { %v7679_v44 = vcombine.low %v3780_v33, %v3794_v31  ;;  %v2138_v41 = vor.u32 %v2137_v53, %v2134_v17  ;;  %v2162_v48 = vrot.slane %v2160_v27, 4  ;;  %v2163_v0 = vshll.u32 %v1673_v21, 16  ;;  %v3715_v30 = vld [vmem:[#allocation2 + $0x38] sm:$0xf]  ;;  %v9327_v36 = vld [vmem:[#allocation2 + $0x8] sm:$0xf] }
 0x21b   : > { %v2169_v11 = vshll.u32 %v1721_v18, 16  ;;  %v2152_v9 = vor.u32 %v2151_v40, %v2148_v38  ;;  %v3796_v22 = vshrl.u32 %v3707_v39, 16  ;;  %v3799_v56 = vshll.u32 %v3707_v39, 16  ;;  %v9326_v18 = vld [vmem:[#allocation2] sm:$0xf] }
 0x21c   : > { %8530 = vmatprep.mubr.bf16.mxu1 %v7679_v44  ;;  %v2139_v28 = vrot.slane %v2138_v41, 4  ;;  %v2130_v59 = vsel %vm10076_vm7, %v2125_v52, %v2129_v62  ;;  %v2165_v47 = vrot.slane %v2163_v0, 5  ;;  %v3805_v45 = vshll.u32 %v10418_v57, 16  ;;  %v3717_v39 = vld [vmem:[#allocation2 + $0x40] sm:$0xf] }
 0x21d   : > { %v3810_v60 = vshrl.u32 %v3709_v15, 16  ;;  %v2153_v34 = vrot.slane %v2152_v9, 4  ;;  %v3798_v3 = vrot.slane %v3796_v22, 4  ;;  %v3801_v6 = vrot.slane %v3799_v56, 5  ;;  %v10440_v40 = vld [vmem:[#allocation2 + $0x3c] sm:$0x1] }
 0x21e   : > { %v2144_v2 = vsel %vm10076_vm7, %v2139_v28, %v2143_v58  ;;  %v2157_v24 = vrot.slane %v2155_v43, 5  ;;  %v2166_v26 = vor.u32 %v2165_v47, %v2162_v48  ;;  %v2171_v8 = vrot.slane %v2169_v11, 5  ;;  %v9328_v11 = vld [vmem:[#allocation2 + $0x10] sm:$0xf]  ;;  %v9329_v28 = vld [vmem:[#allocation2 + $0x18] sm:$0xf] }
 0x21f   : > { %v7565_v12 = vcombine.low %v2130_v59, %v2144_v2  ;;  %v3802_v16 = vor.u32 %v3801_v6, %v3798_v3  ;;  %v3812_v4 = vrot.slane %v3810_v60, 4  ;;  %v3813_v7 = vshll.u32 %v3709_v15, 16  ;;  %v10442_v22 = vld [vmem:[#allocation2 + $0x44] sm:$0x1]  ;;  %v3719_v60 = vld [vmem:[#allocation2 + $0x58] sm:$0xf] }
 0x220   : > { %v3819_v19 = vshll.u32 %v10422_v63, 16  ;;  %v2158_v14 = vsel %vm10076_vm7, %v2153_v34, %v2157_v24  ;;  %v2167_v55 = vrot.slane %v2166_v26, 4  ;;  %v3824_v10 = vshrl.u32 %v3711_v5, 16  ;;  %v9222_v6 = vld [vmem:[#allocation8 + $0x148] sm:$0xff]  }
 0x221   : > { %8366 = vmatprep.mubr.bf16.mxu0 %v7565_v12  ;;  %v3827_v35 = vshll.u32 %v3711_v5, 16  ;;  %v3803_v20 = vrot.slane %v3802_v16, 4  ;;  %v3807_v21 = vrot.slane %v3805_v45, 5  ;;  %v3815_v42 = vrot.slane %v3813_v7, 5  ;;  %v10447_v12 = vld [vmem:[#allocation2 + $0x5c] sm:$0x1] }
 0x222   : > { %v3833_v17 = vshll.u32 %v10427_v13, 16  ;;  %v2172_v50 = vsel %vm10076_vm7, %v2167_v55, %v2171_v8  ;;  %v3826_v23 = vrot.slane %v3824_v10, 4  ;;  %v3838_v61 = vshrl.u32 %v3713_v49, 16 }
 0x223   : > { %v3829_v1 = vrot.slane %v3827_v35, 5  ;;  %v7566_v32 = vcombine.low %v2158_v14, %v2172_v50  ;;  %v3816_v33 = vor.u32 %v3815_v42, %v3812_v4  ;;  %v3821_v53 = vrot.slane %v3819_v19, 5  ;;  %v3721_v4 = vld [vmem:[#allocation2 + $0x60] sm:$0xf]  ;;  %v10453_v42 = vld [vmem:[#allocation2 + $0x64] sm:$0x1] }
 0x224   : > { %v7575_v27 = vcombine.low %v9326_v18, %v9327_v36  ;;  %v3840_v52 = vrot.slane %v3838_v61, 4  ;;  %v3841_v62 = vshll.u32 %v3713_v49, 16  ;;  %v3847_v38 = vshll.u32 %v10432_v54, 16  ;;  %v9330_v35 = vld [vmem:[#allocation2 + $0x20] sm:$0xf]  ;;  %v9225_v50 = vld [vmem:[#allocation8 + $0x150] sm:$0xff]  }
 0x225   : > { %v3830_v31 = vor.u32 %v3829_v1, %v3826_v23  ;;  %8367 = vmatmul.mubr.bf16.gmra.mrb[60].mxu0 %v7566_v32  ;;  %v3808_v44 = vsel %vm10076_vm7, %v3803_v20, %v3807_v21  ;;  %v3817_v41 = vrot.slane %v3816_v33, 4  ;;  %v3852_v43 = vshrl.u32 %v3715_v30, 16  ;;  %v9331_v20 = vld [vmem:[#allocation2 + $0x28] sm:$0xf] }
 0x226   : > { %v3855_v15 = vshll.u32 %v3715_v30, 16  ;;  %8386 = vmatprep.mubr.bf16.mxu0 %v7575_v27  ;;  %v3835_v48 = vrot.slane %v3833_v17, 5  ;;  %v3843_v0 = vrot.slane %v3841_v62, 5  ;;  %v7576_v9 = vcombine.low %v9328_v11, %v9329_v28  ;;  %v3723_v32 = vld [vmem:[#allocation2 + $0x68] sm:$0xf] }
 0x227   : > { %v3831_v58 = vrot.slane %v3830_v31, 4  ;;  %v3822_v56 = vsel %vm10076_vm7, %v3817_v41, %v3821_v53  ;;  %v3854_v59 = vrot.slane %v3852_v43, 4  ;;  %v3866_v45 = vshrl.u32 %v3717_v39, 16  ;;  %v9238_v33 = vld [vmem:[#allocation8 + $0x88] sm:$0xff]   ;;  %v9332_v28 = vld [vmem:[#allocation2 + $0x30] sm:$0xf] }
 0x228   : > { %v3857_v47 = vrot.slane %v3855_v15, 5  ;;  %v7680_v2 = vcombine.low %v3808_v44, %v3822_v56  ;;  %v3844_v34 = vor.u32 %v3843_v0, %v3840_v52  ;;  %v3849_v3 = vrot.slane %v3847_v38, 5  ;;  %v3725_v38 = vld [vmem:[#allocation2 + $0x70] sm:$0xf]  ;;  %v10462_v41 = vld [vmem:[#allocation2 + $0x6c] sm:$0x1] }
 0x229   : > { %v3861_v5 = vshll.u32 %v10440_v40, 16  ;;  %v3868_v26 = vrot.slane %v3866_v45, 4  ;;  %v3869_v8 = vshll.u32 %v3717_v39, 16  ;;  %v3875_v16 = vshll.u32 %v10442_v22, 16 }
 0x22a   : > { %v3858_v24 = vor.u32 %v3857_v47, %v3854_v59  ;;  %8531 = vmatmul.mubr.bf16.vlgmr.msra.gmra.mrb[16].mxu1 %v7680_v2  ;;  %v3836_v7 = vsel %vm10076_vm7, %v3831_v58, %v3835_v48  ;;  %v3845_v19 = vrot.slane %v3844_v34, 4  ;;  %v3880_v49 = vshrl.u32 %v3719_v60, 16  ;;  %v9241_v58 = vld [vmem:[#allocation8 + $0x90] sm:$0xff]   ;;  %v3727_v34 = vld [vmem:[#allocation2 + $0x78] sm:$0xf] }
 0x22b   : > { %v3883_v14 = vshll.u32 %v3719_v60, 16  ;;  %8563 = vmatpush3.bf16.msra.mxu1 %v10347_v51  ;;  %v3871_v10 = vrot.slane %v3869_v8, 5  ;;  %v7577_v21 = vcombine.low %v9330_v35, %v9331_v20  ;;  %v3889_v17 = vshll.u32 %v10447_v12, 16  ;;  %v10464_v59 = vld [vmem:[#allocation2 + $0x74] sm:$0x1] }
 0x22c   : > { %v3859_v55 = vrot.slane %v3858_v24, 4  ;;  %v3850_v23 = vsel %vm10076_vm7, %v3845_v19, %v3849_v3  ;;  %8564 = vmatprep.subr.bf16.mxu1 %v9222_v6  ;;  %v3882_v1 = vrot.slane %v3880_v49, 4  ;;  %v3894_v30 = vshrl.u32 %v3721_v4, 16  ;;  %v3729_v8 = vld [vmem:[#allocation2 + $0x80] sm:$0xf] }
 0x22d   : > { %v3885_v61 = vrot.slane %v3883_v14, 5  ;;  %v7681_v51 = vcombine.low %v3836_v7, %v3850_v23  ;;  %8387 = vmatmul.mubr.bf16.vlgmr.msra.gmra.mrb[32].mxu0 %v7576_v9  ;;  %v3863_v53 = vrot.slane %v3861_v5, 5  ;;  %v3872_v18 = vor.u32 %v3871_v10, %v3868_v26  ;;  %v9333_v9 = vld [vmem:[#allocation2 + $0x38] sm:$0xf]  ;;  %v10469_v26 = vld [vmem:[#allocation2 + $0x7c] sm:$0x1] }
 0x22e   : > { %v3877_v36 = vrot.slane %v3875_v16, 5  ;;  %8390 = vmatprep.mubr.bf16.mxu0 %v7577_v21  ;;  %v3896_v31 = vrot.slane %v3894_v30, 4  ;;  %v3897_v52 = vshll.u32 %v3721_v4, 16  ;;  %v3903_v62 = vshll.u32 %v10453_v42, 16  ;;  %8419 = vmatpush3.bf16.msra.mxu0 %v10341_v46  ;;  %v9228_v46 = vld [vmem:[#allocation8 + $0x158] sm:$0xff]  }
 0x22f   : > { %v3886_v27 = vor.u32 %v3885_v61, %v3882_v1  ;;  %8534 = vmatprep.mubr.bf16.mxu1 %v7681_v51  ;;  %v3864_v39 = vsel %vm10076_vm7, %v3859_v55, %v3863_v53  ;;  %v3873_v44 = vrot.slane %v3872_v18, 4  ;;  %8565 = vmatpush3.bf16.msra.mxu1 %v9222_v6  ;;  %v3908_v43 = vshrl.u32 %v3723_v32, 16  ;;  %v10472_v49 = vld [vmem:[#allocation2 + $0x84] sm:$0x1]  ;;  %v9243_v14 = vld [vmem:[#allocation8 + $0x98] sm:$0xff]  }
 0x230   : > { %v3911_v15 = vshll.u32 %v3723_v32, 16  ;;  %v3891_v0 = vrot.slane %v3889_v17, 5  ;;  %v3899_v11 = vrot.slane %v3897_v52, 5  ;;  %8566 = vmatprep.subr.bf16.mxu1 %v9225_v50  ;;  %v7578_v56 = vcombine.low %v9332_v28, %v9333_v9  ;;  %8420 = vmatprep.subr.bf16.mxu0 %v9238_v33  ;;  %v9334_v10 = vld [vmem:[#allocation2 + $0x50] sm:$0xf]  ;;  %v9231_v1 = vld [vmem:[#allocation8 + $0x160] sm:$0xff]  }
 0x231   : > { %v3887_v48 = vrot.slane %v3886_v27, 4  ;;  %v3878_v47 = vsel %vm10076_vm7, %v3873_v44, %v3877_v36  ;;  %v3910_v45 = vrot.slane %v3908_v43, 4  ;;  %v3922_v2 = vshrl.u32 %v3725_v38, 16  ;;  %v9335_v35 = vld [vmem:[#allocation2 + $0x58] sm:$0xf]  ;;  %v9246_v27 = vld [vmem:[#allocation8 + $0xa0] sm:$0xff]  }
 0x232   : > { %v3913_v60 = vrot.slane %v3911_v15, 5  ;;  %v7682_v3 = vcombine.low %v3864_v39, %v3878_v47  ;;  %v3900_v6 = vor.u32 %v3899_v11, %v3896_v31  ;;  %v3905_v5 = vrot.slane %v3903_v62, 5  ;;  %8421 = vmatpush3.bf16.msra.mxu0 %v9238_v33  ;;  %v3731_v23 = vld [vmem:[#allocation2 + $0x88] sm:$0xf]  ;;  %v3733_v36 = vld [vmem:[#allocation2 + $0x90] sm:$0xf] }
 0x233   : > { %v3917_v24 = vshll.u32 %v10462_v41, 16  ;;  %v3924_v4 = vrot.slane %v3922_v2, 4  ;;  %v3925_v7 = vshll.u32 %v3725_v38, 16  ;;  %v3931_v19 = vshll.u32 %v10464_v59, 16  ;;  %8567 = vmatpush3.bf16.msra.mxu1 %v9225_v50  ;;  %8422 = vmatprep.subr.bf16.mxu0 %v9241_v58  ;;  %v10479_v39 = vld [vmem:[#allocation2 + $0x8c] sm:$0x1] }
 0x234   : > { %v3914_v16 = vor.u32 %v3913_v60, %v3910_v45  ;;  %8535 = vmatmul.mubr.bf16.gmra.mrb[20].mxu1 %v7682_v3  ;;  %v3901_v55 = vrot.slane %v3900_v6, 4  ;;  %v7579_v20 = vcombine.low %v9334_v10, %v9335_v35  ;;  %v3936_v21 = vshrl.u32 %v3727_v34, 16  ;;  %8568 = vmatprep.subr.bf16.mxu1 %v9228_v46  ;;  %v9234_v11 = vld [vmem:[#allocation8 + $0x168] sm:$0xff]   ;;  %v9336_v2 = vld [vmem:[#allocation2 + $0x60] sm:$0xf] }
 0x235   : > { %v3939_v17 = vshll.u32 %v3727_v34, 16  ;;  %v3892_v61 = vsel %vm10076_vm7, %v3887_v48, %v3891_v0  ;;  %8391 = vmatmul.mubr.bf16.gmra.mrb[36].mxu0 %v7578_v56  ;;  %v3927_v50 = vrot.slane %v3925_v7, 5  ;;  %v3945_v32 = vshll.u32 %v10469_v26, 16  ;;  %v10482_v0 = vld [vmem:[#allocation2 + $0x94] sm:$0x1]  ;;  %v9248_v7 = vld [vmem:[#allocation8 + $0xa8] sm:$0xff]  }
 0x236   : > { %v3915_v30 = vrot.slane %v3914_v16, 4  ;;  %v3906_v33 = vsel %vm10076_vm7, %v3901_v55, %v3905_v5  ;;  %8394 = vmatprep.mubr.bf16.mxu0 %v7579_v20  ;;  %v3938_v51 = vrot.slane %v3936_v21, 4  ;;  %v3950_v18 = vshrl.u32 %v3729_v8, 16  ;;  %8423 = vmatpush3.bf16.msra.mxu0 %v9241_v58  ;;  %v3735_v47 = vld [vmem:[#allocation2 + $0xa8] sm:$0xf]  ;;  %v9239_v20 = vld [vmem:[#allocation8 + $0x170] sm:$0xff]  }
 0x237   : > { %v3941_v53 = vrot.slane %v3939_v17, 5  ;;  %v7683_v31 = vcombine.low %v3892_v61, %v3906_v33  ;;  %v3919_v52 = vrot.slane %v3917_v24, 5  ;;  %v3928_v62 = vor.u32 %v3927_v50, %v3924_v4  ;;  %8569 = vmatpush3.bf16.msra.mxu1 %v9228_v46  ;;  %8424 = vmatprep.subr.bf16.mxu0 %v9243_v14  ;;  %v9337_v34 = vld [vmem:[#allocation2 + $0x68] sm:$0xf]  ;;  %v10486_v6 = vld [vmem:[#allocation2 + $0xac] sm:$0x1] }
 0x238   : > { %v3933_v38 = vrot.slane %v3931_v19, 5  ;;  %v3952_v43 = vrot.slane %v3950_v18, 4  ;;  %v3953_v15 = vshll.u32 %v3729_v8, 16  ;;  %v3959_v48 = vshll.u32 %v10472_v49, 16  ;;  %8570 = vmatprep.subr.bf16.mxu1 %v9231_v1  ;;  %v10490_v4 = vld [vmem:[#allocation2 + $0xb0] sm:$0xf] }
 0x239   : > { %v3942_v44 = vor.u32 %v3941_v53, %v3938_v51  ;;  %8538 = vmatprep.mubr.bf16.mxu1 %v7683_v31  ;;  %v3920_v58 = vsel %vm10076_vm7, %v3915_v30, %v3919_v52  ;;  %v3929_v28 = vrot.slane %v3928_v62, 4  ;;  %v3964_v9 = vshrl.u32 %v3731_v23, 16  ;;  %v10494_v61 = vld [vmem:[#allocation2 + $0xb4] sm:$0x1]  ;;  %v9339_v50 = vld [vmem:[#allocation2 + $0x78] sm:$0xf] }
 0x23a   : > { %v3967_v56 = vshll.u32 %v3731_v23, 16  ;;  %v3947_v46 = vrot.slane %v3945_v32, 5  ;;  %v3955_v60 = vrot.slane %v3953_v15, 5  ;;  %v7580_v3 = vcombine.low %v9336_v2, %v9337_v34  ;;  %8425 = vmatpush3.bf16.msra.mxu0 %v9243_v14  ;;  %v9244_v62 = vld [vmem:[#allocation8 + $0x178] sm:$0xff]   ;;  %v10506_v2 = vld [vmem:[#allocation2 + $0xc4] sm:$0x1] }
 0x23b   : > { %v3943_v45 = vrot.slane %v3942_v44, 4  ;;  %v3934_v5 = vsel %vm10076_vm7, %v3929_v28, %v3933_v38  ;;  %v3966_v24 = vrot.slane %v3964_v9, 4  ;;  %v3978_v16 = vshrl.u32 %v3733_v36, 16  ;;  %8571 = vmatpush3.bf16.msra.mxu1 %v9231_v1  ;;  %8426 = vmatprep.subr.bf16.mxu0 %v9246_v27  ;;  %v9338_v1 = vld [vmem:[#allocation2 + $0x70] sm:$0xf] }
 0x23c   : > { %v3969_v8 = vrot.slane %v3967_v56, 5  ;;  %v7684_v19 = vcombine.low %v3920_v58, %v3934_v5  ;;  %v3956_v55 = vor.u32 %v3955_v60, %v3952_v43  ;;  %v3961_v10 = vrot.slane %v3959_v48, 5  ;;  %8572 = vmatprep.subr.bf16.mxu1 %v9234_v11  ;;  %v10502_v56 = vld [vmem:[#allocation2 + $0xbc] sm:$0x1]  ;;  %v9341_v5 = vld [vmem:[#allocation2 + $0x88] sm:$0xf] }
 0x23d   : > { %v3973_v35 = vshll.u32 %v10479_v39, 16  ;;  %8395 = vmatmul.mubr.bf16.gmra.mrb[40].mxu0 %v7580_v3  ;;  %v3980_v21 = vrot.slane %v3978_v16, 4  ;;  %v3981_v17 = vshll.u32 %v3733_v36, 16  ;;  %v3987_v23 = vshll.u32 %v10482_v0, 16  ;;  %v3739_v36 = vld [vmem:[#allocation2 + $0xb8] sm:$0xf] }
 0x23e   : > { %v3970_v14 = vor.u32 %v3969_v8, %v3966_v24  ;;  %8539 = vmatmul.mubr.bf16.gmra.mrb[24].mxu1 %v7684_v19  ;;  %v3957_v30 = vrot.slane %v3956_v55, 4  ;;  %v7581_v32 = vcombine.low %v9338_v1, %v9339_v50  ;;  %v3992_v33 = vshrl.u32 %v3735_v47, 16  ;;  %8427 = vmatpush3.bf16.msra.mxu0 %v9246_v27  ;;  %v9251_v27 = vld [vmem:[#allocation8 + $0xb0] sm:$0xff]   ;;  %v9340_v3 = vld [vmem:[#allocation2 + $0x80] sm:$0xf]  ;;  %v9252_v55 = vld [vmem:[#allocation8 + $0xb8] sm:$0xff]  }
 0x23f   : > { %v3995_v51 = vshll.u32 %v3735_v47, 16  ;;  %v3948_v53 = vsel %vm10076_vm7, %v3943_v45, %v3947_v46  ;;  %v3983_v31 = vrot.slane %v3981_v17, 5  ;;  %v4001_v52 = vshll.u32 %v10486_v6, 16  ;;  %8573 = vmatpush3.bf16.msra.mxu1 %v9234_v11  ;;  %8428 = vmatprep.subr.bf16.mxu0 %v9248_v7  ;;  %v3741_v47 = vld [vmem:[#allocation2 + $0xc0] sm:$0xf] }
 0x240   : > { %v3971_v18 = vrot.slane %v3970_v14, 4  ;;  %v3962_v38 = vsel %vm10076_vm7, %v3957_v30, %v3961_v10  ;;  %8398 = vmatprep.mubr.bf16.mxu0 %v7581_v32  ;;  %v3994_v44 = vrot.slane %v3992_v33, 4  ;;  %v4006_v15 = vshrl.u32 %v10490_v4, 16  ;;  %8574 = vmatprep.subr.bf16.mxu1 %v9239_v20  ;;  %v3743_v19 = vld [vmem:[#allocation2 + $0xc8] sm:$0xf] }
 0x241   : > { %v3997_v43 = vrot.slane %v3995_v51, 5  ;;  %v7685_v48 = vcombine.low %v3948_v53, %v3962_v38  ;;  %v3975_v58 = vrot.slane %v3973_v35, 5  ;;  %v3984_v28 = vor.u32 %v3983_v31, %v3980_v21  ;;  %v10510_v21 = vld [vmem:[#allocation2 + $0xcc] sm:$0x1]  ;;  %v3745_v51 = vld [vmem:[#allocation2 + $0xd0] sm:$0xf] }
 0x242   : > { %v3989_v9 = vrot.slane %v3987_v23, 5  ;;  %v4008_v45 = vrot.slane %v4006_v15, 4  ;;  %v4009_v46 = vshll.u32 %v10490_v4, 16  ;;  %v4015_v60 = vshll.u32 %v10494_v61, 16  ;;  %8429 = vmatpush3.bf16.msra.mxu0 %v9248_v7  ;;  %v10512_v7 = vld [vmem:[#allocation8 + $0x180] sm:$0xff]  }
 0x243   : > { %v3998_v11 = vor.u32 %v3997_v43, %v3994_v44  ;;  %8542 = vmatprep.mubr.bf16.mxu1 %v7685_v48  ;;  %v3985_v34 = vrot.slane %v3984_v28, 4  ;;  %v7582_v24 = vcombine.low %v9340_v3, %v9341_v5  ;;  %v4020_v8 = vshrl.u32 %v3739_v36, 16  ;;  %8575 = vmatpush3.bf16.msra.mxu1 %v9239_v20  ;;  %v9342_v38 = vld [vmem:[#allocation2 + $0xa0] sm:$0xf]  ;;  %v9343_v44 = vld [vmem:[#allocation2 + $0xa8] sm:$0xf] }
 0x244   : > { %v4023_v16 = vshll.u32 %v3739_v36, 16  ;;  %v3976_v10 = vsel %vm10076_vm7, %v3971_v18, %v3975_v58  ;;  %v4003_v4 = vrot.slane %v4001_v52, 5  ;;  %v4011_v14 = vrot.slane %v4009_v46, 5  ;;  %8576 = vmatprep.subr.bf16.mxu1 %v9244_v62  ;;  %8430 = vmatprep.subr.bf16.mxu0 %v9251_v27  ;;  %v3747_v58 = vld [vmem:[#allocation2 + $0xd8] sm:$0xf] }
 0x245   : > { %v3999_v35 = vrot.slane %v3998_v11, 4  ;;  %v3990_v17 = vsel %vm10076_vm7, %v3985_v34, %v3989_v9  ;;  %8399 = vmatmul.mubr.bf16.gmra.mrb[44].mxu0 %v7582_v24  ;;  %v4022_v23 = vrot.slane %v4020_v8, 4  ;;  %v4034_v20 = vshrl.u32 %v3741_v47, 16  ;;  %v10526_v8 = vld [vmem:[#allocation2 + $0xdc] sm:$0x1] }
 0x246   : > { %v4025_v30 = vrot.slane %v4023_v16, 5  ;;  %v7686_v1 = vcombine.low %v3976_v10, %v3990_v17  ;;  %v4012_v50 = vor.u32 %v4011_v14, %v4008_v45  ;;  %v4017_v32 = vrot.slane %v4015_v60, 5  ;;  %8431 = vmatpush3.bf16.msra.mxu0 %v9251_v27  ;;  %v3749_v16 = vld [vmem:[#allocation2 + $0xe0] sm:$0xf]  ;;  %v10532_v17 = vld [vmem:[#allocation2 + $0xe4] sm:$0x1] }
 0x247   : > { %v4029_v33 = vshll.u32 %v10502_v56, 16  ;;  %v4036_v18 = vrot.slane %v4034_v20, 4  ;;  %v4037_v31 = vshll.u32 %v3741_v47, 16  ;;  %v4043_v52 = vshll.u32 %v10506_v2, 16  ;;  %8577 = vmatpush3.bf16.msra.mxu1 %v9244_v62  ;;  %8432 = vmatprep.subr.bf16.mxu0 %v9252_v55  ;;  %v10521_v47 = vld [vmem:[#allocation2 + $0xd4] sm:$0x1] }
 0x248   : > { %v4026_v53 = vor.u32 %v4025_v30, %v4022_v23  ;;  %8543 = vmatmul.mubr.bf16.gmra.mrb[28].mxu1 %v7686_v1  ;;  %v4013_v36 = vrot.slane %v4012_v50, 4  ;;  %v7583_v43 = vcombine.low %v9342_v38, %v9343_v44  ;;  %v4048_v15 = vshrl.u32 %v3743_v19, 16  ;;  %8610 = vmatprep.subr.bf16.mxu1 %v10512_v7  ;;  %v9345_v23 = vld [vmem:[#allocation2 + $0xb0] sm:$0xf]  ;;  %v9346_v30 = vld [vmem:[#allocation2 + $0xb8] sm:$0xf] }
 0x249   : > { %v4051_v48 = vshll.u32 %v3743_v19, 16  ;;  %v4004_v27 = vsel %vm10076_vm7, %v3999_v35, %v4003_v4  ;;  %v4039_v9 = vrot.slane %v4037_v31, 5  ;;  %v4057_v62 = vshll.u32 %v10510_v21, 16  ;;  %v10528_v19 = vld [vmem:[#allocation8 + $0xc0] sm:$0xff]  }
 0x24a   : > { %v4027_v28 = vrot.slane %v4026_v53, 4  ;;  %v4018_v11 = vsel %vm10076_vm7, %v4013_v36, %v4017_v32  ;;  %8402 = vmatprep.mubr.bf16.mxu0 %v7583_v43  ;;  %v4050_v45 = vrot.slane %v4048_v15, 4  ;;  %v4062_v60 = vshrl.u32 %v3745_v51, 16  ;;  %8433 = vmatpush3.bf16.msra.mxu0 %v9252_v55  ;;  %v3751_v32 = vld [vmem:[#allocation2 + $0xf8] sm:$0xf] }
 0x24b   : > { %v4053_v46 = vrot.slane %v4051_v48, 5  ;;  %v7687_v34 = vcombine.low %v4004_v27, %v4018_v11  ;;  %v4031_v3 = vrot.slane %v4029_v33, 5  ;;  %v4040_v5 = vor.u32 %v4039_v9, %v4036_v18  ;;  %8466 = vmatprep.subr.bf16.mxu0 %v10528_v19  ;;  %v3753_v27 = vld [vmem:[#allocation2 + $0x100] sm:$0xf] }
 0x24c   : > { %v4045_v24 = vrot.slane %v4043_v52, 5  ;;  %v4064_v35 = vrot.slane %v4062_v60, 4  ;;  %v4065_v4 = vshll.u32 %v3745_v51, 16  ;;  %v4071_v14 = vshll.u32 %v10521_v47, 16  ;;  %v10536_v52 = vld [vmem:[#allocation2 + $0xfc] sm:$0x1] }
 0x24d   : > { %v4054_v10 = vor.u32 %v4053_v46, %v4050_v45  ;;  %8546 = vmatprep.mubr.bf16.mxu1 %v7687_v34  ;;  %v4041_v55 = vrot.slane %v4040_v5, 4  ;;  %v7584_v20 = vcombine.low %v9345_v23, %v9346_v30  ;;  %v4076_v1 = vshrl.u32 %v3747_v58, 16  ;;  %v9347_v46 = vld [vmem:[#allocation2 + $0xc0] sm:$0xf]  ;;  %v9348_v60 = vld [vmem:[#allocation2 + $0xc8] sm:$0xf] }
 0x24e   : > { %v4079_v50 = vshll.u32 %v3747_v58, 16  ;;  %v4032_v33 = vsel %vm10076_vm7, %v4027_v28, %v4031_v3  ;;  %v4059_v18 = vrot.slane %v4057_v62, 5  ;;  %v4067_v31 = vrot.slane %v4065_v4, 5  ;;  %v10542_v3 = vld [vmem:[#allocation2 + $0x104] sm:$0x1] }
 0x24f   : > { %v4055_v53 = vrot.slane %v4054_v10, 4  ;;  %v4046_v51 = vsel %vm10076_vm7, %v4041_v55, %v4045_v24  ;;  %8403 = vmatmul.mubr.bf16.gmra.mrb[48].mxu0 %v7584_v20  ;;  %v4078_v36 = vrot.slane %v4076_v1, 4  ;;  %v4090_v44 = vshrl.u32 %v3749_v16, 16  ;;  %v3755_v10 = vld [vmem:[#allocation2 + $0x108] sm:$0xf] }
 0x250   : > { %v4081_v38 = vrot.slane %v4079_v50, 5  ;;  %v7688_v43 = vcombine.low %v4032_v33, %v4046_v51  ;;  %v4068_v15 = vor.u32 %v4067_v31, %v4064_v35  ;;  %v4073_v48 = vrot.slane %v4071_v14, 5  ;;  %v3757_v51 = vld [vmem:[#allocation2 + $0x110] sm:$0xf] }
 0x251   : > { %v4085_v58 = vshll.u32 %v10526_v8, 16  ;;  %v4092_v28 = vrot.slane %v4090_v44, 4  ;;  %v4093_v11 = vshll.u32 %v3749_v16, 16  ;;  %v4099_v62 = vshll.u32 %v10532_v17, 16  ;;  %v10552_v44 = vld [vmem:[#allocation2 + $0x114] sm:$0x1] }
 0x252   : > { %v4082_v9 = vor.u32 %v4081_v38, %v4078_v36  ;;  %8547 = vmatmul.mubr.bf16.gmra.mrb[0].mxu1 %v7688_v43  ;;  %v4069_v45 = vrot.slane %v4068_v15, 4  ;;  %v7585_v34 = vcombine.low %v9347_v46, %v9348_v60  ;;  %v4104_v5 = vshrl.u32 %v3751_v32, 16  ;;  %v9349_v15 = vld [vmem:[#allocation2 + $0xd0] sm:$0xf] }
 0x253   : > { %v4107_v24 = vshll.u32 %v3751_v32, 16  ;;  %v4060_v35 = vsel %vm10076_vm7, %v4055_v53, %v4059_v18  ;;  %v4095_v14 = vrot.slane %v4093_v11, 5  ;;  %v4113_v55 = vshll.u32 %v10536_v52, 16  ;;  %v10549_v32 = vld [vmem:[#allocation2 + $0x10c] sm:$0x1] }
 0x254   : > { %v4083_v4 = vrot.slane %v4082_v9, 4  ;;  %v4074_v16 = vsel %vm10076_vm7, %v4069_v45, %v4073_v48  ;;  %8406 = vmatprep.mubr.bf16.mxu0 %v7585_v34  ;;  %v4106_v23 = vrot.slane %v4104_v5, 4  ;;  %v4118_v20 = vshrl.u32 %v3753_v27, 16  ;;  %v9350_v48 = vld [vmem:[#allocation2 + $0xd8] sm:$0xf] }
 0x255   : > { %v4109_v30 = vrot.slane %v4107_v24, 5  ;;  %v7689_v1 = vcombine.low %v4060_v35, %v4074_v16  ;;  %v4087_v50 = vrot.slane %v4085_v58, 5  ;;  %v4096_v33 = vor.u32 %v4095_v14, %v4092_v28  ;;  %v3759_v58 = vld [vmem:[#allocation2 + $0x118] sm:$0xf] }
 0x256   : > { %v4101_v31 = vrot.slane %v4099_v62, 5  ;;  %v4120_v53 = vrot.slane %v4118_v20, 4  ;;  %v4121_v18 = vshll.u32 %v3753_v27, 16  ;;  %v4127_v38 = vshll.u32 %v10542_v3, 16 }
 0x257   : > { %v4110_v36 = vor.u32 %v4109_v30, %v4106_v23  ;;  %8550 = vmatprep.mubr.bf16.mxu1 %v7689_v1  ;;  %v4097_v43 = vrot.slane %v4096_v33, 4  ;;  %v7586_v9 = vcombine.low %v9349_v15, %v9350_v48  ;;  %v4132_v11 = vshrl.u32 %v3755_v10, 16  ;;  %v3761_v30 = vld [vmem:[#allocation2 + $0x120] sm:$0xf] }
 0x258   : > { %v4135_v45 = vshll.u32 %v3755_v10, 16  ;;  %v4088_v28 = vsel %vm10076_vm7, %v4083_v4, %v4087_v50  ;;  %v4115_v46 = vrot.slane %v4113_v55, 5  ;;  %v4123_v60 = vrot.slane %v4121_v18, 5  ;;  %v10559_v10 = vld [vmem:[#allocation2 + $0x11c] sm:$0x1] }
 0x259   : > { %v4111_v62 = vrot.slane %v4110_v36, 4  ;;  %v4102_v27 = vsel %vm10076_vm7, %v4097_v43, %v4101_v31  ;;  %8407 = vmatmul.mubr.bf16.gmra.mrb[52].mxu0 %v7586_v9  ;;  %v4134_v34 = vrot.slane %v4132_v11, 4  ;;  %v4146_v24 = vshrl.u32 %v3757_v51, 16  ;;  %v10562_v50 = vld [vmem:[#allocation2 + $0x124] sm:$0x1] }
 0x25a   : > { %v4137_v5 = vrot.slane %v4135_v45, 5  ;;  %v7690_v35 = vcombine.low %v4088_v28, %v4102_v27  ;;  %v4124_v14 = vor.u32 %v4123_v60, %v4120_v53  ;;  %v4129_v16 = vrot.slane %v4127_v38, 5  ;;  %v9351_v31 = vld [vmem:[#allocation2 + $0xf0] sm:$0xf]  ;;  %v9352_v36 = vld [vmem:[#allocation2 + $0xf8] sm:$0xf] }
 0x25b   : > { %v4141_v23 = vshll.u32 %v10549_v32, 16  ;;  %v4148_v4 = vrot.slane %v4146_v24, 4  ;;  %v4149_v1 = vshll.u32 %v3757_v51, 16  ;;  %v4155_v55 = vshll.u32 %v10552_v44, 16  ;;  %v3763_v38 = vld [vmem:[#allocation2 + $0x128] sm:$0xf] }
 0x25c   : > { %v4138_v20 = vor.u32 %v4137_v5, %v4134_v34  ;;  %8551 = vmatmul.mubr.bf16.gmra.mrb[4].mxu1 %v7690_v35  ;;  %v4125_v33 = vrot.slane %v4124_v14, 4  ;;  %v7587_v18 = vcombine.low %v9351_v31, %v9352_v36  ;;  %v4160_v43 = vshrl.u32 %v3759_v58, 16  ;;  %v3765_v27 = vld [vmem:[#allocation2 + $0x130] sm:$0xf]  ;;  %v10569_v35 = vld [vmem:[#allocation2 + $0x12c] sm:$0x1] }
 0x25d   : > { %v4163_v53 = vshll.u32 %v3759_v58, 16  ;;  %v4116_v15 = vsel %vm10076_vm7, %v4111_v62, %v4115_v46  ;;  %v4151_v9 = vrot.slane %v4149_v1, 5  ;;  %v4169_v11 = vshll.u32 %v10559_v10, 16  ;;  %v10572_v1 = vld [vmem:[#allocation2 + $0x134] sm:$0x1] }
 0x25e   : > { %v4139_v48 = vrot.slane %v4138_v20, 4  ;;  %v4130_v51 = vsel %vm10076_vm7, %v4125_v33, %v4129_v16  ;;  %8410 = vmatprep.mubr.bf16.mxu0 %v7587_v18  ;;  %v4162_v45 = vrot.slane %v4160_v43, 4  ;;  %v4174_v60 = vshrl.u32 %v3761_v30, 16  ;;  %v9353_v33 = vld [vmem:[#allocation2 + $0x100] sm:$0xf] }
 0x25f   : > { %v4165_v28 = vrot.slane %v4163_v53, 5  ;;  %v7691_v34 = vcombine.low %v4116_v15, %v4130_v51  ;;  %v4143_v5 = vrot.slane %v4141_v23, 5  ;;  %v4152_v24 = vor.u32 %v4151_v9, %v4148_v4  ;;  %v9354_v31 = vld [vmem:[#allocation2 + $0x108] sm:$0xf] }
 0x260   : > { %v4157_v58 = vrot.slane %v4155_v55, 5  ;;  %v4176_v62 = vrot.slane %v4174_v60, 4  ;;  %v4177_v46 = vshll.u32 %v3761_v30, 16  ;;  %v4183_v20 = vshll.u32 %v10562_v50, 16 }
 0x261   : > { %v4166_v14 = vor.u32 %v4165_v28, %v4162_v45  ;;  %8554 = vmatprep.mubr.bf16.mxu1 %v7691_v34  ;;  %v4153_v16 = vrot.slane %v4152_v24, 4  ;;  %v7588_v36 = vcombine.low %v9353_v33, %v9354_v31  ;;  %v4188_v18 = vshrl.u32 %v3763_v38, 16  ;;  %v4537_v24 = vld [vmem:[#allocation2 + $0x8] sm:$0xe] }
 0x262   : > { %v4191_v43 = vshll.u32 %v3763_v38, 16  ;;  %v4144_v23 = vsel %vm10076_vm7, %v4139_v48, %v4143_v5  ;;  %v4171_v55 = vrot.slane %v4169_v11, 5  ;;  %v4179_v53 = vrot.slane %v4177_v46, 5  ;;  %v4538_v11 = vld [vmem:[#allocation2 + $0x10] sm:$0xe] }
 0x263   : > { %v4167_v4 = vrot.slane %v4166_v14, 4  ;;  %v4158_v30 = vsel %vm10076_vm7, %v4153_v16, %v4157_v58  ;;  %8411 = vmatmul.mubr.bf16.gmra.mrb[56].mxu0 %v7588_v36  ;;  %v4190_v15 = vrot.slane %v4188_v18, 4  ;;  %v4202_v51 = vshrl.u32 %v3765_v27, 16  ;;  %v9355_v14 = vld [vmem:[#allocation2 + $0x110] sm:$0xf] }
 0x264   : > { %v4193_v9 = vrot.slane %v4191_v43, 5  ;;  %v7692_v45 = vcombine.low %v4144_v23, %v4158_v30  ;;  %v4180_v28 = vor.u32 %v4179_v53, %v4176_v62  ;;  %v4185_v60 = vrot.slane %v4183_v20, 5  ;;  %v9356_v58 = vld [vmem:[#allocation2 + $0x118] sm:$0xf]  ;;  %v9357_v43 = vld [vmem:[#allocation2 + $0xc] sm:$0x1] }
 0x265   : > { %v4197_v34 = vshll.u32 %v10569_v35, 16  ;;  %v4204_v33 = vrot.slane %v4202_v51, 4  ;;  %v4205_v31 = vshll.u32 %v3765_v27, 16  ;;  %v4211_v48 = vshll.u32 %v10572_v1, 16  ;;  %v4539_v18 = vld [vmem:[#allocation2 + $0x18] sm:$0xe] }
 0x266   : > { %v4194_v38 = vor.u32 %v4193_v9, %v4190_v15  ;;  %8555 = vmatmul.mubr.bf16.gmra.mrb[8].mxu1 %v7692_v45  ;;  %v4181_v5 = vrot.slane %v4180_v28, 4  ;;  %v7589_v46 = vcombine.low %v9355_v14, %v9356_v58  ;;  %v4172_v62 = vsel %vm10076_vm7, %v4167_v4, %v4171_v55  ;;  %v9358_v30 = vld [vmem:[#allocation2 + $0x14] sm:$0x1]  ;;  %v4540_v9 = vld [vmem:[#allocation2 + $0x20] sm:$0xe] }
 0x267   : > { %v4207_v16 = vrot.slane %v4205_v31, 5  ;;  %v7703_v36 = vrot.slane %v4537_v24, 9  ;;  %v4635_v23 = vrot.slane %v9357_v43, 5  ;;  %v7704_v53 = vrot.slane %v4538_v11, 9  ;;  %v9359_v55 = vld [vmem:[#allocation2 + $0x120] sm:$0xf] }
 0x268   : > { %v4195_v20 = vrot.slane %v4194_v38, 4  ;;  %v4186_v27 = vsel %vm10076_vm7, %v4181_v5, %v4185_v60  ;;  %8414 = vmatprep.mubr.bf16.mxu0 %v7589_v46  ;;  %v4639_v15 = vrot.slane %v9358_v30, 5  ;;  %v4199_v45 = vrot.slane %v4197_v34, 5  ;;  %v9360_v24 = vld [vmem:[#allocation2 + $0x128] sm:$0xf] }
 0x269   : > { %v7693_v51 = vcombine.low %v4172_v62, %v4186_v27  ;;  %v4208_v28 = vor.u32 %v4207_v16, %v4204_v33  ;;  %v7590_v38 = vcombine.low %v9359_v55, %v9360_v24  ;;  %v2768_v60 = vld [vmem:[#allocation2] sm:$0xe]  ;;  %v2769_v31 = vld [vmem:[#allocation2 + $0x8] sm:$0xe]  ;;  %v4213_v5 = vrot.slane %v4211_v48, 5 }
 0x26a   : > { %v4640_v11 = vsel %vm10586_vm12, %v7704_v53, %v4639_v15  ;;  %v7705_v14 = vrot.slane %v4539_v18, 9  ;;  %v4643_v58 = vrot.slane %v10418_v57, 5  ;;  %v4541_v34 = vld [vmem:[#allocation2 + $0x28] sm:$0xe]  ;;  %v4200_v33 = vsel %vm10076_vm7, %v4195_v20, %v4199_v45  ;;  %v4542_v27 = vld [vmem:[#allocation2 + $0x30] sm:$0xe] }
 0x26b   : > { %8558 = vmatprep.mubr.bf16.mxu1 %v7693_v51  ;;  %v4209_v46 = vrot.slane %v4208_v28, 4  ;;  %8415 = vmatmul.mubr.bf16.gmra.mrb[60].mxu0 %v7590_v38  ;;  %v7706_v62 = vrot.slane %v4540_v9, 9  ;;  %v4647_v16 = vrot.slane %v10422_v63, 5  ;;  %v4636_v48 = vsel %vm10586_vm12, %v7703_v36, %v4635_v23  ;;  %v9361_v30 = vld [vmem:[#allocation2 + $0x4] sm:$0x1] }
 0x26c   : > { %v7599_v43 = vrot.slane %v2768_v60, 9  ;;  %v2869_v53 = vrot.slane %v9361_v30, 5  ;;  %v7600_v18 = vrot.slane %v2769_v31, 9  ;;  %v2770_v15 = vld [vmem:[#allocation2 + $0x10] sm:$0xe]  ;;  %v7735_v51 = vcombine.low %v4636_v48, %v4640_v11 }
 0x26d   : > { %v4214_v57 = vsel %vm10076_vm7, %v4209_v46, %v4213_v5  ;;  %v10602_v20 = vsel %vm10586_vm12, %v7705_v14, %v4643_v58  ;;  %v9362_v9 = vld [vmem:[#allocation2 + $0xc] sm:$0x1]  ;;  %v2771_v63 = vld [vmem:[#allocation2 + $0x18] sm:$0xe]  ;;  %v4648_v36 = vsel %vm10586_vm12, %v7706_v62, %v4647_v16  ;;  %v7707_v55 = vrot.slane %v4541_v34, 9 }
 0x26e   : > { %v2873_v45 = vrot.slane %v9362_v9, 5  ;;  %v7694_v28 = vcombine.low %v4200_v33, %v4214_v57  ;;  %v2870_v23 = vsel %vm10586_vm12, %v7599_v43, %v2869_v53  ;;  %v4543_v24 = vld [vmem:[#allocation2 + $0x38] sm:$0xe]  ;;  %v7708_v60 = vrot.slane %v4542_v27, 9  ;;  %v4544_v11 = vld [vmem:[#allocation2 + $0x40] sm:$0xe] }
 0x26f   : > { %v4655_v31 = vrot.slane %v10432_v54, 5  ;;  %v7601_v5 = vrot.slane %v2770_v15, 9  ;;  %v4651_v58 = vrot.slane %v10427_v13, 5  ;;  %v9363_v33 = vld [vmem:[#allocation2 + $0x14] sm:$0x1]  ;;  %v7602_v62 = vrot.slane %v2771_v63, 9 }
 0x270   : > { %v2874_v38 = vsel %vm10586_vm12, %v7600_v18, %v2873_v45  ;;  %8559 = vmatmul.mubr.bf16.gmra.mrb[12].mxu1 %v7694_v28  ;;  %v2877_v46 = vrot.slane %v9363_v33, 5  ;;  %v2772_v16 = vld [vmem:[#allocation2 + $0x20] sm:$0xe]  ;;  %v7736_v34 = vcombine.low %v10602_v20, %v4648_v36  ;;  %v9364_v43 = vld [vmem:[#allocation2 + $0x1c] sm:$0x1]  ;;  %v7709_v18 = vrot.slane %v4543_v24, 9 }
 0x271   : > { %v7631_v14 = vcombine.low %v2870_v23, %v2874_v38  ;;  %8578 = vmatprep.mubr.bf16.mxu1 %v7735_v51  ;;  %v4656_v48 = vsel %vm10586_vm12, %v7708_v60, %v4655_v31  ;;  %v2881_v27 = vrot.slane %v9364_v43, 5  ;;  %v2773_v30 = vld [vmem:[#allocation2 + $0x28] sm:$0xe]  ;;  %v4545_v54 = vld [vmem:[#allocation2 + $0x58] sm:$0xe]  ;;  %v7710_v13 = vrot.slane %v4544_v11, 9 }
 0x272   : > { %v2878_v53 = vsel %vm10586_vm12, %v7601_v5, %v2877_v46  ;;  %v4663_v15 = vrot.slane %v10442_v22, 5  ;;  %v4546_v57 = vld [vmem:[#allocation2 + $0x60] sm:$0xe]  ;;  %v4659_v20 = vrot.slane %v10440_v40, 5  ;;  %v7603_v9 = vrot.slane %v2772_v16, 9 }
 0x273   : > { %8434 = vmatprep.mubr.bf16.mxu0 %v7631_v14  ;;  %v2882_v51 = vsel %vm10586_vm12, %v7602_v62, %v2881_v27  ;;  %v9365_v45 = vld [vmem:[#allocation2 + $0x24] sm:$0x1]  ;;  %v2774_v28 = vld [vmem:[#allocation2 + $0x30] sm:$0xe]  ;;  %v4652_v36 = vsel %vm10586_vm12, %v7707_v55, %v4651_v58  ;;  %v7604_v38 = vrot.slane %v2773_v30, 9  ;;  %v7711_v11 = vrot.slane %v4545_v54, 9 }
 0x274   : > { %v2885_v63 = vrot.slane %v9365_v45, 5  ;;  %v7632_v23 = vcombine.low %v2878_v53, %v2882_v51  ;;  %v9366_v60 = vld [vmem:[#allocation2 + $0x2c] sm:$0x1]  ;;  %v2775_v31 = vld [vmem:[#allocation2 + $0x38] sm:$0xe]  ;;  %v7737_v5 = vcombine.low %v4652_v36, %v4656_v48  ;;  %v10625_v22 = vsel %vm10586_vm12, %v7710_v13, %v4663_v15 }
 0x275   : > { %v2889_v24 = vrot.slane %v9366_v60, 5  ;;  %v4667_v40 = vrot.slane %v10447_v12, 5  ;;  %v9253_v14 = vld [vmem:[#allocation8 + $0x188] sm:$0xff]   ;;  %v7712_v46 = vrot.slane %v4546_v57, 9  ;;  %v4671_v55 = vrot.slane %v10453_v42, 5 }
 0x276   : > { %8435 = vmatmul.mubr.bf16.vlgmr.msra.gmra.mrb[32].mxu0 %v7632_v23  ;;  %v7605_v58 = vrot.slane %v2774_v28, 9  ;;  %v4548_v62 = vld [vmem:[#allocation2 + $0x70] sm:$0xe]  ;;  %v10633_v16 = vsel %vm10586_vm12, %v7709_v18, %v4659_v20  ;;  %v2886_v48 = vsel %vm10586_vm12, %v7603_v9, %v2885_v63  ;;  %v9367_v43 = vld [vmem:[#allocation2 + $0x34] sm:$0x1]  ;;  %v7606_v12 = vrot.slane %v2775_v31, 9 }
 0x277   : > { %v2890_v33 = vsel %vm10586_vm12, %v7604_v38, %v2889_v24  ;;  %v2893_v27 = vrot.slane %v9367_v43, 5  ;;  %v4547_v30 = vld [vmem:[#allocation2 + $0x68] sm:$0xe]  ;;  %v2776_v54 = vld [vmem:[#allocation2 + $0x50] sm:$0xe]  ;;  %8467 = vmatpush3.bf16.msra.mxu0 %v10528_v19  ;;  %v7738_v42 = vcombine.low %v10633_v16, %v10625_v22  ;;  %v10642_v13 = vsel %vm10586_vm12, %v7711_v11, %v4667_v40 }
 0x278   : > { %8579 = vmatmul.mubr.bf16.vlgmr.msra.gmra.mrb[16].mxu1 %v7736_v34  ;;  %v7633_v53 = vcombine.low %v2886_v48, %v2890_v33  ;;  %v9368_v18 = vld [vmem:[#allocation2 + $0x3c] sm:$0x1]  ;;  %v2777_v57 = vld [vmem:[#allocation2 + $0x58] sm:$0xe]  ;;  %v9369_v51 = vld [vmem:[#allocation8 + $0xc8] sm:$0xff]   ;;  %v4672_v19 = vsel %vm10586_vm12, %v7712_v46, %v4671_v55  ;;  %v7714_v20 = vrot.slane %v4548_v62, 9 }
 0x279   : > { %v2897_v15 = vrot.slane %v9368_v18, 5  ;;  %8468 = vmatprep.subr.bf16.mxu0 %v9369_v51  ;;  %8611 = vmatpush3.bf16.msra.mxu1 %v10512_v7  ;;  %v2894_v34 = vsel %vm10586_vm12, %v7605_v58, %v2893_v27  ;;  %v4679_v9 = vrot.slane %v10464_v59, 5  ;;  %v4549_v45 = vld [vmem:[#allocation2 + $0x78] sm:$0xe]  ;;  %v4550_v63 = vld [vmem:[#allocation2 + $0x80] sm:$0xe] }
 0x27a   : > { %8582 = vmatprep.mubr.bf16.mxu1 %v7737_v5  ;;  %8612 = vmatprep.subr.bf16.mxu1 %v9253_v14  ;;  %v9254_v28 = vld [vmem:[#allocation8 + $0x190] sm:$0xff]   ;;  %v7713_v23 = vrot.slane %v4547_v30, 9  ;;  %v7607_v7 = vrot.slane %v2776_v54, 9  ;;  %v2778_v24 = vld [vmem:[#allocation2 + $0x60] sm:$0xe]  ;;  %v4675_v5 = vrot.slane %v10462_v41, 5  ;;  %v7739_v30 = vcombine.low %v10642_v13, %v4672_v19 }
 0x27b   : > { %8438 = vmatprep.mubr.bf16.mxu0 %v7633_v53  ;;  %v2898_v36 = vsel %vm10586_vm12, %v7606_v12, %v2897_v15  ;;  %v9370_v38 = vld [vmem:[#allocation2 + $0x54] sm:$0x1]  ;;  %v7608_v22 = vrot.slane %v2777_v57, 9  ;;  %v9371_v11 = vld [vmem:[#allocation2 + $0x5c] sm:$0x1]  ;;  %8469 = vmatpush3.bf16.msra.mxu0 %v9369_v51  ;;  %v10655_v33 = vsel %vm10586_vm12, %v7714_v20, %v4679_v9  ;;  %v7715_v55 = vrot.slane %v4549_v45, 9 }
 0x27c   : > { %v2901_v60 = vrot.slane %v9370_v38, 5  ;;  %v7634_v31 = vcombine.low %v2894_v34, %v2898_v36  ;;  %v2905_v40 = vrot.slane %v9371_v11, 5  ;;  %v2779_v59 = vld [vmem:[#allocation2 + $0x68] sm:$0xe]  ;;  %v4683_v58 = vrot.slane %v10469_v26, 5  ;;  %v9372_v16 = vld [vmem:[#allocation8 + $0xd0] sm:$0xff]  }
 0x27d   : > { %v4551_v62 = vld [vmem:[#allocation2 + $0x88] sm:$0xe]  ;;  %8470 = vmatprep.subr.bf16.mxu0 %v9372_v16  ;;  %8613 = vmatpush3.bf16.msra.mxu1 %v9253_v14  ;;  %v7716_v48 = vrot.slane %v4550_v63, 9  ;;  %v4687_v43 = vrot.slane %v10472_v49, 5  ;;  %v7609_v27 = vrot.slane %v2778_v24, 9  ;;  %v9255_v53 = vld [vmem:[#allocation8 + $0x198] sm:$0xff]   ;;  %v10666_v14 = vsel %vm10586_vm12, %v7713_v23, %v4675_v5 }
 0x27e   : > { %v2902_v46 = vsel %vm10586_vm12, %v7607_v7, %v2901_v60  ;;  %v2906_v41 = vsel %vm10586_vm12, %v7608_v22, %v2905_v40  ;;  %v4552_v12 = vld [vmem:[#allocation2 + $0x90] sm:$0xe]  ;;  %8614 = vmatprep.subr.bf16.mxu1 %v9254_v28  ;;  %8439 = vmatmul.mubr.bf16.gmra.mrb[36].mxu0 %v7634_v31  ;;  %v9373_v18 = vld [vmem:[#allocation2 + $0x64] sm:$0x1]  ;;  %v7610_v15 = vrot.slane %v2779_v59, 9  ;;  %v7717_v20 = vrot.slane %v4551_v62, 9 }
 0x27f   : > { %v7635_v54 = vcombine.low %v2902_v46, %v2906_v41  ;;  %v2909_v26 = vrot.slane %v9373_v18, 5  ;;  %v2780_v57 = vld [vmem:[#allocation2 + $0x70] sm:$0xe]  ;;  %v9374_v51 = vld [vmem:[#allocation2 + $0x6c] sm:$0x1]  ;;  %v4691_v49 = vrot.slane %v10479_v39, 5  ;;  %8471 = vmatpush3.bf16.msra.mxu0 %v9372_v16  ;;  %v7740_v13 = vcombine.low %v10666_v14, %v10655_v33 }
 0x280   : > { %v2913_v34 = vrot.slane %v9374_v51, 5  ;;  %v2781_v9 = vld [vmem:[#allocation2 + $0x78] sm:$0xe]  ;;  %8583 = vmatmul.mubr.bf16.gmra.mrb[20].mxu1 %v7738_v42  ;;  %v7718_v45 = vrot.slane %v4552_v12, 9  ;;  %v4695_v63 = vrot.slane %v10482_v0, 5  ;;  %v10676_v23 = vsel %vm10586_vm12, %v7715_v55, %v4683_v58  ;;  %v9256_v24 = vld [vmem:[#allocation8 + $0x1a0] sm:$0xff]  }
 0x281   : > { %8442 = vmatprep.mubr.bf16.mxu0 %v7635_v54  ;;  %v2910_v19 = vsel %vm10586_vm12, %v7609_v27, %v2909_v26  ;;  %v4553_v36 = vld [vmem:[#allocation2 + $0xa8] sm:$0xe]  ;;  %8586 = vmatprep.mubr.bf16.mxu1 %v7739_v30  ;;  %v4688_v39 = vsel %vm10586_vm12, %v7716_v48, %v4687_v43  ;;  %v7611_v42 = vrot.slane %v2780_v57, 9  ;;  %v9375_v7 = vld [vmem:[#allocation2 + $0x74] sm:$0x1]  ;;  %v10684_v0 = vsel %vm10586_vm12, %v7717_v20, %v4691_v49  ;;  %v9377_v59 = vld [vmem:[#allocation8 + $0xd8] sm:$0xff]  }
 0x282   : > { %8615 = vmatpush3.bf16.msra.mxu1 %v9254_v28  ;;  %v2917_v38 = vrot.slane %v9375_v7, 5  ;;  %v4554_v60 = vld [vmem:[#allocation2 + $0xb0] sm:$0xe]  ;;  %v2914_v31 = vsel %vm10586_vm12, %v7610_v15, %v2913_v34  ;;  %v7612_v28 = vrot.slane %v2781_v9, 9  ;;  %v9376_v5 = vld [vmem:[#allocation2 + $0x7c] sm:$0x1]  ;;  %8472 = vmatprep.subr.bf16.mxu0 %v9377_v59  ;;  %v10688_v46 = vsel %vm10586_vm12, %v7718_v45, %v4695_v63 }
 0x283   : > { %8616 = vmatprep.subr.bf16.mxu1 %v9255_v53  ;;  %v2921_v22 = vrot.slane %v9376_v5, 5  ;;  %v2782_v11 = vld [vmem:[#allocation2 + $0x80] sm:$0xe]  ;;  %v2783_v40 = vld [vmem:[#allocation2 + $0x88] sm:$0xe]  ;;  %v7636_v33 = vcombine.low %v2910_v19, %v2914_v31  ;;  %v7719_v55 = vrot.slane %v4553_v36, 9  ;;  %8473 = vmatpush3.bf16.msra.mxu0 %v9377_v59  ;;  %v7741_v57 = vcombine.low %v10676_v23, %v4688_v39 }
 0x284   : > { %v4699_v58 = vrot.slane %v10486_v6, 5  ;;  %v2918_v62 = vsel %vm10586_vm12, %v7611_v42, %v2917_v38  ;;  %v7720_v41 = vrot.slane %v4554_v60, 9  ;;  %v4703_v48 = vrot.slane %v10494_v61, 5  ;;  %v4555_v43 = vld [vmem:[#allocation2 + $0xb8] sm:$0xe]  ;;  %v9378_v12 = vld [vmem:[#allocation8 + $0xe0] sm:$0xff]  }
 0x285   : > { %v2922_v16 = vsel %vm10586_vm12, %v7612_v28, %v2921_v22  ;;  %v4556_v27 = vld [vmem:[#allocation2 + $0xc0] sm:$0xe]  ;;  %8474 = vmatprep.subr.bf16.mxu0 %v9378_v12  ;;  %v7613_v54 = vrot.slane %v2782_v11, 9  ;;  %v9379_v18 = vld [vmem:[#allocation2 + $0x84] sm:$0x1]  ;;  %v7614_v6 = vrot.slane %v2783_v40, 9  ;;  %v7742_v14 = vcombine.low %v10684_v0, %v10688_v46 }
 0x286   : > { %8617 = vmatpush3.bf16.msra.mxu1 %v9255_v53  ;;  %v7637_v30 = vcombine.low %v2918_v62, %v2922_v16  ;;  %v2925_v26 = vrot.slane %v9379_v18, 5  ;;  %v2784_v15 = vld [vmem:[#allocation2 + $0xa0] sm:$0xe]  ;;  %8443 = vmatmul.mubr.bf16.gmra.mrb[40].mxu0 %v7636_v33  ;;  %v10701_v61 = vsel %vm10586_vm12, %v7720_v41, %v4703_v48  ;;  %v9380_v51 = vld [vmem:[#allocation2 + $0x8c] sm:$0x1]  ;;  %v10705_v9 = vsel %vm10586_vm12, %v7719_v55, %v4699_v58  ;;  %v9258_v58 = vld [vmem:[#allocation8 + $0x1b0] sm:$0xff]  }
 0x287   : > { %8618 = vmatprep.subr.bf16.mxu1 %v9256_v24  ;;  %v2929_v34 = vrot.slane %v9380_v51, 5  ;;  %v2785_v53 = vld [vmem:[#allocation2 + $0xa8] sm:$0xe]  ;;  %v7721_v19 = vrot.slane %v4555_v43, 9  ;;  %v7722_v45 = vrot.slane %v4556_v27, 9  ;;  %v4711_v63 = vrot.slane %v10506_v2, 5  ;;  %8475 = vmatpush3.bf16.msra.mxu0 %v9378_v12 }
 0x288   : > { %v4557_v20 = vld [vmem:[#allocation2 + $0xc8] sm:$0xe]  ;;  %8446 = vmatprep.mubr.bf16.mxu0 %v7637_v30  ;;  %v4558_v36 = vld [vmem:[#allocation2 + $0xd0] sm:$0xe]  ;;  %8587 = vmatmul.mubr.bf16.gmra.mrb[24].mxu1 %v7740_v13  ;;  %v7743_v23 = vcombine.low %v10705_v9, %v10701_v61  ;;  %v4707_v39 = vrot.slane %v10502_v56, 5  ;;  %v7615_v42 = vrot.slane %v2784_v15, 9  ;;  %v2926_v28 = vsel %vm10586_vm12, %v7613_v54, %v2925_v26 }
 0x289   : > { %v9257_v49 = vld [vmem:[#allocation8 + $0x1a8] sm:$0xff]   ;;  %v9381_v7 = vld [vmem:[#allocation2 + $0xa4] sm:$0x1]  ;;  %v2786_v60 = vld [vmem:[#allocation2 + $0xb0] sm:$0xe]  ;;  %8590 = vmatprep.mubr.bf16.mxu1 %v7741_v57  ;;  %v2930_v2 = vsel %vm10586_vm12, %v7614_v6, %v2929_v34  ;;  %v7616_v13 = vrot.slane %v2785_v53, 9  ;;  %v10717_v56 = vsel %vm10586_vm12, %v7722_v45, %v4711_v63 }
 0x28a   : > { %v2933_v38 = vrot.slane %v9381_v7, 5  ;;  %v9382_v31 = vld [vmem:[#allocation8 + $0xe8] sm:$0xff]   ;;  %8619 = vmatpush3.bf16.msra.mxu1 %v9256_v24  ;;  %v2787_v11 = vld [vmem:[#allocation2 + $0xb8] sm:$0xe]  ;;  %v7723_v59 = vrot.slane %v4557_v20, 9  ;;  %v4715_v33 = vrot.slane %v10510_v21, 5  ;;  %v7638_v43 = vcombine.low %v2926_v28, %v2930_v2 }
 0x28b   : > { %8476 = vmatprep.subr.bf16.mxu0 %v9382_v31  ;;  %v9383_v5 = vld [vmem:[#allocation2 + $0xac] sm:$0x1]  ;;  %8620 = vmatprep.subr.bf16.mxu1 %v9257_v49  ;;  %v4559_v55 = vld [vmem:[#allocation2 + $0xd8] sm:$0xe]  ;;  %v7724_v62 = vrot.slane %v4558_v36, 9  ;;  %v4719_v16 = vrot.slane %v10521_v47, 5  ;;  %v10727_v27 = vsel %vm10586_vm12, %v7721_v19, %v4707_v39 }
 0x28c   : > { %v2937_v22 = vrot.slane %v9383_v5, 5  ;;  %v2934_v40 = vsel %vm10586_vm12, %v7615_v42, %v2933_v38  ;;  %v7617_v41 = vrot.slane %v2786_v60, 9  ;;  %v4560_v48 = vld [vmem:[#allocation2 + $0xe0] sm:$0xe]  ;;  %8477 = vmatpush3.bf16.msra.mxu0 %v9382_v31  ;;  %v9384_v30 = vld [vmem:[#allocation2 + $0xb4] sm:$0x1]  ;;  %v7744_v34 = vcombine.low %v10727_v27, %v10717_v56 }
 0x28d   : > { %v2941_v21 = vrot.slane %v9384_v30, 5  ;;  %v2788_v54 = vld [vmem:[#allocation2 + $0xc0] sm:$0xe]  ;;  %v9385_v18 = vld [vmem:[#allocation8 + $0xf0] sm:$0xff]   ;;  %v7618_v26 = vrot.slane %v2787_v11, 9  ;;  %v7725_v57 = vrot.slane %v4559_v55, 9  ;;  %v10734_v53 = vsel %vm10586_vm12, %v7723_v59, %v4715_v33 }
 0x28e   : > { %v2938_v24 = vsel %vm10586_vm12, %v7616_v13, %v2937_v22  ;;  %8478 = vmatprep.subr.bf16.mxu0 %v9385_v18  ;;  %v9386_v6 = vld [vmem:[#allocation2 + $0xbc] sm:$0x1]  ;;  %v4723_v47 = vrot.slane %v10526_v8, 5  ;;  %8621 = vmatpush3.bf16.msra.mxu1 %v9257_v49  ;;  %v2789_v51 = vld [vmem:[#allocation2 + $0xc8] sm:$0xe]  ;;  %v7726_v20 = vrot.slane %v4560_v48, 9  ;;  %v10739_v8 = vsel %vm10586_vm12, %v7724_v62, %v4719_v16 }
 0x28f   : > { %v7639_v12 = vcombine.low %v2934_v40, %v2938_v24  ;;  %v2945_v15 = vrot.slane %v9386_v6, 5  ;;  %8447 = vmatmul.mubr.bf16.gmra.mrb[44].mxu0 %v7638_v43  ;;  %v4727_v19 = vrot.slane %v10532_v17, 5  ;;  %v4561_v45 = vld [vmem:[#allocation2 + $0xf8] sm:$0xe]  ;;  %8622 = vmatprep.subr.bf16.mxu1 %v9258_v58  ;;  %v2942_v49 = vsel %vm10586_vm12, %v7617_v41, %v2941_v21  ;;  %v9387_v39 = vld [vmem:[#allocation2 + $0xc4] sm:$0x1] }
 0x290   : > { %v9259_v63 = vld [vmem:[#allocation8 + $0x1b8] sm:$0xff]   ;;  %v7619_v36 = vrot.slane %v2788_v54, 9  ;;  %v2949_v42 = vrot.slane %v9387_v39, 5  ;;  %v4562_v7 = vld [vmem:[#allocation2 + $0x100] sm:$0xe]  ;;  %8479 = vmatpush3.bf16.msra.mxu0 %v9385_v18  ;;  %8591 = vmatmul.mubr.bf16.gmra.mrb[28].mxu1 %v7742_v14  ;;  %v10748_v17 = vsel %vm10586_vm12, %v7725_v57, %v4723_v47  ;;  %v7620_v60 = vrot.slane %v2789_v51, 9 }
 0x291   : > { %8450 = vmatprep.mubr.bf16.mxu0 %v7639_v12  ;;  %v10752_v38 = vsel %vm10586_vm12, %v7726_v20, %v4727_v19  ;;  %v9388_v31 = vld [vmem:[#allocation2 + $0xcc] sm:$0x1]  ;;  %v2790_v2 = vld [vmem:[#allocation2 + $0xd0] sm:$0xe]  ;;  %v9389_v13 = vld [vmem:[#allocation8 + $0xf8] sm:$0xff]   ;;  %8594 = vmatprep.mubr.bf16.mxu1 %v7743_v23  ;;  %v2946_v0 = vsel %vm10586_vm12, %v7618_v26, %v2945_v15  ;;  %v7727_v14 = vrot.slane %v4561_v45, 9  ;;  %v7745_v33 = vcombine.low %v10734_v53, %v10739_v8 }
 0x292   : > { %v2953_v28 = vrot.slane %v9388_v31, 5  ;;  %8480 = vmatprep.subr.bf16.mxu0 %v9389_v13  ;;  %v7746_v46 = vcombine.low %v10748_v17, %v10752_v38  ;;  %v4731_v5 = vrot.slane %v10536_v52, 5  ;;  %v4563_v22 = vld [vmem:[#allocation2 + $0x108] sm:$0xe]  ;;  %8623 = vmatpush3.bf16.msra.mxu1 %v9258_v58  ;;  %v2950_v11 = vsel %vm10586_vm12, %v7619_v36, %v2949_v42  ;;  %v4564_v9 = vld [vmem:[#allocation2 + $0x110] sm:$0xe] }
 0x293   : > { %v7728_v59 = vrot.slane %v4562_v7, 9  ;;  %v4735_v61 = vrot.slane %v10542_v3, 5  ;;  %8624 = vmatprep.subr.bf16.mxu1 %v9259_v63  ;;  %v10767_v23 = vld [vmem:[#allocation8 + $0x1c0] sm:$0xff]   ;;  %v7640_v55 = vcombine.low %v2942_v49, %v2946_v0  ;;  %v2791_v24 = vld [vmem:[#allocation2 + $0xd8] sm:$0xe]  ;;  %v7621_v58 = vrot.slane %v2790_v2, 9 }
 0x294   : > { %v2954_v40 = vsel %vm10586_vm12, %v7620_v60, %v2953_v28  ;;  %v2792_v62 = vld [vmem:[#allocation2 + $0xf0] sm:$0xe]  ;;  %8481 = vmatpush3.bf16.msra.mxu0 %v9389_v13  ;;  %v10773_v16 = vsel %vm10586_vm12, %v7727_v14, %v4731_v5  ;;  %v7729_v41 = vrot.slane %v4563_v22, 9  ;;  %v4739_v48 = vrot.slane %v10549_v32, 5  ;;  %v2793_v43 = vld [vmem:[#allocation2 + $0xf8] sm:$0xe] }
 0x295   : > { %v7641_v52 = vcombine.low %v2950_v11, %v2954_v40  ;;  %v10777_v3 = vsel %vm10586_vm12, %v7728_v59, %v4735_v61  ;;  %v9390_v30 = vld [vmem:[#allocation2 + $0xd4] sm:$0x1]  ;;  %v7730_v54 = vrot.slane %v4564_v9, 9  ;;  %v4743_v18 = vrot.slane %v10552_v44, 5  ;;  %v4565_v26 = vld [vmem:[#allocation2 + $0x118] sm:$0xe] }
 0x296   : > { %v7747_v12 = vcombine.low %v10773_v16, %v10777_v3  ;;  %v2957_v21 = vrot.slane %v9390_v30, 5  ;;  %8625 = vmatpush3.bf16.msra.mxu1 %v9259_v63  ;;  %v7622_v6 = vrot.slane %v2791_v24, 9  ;;  %v9391_v15 = vld [vmem:[#allocation2 + $0xdc] sm:$0x1]  ;;  %v7623_v47 = vrot.slane %v2792_v62, 9 }
 0x297   : > { %8451 = vmatmul.mubr.bf16.gmra.mrb[48].mxu0 %v7640_v55  ;;  %v2961_v57 = vrot.slane %v9391_v15, 5  ;;  %v9392_v51 = vld [vmem:[#allocation2 + $0xf4] sm:$0x1]  ;;  %v4566_v20 = vld [vmem:[#allocation2 + $0x120] sm:$0xe]  ;;  %8658 = vmatprep.subr.bf16.mxu1 %v10767_v23  ;;  %v10786_v32 = vsel %vm10586_vm12, %v7729_v41, %v4739_v48  ;;  %v10790_v44 = vsel %vm10586_vm12, %v7730_v54, %v4743_v18  ;;  %v7624_v19 = vrot.slane %v2793_v43, 9 }
 0x298   : > { %v2965_v53 = vrot.slane %v9392_v51, 5  ;;  %8454 = vmatprep.mubr.bf16.mxu0 %v7641_v52  ;;  %v9393_v45 = vld [vmem:[#allocation2 + $0xfc] sm:$0x1]  ;;  %8595 = vmatmul.mubr.bf16.gmra.mrb[0].mxu1 %v7744_v34  ;;  %v7748_v8 = vcombine.low %v10786_v32, %v10790_v44  ;;  %v7731_v49 = vrot.slane %v4565_v26, 9  ;;  %v4747_v36 = vrot.slane %v10559_v10, 5 }
 0x299   : > { %v2969_v63 = vrot.slane %v9393_v45, 5  ;;  %v4567_v39 = vld [vmem:[#allocation2 + $0x128] sm:$0xe]  ;;  %8598 = vmatprep.mubr.bf16.mxu1 %v7745_v33  ;;  %v2958_v42 = vsel %vm10586_vm12, %v7621_v58, %v2957_v21  ;;  %v7732_v7 = vrot.slane %v4566_v20, 9  ;;  %v4751_v60 = vrot.slane %v10562_v50, 5 }
 0x29a   : > { %v4568_v31 = vld [vmem:[#allocation2 + $0x130] sm:$0xe]  ;;  %v2962_v28 = vsel %vm10586_vm12, %v7622_v6, %v2961_v57  ;;  %v2966_v56 = vsel %vm10586_vm12, %v7623_v47, %v2965_v53  ;;  %v2794_v34 = vld [vmem:[#allocation2 + $0x100] sm:$0xe]  ;;  %v4748_v10 = vsel %vm10586_vm12, %v7731_v49, %v4747_v36  ;;  %v7733_v13 = vrot.slane %v4567_v39, 9 }
 0x29b   : > { %v2970_v27 = vsel %vm10586_vm12, %v7624_v19, %v2969_v63  ;;  %v4752_v2 = vsel %vm10586_vm12, %v7732_v7, %v4751_v60  ;;  %v4755_v50 = vrot.slane %v10569_v35, 5  ;;  %v2797_v0 = vld [vmem:[#allocation2 + $0x118] sm:$0xe]  ;;  %v7642_v14 = vcombine.low %v2958_v42, %v2962_v28  ;;  %v2795_v22 = vld [vmem:[#allocation2 + $0x108] sm:$0xe] }
 0x29c   : > { %v7749_v5 = vcombine.low %v4748_v10, %v4752_v2  ;;  %v7734_v11 = vrot.slane %v4568_v31, 9  ;;  %v4759_v40 = vrot.slane %v10572_v1, 5  ;;  %v7643_v59 = vcombine.low %v2966_v56, %v2970_v27  ;;  %v9394_v9 = vld [vmem:[#allocation2 + $0x104] sm:$0x1]  ;;  %v2796_v55 = vld [vmem:[#allocation2 + $0x110] sm:$0xe] }
 0x29d   : > { %v7625_v61 = vrot.slane %v2794_v34, 9  ;;  %v2973_v33 = vrot.slane %v9394_v9, 5  ;;  %v784_v52 = vld [vmem:[#allocation2 + $0x48] sm:$0x1]  ;;  %v4756_v24 = vsel %vm10586_vm12, %v7733_v13, %v4755_v50  ;;  %v7628_v58 = vrot.slane %v2797_v0, 9  ;;  %v9270_v2 = vld [vmem:[#allocation8 + $0x1d0] sm:$0xff]  }
 0x29e   : > { %v4760_v35 = vsel %vm10586_vm12, %v7734_v11, %v4759_v40  ;;  %v9395_v62 = vld [vmem:[#allocation2 + $0x11c] sm:$0x1]  ;;  %v814_v48 = vld [vmem:[#allocation2 + $0x98] sm:$0x1]  ;;  %v844_v43 = vld [vmem:[#allocation2 + $0xe8] sm:$0x1] }
 0x29f   : > { %8455 = vmatmul.mubr.bf16.gmra.mrb[52].mxu0 %v7642_v14  ;;  %v2985_v41 = vrot.slane %v9395_v62, 5  ;;  %v7626_v1 = vrot.slane %v2795_v22, 9  ;;  %v9396_v30 = vld [vmem:[#allocation2 + $0x10c] sm:$0x1]  ;;  %v7750_v54 = vcombine.low %v4756_v24, %v4760_v35  ;;  %v874_v18 = vld [vmem:[#allocation2 + $0x138] sm:$0x1]  ;;  %v2974_v47 = vsel %vm10586_vm12, %v7625_v61, %v2973_v33 }
 0x2a0   : > { %8458 = vmatprep.mubr.bf16.mxu0 %v7643_v59  ;;  %v2977_v21 = vrot.slane %v9396_v30, 5  ;;  %8599 = vmatmul.mubr.bf16.gmra.mrb[4].mxu1 %v7746_v46  ;;  %v7627_v26 = vrot.slane %v2796_v55, 9  ;;  %v9397_v6 = vld [vmem:[#allocation2 + $0x114] sm:$0x1]  ;;  %v785_v57 = vsel %vm9902_vm3, 0, %v784_v52  ;;  %v815_v51 = vsel %vm9902_vm3, 0, %v814_v48 }
 0x2a1   : > { %v2981_v15 = vrot.slane %v9397_v6, 5  ;;  %8602 = vmatprep.mubr.bf16.mxu1 %v7747_v12  ;;  %786 = vst [vmem:[#allocation2 + $0x48] sm:$0x1] %v785_v57  ;;  %v845_v17 = vsel %vm9902_vm3, 0, %v844_v43  ;;  %v2986_v38 = vsel %vm10586_vm12, %v7628_v58, %v2985_v41  ;;  %v2798_v46 = vld [vmem:[#allocation2 + $0x120] sm:$0xe] }
 0x2a2   : > { %816 = vst [vmem:[#allocation2 + $0x98] sm:$0x1] %v815_v51  ;;  %846 = vst [vmem:[#allocation2 + $0xe8] sm:$0x1] %v845_v17  ;;  %v875_v16 = vsel %vm9902_vm3, 0, %v874_v18  ;;  %v2978_v3 = vsel %vm10586_vm12, %v7626_v1, %v2977_v21  ;;  %v7629_v45 = vrot.slane %v2798_v46, 9 }
 0x2a3   : > { %876 = vst [vmem:[#allocation2 + $0x138] sm:$0x1] %v875_v16  ;;  %v7644_v12 = vcombine.low %v2974_v47, %v2978_v3  ;;  %v2982_v53 = vsel %vm10586_vm12, %v7627_v26, %v2981_v15  ;;  %v2799_v20 = vld [vmem:[#allocation2 + $0x128] sm:$0xe]  ;;  %v9398_v63 = vld [vmem:[#allocation2 + $0x124] sm:$0x1] }
 0x2a4   : > { %v7645_v19 = vcombine.low %v2982_v53, %v2986_v38  ;;  %v2989_v49 = vrot.slane %v9398_v63, 5  ;;  %v7630_v36 = vrot.slane %v2799_v20, 9  ;;  %v9399_v39 = vld [vmem:[#allocation2 + $0x12c] sm:$0x1]  ;;  %v9263_v31 = vld [vmem:[#allocation2 + $0x8] ss:$8 sps:$4 sm:$0xff]  }
 0x2a5   : > { %v2993_v42 = vrot.slane %v9399_v39, 5  ;;  %v906_v28 = vld [vmem:[#allocation2 + $0x4c] sm:$0x1]  ;;  %v9260_v56 = vld [vmem:[#allocation2 + $0x10] ss:$8 sps:$4 sm:$0xff]   ;;  %v9280_v9 = vld [vmem:[#allocation8 + $0x1e0] sm:$0xff]  }
 0x2a6   : > { %v2990_v25 = vsel %vm10586_vm12, %v7629_v45, %v2989_v49  ;;  %v907_v27 = vsel %vm9909_vm4, 0, %v906_v28  ;;  %v9266_v32 = vld [vmem:[#allocation2 + $0x18] ss:$8 sps:$4 sm:$0xff]   ;;  %v9268_v44 = vld [vmem:[#allocation2 + $0x28] ss:$8 sps:$4 sm:$0xff]  }
 0x2a7   : > { %8459 = vmatmul.mubr.bf16.gmra.mrb[56].mxu0 %v7644_v12  ;;  %v2994_v7 = vsel %vm10586_vm12, %v7630_v36, %v2993_v42  ;;  %908 = vst [vmem:[#allocation2 + $0x4c] sm:$0x1] %v907_v27  ;;  %v9265_v34 = vld [vmem:[#allocation8 + $0x1c8] sm:$0xff]   ;;  %v9264_v10 = vld [vmem:[#allocation2 + $0x30] ss:$8 sps:$4 sm:$0xff]  }
 0x2a8   : > { %8462 = vmatprep.mubr.bf16.mxu0 %v7645_v19  ;;  %8603 = vmatmul.mubr.bf16.gmra.mrb[8].mxu1 %v7748_v8  ;;  %v7646_v60 = vcombine.low %v2990_v25, %v2994_v7  ;;  %v9262_v8 = vld [vmem:[#allocation2 + $0x20] ss:$8 sps:$4 sm:$0xff]   ;;  %v9275_v14 = vld [vmem:[#allocation8 + $0x1d8] sm:$0xff]   ;;  %v5471_v40 = vld [vmem:[#allocation2 + $0x14] sm:$0x1] }
 0x2a9   : > { %8606 = vmatprep.mubr.bf16.mxu1 %v7749_v5  ;;  %v9271_v13 = vld [vmem:[#allocation2 + $0x38] ss:$8 sps:$4 sm:$0xff]   ;;  %v5470_v5 = vld [vmem:[#allocation2 + $0x10] sm:$0xf]  ;;  %v936_v11 = vld [vmem:[#allocation2 + $0x9c] sm:$0x1] }
 0x2aa   : > { %v9273_v50 = vld [vmem:[#allocation2 + $0x58] ss:$8 sps:$4 sm:$0xff]   ;;  %v5535_v59 = vshrl.u32 %v5470_v5, 16  ;;  %v9276_v61 = vld [vmem:[#allocation2 + $0x68] ss:$8 sps:$4 sm:$0xff]   ;;  %v937_v24 = vsel %vm9909_vm4, 0, %v936_v11 }
 0x2ab   : > { %v9267_v0 = vld [vmem:[#allocation2 + $0x40] ss:$8 sps:$4 sm:$0xff]   ;;  %v5472_v33 = vld [vmem:[#allocation2 + $0x18] sm:$0xf]  ;;  %v5544_v62 = vshll.u32 %v5471_v40, 16  ;;  %v9287_v3 = vld [vmem:[#allocation8 + $0x1f0] sm:$0xff]  }
 0x2ac   : > { %v9269_v22 = vld [vmem:[#allocation2 + $0x60] ss:$8 sps:$4 sm:$0xff]   ;;  %v9272_v35 = vld [vmem:[#allocation2 + $0x70] ss:$8 sps:$4 sm:$0xff]   ;;  %938 = vst [vmem:[#allocation2 + $0x9c] sm:$0x1] %v937_v24 }
 0x2ad   : > { %v5474_v55 = vld [vmem:[#allocation2 + $0x20] sm:$0xf]  ;;  %v5476_v52 = vld [vmem:[#allocation2 + $0x28] sm:$0xf]  ;;  %v5478_v41 = vld [vmem:[#allocation2 + $0x30] sm:$0xf] }
 0x2ae   : > { %v9278_v58 = vld [vmem:[#allocation2 + $0x78] ss:$8 sps:$4 sm:$0xff]   ;;  %v10851_v48 = vld [vmem:[#allocation2 + $0x1c] sm:$0x1]  ;;  %v5537_v43 = vrot.slane %v5535_v59, 4  ;;  %v5549_v30 = vshrl.u32 %v5472_v33, 16 }
 0x2af   : > { %8463 = vmatmul.mubr.bf16.gmra.mrb[60].mxu0 %v7646_v60  ;;  %v5552_v21 = vshll.u32 %v5472_v33, 16  ;;  %v5563_v18 = vshrl.u32 %v5474_v55, 16  ;;  %v5566_v26 = vshll.u32 %v5474_v55, 16  ;;  %v5577_v6 = vshrl.u32 %v5476_v52, 16  ;;  %v9274_v57 = vld [vmem:[#allocation2 + $0x80] ss:$8 sps:$4 sm:$0xff]  }
 0x2b0   : > { %8482 = vmatprep.mubr.bf16.mxu0 %v9263_v31  ;;  %8607 = vmatmul.mubr.bf16.gmra.mrb[12].mxu1 %v7750_v54  ;;  %v9284_v54 = vld [vmem:[#allocation8 + $0x1e8] sm:$0xff]   ;;  %v5580_v15 = vshll.u32 %v5476_v52, 16  ;;  %v5591_v47 = vshrl.u32 %v5478_v41, 16  ;;  %v5594_v51 = vshll.u32 %v5478_v41, 16  ;;  %v5558_v17 = vshll.u32 %v10851_v48, 16 }
 0x2b1   : > { %8626 = vmatprep.mubr.bf16.mxu1 %v9260_v56  ;;  %v10854_v38 = vld [vmem:[#allocation2 + $0x24] sm:$0x1]  ;;  %v5480_v46 = vld [vmem:[#allocation2 + $0x38] sm:$0xf]  ;;  %v5482_v16 = vld [vmem:[#allocation2 + $0x40] sm:$0xf] }
 0x2b2   : > { %v10856_v53 = vrot.slane %v5544_v62, 5  ;;  %v5551_v20 = vrot.slane %v5549_v30, 4  ;;  %v5554_v19 = vrot.slane %v5552_v21, 5  ;;  %v5477_v45 = vld [vmem:[#allocation2 + $0x2c] sm:$0x1]  ;;  %v5565_v49 = vrot.slane %v5563_v18, 4 }
 0x2b3   : > { %v5484_v63 = vld [vmem:[#allocation2 + $0x48] sm:$0xf]  ;;  %v5568_v36 = vrot.slane %v5566_v26, 5  ;;  %v5579_v39 = vrot.slane %v5577_v6, 4  ;;  %v5582_v42 = vrot.slane %v5580_v15, 5  ;;  %v5593_v60 = vrot.slane %v5591_v47, 4 }
 0x2b4   : > { %v5486_v25 = vld [vmem:[#allocation2 + $0x60] sm:$0xf]  ;;  %v5479_v7 = vld [vmem:[#allocation2 + $0x34] sm:$0x1]  ;;  %v5596_v31 = vrot.slane %v5594_v51, 5  ;;  %v5605_v28 = vshrl.u32 %v5480_v46, 16 }
 0x2b5   : > { %v5608_v56 = vshll.u32 %v5480_v46, 16  ;;  %v9281_v27 = vld [vmem:[#allocation2 + $0x88] ss:$8 sps:$4 sm:$0xff]   ;;  %v5569_v11 = vor.u32 %v5568_v36, %v5565_v49  ;;  %v5586_v40 = vshll.u32 %v5477_v45, 16  ;;  %v5600_v59 = vshll.u32 %v5479_v7, 16  ;;  %v10869_v26 = vld [vmem:[#allocation8 + $0x200] sm:$0xff]  }
 0x2b6   : > { %v5607_v33 = vrot.slane %v5605_v28, 4  ;;  %v10861_v62 = vld [vmem:[#allocation2 + $0x3c] sm:$0x1]  ;;  %v5560_v18 = vrot.slane %v5558_v17, 5  ;;  %v5490_v15 = vld [vmem:[#allocation2 + $0x70] sm:$0xf] }
 0x2b7   : > { %8483 = vmatmul.mubr.bf16.vlgmr.msra.gmra.mrb[32].mxu0 %v9266_v32  ;;  %v5619_v32 = vshrl.u32 %v5482_v16, 16  ;;  %v5610_v55 = vrot.slane %v5608_v56, 5  ;;  %v5588_v51 = vrot.slane %v5586_v40, 5  ;;  %v966_v46 = vld [vmem:[#allocation2 + $0xec] sm:$0x1]  ;;  %v5678_v7 = vshll.u32 %v5490_v15, 16 }
 0x2b8   : > { %8486 = vmatprep.mubr.bf16.mxu0 %v9268_v44  ;;  %8627 = vmatmul.mubr.bf16.vlgmr.msra.gmra.mrb[16].mxu1 %v9262_v8  ;;  %v5622_v44 = vshll.u32 %v5482_v16, 16  ;;  %v5633_v8 = vshrl.u32 %v5484_v63, 16  ;;  %v9282_v16 = vld [vmem:[#allocation2 + $0xc0] ss:$8 sps:$4 sm:$0xff]   ;;  %v10874_v48 = vld [vmem:[#allocation2 + $0x4c] sm:$0x1] }
 0x2b9   : > { %8659 = vmatpush3.bf16.msra.mxu1 %v10767_v23  ;;  %8630 = vmatprep.mubr.bf16.mxu1 %v9264_v10  ;;  %v5538_v23 = vshll.u32 %v5470_v5, 16  ;;  %v5555_v10 = vor.u32 %v5554_v19, %v5551_v20  ;;  %v9290_v5 = vld [vmem:[#allocation8 + $0x1f8] sm:$0xff]   ;;  %v5621_v52 = vrot.slane %v5619_v32, 4  ;;  %v5614_v20 = vshll.u32 %v10861_v62, 16  ;;  %v10872_v19 = vld [vmem:[#allocation2 + $0x44] sm:$0x1] }
 0x2ba   : > { %8660 = vmatprep.subr.bf16.mxu1 %v9265_v34  ;;  %v5624_v24 = vrot.slane %v5622_v44, 5  ;;  %v10876_v45 = vld [vmem:[#allocation2 + $0x64] sm:$0x1]  ;;  %v5628_v32 = vshll.u32 %v10872_v19, 16  ;;  %v5492_v44 = vld [vmem:[#allocation2 + $0x78] sm:$0xf] }
 0x2bb   : > { %v5540_v1 = vrot.slane %v5538_v23, 5  ;;  %v9279_v23 = vld [vmem:[#allocation2 + $0xb0] ss:$8 sps:$4 sm:$0xff]   ;;  %v5680_v40 = vrot.slane %v5678_v7, 5 }
 0x2bd   : > { %8661 = vmatpush3.bf16.msra.mxu1 %v9265_v34  ;;  %v5541_v12 = vor.u32 %v5540_v1, %v5537_v43  ;;  %v5636_v34 = vshll.u32 %v5484_v63, 16 }
 0x2be   : > { %8662 = vmatprep.subr.bf16.mxu1 %v9270_v2 }
 0x2bf   : > { %8487 = vmatmul.mubr.bf16.gmra.mrb[36].mxu0 %v9271_v13  ;;  %v5488_v13 = vld [vmem:[#allocation2 + $0x68] sm:$0xf] }
 0x2c0   : > { %8490 = vmatprep.mubr.bf16.mxu0 %v9273_v50  ;;  %8631 = vmatmul.mubr.bf16.gmra.mrb[20].mxu1 %v9267_v0  ;;  %v5647_v50 = vshrl.u32 %v5486_v25, 16  ;;  %v5650_v0 = vshll.u32 %v5486_v25, 16  ;;  %v5661_v1 = vshrl.u32 %v5488_v13, 16  ;;  %v5664_v30 = vshll.u32 %v5488_v13, 16 }
 0x2c1   : > { %8634 = vmatprep.mubr.bf16.mxu1 %v9269_v22  ;;  %8663 = vmatpush3.bf16.msra.mxu1 %v9270_v2  ;;  %v5572_v2 = vshll.u32 %v10854_v38, 16  ;;  %v10859_v22 = vrot.slane %v5541_v12, 4  ;;  %v5611_v38 = vor.u32 %v5610_v55, %v5607_v33  ;;  %v5602_v12 = vrot.slane %v5600_v59, 5  ;;  %v10899_v33 = vld [vmem:[#allocation2 + $0x7c] sm:$0x1] }
 0x2c2   : > { %8664 = vmatprep.subr.bf16.mxu1 %v9275_v14  ;;  %v5649_v41 = vrot.slane %v5647_v50, 4  ;;  %v5652_v43 = vrot.slane %v5650_v0, 5  ;;  %v5663_v49 = vrot.slane %v5661_v1, 4  ;;  %v5666_v36 = vrot.slane %v5664_v30, 5  ;;  %v9286_v1 = vld [vmem:[#allocation2 + $0x100] ss:$8 sps:$4 sm:$0xff]  }
 0x2c3   : > { %v5547_v21 = vsel %vm10076_vm7, %v10859_v22, %v10856_v53  ;;  %v5574_v6 = vrot.slane %v5572_v2, 5  ;;  %v5625_v53 = vor.u32 %v5624_v24, %v5621_v52  ;;  %v5675_v25 = vshrl.u32 %v5490_v15, 16  ;;  %v10893_v22 = vld [vmem:[#allocation2 + $0x74] sm:$0x1]  ;;  %v5498_v15 = vld [vmem:[#allocation2 + $0x90] sm:$0xf] }
 0x2c4   : > { %v5653_v63 = vor.u32 %v5652_v43, %v5649_v41  ;;  %v5656_v2 = vshll.u32 %v10876_v45, 16  ;;  %v5667_v0 = vor.u32 %v5666_v36, %v5663_v49  ;;  %v5689_v59 = vshrl.u32 %v5492_v44, 16  ;;  %v5494_v41 = vld [vmem:[#allocation2 + $0x80] sm:$0xf]  ;;  %v5496_v43 = vld [vmem:[#allocation2 + $0x88] sm:$0xf] }
 0x2c5   : > { %8665 = vmatpush3.bf16.msra.mxu1 %v9275_v14  ;;  %v9277_v14 = vld [vmem:[#allocation2 + $0x90] ss:$8 sps:$4 sm:$0xff]   ;;  %v5692_v55 = vshll.u32 %v5492_v44, 16  ;;  %v5731_v49 = vshrl.u32 %v5498_v15, 16  ;;  %v5734_v36 = vshll.u32 %v5498_v15, 16 }
 0x2c6   : > { %8666 = vmatprep.subr.bf16.mxu1 %v9280_v9  ;;  %v5654_v50 = vrot.slane %v5653_v63, 4  ;;  %v5720_v63 = vshll.u32 %v5496_v43, 16  ;;  %v5502_v44 = vld [vmem:[#allocation2 + $0xb0] sm:$0xf] }
 0x2c7   : > { %8491 = vmatmul.mubr.bf16.gmra.mrb[40].mxu0 %v9276_v61  ;;  %v5583_v61 = vor.u32 %v5582_v42, %v5579_v39  ;;  %v5642_v39 = vshll.u32 %v10874_v48, 16  ;;  %v10880_v42 = vld [vmem:[#allocation2 + $0x6c] sm:$0x1] }
 0x2c8   : > { %8494 = vmatprep.mubr.bf16.mxu0 %v9278_v58  ;;  %8635 = vmatmul.mubr.bf16.gmra.mrb[24].mxu1 %v9272_v35  ;;  %v5635_v35 = vrot.slane %v5633_v8, 4  ;;  %v5638_v58 = vrot.slane %v5636_v34, 5  ;;  %v5616_v34 = vrot.slane %v5614_v20, 5  ;;  %v5703_v20 = vshrl.u32 %v5494_v41, 16 }
 0x2c9   : > { %8638 = vmatprep.mubr.bf16.mxu1 %v9274_v57  ;;  %8667 = vmatpush3.bf16.msra.mxu1 %v9280_v9  ;;  %v5597_v9 = vor.u32 %v5596_v31, %v5593_v60  ;;  %v5570_v57 = vrot.slane %v5569_v11, 4  ;;  %v5584_v47 = vrot.slane %v5583_v61, 4  ;;  %v967_v60 = vsel %vm9909_vm4, 0, %v966_v46  ;;  %v9283_v31 = vld [vmem:[#allocation2 + $0xd0] ss:$8 sps:$4 sm:$0xff]  }
 0x2ca   : > { %8668 = vmatprep.subr.bf16.mxu1 %v9284_v54  ;;  %v5639_v17 = vor.u32 %v5638_v58, %v5635_v35  ;;  %968 = vst [vmem:[#allocation2 + $0xec] sm:$0x1] %v967_v60  ;;  %v5677_v11 = vrot.slane %v5675_v25, 4  ;;  %v5658_v58 = vrot.slane %v5656_v2, 5  ;;  %v5500_v46 = vld [vmem:[#allocation2 + $0x98] sm:$0xf] }
 0x2cb   : > { %v5589_v56 = vsel %vm10076_vm7, %v5584_v47, %v5588_v51  ;;  %v5745_v7 = vshrl.u32 %v5500_v46, 16  ;;  %v5748_v60 = vshll.u32 %v5500_v46, 16 }
 0x2cc   : > { %v5640_v13 = vrot.slane %v5639_v17, 4  ;;  %v5659_v47 = vsel %vm10076_vm7, %v5654_v50, %v5658_v58  ;;  %v5681_v51 = vor.u32 %v5680_v40, %v5677_v11  ;;  %v5717_v17 = vshrl.u32 %v5496_v43, 16  ;;  %v9288_v50 = vld [vmem:[#allocation2 + $0x110] ss:$8 sps:$4 sm:$0xff]   ;;  %v5508_v58 = vld [vmem:[#allocation2 + $0xc8] sm:$0xf] }
 0x2cd   : > { %8669 = vmatpush3.bf16.msra.mxu1 %v9284_v54  ;;  %v5556_v54 = vrot.slane %v5555_v10, 4  ;;  %v5626_v10 = vrot.slane %v5625_v53, 4  ;;  %v5706_v53 = vshll.u32 %v5494_v41, 16  ;;  %v5733_v11 = vrot.slane %v5731_v49, 4 }
 0x2ce   : > { %8670 = vmatprep.subr.bf16.mxu1 %v9287_v3  ;;  %v5736_v40 = vrot.slane %v5734_v36, 5  ;;  %v5801_v46 = vshrl.u32 %v5508_v58, 16  ;;  %v10951_v36 = vld [vmem:[#allocation2 + $0xbc] sm:$0x1] }
 0x2cf   : > { %8495 = vmatmul.mubr.bf16.gmra.mrb[44].mxu0 %v9281_v27  ;;  %v5561_v28 = vsel %vm10076_vm7, %v5556_v54, %v5560_v18  ;;  %v5612_v27 = vrot.slane %v5611_v38, 4  ;;  %v5668_v54 = vrot.slane %v5667_v0, 4  ;;  %v5691_v38 = vrot.slane %v5689_v59, 4  ;;  %v9289_v59 = vld [vmem:[#allocation2 + $0x120] ss:$8 sps:$4 sm:$0xff]  }
 0x2d0   : > { %8639 = vmatmul.mubr.bf16.gmra.mrb[28].mxu1 %v9277_v14  ;;  %v5670_v14 = vshll.u32 %v10880_v42, 16  ;;  %v10901_v52 = vcombine.low %v5547_v21, %v5561_v28  ;;  %v5708_v2 = vrot.slane %v5706_v53, 5  ;;  %v5719_v0 = vrot.slane %v5717_v17, 4 }
 0x2d1   : > { %8642 = vmatprep.mubr.bf16.mxu1 %v9279_v23  ;;  %8671 = vmatpush3.bf16.msra.mxu1 %v9287_v3  ;;  %v5598_v3 = vrot.slane %v5597_v9, 4  ;;  %v5575_v23 = vsel %vm10076_vm7, %v5570_v57, %v5574_v6  ;;  %v5617_v61 = vsel %vm10076_vm7, %v5612_v27, %v5616_v34  ;;  %v5630_v9 = vrot.slane %v5628_v32, 5  ;;  %v9285_v57 = vld [vmem:[#allocation2 + $0xe0] ss:$8 sps:$4 sm:$0xff]   ;;  %v10927_v27 = vld [vmem:[#allocation2 + $0x8c] sm:$0x1] }
 0x2d2   : > { %8672 = vmatprep.subr.bf16.mxu1 %v9290_v5  ;;  %v10903_v24 = vcombine.low %v5575_v23, %v5589_v56  ;;  %v5672_v18 = vrot.slane %v5670_v14, 5  ;;  %v5684_v6 = vshll.u32 %v10893_v22, 16  ;;  %v10925_v56 = vrot.slane %v5681_v51, 4 }
 0x2d3   : > { %v5603_v8 = vsel %vm10076_vm7, %v5598_v3, %v5602_v12  ;;  %v5631_v30 = vsel %vm10076_vm7, %v5626_v10, %v5630_v9  ;;  %v5698_v3 = vshll.u32 %v10899_v33, 16  ;;  %v10915_v12 = vld [vmem:[#allocation2 + $0x84] sm:$0x1]  ;;  %v5705_v10 = vrot.slane %v5703_v20, 4 }
 0x2d4   : > { %v10905_v35 = vcombine.low %v5603_v8, %v5617_v61  ;;  %v10919_v25 = vrot.slane %v5684_v6, 5  ;;  %v5712_v32 = vshll.u32 %v10915_v12, 16  ;;  %v5722_v14 = vrot.slane %v5720_v63, 5 }
 0x2d5   : > { %8673 = vmatpush3.bf16.msra.mxu1 %v9290_v5  ;;  %v5644_v5 = vrot.slane %v5642_v39, 5  ;;  %v5673_v39 = vsel %vm10076_vm7, %v5668_v54, %v5672_v18  ;;  %v10930_v34 = vrot.slane %v5698_v3, 5  ;;  %v5747_v23 = vrot.slane %v5745_v7, 4  ;;  %v996_v54 = vld [vmem:[#allocation2 + $0x13c] sm:$0x1] }
 0x2d6   : > { %8706 = vmatprep.subr.bf16.mxu1 %v10869_v26  ;;  %v10923_v28 = vcombine.low %v5659_v47, %v5673_v39  ;;  %v5750_v61 = vrot.slane %v5748_v60, 5  ;;  %v5759_v9 = vshrl.u32 %v5502_v44, 16  ;;  %v5687_v41 = vsel %vm10076_vm7, %v10925_v56, %v10919_v25  ;;  %v10946_v3 = vld [vmem:[#allocation2 + $0x9c] sm:$0x1]  ;;  %v6324_v25 = vld [vmem:[#allocation2 + $0xd0] sm:$0xe] }
 0x2d7   : > { %v5645_v21 = vsel %vm10076_vm7, %v5640_v13, %v5644_v5  ;;  %v5504_v13 = vld [vmem:[#allocation2 + $0xb8] sm:$0xf]  ;;  %v10932_v5 = vld [vmem:[#allocation2 + $0x94] sm:$0x1]  ;;  %v10938_v43 = vrot.slane %v5712_v32, 5  ;;  %v5709_v6 = vor.u32 %v5708_v2, %v5705_v10  ;;  %v5726_v15 = vshll.u32 %v10927_v27, 16 }
 0x2d8   : > { %8643 = vmatmul.mubr.bf16.gmra.mrb[0].mxu1 %v9282_v16  ;;  %v5694_v16 = vrot.slane %v5692_v55, 5  ;;  %v5762_v55 = vshll.u32 %v5502_v44, 16  ;;  %v5723_v47 = vor.u32 %v5722_v14, %v5719_v0  ;;  %v5737_v51 = vor.u32 %v5736_v40, %v5733_v11  ;;  %v5510_v2 = vld [vmem:[#allocation2 + $0xd0] sm:$0xf]  ;;  %v5512_v14 = vld [vmem:[#allocation2 + $0xd8] sm:$0xf] }
 0x2d9   : > { %8646 = vmatprep.mubr.bf16.mxu1 %v9283_v31  ;;  %v10921_v31 = vcombine.low %v5631_v30, %v5645_v21  ;;  %v5776_v30 = vshll.u32 %v5504_v13, 16  ;;  %v5506_v21 = vld [vmem:[#allocation2 + $0xc0] sm:$0xf]  ;;  %v5751_v20 = vor.u32 %v5750_v61, %v5747_v23  ;;  %v5761_v53 = vrot.slane %v5759_v9, 4  ;;  %v10958_v61 = vld [vmem:[#allocation2 + $0xc4] sm:$0x1] }
 0x2da   : > { %v5695_v8 = vor.u32 %v5694_v16, %v5691_v38  ;;  %v10944_v38 = vld [vmem:[#allocation2 + $0xb4] sm:$0x1]  ;;  %v5804_v16 = vshll.u32 %v5508_v58, 16  ;;  %v5764_v17 = vrot.slane %v5762_v55, 5  ;;  %v997_v63 = vsel %vm9909_vm4, 0, %v996_v54 }
 0x2db   : > { %v5754_v49 = vshll.u32 %v10946_v3, 16  ;;  %v5778_v7 = vrot.slane %v5776_v30, 5  ;;  %v5787_v60 = vshrl.u32 %v5506_v21, 16  ;;  %998 = vst [vmem:[#allocation2 + $0x13c] sm:$0x1] %v997_v63  ;;  %v5710_v44 = vrot.slane %v5709_v6, 4 }
 0x2dc   : > { %v10940_v18 = vrot.slane %v5695_v8, 4  ;;  %v5728_v8 = vrot.slane %v5726_v15, 5  ;;  %v5790_v10 = vshll.u32 %v5506_v21, 16  ;;  %v5806_v0 = vrot.slane %v5804_v16, 5  ;;  %v9291_v9 = vld [vmem:[#allocation2 + $0x130] ss:$8 sps:$4 sm:$0xff]  }
 0x2dd   : > { %v5738_v11 = vrot.slane %v5737_v51, 4  ;;  %v5752_v40 = vrot.slane %v5751_v20, 4  ;;  %v5768_v23 = vshll.u32 %v10944_v38, 16  ;;  %v5756_v55 = vrot.slane %v5754_v49, 5  ;;  %v10961_v30 = vld [vmem:[#allocation2 + $0xcc] sm:$0x1] }
 0x2de   : > { %v5701_v32 = vsel %vm10076_vm7, %v10940_v18, %v10930_v34  ;;  %v5782_v34 = vshll.u32 %v10951_v36, 16  ;;  %v5792_v54 = vrot.slane %v5790_v10, 5  ;;  %v5815_v18 = vshrl.u32 %v5510_v2, 16 }
 0x2df   : > { %v5818_v6 = vshll.u32 %v5510_v2, 16  ;;  %v5829_v15 = vshrl.u32 %v5512_v14, 16  ;;  %v5832_v51 = vshll.u32 %v5512_v14, 16  ;;  %v10973_v20 = vrot.slane %v5768_v23, 5  ;;  %v9293_v14 = vld [vmem:[#allocation8 + $0x208] sm:$0xff]  }
 0x2e0   : > { %8647 = vmatmul.mubr.bf16.gmra.mrb[4].mxu1 %v9285_v57  ;;  %v5740_v57 = vshll.u32 %v10932_v5, 16  ;;  %v10980_v49 = vrot.slane %v5782_v34, 5 }
 0x2e1   : > { %8650 = vmatprep.mubr.bf16.mxu1 %v9286_v1  ;;  %v5773_v1 = vshrl.u32 %v5504_v13, 16  ;;  %v5724_v13 = vrot.slane %v5723_v47, 4  ;;  %v10991_v10 = vrot.slane %v5829_v15, 4  ;;  %v9294_v15 = vld [vmem:[#allocation8 + $0x210] sm:$0xff]  }
 0x2e2   : > { %v5742_v29 = vrot.slane %v5740_v57, 5  ;;  %v5715_v57 = vsel %vm10076_vm7, %v5710_v44, %v10938_v43  ;;  %v5757_v43 = vsel %vm10076_vm7, %v5752_v40, %v5756_v55  ;;  %v10987_v44 = vrot.slane %v5815_v18, 4 }
 0x2e3   : > { %v5775_v39 = vrot.slane %v5773_v1, 4  ;;  %v5789_v1 = vrot.slane %v5787_v60, 4  ;;  %v5729_v21 = vsel %vm10076_vm7, %v5724_v13, %v5728_v8  ;;  %v10985_v60 = vld [vmem:[#allocation2 + $0xd4] sm:$0x1]  ;;  %v10989_v8 = vrot.slane %v5818_v6, 5 }
 0x2e4   : > { %v10995_v13 = vld [vmem:[#allocation2 + $0xdc] sm:$0x1]  ;;  %v11006_v40 = vcombine.low %v5715_v57, %v5729_v21  ;;  %v6315_v6 = vld [vmem:[#allocation2 + $0x78] sm:$0xe]  ;;  %v6450_v21 = vrot.slane %v10915_v12, 5 }
 0x2e5   : > { %v5779_v58 = vor.u32 %v5778_v7, %v5775_v39  ;;  %v5810_v39 = vshll.u32 %v10961_v30, 16  ;;  %v5793_v7 = vor.u32 %v5792_v54, %v5789_v1  ;;  %v7818_v18 = vrot.slane %v6315_v6, 9  ;;  %v6319_v57 = vld [vmem:[#allocation2 + $0x98] sm:$0xe] }
 0x2e6   : > { %v6446_v54 = vrot.slane %v10899_v33, 5  ;;  %v6454_v33 = vrot.slane %v10927_v27, 5  ;;  %v7822_v27 = vrot.slane %v6319_v57, 9  ;;  %v9296_v57 = vld [vmem:[#allocation8 + $0x220] sm:$0xff]  }
 0x2e7   : > { %v10978_v63 = vrot.slane %v5779_v58, 4  ;;  %v6314_v58 = vld [vmem:[#allocation2 + $0x70] sm:$0xe]  ;;  %v11027_v34 = vrot.slane %v5793_v7, 4 }
 0x2e8   : > { %8651 = vmatmul.mubr.bf16.gmra.mrb[8].mxu1 %v9288_v50  ;;  %v5803_v50 = vrot.slane %v5801_v46, 4  ;;  %v5743_v46 = vsel %vm10076_vm7, %v5738_v11, %v5742_v29  ;;  %v10997_v29 = vrot.slane %v5832_v51, 5  ;;  %v11004_v11 = vcombine.low %v5687_v41, %v5701_v32  ;;  %v11025_v32 = vld [vmem:[#allocation2 + $0x108] sm:$0xf]  ;;  %v6318_v7 = vld [vmem:[#allocation2 + $0x90] sm:$0xe] }
 0x2e9   : > { %8654 = vmatprep.mubr.bf16.mxu1 %v9289_v59  ;;  %v5765_v59 = vor.u32 %v5764_v17, %v5761_v53  ;;  %v5796_v53 = vshll.u32 %v10958_v61, 16  ;;  %v5514_v17 = vld [vmem:[#allocation2 + $0xe0] sm:$0xf]  ;;  %v11015_v55 = vcombine.low %v5743_v46, %v5757_v43  ;;  %v11023_v41 = vrot.slane %v5810_v39, 5 }
 0x2ea   : > { %v5807_v47 = vor.u32 %v5806_v0, %v5803_v50  ;;  %v5843_v50 = vshrl.u32 %v5514_v17, 16  ;;  %v5846_v0 = vshll.u32 %v5514_v17, 16  ;;  %v6316_v46 = vld [vmem:[#allocation2 + $0x80] sm:$0xe]  ;;  %v7817_v43 = vrot.slane %v6314_v58, 9 }
 0x2eb   : > { %v10971_v16 = vrot.slane %v5765_v59, 4  ;;  %v11021_v56 = vrot.slane %v5796_v53, 5  ;;  %v6317_v53 = vld [vmem:[#allocation2 + $0x88] sm:$0xe]  ;;  %v6442_v39 = vrot.slane %v10893_v22, 5  ;;  %v11062_v1 = vsel %vm10586_vm12, %v7818_v18, %v6446_v54 }
 0x2ec   : > { %v10993_v2 = vrot.slane %v5807_v47, 4  ;;  %v11040_v47 = vrot.slane %v5843_v50, 4  ;;  %v11042_v51 = vrot.slane %v5846_v0, 5  ;;  %v6320_v58 = vld [vmem:[#allocation2 + $0xb0] sm:$0xe]  ;;  %v7820_v6 = vrot.slane %v6317_v53, 9 }
 0x2ed   : > { %v11058_v22 = vsel %vm10586_vm12, %v7817_v43, %v6442_v39  ;;  %v6321_v59 = vld [vmem:[#allocation2 + $0xb8] sm:$0xe]  ;;  %v6458_v43 = vrot.slane %v10932_v5, 5  ;;  %v6322_v39 = vld [vmem:[#allocation2 + $0xc0] sm:$0xe]  ;;  %v7823_v18 = vrot.slane %v6320_v58, 9 }
 0x2ee   : > { %v11074_v54 = vsel %vm10586_vm12, %v7820_v6, %v6454_v33  ;;  %v6323_v53 = vld [vmem:[#allocation2 + $0xc8] sm:$0xe]  ;;  %v6470_v58 = vrot.slane %v10951_v36, 5  ;;  %v7825_v6 = vrot.slane %v6322_v39, 9  ;;  %v6474_v33 = vrot.slane %v10958_v61, 5 }
 0x2ef   : > { %v6326_v36 = vld [vmem:[#allocation2 + $0xe0] sm:$0xe]  ;;  %v6327_v39 = vld [vmem:[#allocation2 + $0xe8] sm:$0xe]  ;;  %v11103_v61 = vld [vmem:[#allocation2 + $0xec] sm:$0x1] }
 0x2f0   : > { %8655 = vmatmul.mubr.bf16.gmra.mrb[12].mxu1 %v9291_v9  ;;  %v11013_v9 = vld [vmem:[#allocation2 + $0x100] sm:$0xf]  ;;  %v11127_v17 = vld [vmem:[#allocation2 + $0x124] sm:$0x1] }
 0x2f1   : > { %8674 = vmatprep.mubr.bf16.mxu1 %v10901_v52  ;;  %v10983_v52 = vld [vmem:[#allocation2 + $0xe8] sm:$0xf] }
 0x2f2   : > { %v5857_v23 = vshrl.u32 %v10983_v52, 16 }
 0x2f8   : > { %8675 = vmatmul.mubr.bf16.vlgmr.msra.gmra.mrb[16].mxu1 %v10903_v24  ;;  %v11046_v24 = vrot.slane %v5857_v23, 4  ;;  %v7819_v23 = vrot.slane %v6316_v46, 9  ;;  %v7821_v46 = vrot.slane %v6318_v7, 9  ;;  %v6466_v7 = vrot.slane %v10944_v38, 5 }
 0x2f9   : > { %8707 = vmatpush3.bf16.msra.mxu1 %v10869_v26  ;;  %8678 = vmatprep.mubr.bf16.mxu1 %v10905_v35  ;;  %v9295_v26 = vld [vmem:[#allocation8 + $0x218] sm:$0xff]   ;;  %v11077_v35 = vld [vmem:[#allocation2 + $0xe4] sm:$0x1] }
 0x2fa   : > { %8708 = vmatprep.subr.bf16.mxu1 %v9293_v14  ;;  %v11069_v12 = vsel %vm10586_vm12, %v7819_v23, %v6450_v21  ;;  %v11083_v5 = vsel %vm10586_vm12, %v7821_v46, %v6458_v43  ;;  %v7824_v23 = vrot.slane %v6321_v59, 9  ;;  %v6325_v21 = vld [vmem:[#allocation2 + $0xd8] sm:$0xe]  ;;  %v11094_v46 = vld [vmem:[#allocation2 + $0x104] sm:$0x1]  ;;  %v7826_v59 = vrot.slane %v6323_v53, 9 }
 0x2fb   : > { %11609 = vst [vmem:[#allocation17_spill] sm:$0xff] %v11083_v5  ;;  %v6478_v43 = vrot.slane %v10961_v30, 5  ;;  %v6482_v30 = vrot.slane %v10985_v60, 5  ;;  %v6328_v53 = vld [vmem:[#allocation2 + $0x100] sm:$0xe]  ;;  %v7828_v50 = vrot.slane %v6325_v21, 9 }
 0x2fc   : > { %v6490_v38 = vrot.slane %v11077_v35, 5  ;;  %v6333_v5 = vld [vmem:[#allocation2 + $0x128] sm:$0xe] }
 0x2fd   : > { %8709 = vmatpush3.bf16.msra.mxu1 %v9293_v14  ;;  %v6462_v14 = vrot.slane %v10946_v3, 5  ;;  %v11124_v0 = vsel %vm10586_vm12, %v7826_v59, %v6478_v43  ;;  %v11136_v59 = vld [vmem:[#allocation2 + $0x12c] sm:$0x1]  ;;  %v7830_v43 = vrot.slane %v6327_v39, 9 }
 0x2fe   : > { %8710 = vmatprep.subr.bf16.mxu1 %v9294_v15  ;;  %11614 = vst [vmem:[#allocation22_spill] sm:$0xff] %v11124_v0  ;;  %v9297_v0 = vld [vmem:[#allocation8 + $0x228] sm:$0xff]  }
 0x2ff   : > { %v11089_v3 = vsel %vm10586_vm12, %v7822_v27, %v6462_v14  ;;  %v11105_v27 = vld [vmem:[#allocation2 + $0x10c] sm:$0x1]  ;;  %v11115_v14 = vsel %vm10586_vm12, %v7825_v6, %v6474_v33  ;;  %v7829_v33 = vrot.slane %v6326_v36, 9  ;;  %v11157_v36 = vld [vmem:[#allocation2 + $0x134] sm:$0x1] }
 0x300   : > { %8679 = vmatmul.mubr.bf16.gmra.mrb[20].mxu1 %v10921_v31  ;;  %11610 = vst [vmem:[#allocation18_spill] sm:$0xff] %v11089_v3  ;;  %v11100_v31 = vsel %vm10586_vm12, %v7823_v18, %v6466_v7  ;;  %11613 = vst [vmem:[#allocation21_spill] sm:$0xff] %v11115_v14  ;;  %v7827_v18 = vrot.slane %v6324_v25, 9  ;;  %v11118_v7 = vld [vmem:[#allocation2 + $0x11c] sm:$0x1]  ;;  %v7831_v3 = vrot.slane %v6328_v53, 9 }
 0x301   : > { %8682 = vmatprep.mubr.bf16.mxu1 %v10923_v28  ;;  %8711 = vmatpush3.bf16.msra.mxu1 %v9294_v15  ;;  %11611 = vst [vmem:[#allocation19_spill] sm:$0xff] %v11100_v31  ;;  %v11107_v28 = vld [vmem:[#allocation2 + $0x114] sm:$0x1]  ;;  %v11111_v15 = vsel %vm10586_vm12, %v7824_v23, %v6470_v58  ;;  %v6486_v23 = vrot.slane %v10995_v13, 5  ;;  %v6329_v58 = vld [vmem:[#allocation2 + $0x108] sm:$0xe] }
 0x302   : > { %8712 = vmatprep.subr.bf16.mxu1 %v9295_v26  ;;  %11612 = vst [vmem:[#allocation20_spill] sm:$0xff] %v11111_v15  ;;  %v11133_v6 = vsel %vm10586_vm12, %v7827_v18, %v6482_v30  ;;  %v6330_v15 = vld [vmem:[#allocation2 + $0x110] sm:$0xe]  ;;  %v6494_v31 = vrot.slane %v11103_v61, 5  ;;  %v6331_v25 = vld [vmem:[#allocation2 + $0x118] sm:$0xe]  ;;  %v11147_v18 = vsel %vm10586_vm12, %v7829_v33, %v6490_v38 }
 0x303   : > { %v11140_v21 = vsel %vm10586_vm12, %v7828_v50, %v6486_v23  ;;  %11616 = vst [vmem:[#allocation24_spill] sm:$0xff] %v11147_v18  ;;  %v7832_v30 = vrot.slane %v6329_v58, 9  ;;  %v6332_v14 = vld [vmem:[#allocation2 + $0x120] sm:$0xe]  ;;  %v6502_v39 = vrot.slane %v11105_v27, 5  ;;  %v7833_v53 = vrot.slane %v6330_v15, 9 }
 0x304   : > { %11615 = vst [vmem:[#allocation23_spill] sm:$0xff] %v11140_v21  ;;  %v11152_v50 = vsel %vm10586_vm12, %v7830_v43, %v6494_v31  ;;  %v6506_v23 = vrot.slane %v11107_v28, 5  ;;  %v7834_v33 = vrot.slane %v6331_v25, 9  ;;  %v6510_v31 = vrot.slane %v11118_v7, 5  ;;  %v6334_v43 = vld [vmem:[#allocation2 + $0x130] sm:$0xe] }
 0x305   : > { %8713 = vmatpush3.bf16.msra.mxu1 %v9295_v26  ;;  %v6498_v26 = vrot.slane %v11094_v46, 5  ;;  %11617 = vst [vmem:[#allocation25_spill] sm:$0xff] %v11152_v50  ;;  %v11167_v15 = vld [vmem:[#allocation2 + $0x13c] sm:$0x1]  ;;  %v7835_v50 = vrot.slane %v6332_v14, 9  ;;  %v7836_v18 = vrot.slane %v6333_v5, 9 }
 0x306   : > { %8714 = vmatprep.subr.bf16.mxu1 %v9296_v57  ;;  %v11175_v38 = vsel %vm10586_vm12, %v7833_v53, %v6506_v23  ;;  %v6335_v25 = vld [vmem:[#allocation2 + $0x138] sm:$0xe]  ;;  %v7837_v53 = vrot.slane %v6334_v43, 9  ;;  %v6522_v23 = vrot.slane %v11157_v36, 5  ;;  %v11619_v21 = vshll.u32 %v10983_v52, 16 }
 0x307   : > { %v11163_v58 = vsel %vm10586_vm12, %v7831_v3, %v6498_v26  ;;  %v6514_v3 = vrot.slane %v11127_v17, 5  ;;  %v9298_v26 = vld [vmem:[#allocation8 + $0x230] sm:$0xff]   ;;  %v7838_v5 = vrot.slane %v6335_v25, 9  ;;  %v11639_v4 = vld [vmem:[#allocation21_spill] sm:$0xff] }
 0x308   : > { %8683 = vmatmul.mubr.bf16.gmra.mrb[24].mxu1 %v11004_v11  ;;  %v11171_v11 = vsel %vm10586_vm12, %v7832_v30, %v6502_v39  ;;  %v6518_v30 = vrot.slane %v11136_v59, 5  ;;  %v11620_v39 = vshrl.u32 %v11013_v9, 16  ;;  %v11207_v52 = vsel %vm10586_vm12, %v7837_v53, %v6522_v23 }
 0x309   : > { %8686 = vmatprep.mubr.bf16.mxu1 %v11006_v40  ;;  %8715 = vmatpush3.bf16.msra.mxu1 %v9296_v57  ;;  %v11182_v57 = vsel %vm10586_vm12, %v7834_v33, %v6510_v31  ;;  %v11189_v14 = vsel %vm10586_vm12, %v7835_v50, %v6514_v3  ;;  %v5862_v40 = vrot.slane %v11619_v21, 5  ;;  %v6526_v31 = vrot.slane %v11167_v15, 5 }
 0x30a   : > { %8716 = vmatprep.subr.bf16.mxu1 %v9297_v0  ;;  %11618 = vst [vmem:[#allocation26_spill] sm:$0xff] %v11182_v57  ;;  %v11196_v33 = vsel %vm10586_vm12, %v7836_v18, %v6518_v30  ;;  %v5873_v57 = vrot.slane %v11620_v39, 4  ;;  %v11621_v50 = vshll.u32 %v11013_v9, 16  ;;  %v11622_v21 = vsel %vm10076_vm7, %v10978_v63, %v10980_v49  ;;  %v9299_v39 = vld [vmem:[#allocation8 + $0x238] sm:$0xff]  }
 0x30b   : > { %v7853_v43 = vcombine.low %v11189_v14, %v11196_v33  ;;  %v11624_v9 = vor.u32 %v10989_v8, %v10987_v44  ;;  %v5852_v30 = vshll.u32 %v11077_v35, 16  ;;  %v11225_v53 = vsel %vm10586_vm12, %v7838_v5, %v6526_v31  ;;  %v5524_v44 = vld [vmem:[#allocation2 + $0x118] sm:$0xf] }
 0x30c   : > { %v5876_v3 = vrot.slane %v11621_v50, 5  ;;  %v5799_v63 = vsel %vm10076_vm7, %v11027_v34, %v11021_v56  ;;  %v5849_v49 = vor.u32 %v11042_v51, %v11040_v47  ;;  %v7854_v8 = vcombine.low %v11207_v52, %v11225_v53 }
 0x30d   : > { %8717 = vmatpush3.bf16.msra.mxu1 %v9297_v0  ;;  %v11623_v0 = vsel %vm10076_vm7, %v10971_v16, %v10973_v20  ;;  %v5822_v25 = vrot.slane %v11624_v9, 4  ;;  %v11625_v16 = vor.u32 %v10997_v29, %v10991_v10  ;;  %v11626_v35 = vsel %vm10076_vm7, %v10993_v2, %v11023_v41  ;;  %v5522_v2 = vld [vmem:[#allocation2 + $0x110] sm:$0xf]  ;;  %v5526_v41 = vld [vmem:[#allocation2 + $0x120] sm:$0xf] }
 0x30e   : > { %v7791_v18 = vcombine.low %v11623_v0, %v11622_v21  ;;  %8718 = vmatprep.subr.bf16.mxu1 %v9298_v26  ;;  %v7792_v23 = vcombine.low %v5799_v63, %v11626_v35  ;;  %v11627_v56 = vshll.u32 %v10985_v60, 16  ;;  %v11628_v10 = vshll.u32 %v10995_v13, 16 }
 0x30f   : > { %v5836_v20 = vrot.slane %v11625_v16, 4  ;;  %v11629_v47 = vshrl.u32 %v11025_v32, 16  ;;  %v5863_v5 = vor.u32 %v5862_v40, %v11046_v24  ;;  %v5877_v31 = vor.u32 %v5876_v3, %v5873_v57 }
 0x310   : > { %8687 = vmatmul.mubr.bf16.gmra.mrb[28].mxu1 %v11015_v55  ;;  %v5826_v34 = vrot.slane %v11627_v56, 5  ;;  %v5840_v29 = vrot.slane %v11628_v10, 5  ;;  %v5866_v55 = vshll.u32 %v11103_v61, 16  ;;  %v11630_v50 = vshll.u32 %v11025_v32, 16  ;;  %v5528_v32 = vld [vmem:[#allocation2 + $0x128] sm:$0xf] }
 0x311   : > { %v5887_v51 = vrot.slane %v11629_v47, 4  ;;  %8690 = vmatprep.mubr.bf16.mxu1 %v7791_v18  ;;  %8719 = vmatpush3.bf16.msra.mxu1 %v9298_v26  ;;  %v5854_v13 = vrot.slane %v5852_v30, 5  ;;  %v5913_v0 = vshrl.u32 %v5524_v44, 16  ;;  %v5916_v9 = vshll.u32 %v5524_v44, 16 }
 0x312   : > { %v5890_v21 = vrot.slane %v11630_v50, 5  ;;  %v5827_v60 = vsel %vm10076_vm7, %v5822_v25, %v5826_v34  ;;  %8720 = vmatprep.subr.bf16.mxu1 %v9299_v39  ;;  %v5841_v18 = vsel %vm10076_vm7, %v5836_v20, %v5840_v29  ;;  %v5850_v24 = vrot.slane %v5849_v49, 4  ;;  %v5530_v29 = vld [vmem:[#allocation2 + $0x130] sm:$0xf] }
 0x313   : > { %v5880_v61 = vshll.u32 %v11094_v46, 16  ;;  %v5894_v40 = vshll.u32 %v11105_v27, 16  ;;  %v5899_v57 = vshrl.u32 %v5522_v2, 16  ;;  %v5902_v3 = vshll.u32 %v5522_v2, 16  ;;  %v5532_v2 = vld [vmem:[#allocation2 + $0x138] sm:$0xf] }
 0x314   : > { %v5927_v26 = vshrl.u32 %v5526_v41, 16  ;;  %v5930_v63 = vshll.u32 %v5526_v41, 16  ;;  %v5864_v16 = vrot.slane %v5863_v5, 4  ;;  %v5868_v35 = vrot.slane %v5866_v55, 5 }
 0x315   : > { %v5878_v25 = vrot.slane %v5877_v31, 4  ;;  %v5891_v30 = vor.u32 %v5890_v21, %v5887_v51  ;;  %8721 = vmatpush3.bf16.msra.mxu1 %v9299_v39  ;;  %v5915_v44 = vrot.slane %v5913_v0, 4  ;;  %v5918_v56 = vrot.slane %v5916_v9, 5 }
 0x316   : > { %v5941_v34 = vshrl.u32 %v5528_v32, 16  ;;  %v5944_v10 = vshll.u32 %v5528_v32, 16  ;;  %v7793_v20 = vcombine.low %v5827_v60, %v5841_v18  ;;  %v5882_v49 = vrot.slane %v5880_v61, 5 }
 0x317   : > { %v5855_v46 = vsel %vm10076_vm7, %v5850_v24, %v5854_v13  ;;  %v5896_v27 = vrot.slane %v5894_v40, 5  ;;  %v5929_v47 = vrot.slane %v5927_v26, 4  ;;  %v5932_v50 = vrot.slane %v5930_v63, 5 }
 0x318   : > { %8691 = vmatmul.mubr.bf16.gmra.mrb[0].mxu1 %v7792_v23  ;;  %v5869_v51 = vsel %vm10076_vm7, %v5864_v16, %v5868_v35  ;;  %v5892_v39 = vrot.slane %v5891_v30, 4  ;;  %v5901_v5 = vrot.slane %v5899_v57, 4  ;;  %v5904_v55 = vrot.slane %v5902_v3, 5 }
 0x319   : > { %8694 = vmatprep.mubr.bf16.mxu1 %v7793_v20  ;;  %v5883_v31 = vsel %vm10076_vm7, %v5878_v25, %v5882_v49  ;;  %v5919_v21 = vor.u32 %v5918_v56, %v5915_v44  ;;  %v5943_v41 = vrot.slane %v5941_v34, 4  ;;  %v5946_v23 = vrot.slane %v5944_v10, 5 }
 0x31a   : > { %v5955_v60 = vshrl.u32 %v5530_v29, 16  ;;  %v5958_v0 = vshll.u32 %v5530_v29, 16  ;;  %v5969_v13 = vshrl.u32 %v5532_v2, 16  ;;  %v5972_v9 = vshll.u32 %v5532_v2, 16  ;;  %v9300_v2 = vld [vmem:[#allocation9] sm:$0xff]  }
 0x31b   : > { %v5908_v18 = vshll.u32 %v11107_v28, 16  ;;  %v5933_v24 = vor.u32 %v5932_v50, %v5929_v47  ;;  %v7794_v61 = vcombine.low %v5855_v46, %v5869_v51  ;;  %v5897_v40 = vsel %vm10076_vm7, %v5892_v39, %v5896_v27  ;;  %v9301_v51 = vld [vmem:[#allocation9 + $0x8] sm:$0xff]   ;;  %8754 = vmatprep.subr.bf16.mxu0 %v9300_v2 }
 0x31c   : > { %v5905_v32 = vor.u32 %v5904_v55, %v5901_v5  ;;  %v5922_v57 = vshll.u32 %v11118_v7, 16  ;;  %v7795_v3 = vcombine.low %v5883_v31, %v5897_v40  ;;  %v5920_v26 = vrot.slane %v5919_v21, 4  ;;  %v6304_v5 = vld [vmem:[#allocation2 + $0x10] sm:$0xe]  ;;  %8755 = vmatpush3.bf16.msra.mxu0 %v9300_v2  ;;  %v6310_v2 = vld [vmem:[#allocation2 + $0x40] sm:$0xe] }
 0x31d   : > { %v5936_v63 = vshll.u32 %v11127_v17, 16  ;;  %v5947_v16 = vor.u32 %v5946_v23, %v5943_v41  ;;  %v5957_v35 = vrot.slane %v5955_v60, 4  ;;  %v5960_v25 = vrot.slane %v5958_v0, 5  ;;  %v6305_v60 = vld [vmem:[#allocation2 + $0x18] sm:$0xe]  ;;  %8756 = vmatprep.subr.bf16.mxu0 %v9301_v51 }
 0x31e   : > { %v5971_v30 = vrot.slane %v5969_v13, 4  ;;  %v5974_v44 = vrot.slane %v5972_v9, 5  ;;  %v5934_v56 = vrot.slane %v5933_v24, 4  ;;  %v5950_v28 = vshll.u32 %v11136_v59, 16  ;;  %v9400_v13 = vld [vmem:[#allocation2 + $0x14] sm:$0x1] }
 0x31f   : > { %v5906_v34 = vrot.slane %v5905_v32, 4  ;;  %v5924_v10 = vrot.slane %v5922_v57, 5  ;;  %v5910_v20 = vrot.slane %v5908_v18, 5  ;;  %v5938_v49 = vrot.slane %v5936_v63, 5  ;;  %v9302_v18 = vld [vmem:[#allocation9 + $0x10] sm:$0xff]   ;;  %v9303_v63 = vld [vmem:[#allocation9 + $0x18] sm:$0xff]  }
 0x320   : > { %8695 = vmatmul.mubr.bf16.gmra.mrb[4].mxu1 %v7794_v61  ;;  %v5948_v29 = vrot.slane %v5947_v16, 4  ;;  %v5961_v46 = vor.u32 %v5960_v25, %v5957_v35  ;;  %v5975_v17 = vor.u32 %v5974_v44, %v5971_v30  ;;  %v5978_v27 = vshll.u32 %v11167_v15, 16  ;;  %v9401_v61 = vld [vmem:[#allocation2 + $0x1c] sm:$0x1]  ;;  %8757 = vmatpush3.bf16.msra.mxu0 %v9301_v51  ;;  %v6308_v16 = vld [vmem:[#allocation2 + $0x30] sm:$0xe] }
 0x321   : > { %8698 = vmatprep.mubr.bf16.mxu1 %v7795_v3  ;;  %v5925_v7 = vsel %vm10076_vm7, %v5920_v26, %v5924_v10  ;;  %v5939_v47 = vsel %vm10076_vm7, %v5934_v56, %v5938_v49  ;;  %v5952_v50 = vrot.slane %v5950_v28, 5  ;;  %v5911_v59 = vsel %vm10076_vm7, %v5906_v34, %v5910_v20  ;;  %v6307_v26 = vld [vmem:[#allocation2 + $0x28] sm:$0xe]  ;;  %8758 = vmatprep.subr.bf16.mxu0 %v9302_v18  ;;  %v6306_v30 = vld [vmem:[#allocation2 + $0x20] sm:$0xe] }
 0x322   : > { %v5964_v39 = vshll.u32 %v11157_v36, 16  ;;  %v7796_v55 = vcombine.low %v5911_v59, %v5925_v7  ;;  %v5962_v41 = vrot.slane %v5961_v46, 4  ;;  %v5976_v15 = vrot.slane %v5975_v17, 4  ;;  %v9402_v28 = vld [vmem:[#allocation2 + $0x2c] sm:$0x1] }
 0x323   : > { %v5953_v31 = vsel %vm10076_vm7, %v5948_v29, %v5952_v50  ;;  %v5980_v23 = vrot.slane %v5978_v27, 5  ;;  %v7807_v0 = vrot.slane %v6304_v5, 9  ;;  %v6402_v9 = vrot.slane %v9400_v13, 5  ;;  %v6309_v10 = vld [vmem:[#allocation2 + $0x38] sm:$0xe]  ;;  %v9304_v29 = vld [vmem:[#allocation9 + $0x20] sm:$0xff]  }
 0x324   : > { %v7797_v21 = vcombine.low %v5939_v47, %v5953_v31  ;;  %v5966_v36 = vrot.slane %v5964_v39, 5  ;;  %v7808_v24 = vrot.slane %v6305_v60, 9  ;;  %v6406_v40 = vrot.slane %v9401_v61, 5  ;;  %8759 = vmatpush3.bf16.msra.mxu0 %v9302_v18  ;;  %v9403_v20 = vld [vmem:[#allocation2 + $0x34] sm:$0x1] }
 0x325   : > { %v5981_v57 = vsel %vm10076_vm7, %v5976_v15, %v5980_v23  ;;  %v6403_v3 = vsel %vm10586_vm12, %v7807_v0, %v6402_v9  ;;  %v7810_v56 = vrot.slane %v6307_v26, 9  ;;  %v6414_v34 = vrot.slane %v9402_v28, 5  ;;  %8760 = vmatprep.subr.bf16.mxu0 %v9303_v63  ;;  %v9404_v46 = vld [vmem:[#allocation2 + $0x24] sm:$0x1]  ;;  %v6311_v59 = vld [vmem:[#allocation2 + $0x48] sm:$0xe] }
 0x326   : > { %v5967_v32 = vsel %vm10076_vm7, %v5962_v41, %v5966_v36  ;;  %v6407_v25 = vsel %vm10586_vm12, %v7808_v24, %v6406_v40  ;;  %v7811_v37 = vrot.slane %v6308_v16, 9  ;;  %v6418_v49 = vrot.slane %v9403_v20, 5  ;;  %v6312_v5 = vld [vmem:[#allocation2 + $0x60] sm:$0xe]  ;;  %v6313_v60 = vld [vmem:[#allocation2 + $0x68] sm:$0xe] }
 0x327   : > { %v7798_v35 = vcombine.low %v5967_v32, %v5981_v57  ;;  %v7839_v44 = vcombine.low %v6403_v3, %v6407_v25  ;;  %v7809_v7 = vrot.slane %v6306_v30, 9  ;;  %v6410_v17 = vrot.slane %v9404_v46, 5  ;;  %v11633_v32 = vld [vmem:[#allocation17_spill] sm:$0xff]  ;;  %v11634_v57 = vld [vmem:[#allocation18_spill] sm:$0xff]  ;;  %v11636_v26 = vld [vmem:[#allocation19_spill] sm:$0xff] }
 0x328   : > { %8699 = vmatmul.mubr.bf16.gmra.mrb[8].mxu1 %v7796_v55  ;;  %v7812_v27 = vrot.slane %v6309_v10, 9  ;;  %v6422_v47 = vrot.slane %v10861_v62, 5  ;;  %v6415_v50 = vsel %vm10586_vm12, %v7810_v56, %v6414_v34  ;;  %8761 = vmatpush3.bf16.msra.mxu0 %v9303_v63  ;;  %v6419_v51 = vsel %vm10586_vm12, %v7811_v37, %v6418_v49  ;;  %v11637_v63 = vld [vmem:[#allocation20_spill] sm:$0xff]  ;;  %v11642_v30 = vld [vmem:[#allocation23_spill] sm:$0xff]  ;;  %v11648_v56 = vld [vmem:[#allocation26_spill] sm:$0xff] }
 0x329   : > { %8702 = vmatprep.mubr.bf16.mxu1 %v7797_v21  ;;  %8762 = vmatprep.subr.bf16.mxu0 %v9304_v29  ;;  %v6411_v39 = vsel %vm10586_vm12, %v7809_v7, %v6410_v17  ;;  %v7813_v21 = vrot.slane %v6310_v2, 9  ;;  %v6426_v41 = vrot.slane %v10872_v19, 5  ;;  %v7814_v15 = vrot.slane %v6311_v59, 9 }
 0x32a   : > { %v7840_v55 = vcombine.low %v6411_v39, %v6415_v50  ;;  %v6423_v31 = vsel %vm10586_vm12, %v7812_v27, %v6422_v47  ;;  %v6430_v23 = vrot.slane %v10874_v48, 5  ;;  %v7815_v0 = vrot.slane %v6312_v5, 9  ;;  %v9305_v47 = vld [vmem:[#allocation9 + $0x28] sm:$0xff]   ;;  %v9306_v39 = vld [vmem:[#allocation9 + $0x30] sm:$0xff]   ;;  %v9307_v5 = vld [vmem:[#allocation9 + $0x38] sm:$0xff]  }
 0x32b   : > { %v7841_v62 = vcombine.low %v6419_v51, %v6423_v31  ;;  %v6434_v13 = vrot.slane %v10876_v45, 5  ;;  %v7816_v9 = vrot.slane %v6313_v60, 9  ;;  %v6438_v18 = vrot.slane %v10880_v42, 5 }
 0x32c   : > { %8763 = vmatpush3.bf16.msra.mxu0 %v9304_v29  ;;  %v6427_v36 = vsel %vm10586_vm12, %v7813_v21, %v6426_v41  ;;  %v6431_v24 = vsel %vm10586_vm12, %v7814_v15, %v6430_v23  ;;  %v11631_v45 = vcombine.low %v11058_v22, %v11062_v1  ;;  %v11632_v42 = vcombine.low %v11069_v12, %v11074_v54  ;;  %v11644_v22 = vld [vmem:[#allocation24_spill] sm:$0xff] }
 0x32d   : > { %v6435_v19 = vsel %vm10586_vm12, %v7815_v0, %v6434_v13  ;;  %v7842_v48 = vcombine.low %v6427_v36, %v6431_v24  ;;  %v6439_v61 = vsel %vm10586_vm12, %v7816_v9, %v6438_v18  ;;  %v11635_v3 = vcombine.low %v11633_v32, %v11634_v57  ;;  %8764 = vmatprep.subr.bf16.mxu0 %v9305_v47  ;;  %v11385_v13 = vld [vmem:[%s11566_s4] ss:$0 sm:$0xff] }
 0x32e   : > { %v7843_v40 = vcombine.low %v6435_v19, %v6439_v61  ;;  %v11638_v16 = vcombine.low %v11636_v26, %v11637_v63  ;;  %v11643_v1 = vcombine.low %v11133_v6, %v11642_v30  ;;  %v11647_v54 = vcombine.low %v11163_v58, %v11171_v11 }
 0x32f   : > { %v11649_v28 = vcombine.low %v11175_v38, %v11648_v56 }
 0x330   : > { %8703 = vmatmul.mubr.bf16.gmra.mrb[12].mxu1 %v7798_v35  ;;  %v11640_v35 = vld [vmem:[#allocation22_spill] sm:$0xff]  ;;  %8765 = vmatpush3.bf16.msra.mxu0 %v9305_v47 }
 0x331   : > { %8722 = vmatprep.mubr.bf16.mxu1 %v7839_v44  ;;  %v11641_v25 = vcombine.low %v11639_v4, %v11640_v35  ;;  %v11645_v44 = vld [vmem:[#allocation25_spill] sm:$0xff]  ;;  %8766 = vmatprep.subr.bf16.mxu0 %v9306_v39 }
 0x332   : > { %v11646_v12 = vcombine.low %v11644_v22, %v11645_v44 }
 0x334   : > { %8767 = vmatpush3.bf16.msra.mxu0 %v9306_v39 }
 0x335   : > { %8768 = vmatprep.subr.bf16.mxu0 %v9307_v5 }
 0x338   : > { %8723 = vmatmul.mubr.bf16.vlgmr.msra.gmra.mrb[16].mxu1 %v7840_v55  ;;  %8769 = vmatpush3.bf16.msra.mxu0 %v9307_v5 }
 0x339   : > { %8726 = vmatprep.mubr.bf16.mxu1 %v7841_v62 }
 0x340   : > { %8727 = vmatmul.mubr.bf16.gmra.mrb[20].mxu1 %v7842_v48 }
 0x341   : > { %8730 = vmatprep.mubr.bf16.mxu1 %v7843_v40 }
 0x348   : > { %8731 = vmatmul.mubr.bf16.gmra.mrb[24].mxu1 %v11631_v45 }
 0x349   : > { %8734 = vmatprep.mubr.bf16.mxu1 %v11632_v42 }
 0x350   : > { %8735 = vmatmul.mubr.bf16.gmra.mrb[28].mxu1 %v11635_v3 }
 0x351   : > { %8738 = vmatprep.mubr.bf16.mxu1 %v11638_v16 }
 0x358   : > { %8739 = vmatmul.mubr.bf16.gmra.mrb[0].mxu1 %v11641_v25 }
 0x359   : > { %8742 = vmatprep.mubr.bf16.mxu1 %v11643_v1 }
 0x360   : > { %8743 = vmatmul.mubr.bf16.gmra.mrb[4].mxu1 %v11646_v12 }
 0x361   : > { %8746 = vmatprep.mubr.bf16.mxu1 %v11647_v54 }
 0x368   : > { %8747 = vmatmul.mubr.bf16.gmra.mrb[8].mxu1 %v11649_v28 }
 0x369   : > { %8750 = vmatprep.mubr.bf16.mxu1 %v7853_v43 }
 0x36a   : > { %v11341_v34 = vpop.f32.mrb[48].mxu0 }
 0x36b   : > { %v11343_v6 = vpop.f32.mrb[49].mxu0 }
 0x36c   : > { %v11345_v10 = vpop.f32.mrb[50].mxu0 }
 0x36d   : > { %v11347_v37 = vpop.f32.mrb[51].mxu0 }
 0x370   : > { %8751 = vmatmul.mubr.bf16.gmra.mrb[12].mxu1 %v7854_v8 }
 0x372   : > { %v11352_v58 = vpop.f32.mrb[52].mxu0 }
 0x373   : > { %v11354_v38 = vpop.f32.mrb[53].mxu0 }
 0x374   : > { %v11356_v11 = vpop.f32.mrb[54].mxu0 }
 0x375   : > { %v11358_v14 = vpop.f32.mrb[55].mxu0 }
 0x37a   : > { %v11360_v33 = vpop.f32.mrb[56].mxu0 }
 0x37b   : > { %v11362_v43 = vpop.f32.mrb[57].mxu0 }
 0x37c   : > { %v11364_v20 = vpop.f32.mrb[58].mxu0 }
 0x37d   : > { %v11366_v49 = vpop.f32.mrb[59].mxu0 }
 0x382   : > { %v11368_v29 = vpop.f32.mrb[60].mxu0 }
 0x383   : > { %v11370_v52 = vpop.f32.mrb[61].mxu0 }
 0x384   : > { %v11372_v53 = vpop.f32.mrb[62].mxu0 }
 0x385   : > { %v11374_v8 = vpop.f32.mrb[63].mxu0 }
 0x38a   : > { %v8484_v7 = vpop.f32.mrb[32].mxu0 }
 0x38b   : > { %v3544_v46 = vpop.f32.mrb[33].mxu0 }
 0x38c   : > { %v8485_v17 = vpop.f32.mrb[34].mxu0 }
 0x38d   : > { %v3547_v27 = vpop.f32.mrb[35].mxu0 }
 0x392   : > { %v8488_v50 = vpop.f32.mrb[36].mxu0 }
 0x393   : > { %v3560_v2 = vpop.f32.mrb[37].mxu0 }
 0x394   : > { %v8489_v51 = vpop.f32.mrb[38].mxu0 }
 0x395   : > { %v3563_v59 = vpop.f32.mrb[39].mxu0 }
 0x39a   : > { %v8492_v55 = vpop.f32.mrb[40].mxu0 }
 0x39b   : > { %v3576_v31 = vpop.f32.mrb[41].mxu0 }
 0x39c   : > { %v8493_v21 = vpop.f32.mrb[42].mxu0 }
 0x39d   : > { %v3579_v62 = vpop.f32.mrb[43].mxu0 }
 0x3a2   : > { %v8496_v41 = vpop.f32.mrb[44].mxu0 }
 0x3a3   : > { %v11376_v15 = vpop.f32.mrb[45].mxu0 }
 0x3a4   : > { %v11378_v23 = vpop.f32.mrb[46].mxu0 }
 0x3a5   : > { %v11380_v60 = vpop.f32.mrb[47].mxu0 }
 0x40b   : > { %v8724_v0 = vpop.f32.mrb[16].mxu1 }
 0x40c   : > { %v8818_v9 = vadd.f32 %v8724_v0, %v8484_v7  ;;  %v6691_v18 = vpop.f32.mrb[17].mxu1 }
 0x40d   : > { %v8819_v36 = vadd.f32 %v6691_v18, %v3544_v46  ;;  %v8725_v24 = vpop.f32.mrb[18].mxu1 }
 0x40e   : > { %v6859_v19 = vadd.f32 %v8818_v9, %v11385_v13  ;;  %v8820_v48 = vadd.f32 %v8725_v24, %v8485_v17  ;;  %v6694_v61 = vpop.f32.mrb[19].mxu1 }
 0x40f   : > { %v6857_v40 = vadd.f32 %v8819_v36, %v11385_v13  ;;  %v8821_v45 = vadd.f32 %v6694_v61, %v3547_v27 }
 0x410   : > { %v6860_v42 = vadd.f32 %v8820_v48, %v11385_v13  ;;  %v6891_v57 = vmax.f32 %v6859_v19, 0.0 }
 0x411   : > { %v6858_v32 = vadd.f32 %v8821_v45, %v11385_v13  ;;  %v6889_v26 = vmax.f32 %v6857_v40, 0.0 }
 0x412   : > { %v6892_v3 = vmax.f32 %v6860_v42, 0.0 }
 0x413   : > { %v6890_v63 = vmax.f32 %v6858_v32, 0.0  ;;  %v8728_v16 = vpop.f32.mrb[20].mxu1 }
 0x414   : > { %v6922_v4 = vpack.c.bf16 %v6892_v3, %v6891_v57  ;;  %v8822_v35 = vadd.f32 %v8728_v16, %v8488_v50  ;;  %v6707_v25 = vpop.f32.mrb[21].mxu1 }
 0x415   : > { %v8823_v30 = vadd.f32 %v6707_v25, %v3560_v2  ;;  %v8729_v1 = vpop.f32.mrb[22].mxu1  ;;  %v6921_v22 = vpack.c.bf16 %v6890_v63, %v6889_v26 }
 0x416   : > { %v6863_v44 = vadd.f32 %v8822_v35, %v11385_v13  ;;  %v8824_v12 = vadd.f32 %v8729_v1, %v8489_v51  ;;  %v6710_v54 = vpop.f32.mrb[23].mxu1 }
 0x417   : > { %v6861_v56 = vadd.f32 %v8823_v30, %v11385_v13  ;;  %v8825_v28 = vadd.f32 %v6710_v54, %v3563_v59  ;;  %8770 = vmatprep.mubr.bf16.mxu0 %v6921_v22 }
 0x418   : > { %v6864_v7 = vadd.f32 %v8824_v12, %v11385_v13  ;;  %8771 = vmatmul.mubr.bf16.vlgmr.msra.gmra.mrb[64].mxu0 %v6922_v4  ;;  %v6895_v17 = vmax.f32 %v6863_v44, 0.0 }
 0x419   : > { %v6862_v46 = vadd.f32 %v8825_v28, %v11385_v13  ;;  %v6893_v47 = vmax.f32 %v6861_v56, 0.0 }
 0x41a   : > { %v6896_v27 = vmax.f32 %v6864_v7, 0.0 }
 0x41b   : > { %v6894_v50 = vmax.f32 %v6862_v46, 0.0  ;;  %v8732_v2 = vpop.f32.mrb[24].mxu1 }
 0x41c   : > { %v8826_v39 = vadd.f32 %v8732_v2, %v8492_v55  ;;  %v6723_v5 = vpop.f32.mrb[25].mxu1  ;;  %v6924_v0 = vpack.c.bf16 %v6896_v27, %v6895_v17 }
 0x41d   : > { %v8827_v9 = vadd.f32 %v6723_v5, %v3576_v31  ;;  %v8733_v51 = vpop.f32.mrb[26].mxu1  ;;  %v6923_v18 = vpack.c.bf16 %v6894_v50, %v6893_v47 }
 0x41e   : > { %v6867_v36 = vadd.f32 %v8826_v39, %v11385_v13  ;;  %v8828_v59 = vadd.f32 %v8733_v51, %v8493_v21  ;;  %v6726_v24 = vpop.f32.mrb[27].mxu1 }
 0x41f   : > { %v6865_v19 = vadd.f32 %v8827_v9, %v11385_v13  ;;  %v8829_v48 = vadd.f32 %v6726_v24, %v3579_v62  ;;  %8774 = vmatprep.mubr.bf16.mxu0 %v6923_v18 }
 0x420   : > { %v6868_v61 = vadd.f32 %v8828_v59, %v11385_v13  ;;  %8775 = vmatmul.mubr.bf16.gmra.mrb[68].mxu0 %v6924_v0  ;;  %v6899_v45 = vmax.f32 %v6867_v36, 0.0 }
 0x421   : > { %v6866_v40 = vadd.f32 %v8829_v48, %v11385_v13  ;;  %v6897_v42 = vmax.f32 %v6865_v19, 0.0 }
 0x422   : > { %v6900_v55 = vmax.f32 %v6868_v61, 0.0 }
 0x423   : > { %v6898_v32 = vmax.f32 %v6866_v40, 0.0  ;;  %v8736_v31 = vpop.f32.mrb[28].mxu1 }
 0x424   : > { %v8830_v57 = vadd.f32 %v8736_v31, %v8496_v41  ;;  %v6739_v3 = vpop.f32.mrb[29].mxu1  ;;  %v6926_v26 = vpack.c.bf16 %v6900_v55, %v6899_v45 }
 0x425   : > { %v8831_v21 = vadd.f32 %v6739_v3, %v11376_v15  ;;  %v8737_v63 = vpop.f32.mrb[30].mxu1  ;;  %v6925_v16 = vpack.c.bf16 %v6898_v32, %v6897_v42 }
 0x426   : > { %v6871_v62 = vadd.f32 %v8830_v57, %v11385_v13  ;;  %v8832_v4 = vadd.f32 %v8737_v63, %v11378_v23  ;;  %v6742_v35 = vpop.f32.mrb[31].mxu1 }
 0x427   : > { %v6869_v25 = vadd.f32 %v8831_v21, %v11385_v13  ;;  %v8833_v30 = vadd.f32 %v6742_v35, %v11380_v60  ;;  %8778 = vmatprep.mubr.bf16.mxu0 %v6925_v16 }
 0x428   : > { %v6872_v1 = vadd.f32 %v8832_v4, %v11385_v13  ;;  %8779 = vmatmul.mubr.bf16.gmra.mrb[72].mxu0 %v6926_v26  ;;  %v6903_v22 = vmax.f32 %v6871_v62, 0.0 }
 0x429   : > { %v6870_v41 = vadd.f32 %v8833_v30, %v11385_v13  ;;  %v6901_v15 = vmax.f32 %v6869_v25, 0.0 }
 0x42a   : > { %v6904_v44 = vmax.f32 %v6872_v1, 0.0 }
 0x42b   : > { %v6902_v12 = vmax.f32 %v6870_v41, 0.0  ;;  %v8740_v54 = vpop.f32.mrb[0].mxu1 }
 0x42c   : > { %v8834_v56 = vadd.f32 %v8740_v54, %v11341_v34  ;;  %v6755_v28 = vpop.f32.mrb[1].mxu1  ;;  %v6928_v23 = vpack.c.bf16 %v6904_v44, %v6903_v22 }
 0x42d   : > { %v8835_v7 = vadd.f32 %v6755_v28, %v11343_v6  ;;  %v8741_v46 = vpop.f32.mrb[2].mxu1  ;;  %v6927_v17 = vpack.c.bf16 %v6902_v12, %v6901_v15 }
 0x42e   : > { %v6875_v60 = vadd.f32 %v8834_v56, %v11385_v13  ;;  %v8836_v27 = vadd.f32 %v8741_v46, %v11345_v10  ;;  %v6758_v47 = vpop.f32.mrb[3].mxu1 }
 0x42f   : > { %v6873_v50 = vadd.f32 %v8835_v7, %v11385_v13  ;;  %v8837_v2 = vadd.f32 %v6758_v47, %v11347_v37  ;;  %8782 = vmatprep.mubr.bf16.mxu0 %v6927_v17 }
 0x430   : > { %v6876_v39 = vadd.f32 %v8836_v27, %v11385_v13  ;;  %8783 = vmatmul.mubr.bf16.gmra.mrb[76].mxu0 %v6928_v23  ;;  %v6907_v5 = vmax.f32 %v6875_v60, 0.0 }
 0x431   : > { %v6874_v34 = vadd.f32 %v8837_v2, %v11385_v13  ;;  %v6905_v6 = vmax.f32 %v6873_v50, 0.0 }
 0x432   : > { %v6908_v0 = vmax.f32 %v6876_v39, 0.0 }
 0x433   : > { %v6906_v9 = vmax.f32 %v6874_v34, 0.0  ;;  %v8744_v51 = vpop.f32.mrb[4].mxu1 }
 0x434   : > { %v8838_v18 = vadd.f32 %v8744_v51, %v11352_v58  ;;  %v6771_v36 = vpop.f32.mrb[5].mxu1  ;;  %v6930_v10 = vpack.c.bf16 %v6908_v0, %v6907_v5  ;;  %v9405_v5 = vld [vmem:[%s9872_s8 + $0x8] sm:$0xff]  }
 0x435   : > { %v8839_v59 = vadd.f32 %v6771_v36, %v11354_v38  ;;  %v8745_v24 = vpop.f32.mrb[6].mxu1  ;;  %v6929_v19 = vpack.c.bf16 %v6906_v9, %v6905_v6  ;;  %v7203_v0 = vunpack.c.l.bf16 %v9405_v5 }
 0x436   : > { %v6879_v37 = vadd.f32 %v8838_v18, %v11385_v13  ;;  %v8840_v48 = vadd.f32 %v8745_v24, %v11356_v11  ;;  %v6774_v61 = vpop.f32.mrb[7].mxu1 }
 0x437   : > { %v6877_v40 = vadd.f32 %v8839_v59, %v11385_v13  ;;  %v8841_v45 = vadd.f32 %v6774_v61, %v11358_v14  ;;  %8786 = vmatprep.mubr.bf16.mxu0 %v6929_v19  ;;  %v7204_v59 = vunpack.c.h.bf16 %v9405_v5 }
 0x438   : > { %v6880_v55 = vadd.f32 %v8840_v48, %v11385_v13  ;;  %8787 = vmatmul.mubr.bf16.gmra.mrb[80].mxu0 %v6930_v10  ;;  %v6911_v42 = vmax.f32 %v6879_v37, 0.0 }
 0x439   : > { %v6878_v58 = vadd.f32 %v8841_v45, %v11385_v13  ;;  %v6909_v38 = vmax.f32 %v6877_v40, 0.0 }
 0x43a   : > { %v6912_v32 = vmax.f32 %v6880_v55, 0.0 }
 0x43b   : > { %v6910_v31 = vmax.f32 %v6878_v58, 0.0  ;;  %v8748_v57 = vpop.f32.mrb[8].mxu1 }
 0x43c   : > { %v8842_v3 = vadd.f32 %v8748_v57, %v11360_v33  ;;  %v6787_v26 = vpop.f32.mrb[9].mxu1  ;;  %v6932_v11 = vpack.c.bf16 %v6912_v32, %v6911_v42 }
 0x43d   : > { %v8843_v21 = vadd.f32 %v6787_v26, %v11362_v43  ;;  %v8749_v63 = vpop.f32.mrb[10].mxu1  ;;  %v6931_v16 = vpack.c.bf16 %v6910_v31, %v6909_v38 }
 0x43e   : > { %v6883_v14 = vadd.f32 %v8842_v3, %v11385_v13  ;;  %v8844_v62 = vadd.f32 %v8749_v63, %v11364_v20  ;;  %v6790_v4 = vpop.f32.mrb[11].mxu1  ;;  %v9407_v3 = vld [vmem:[%s9872_s8 + $0x18] sm:$0xff]  }
 0x43f   : > { %v6881_v35 = vadd.f32 %v8843_v21, %v11385_v13  ;;  %v8845_v25 = vadd.f32 %v6790_v4, %v11366_v49  ;;  %8790 = vmatprep.mubr.bf16.mxu0 %v6931_v16  ;;  %v7207_v26 = vunpack.c.l.bf16 %v9407_v3 }
 0x440   : > { %v6884_v30 = vadd.f32 %v8844_v62, %v11385_v13  ;;  %8791 = vmatmul.mubr.bf16.gmra.mrb[84].mxu0 %v6932_v11  ;;  %v6915_v1 = vmax.f32 %v6883_v14, 0.0  ;;  %v9408_v14 = vld [vmem:[%s9872_s8 + $0x10] sm:$0xff]  }
 0x441   : > { %v6882_v33 = vadd.f32 %v8845_v25, %v11385_v13  ;;  %v6913_v43 = vmax.f32 %v6881_v35, 0.0  ;;  %v7205_v62 = vunpack.c.l.bf16 %v9408_v14 }
 0x442   : > { %v6916_v41 = vmax.f32 %v6884_v30, 0.0 }
 0x443   : > { %v6914_v22 = vmax.f32 %v6882_v33, 0.0  ;;  %v8752_v44 = vpop.f32.mrb[12].mxu1  ;;  %v7208_v33 = vunpack.c.h.bf16 %v9407_v3 }
 0x444   : > { %v8846_v15 = vadd.f32 %v8752_v44, %v11368_v29  ;;  %v6803_v12 = vpop.f32.mrb[13].mxu1  ;;  %v6934_v20 = vpack.c.bf16 %v6916_v41, %v6915_v1  ;;  %v7206_v44 = vunpack.c.h.bf16 %v9408_v14 }
 0x445   : > { %v8847_v54 = vadd.f32 %v6803_v12, %v11370_v52  ;;  %v8753_v56 = vpop.f32.mrb[14].mxu1  ;;  %v6933_v28 = vpack.c.bf16 %v6914_v22, %v6913_v43 }
 0x446   : > { %v6887_v49 = vadd.f32 %v8846_v15, %v11385_v13  ;;  %v8848_v23 = vadd.f32 %v8753_v56, %v11372_v53  ;;  %v6806_v7 = vpop.f32.mrb[15].mxu1  ;;  %v11441_v53 = vld [vmem:[%s11568_s6] ss:$0 sm:$0xff] }
 0x447   : > { %v6885_v46 = vadd.f32 %v8847_v54, %v11385_v13  ;;  %v8849_v17 = vadd.f32 %v6806_v7, %v11374_v8  ;;  %8794 = vmatprep.mubr.bf16.mxu0 %v6933_v28 }
 0x448   : > { %v6888_v60 = vadd.f32 %v8848_v23, %v11385_v13  ;;  %8795 = vmatmul.mubr.bf16.gmra.mrb[88].mxu0 %v6934_v20  ;;  %v6919_v52 = vmax.f32 %v6887_v49, 0.0 }
 0x449   : > { %v6886_v29 = vadd.f32 %v8849_v17, %v11385_v13  ;;  %v6917_v47 = vmax.f32 %v6885_v46, 0.0  ;;  %v9406_v13 = vld [vmem:[%s9872_s8] sm:$0xff]   ;;  %v9409_v17 = vld [vmem:[%s9872_s8 + $0x28] sm:$0xff]  }
 0x44a   : > { %v6920_v27 = vmax.f32 %v6888_v60, 0.0  ;;  %v7201_v9 = vunpack.c.l.bf16 %v9406_v13  ;;  %v7202_v19 = vunpack.c.h.bf16 %v9406_v13  ;;  %v7211_v60 = vunpack.c.l.bf16 %v9409_v17 }
 0x44b   : > { %v6918_v50 = vmax.f32 %v6886_v29, 0.0 }
 0x44c   : > { %v6936_v2 = vpack.c.bf16 %v6920_v27, %v6919_v52 }
 0x44d   : > { %v6935_v39 = vpack.c.bf16 %v6918_v50, %v6917_v47  ;;  %v9410_v50 = vld [vmem:[%s9872_s8 + $0x20] sm:$0xff]  }
 0x44f   : > { %8798 = vmatprep.mubr.bf16.mxu0 %v6935_v39 }
 0x450   : > { %8799 = vmatmul.mubr.bf16.gmra.mrb[92].mxu0 %v6936_v2  ;;  %v7209_v2 = vunpack.c.l.bf16 %v9410_v50 }
 0x4eb   : > { %v8772_v8 = vpop.f32.mrb[64].mxu0 }
 0x4ec   : > { %v7051_v34 = vadd.f32 %v8772_v8, %v11441_v53  ;;  %v7042_v6 = vpop.f32.mrb[65].mxu0 }
 0x4ed   : > { %v7043_v51 = vadd.f32 %v11441_v53, %v7042_v6  ;;  %v8773_v18 = vpop.f32.mrb[66].mxu0 }
 0x4ee   : > { %v7171_v36 = vmax.f32 %v7051_v34, 0.0  ;;  %v7054_v10 = vadd.f32 %v8773_v18, %v11441_v53  ;;  %v7045_v24 = vpop.f32.mrb[67].mxu0  ;;  %v7210_v18 = vunpack.c.h.bf16 %v9410_v50 }
 0x4ef   : > { %v7169_v37 = vmax.f32 %v7043_v51, 0.0  ;;  %v7046_v48 = vadd.f32 %v11441_v53, %v7045_v24 }
 0x4f0   : > { %v7235_v61 = vadd.f32 %v7203_v0, %v7171_v36  ;;  %v7172_v40 = vmax.f32 %v7054_v10, 0.0  ;;  %v7212_v0 = vunpack.c.h.bf16 %v9409_v17 }
 0x4f1   : > { %v7233_v45 = vadd.f32 %v7201_v9, %v7169_v37  ;;  %v7170_v55 = vmax.f32 %v7046_v48, 0.0 }
 0x4f2   : > { %v7236_v58 = vadd.f32 %v7204_v59, %v7172_v40  ;;  %v7267_v38 = vmax.f32 %v7235_v61, 0.0 }
 0x4f3   : > { %v7234_v42 = vadd.f32 %v7202_v19, %v7170_v55  ;;  %v8776_v32 = vpop.f32.mrb[68].mxu0  ;;  %v7265_v21 = vmax.f32 %v7233_v45, 0.0  ;;  %v9411_v55 = vld [vmem:[%s9872_s8 + $0x38] sm:$0xff]  }
 0x4f4   : > { %v7268_v31 = vmax.f32 %v7236_v58, 0.0  ;;  %v7067_v57 = vadd.f32 %v8776_v32, %v11441_v53  ;;  %v7058_v11 = vpop.f32.mrb[69].mxu0  ;;  %v7215_v58 = vunpack.c.l.bf16 %v9411_v55 }
 0x4f5   : > { %v7266_v63 = vmax.f32 %v7234_v42, 0.0  ;;  %v7059_v16 = vadd.f32 %v11441_v53, %v7058_v11  ;;  %v8777_v4 = vpop.f32.mrb[70].mxu0 }
 0x4f6   : > { %v7923_v35 = vpack.c.bf16 %v7268_v31, %v7267_v38  ;;  %v7175_v25 = vmax.f32 %v7067_v57, 0.0  ;;  %v7070_v30 = vadd.f32 %v8777_v4, %v11441_v53  ;;  %v7061_v1 = vpop.f32.mrb[71].mxu0  ;;  %v9412_v57 = vld [vmem:[%s9872_s8 + $0x30] sm:$0xff]  }
 0x4f7   : > { %v7918_v41 = vpack.c.bf16 %v7266_v63, %v7265_v21  ;;  %v7173_v43 = vmax.f32 %v7059_v16, 0.0  ;;  %v7062_v22 = vadd.f32 %v11441_v53, %v7061_v1  ;;  %v7213_v3 = vunpack.c.l.bf16 %v9412_v57 }
 0x4f8   : > { %7995 = vst [vmem:[%s11457_s21 + $0x8] sm:$0xff] %v7923_v35   ;;  %v7239_v15 = vadd.f32 %v7207_v26, %v7175_v25  ;;  %v7176_v12 = vmax.f32 %v7070_v30, 0.0  ;;  %v7216_v16 = vunpack.c.h.bf16 %v9411_v55  ;;  %v7214_v25 = vunpack.c.h.bf16 %v9412_v57 }
 0x4f9   : > { %7919 = vst [vmem:[%s11457_s21] sm:$0xff] %v7918_v41   ;;  %v7237_v20 = vadd.f32 %v7205_v62, %v7173_v43  ;;  %v7174_v54 = vmax.f32 %v7062_v22, 0.0 }
 0x4fa   : > { %v7240_v56 = vadd.f32 %v7208_v33, %v7176_v12  ;;  %v7271_v23 = vmax.f32 %v7239_v15, 0.0 }
 0x4fb   : > { %v7238_v28 = vadd.f32 %v7206_v44, %v7174_v54  ;;  %v8780_v49 = vpop.f32.mrb[72].mxu0  ;;  %v7269_v52 = vmax.f32 %v7237_v20, 0.0  ;;  %v9413_v54 = vld [vmem:[%s9872_s8 + $0x48] sm:$0xff]  }
 0x4fc   : > { %v7272_v7 = vmax.f32 %v7240_v56, 0.0  ;;  %v7083_v46 = vadd.f32 %v8780_v49, %v11441_v53  ;;  %v7074_v29 = vpop.f32.mrb[73].mxu0  ;;  %v7219_v56 = vunpack.c.l.bf16 %v9413_v54 }
 0x4fd   : > { %v7270_v27 = vmax.f32 %v7238_v28, 0.0  ;;  %v7075_v47 = vadd.f32 %v11441_v53, %v7074_v29  ;;  %v8781_v39 = vpop.f32.mrb[74].mxu0 }
 0x4fe   : > { %v7933_v8 = vpack.c.bf16 %v7272_v7, %v7271_v23  ;;  %v7179_v34 = vmax.f32 %v7083_v46, 0.0  ;;  %v7086_v5 = vadd.f32 %v8781_v39, %v11441_v53  ;;  %v7077_v6 = vpop.f32.mrb[75].mxu0  ;;  %v9414_v46 = vld [vmem:[%s9872_s8 + $0x40] sm:$0xff]  }
 0x4ff   : > { %v7928_v13 = vpack.c.bf16 %v7270_v27, %v7269_v52  ;;  %v7177_v9 = vmax.f32 %v7075_v47, 0.0  ;;  %v7078_v51 = vadd.f32 %v11441_v53, %v7077_v6  ;;  %v7217_v17 = vunpack.c.l.bf16 %v9414_v46 }
 0x500   : > { %7997 = vst [vmem:[%s11457_s21 + $0x18] sm:$0xff] %v7933_v8   ;;  %v7243_v36 = vadd.f32 %v7211_v60, %v7179_v34  ;;  %v7180_v10 = vmax.f32 %v7086_v5, 0.0  ;;  %v7220_v47 = vunpack.c.h.bf16 %v9413_v54  ;;  %v7218_v34 = vunpack.c.h.bf16 %v9414_v46 }
 0x501   : > { %7996 = vst [vmem:[%s11457_s21 + $0x10] sm:$0xff] %v7928_v13   ;;  %v7241_v59 = vadd.f32 %v7209_v2, %v7177_v9  ;;  %v7178_v24 = vmax.f32 %v7078_v51, 0.0 }
 0x502   : > { %v7244_v19 = vadd.f32 %v7212_v0, %v7180_v10  ;;  %v7275_v61 = vmax.f32 %v7243_v36, 0.0 }
 0x503   : > { %v7242_v37 = vadd.f32 %v7210_v18, %v7178_v24  ;;  %v8784_v48 = vpop.f32.mrb[76].mxu0  ;;  %v7273_v32 = vmax.f32 %v7241_v59, 0.0  ;;  %v9415_v24 = vld [vmem:[%s9872_s8 + $0x58] sm:$0xff]  }
 0x504   : > { %v7276_v40 = vmax.f32 %v7244_v19, 0.0  ;;  %v7099_v45 = vadd.f32 %v8784_v48, %v11441_v53  ;;  %v7090_v42 = vpop.f32.mrb[77].mxu0  ;;  %v7223_v19 = vunpack.c.l.bf16 %v9415_v24 }
 0x505   : > { %v7274_v38 = vmax.f32 %v7242_v37, 0.0  ;;  %v7091_v31 = vadd.f32 %v11441_v53, %v7090_v42  ;;  %v8785_v26 = vpop.f32.mrb[78].mxu0 }
 0x506   : > { %v7943_v11 = vpack.c.bf16 %v7276_v40, %v7275_v61  ;;  %v7183_v21 = vmax.f32 %v7099_v45, 0.0  ;;  %v7102_v63 = vadd.f32 %v8785_v26, %v11441_v53  ;;  %v7093_v14 = vpop.f32.mrb[79].mxu0  ;;  %v9416_v45 = vld [vmem:[%s9872_s8 + $0x50] sm:$0xff]  }
 0x507   : > { %v7938_v62 = vpack.c.bf16 %v7274_v38, %v7273_v32  ;;  %v7181_v4 = vmax.f32 %v7091_v31, 0.0  ;;  %v7094_v35 = vadd.f32 %v11441_v53, %v7093_v14  ;;  %v7221_v55 = vunpack.c.l.bf16 %v9416_v45 }
 0x508   : > { %7999 = vst [vmem:[%s11457_s21 + $0x28] sm:$0xff] %v7943_v11   ;;  %v7247_v30 = vadd.f32 %v7215_v58, %v7183_v21  ;;  %v7184_v33 = vmax.f32 %v7102_v63, 0.0  ;;  %v7224_v31 = vunpack.c.h.bf16 %v9415_v24  ;;  %v7222_v21 = vunpack.c.h.bf16 %v9416_v45 }
 0x509   : > { %7998 = vst [vmem:[%s11457_s21 + $0x20] sm:$0xff] %v7938_v62   ;;  %v7245_v1 = vadd.f32 %v7213_v3, %v7181_v4  ;;  %v7182_v41 = vmax.f32 %v7094_v35, 0.0 }
 0x50a   : > { %v7248_v43 = vadd.f32 %v7216_v16, %v7184_v33  ;;  %v7279_v15 = vmax.f32 %v7247_v30, 0.0 }
 0x50b   : > { %v7246_v22 = vadd.f32 %v7214_v25, %v7182_v41  ;;  %v8788_v44 = vpop.f32.mrb[80].mxu0  ;;  %v7277_v49 = vmax.f32 %v7245_v1, 0.0  ;;  %v9417_v41 = vld [vmem:[%s9872_s8 + $0x68] sm:$0xff]  }
 0x50c   : > { %v7280_v12 = vmax.f32 %v7248_v43, 0.0  ;;  %v7115_v20 = vadd.f32 %v8788_v44, %v11441_v53  ;;  %v7106_v28 = vpop.f32.mrb[81].mxu0  ;;  %v7227_v43 = vunpack.c.l.bf16 %v9417_v41 }
 0x50d   : > { %v7278_v23 = vmax.f32 %v7246_v22, 0.0  ;;  %v7107_v7 = vadd.f32 %v11441_v53, %v7106_v28  ;;  %v8789_v60 = vpop.f32.mrb[82].mxu0 }
 0x50e   : > { %v7953_v29 = vpack.c.bf16 %v7280_v12, %v7279_v15  ;;  %v7187_v52 = vmax.f32 %v7115_v20, 0.0  ;;  %v7118_v27 = vadd.f32 %v8789_v60, %v11441_v53  ;;  %v7109_v50 = vpop.f32.mrb[83].mxu0  ;;  %v9418_v20 = vld [vmem:[%s9872_s8 + $0x60] sm:$0xff]  }
 0x50f   : > { %v7948_v2 = vpack.c.bf16 %v7278_v23, %v7277_v49  ;;  %v7185_v39 = vmax.f32 %v7107_v7, 0.0  ;;  %v7110_v8 = vadd.f32 %v11441_v53, %v7109_v50  ;;  %v7225_v54 = vunpack.c.l.bf16 %v9418_v20 }
 0x510   : > { %8001 = vst [vmem:[%s11457_s21 + $0x38] sm:$0xff] %v7953_v29   ;;  %v7251_v5 = vadd.f32 %v7219_v56, %v7187_v52  ;;  %v7188_v0 = vmax.f32 %v7118_v27, 0.0  ;;  %v7228_v7 = vunpack.c.h.bf16 %v9417_v41  ;;  %v7226_v52 = vunpack.c.h.bf16 %v9418_v20 }
 0x511   : > { %8000 = vst [vmem:[%s11457_s21 + $0x30] sm:$0xff] %v7948_v2   ;;  %v7249_v6 = vadd.f32 %v7217_v17, %v7185_v39  ;;  %v7186_v13 = vmax.f32 %v7110_v8, 0.0 }
 0x512   : > { %v7252_v9 = vadd.f32 %v7220_v47, %v7188_v0  ;;  %v7283_v36 = vmax.f32 %v7251_v5, 0.0 }
 0x513   : > { %v7250_v51 = vadd.f32 %v7218_v34, %v7186_v13  ;;  %v8792_v18 = vpop.f32.mrb[84].mxu0  ;;  %v7281_v48 = vmax.f32 %v7249_v6, 0.0  ;;  %v9419_v13 = vld [vmem:[%s9872_s8 + $0x78] sm:$0xff]  }
 0x514   : > { %v7284_v10 = vmax.f32 %v7252_v9, 0.0  ;;  %v7131_v59 = vadd.f32 %v8792_v18, %v11441_v53  ;;  %v7122_v37 = vpop.f32.mrb[85].mxu0  ;;  %v7231_v9 = vunpack.c.l.bf16 %v9419_v13 }
 0x515   : > { %v7282_v61 = vmax.f32 %v7250_v51, 0.0  ;;  %v7123_v40 = vadd.f32 %v11441_v53, %v7122_v37  ;;  %v8793_v58 = vpop.f32.mrb[86].mxu0 }
 0x516   : > { %v7963_v42 = vpack.c.bf16 %v7284_v10, %v7283_v36  ;;  %v7191_v32 = vmax.f32 %v7131_v59, 0.0  ;;  %v7134_v38 = vadd.f32 %v8793_v58, %v11441_v53  ;;  %v7125_v57 = vpop.f32.mrb[87].mxu0  ;;  %v9420_v59 = vld [vmem:[%s9872_s8 + $0x70] sm:$0xff]   ;;  %s11514_s8 = scalar_lea.hbm %s11569_s7, %s7914_s16 }
 0x517   : > { %v7958_v3 = vpack.c.bf16 %v7282_v61, %v7281_v48  ;;  %v7189_v26 = vmax.f32 %v7123_v40, 0.0  ;;  %v7126_v11 = vadd.f32 %v11441_v53, %v7125_v57  ;;  %v7229_v24 = vunpack.c.l.bf16 %v9420_v59 }
 0x518   : > { %8003 = vst [vmem:[%s11457_s21 + $0x48] sm:$0xff] %v7963_v42   ;;  %v7255_v63 = vadd.f32 %v7223_v19, %v7191_v32  ;;  %v7192_v16 = vmax.f32 %v7134_v38, 0.0  ;;  %v7232_v40 = vunpack.c.h.bf16 %v9419_v13  ;;  %v7230_v32 = vunpack.c.h.bf16 %v9420_v59 }
 0x519   : > { %8002 = vst [vmem:[%s11457_s21 + $0x40] sm:$0xff] %v7958_v3   ;;  %v7253_v14 = vadd.f32 %v7221_v55, %v7189_v26  ;;  %v7190_v62 = vmax.f32 %v7126_v11, 0.0 }
 0x51a   : > { %v7256_v4 = vadd.f32 %v7224_v31, %v7192_v16  ;;  %v7287_v30 = vmax.f32 %v7255_v63, 0.0 }
 0x51b   : > { %v7254_v35 = vadd.f32 %v7222_v21, %v7190_v62  ;;  %v8796_v25 = vpop.f32.mrb[88].mxu0  ;;  %v7285_v44 = vmax.f32 %v7253_v14, 0.0 }
 0x51c   : > { %v7288_v33 = vmax.f32 %v7256_v4, 0.0  ;;  %v7147_v1 = vadd.f32 %v8796_v25, %v11441_v53  ;;  %v7138_v22 = vpop.f32.mrb[89].mxu0 }
 0x51d   : > { %v7286_v15 = vmax.f32 %v7254_v35, 0.0  ;;  %v7139_v12 = vadd.f32 %v11441_v53, %v7138_v22  ;;  %v8797_v56 = vpop.f32.mrb[90].mxu0 }
 0x51e   : > { %v7973_v28 = vpack.c.bf16 %v7288_v33, %v7287_v30  ;;  %v7195_v49 = vmax.f32 %v7147_v1, 0.0  ;;  %v7150_v23 = vadd.f32 %v8797_v56, %v11441_v53  ;;  %v7141_v46 = vpop.f32.mrb[91].mxu0 }
 0x51f   : > { %v7968_v17 = vpack.c.bf16 %v7286_v15, %v7285_v44  ;;  %v7193_v60 = vmax.f32 %v7139_v12, 0.0  ;;  %v7142_v29 = vadd.f32 %v11441_v53, %v7141_v46 }
 0x520   : > { %8005 = vst [vmem:[%s11457_s21 + $0x58] sm:$0xff] %v7973_v28   ;;  %v7259_v27 = vadd.f32 %v7227_v43, %v7195_v49  ;;  %v7196_v47 = vmax.f32 %v7150_v23, 0.0 }
 0x521   : > { %8004 = vst [vmem:[%s11457_s21 + $0x50] sm:$0xff] %v7968_v17   ;;  %v7257_v50 = vadd.f32 %v7225_v54, %v7193_v60  ;;  %v7194_v2 = vmax.f32 %v7142_v29, 0.0 }
 0x522   : > { %v7260_v39 = vadd.f32 %v7228_v7, %v7196_v47  ;;  %v7291_v5 = vmax.f32 %v7259_v27, 0.0 }
 0x523   : > { %v7258_v8 = vadd.f32 %v7226_v52, %v7194_v2  ;;  %v8800_v34 = vpop.f32.mrb[92].mxu0  ;;  %v7289_v18 = vmax.f32 %v7257_v50, 0.0 }
 0x524   : > { %v7292_v0 = vmax.f32 %v7260_v39, 0.0  ;;  %v7163_v6 = vadd.f32 %v8800_v34, %v11441_v53  ;;  %v7154_v51 = vpop.f32.mrb[93].mxu0 }
 0x525   : > { %v7290_v36 = vmax.f32 %v7258_v8, 0.0  ;;  %v7155_v10 = vadd.f32 %v11441_v53, %v7154_v51  ;;  %v8801_v19 = vpop.f32.mrb[94].mxu0 }
 0x526   : > { %v7983_v37 = vpack.c.bf16 %v7292_v0, %v7291_v5  ;;  %v7199_v48 = vmax.f32 %v7163_v6, 0.0  ;;  %v7166_v61 = vadd.f32 %v8801_v19, %v11441_v53  ;;  %v7157_v45 = vpop.f32.mrb[95].mxu0 }
 0x527   : > { %v7978_v55 = vpack.c.bf16 %v7290_v36, %v7289_v18  ;;  %v7197_v58 = vmax.f32 %v7155_v10, 0.0  ;;  %v7158_v42 = vadd.f32 %v11441_v53, %v7157_v45 }
 0x528   : > { %8007 = vst [vmem:[%s11457_s21 + $0x68] sm:$0xff] %v7983_v37   ;;  %v7263_v38 = vadd.f32 %v7231_v9, %v7199_v48  ;;  %v7200_v31 = vmax.f32 %v7166_v61, 0.0 }
 0x529   : > { %8006 = vst [vmem:[%s11457_s21 + $0x60] sm:$0xff] %v7978_v55   ;;  %v7261_v57 = vadd.f32 %v7229_v24, %v7197_v58  ;;  %v7198_v3 = vmax.f32 %v7158_v42, 0.0 }
 0x52a   : > { %v7264_v26 = vadd.f32 %v7232_v40, %v7200_v31  ;;  %v7295_v21 = vmax.f32 %v7263_v38, 0.0 }
 0x52b   : > { %v7262_v11 = vadd.f32 %v7230_v32, %v7198_v3  ;;  %v7293_v16 = vmax.f32 %v7261_v57, 0.0 }
 0x52c   : > { %v7296_v63 = vmax.f32 %v7264_v26, 0.0 }
 0x52d   : > { %v7294_v14 = vmax.f32 %v7262_v11, 0.0 }
 0x52e   : > { %v7993_v53 = vpack.c.bf16 %v7296_v63, %v7295_v21 }
 0x52f   : > { %v7988_v62 = vpack.c.bf16 %v7294_v14, %v7293_v16 }
 0x530   : > { %8009 = vst [vmem:[%s11457_s21 + $0x78] sm:$0xff] %v7993_v53  }
 0x531   : > { %8008 = vst [vmem:[%s11457_s21 + $0x70] sm:$0xff] %v7988_v62  }
 0x532   : > { %9548 = shalt.err (!%p9545_p4)
}
 0x533   : > { %s9549_s10 = scalar_lea.hbm %s11514_s8, 2048  ;;  %s9553_s20 = scalar_lea.hbm %s11569_s7, 4096 }
 0x534   : > { %p9550_p9 = scmp.ne.s32.totalorder %s11514_s8, %s9549_s10  ;;  %p9554_p8 = scmp.lt.u32.totalorder %s11514_s8, %s11569_s7 }
 0x535   : > { %p9555_p13 = scmp.lt.u32.totalorder %s9553_s20, %s9549_s10  ;;  %p9557_p10 = scmp.lt.u32.totalorder %s9549_s10, %s11514_s8 }
 0x536   : > { %p9551_p0 = pnand %p9550_p9, %p9815_p5 }
 0x537   : > { %p9556_p6 = por %p9555_p13, %p9554_p8 }
 0x538   : > { %p9552_p11 = pneg %p9551_p0 }
 0x539   : > { %p9558_p3 = por %p9557_p10, %p9556_p6 }
 0x53b   : > { %p9559_p7 = pnand %p9558_p3, %p9552_p11 }
 0x53d   : > { %9562 = shalt.err (!%p9559_p7)
}
 0x53e   : > { %s9619_s23 = smov 64   ;;  %s9620_s11 = smov 4  }
 0x53f   : > { %9088 = dma.vmem_to_hbm [thread:$0]  (%p9815_p5), %s11516_s29, 2048, %s11514_s8, %s7362_s28, %s9619_s23, %s9619_s23, %s9620_s11  }
 0x540 PF: > { %s11650_s30 = sld [smem:[#allocation16_spill]]  ;;  %s7391_s9 = sand.u32 1, %s9597_s24  }
 0x541   : > { %p11652_p1 = scmp.ge.s32.totalorder %s9609_s27, 2  ;;  %s7392_s13 = scalar_lea.sflag [#allocation5], %s7391_s9 }
 0x546   : > { %p11651_p12 = scmp.ne.s32.totalorder %s11650_s30, 0 }
 0x548   : > { %p9105_p2 = pnand %p11652_p1, %p11651_p12 }
 0x54a   : > { %9592 = dma.done.wait (!%p9105_p2), %s7392_s13, 2048  }
 0x54b   : > { %9594 = vsyncadd (!%p9105_p2), %s7392_s13, 4294965248  ;;  %p22_p4 = scmp.ge.s32.totalorder %s9801_s22, 4   ;;  %s11653_s24 = smov %s9601_s25 }
 0x54c   : > { %s11654_s25 = smov %s9605_s26  ;;  %s11655_s26 = smov %s9811_s18 }
 0x54d   : > { %s11656_s27 = smov %s9801_s22  ;;  %24 = sbr.rel (!%p22_p4) target bundleno = 7 (0x7), region = 116 }
 0x554   :  { %7397 = vsyncpa [#allocation4], 1 }
 0x555   :  { %7399 = vsyncpa [#allocation4 + $0x1], 1 }
 0x556   :  { %7400 = vsyncpa [#allocation7], 1 }
 0x557   :  { %7401 = vsyncpa [#allocation10], 1 }
 0x558   :  { %7402 = vsyncpa [#allocation5], 1 }
 0x559   :  { %7404 = vsyncpa [#allocation5 + $0x1], 1 }

// kernel: tpu_custom_call.1
= control target key start
LH: loop header
LB: loop body
LE: loop exit
PB: predicated region body
PF: predicated region fallthrough
CT: control target
= control target key end

     0   :  { %12 = vsyncpa [#allocation4], 0  ;;  %s11562_s0 = inlined_call_operand.hbm [shape: bf16[8,8,8,128], index: 0, kind: input, shape index: {}]   ;;  %s11563_s1 = inlined_call_operand.hbm [shape: bf16[128,128], index: 1, kind: input, shape index: {}]   ;;  %s11564_s2 = inlined_call_operand.vmem [shape: f32[1,128], index: 2, kind: input, shape index: {}]   ;;  %s11565_s3 = inlined_call_operand.hbm [shape: bf16[9,128,128], index: 3, kind: input, shape index: {}]   ;;  %s11566_s4 = inlined_call_operand.vmem [shape: f32[1,128], index: 4, kind: input, shape index: {}]   ;;  %s11567_s5 = inlined_call_operand.hbm [shape: bf16[128,128], index: 5, kind: input, shape index: {}]   ;;  %s11568_s6 = inlined_call_operand.vmem [shape: f32[1,128], index: 6, kind: input, shape index: {}]   ;;  %s11569_s7 = inlined_call_operand.hbm [shape: bf16[8,8,8,128], index: 7, kind: output, shape index: {}]  }
   0x1   :  { %14 = vsyncpa [#allocation4 + $0x1], 0 }
   0x2   :  { %15 = vsyncpa [#allocation7], 0 }
   0x3   :  { %16 = vsyncpa [#allocation10], 0 }
   0x4   :  { %17 = vsyncpa [#allocation5], 0 }
   0x5   :  { %19 = vsyncpa [#allocation5 + $0x1], 0  ;;  %s9661_s24 = smov 0   ;;  %s9663_s25 = smov 0  }
   0x6   :  { %s9665_s26 = smov 0   ;;  %s9667_s27 = smov 0  }
   0x7 LB: > { %s9682_s28 = sadd.s32 4294967295, %s9609_s27   ;;  %s7478_s29 = sadd.s32 4294967294, %s9609_s27   ;;  %s9609_s27 = sphi %s9667_s27, %s11656_s27   ;;  %s9605_s26 = sphi %s9665_s26, %s11655_s26   ;;  %s9601_s25 = sphi %s9663_s25, %s11654_s25   ;;  %s9597_s24 = sphi %s9661_s24, %s11653_s24  }
   0x8   : > { %p45_p0 = scmp.ne.s32.totalorder %s9601_s25, %s9597_s24  ;;  %p11570_p1 = scmp.eq.s32.totalorder %s9682_s28, 0 }
   0x9   : > { %p201_p3 = scmp.eq.s32.totalorder %s7478_s29, 1  ;;  %p7479_p5 = scmp.ge.s32.totalorder %s9609_s27, 1 }
   0xa   : > { %p9691_p4 = por %p11570_p1, %p45_p0  ;;  %p208_p7 = scmp.lt.s32.totalorder %s9609_s27, 3 }
   0xb   : > { %p9696_p6 = por %p201_p3, %p45_p0  ;;  %s9611_s10 = smov [#allocation6]  }
   0xc   : > { %s11584_s30 = scalar_select %p9691_p4, 1, 0 }
   0xd   : > { %s11585_s8 = scalar_select %p9696_p6, 1, 0 }
   0xe   : > { %p9701_p8 = pnand %p7479_p5, %p208_p7  ;;  %s220_s11 = sshll.u32 %s9611_s10, 4  ;;  %s9705_s11 = int_to_ptr.vmem [resolvable:$true] %s220_s11 }
   0xf   : > { %11586 = sst [smem:[#allocation16_spill]] %s11585_s8  ;;  %s9612_s13 = smov [#allocation8]  }
  0x10   : > { %s11587_s9 = scalar_select %p9701_p8, 1, 0 }
  0x11   : > { %p9090_p9 = pneg %p9701_p8  ;;  %s236_s14 = sshll.u32 %s9612_s13, 4  ;;  %s9716_s14 = int_to_ptr.vmem [resolvable:$true] %s236_s14 }
  0x12   : > { %s9613_s15 = smov [#allocation9]   ;;  %s9421_s19 = scalar_lea.hbm %s11563_s1, 1024 }
  0x13   : > { %p9712_p11 = pnand %p9090_p9, %p11570_p1  ;;  %s9718_s16 = sshll.u32 %s9613_s15, 4  ;;  %s253_s16 = int_to_ptr.vmem [resolvable:$true] %s9718_s16 }
  0x14   : > { %p9422_p12 = scmp.ne.s32.totalorder %s11563_s1, %s9421_s19  ;;  %p9428_p5 = scmp.lt.u32.totalorder %s9421_s19, %s11563_s1 }
  0x15   : > { %p9728_p13 = pneg %p9712_p11 }
  0x17   : > { %p9424_p0 = pnand %p9728_p13, %p9422_p12 }
  0x19   : > { %p9425_p3 = pneg %p9424_p0 }
  0x1b   : > { %p9430_p7 = pnand %p9428_p5, %p9425_p3 }
  0x1d   : > { %9433 = shalt.err (!%p9430_p7)
}
  0x1e   : > { %s9434_s10 = scalar_lea.vmem %s9705_s11, 1024  ;;  %p9442_p2 = scmp.lt.s32.totalorder %s9705_s11, %s9705_s11 }
  0x1f   : > { %p9435_p9 = scmp.ne.s32.totalorder %s9705_s11, %s9434_s10  ;;  %p9443_p6 = scmp.lt.s32.totalorder %s9434_s10, %s9434_s10 }
  0x21   : > { %p9437_p10 = pnand %p9435_p9, %p9728_p13  ;;  %p9444_p12 = por %p9443_p6, %p9442_p2 }
  0x23   : > { %p9438_p1 = pneg %p9437_p10 }
  0x25   : > { %p9445_p0 = pnand %p9444_p12, %p9438_p1 }
  0x27   : > { %9448 = shalt.err (!%p9445_p0)
}
  0x28   : > { %s9614_s13 = smov 64   ;;  %s9615_s15 = smov 4  }
  0x29   : > { %9093 = dma.hbm_to_vmem [thread:$0]  (!%p9712_p11), %s11563_s1, 1024, %s9705_s11, [#allocation7], %s9614_s13, %s9614_s13, %s9615_s15  }
  0x2a   : > { %s9449_s21 = scalar_lea.hbm %s11565_s3, 9216 }
  0x2b   : > { %p9450_p1 = scmp.ne.s32.totalorder %s11565_s3, %s9449_s21  ;;  %p9456_p10 = scmp.lt.u32.totalorder %s9449_s21, %s11565_s3 }
  0x2d   : > { %p9452_p2 = pnand %p9450_p1, %p9728_p13 }
  0x2f   : > { %p9453_p6 = pneg %p9452_p2 }
  0x31   : > { %p9458_p3 = pnand %p9456_p10, %p9453_p6 }
  0x33   : > { %9461 = shalt.err (!%p9458_p3)
}
  0x34   : > { %s9462_s11 = scalar_lea.vmem %s9716_s14, 9216  ;;  %p9470_p12 = scmp.lt.s32.totalorder %s9716_s14, %s9716_s14 }
  0x35   : > { %p9463_p5 = scmp.ne.s32.totalorder %s9716_s14, %s9462_s11  ;;  %p9471_p0 = scmp.lt.s32.totalorder %s9462_s11, %s9462_s11 }
  0x37   : > { %p9465_p7 = pnand %p9463_p5, %p9728_p13  ;;  %p9472_p1 = por %p9471_p0, %p9470_p12 }
  0x39   : > { %p9466_p9 = pneg %p9465_p7 }
  0x3b   : > { %p9473_p2 = pnand %p9472_p1, %p9466_p9 }
  0x3d   : > { %9476 = shalt.err (!%p9473_p2)
}
  0x3e   : > { %9096 = dma.hbm_to_vmem [thread:$0]  (!%p9712_p11), %s11565_s3, 9216, %s9716_s14, [#allocation7], %s9614_s13, %s9614_s13, %s9615_s15  }
  0x3f   : > { %s9477_s20 = scalar_lea.hbm %s11567_s5, 1024 }
  0x40   : > { %p9478_p6 = scmp.ne.s32.totalorder %s11567_s5, %s9477_s20  ;;  %p9484_p5 = scmp.lt.u32.totalorder %s9477_s20, %s11567_s5 }
  0x42   : > { %p9480_p10 = pnand %p9478_p6, %p9728_p13 }
  0x44   : > { %p9481_p3 = pneg %p9480_p10 }
  0x46   : > { %p9486_p7 = pnand %p9484_p5, %p9481_p3 }
  0x48   : > { %9489 = shalt.err (!%p9486_p7)
}
  0x49   : > { %s9490_s11 = scalar_lea.vmem %s253_s16, 1024  ;;  %p9498_p1 = scmp.lt.s32.totalorder %s253_s16, %s253_s16 }
  0x4a   : > { %p9491_p9 = scmp.ne.s32.totalorder %s253_s16, %s9490_s11  ;;  %p9499_p2 = scmp.lt.s32.totalorder %s9490_s11, %s9490_s11 }
  0x4c   : > { %p9493_p12 = pnand %p9491_p9, %p9728_p13  ;;  %p9500_p4 = por %p9499_p2, %p9498_p1 }
  0x4e   : > { %p9494_p0 = pneg %p9493_p12 }
  0x50   : > { %p9501_p8 = pnand %p9500_p4, %p9494_p0 }
  0x52   : > { %9504 = shalt.err (!%p9501_p8)
}
  0x53   : > { %9099 = dma.hbm_to_vmem [thread:$0]  (!%p9712_p11), %s11567_s5, 1024, %s253_s16, [#allocation10], %s9614_s13, %s9614_s13, %s9615_s15  }
  0x54   : > { %s9801_s22 = sadd.s32 1, %s9609_s27   ;;  %s32_s17 = sadd.s32 1, %s9605_s26 }
  0x55   : > { %s29_s12 = ssub.s32 %s9609_s27, %s9801_s22  ;;  %p39_p8 = scmp.ne.s32.totalorder %s9605_s26, %s9601_s25 }
  0x56   : > { %p30_p4 = scmp.eq.s32.totalorder %s29_s12, 0  ;;  %p40_p13 = scmp.eq.s32.totalorder %s9609_s27, 0 }
  0x57   : > { %p9111_p6 = scmp.lt.s32.totalorder %s9609_s27, 2  ;;  %p11590_p3 = scmp.eq.s32.totalorder %s9682_s28, 1 }
  0x58   : > { %s9811_s18 = scalar_select %p30_p4, %s9605_s26, %s32_s17  }
  0x59   : > { %p41_p10 = por %p40_p13, %p39_p8  ;;  %p9815_p5 = por %p11590_p3, %p39_p8 }
  0x5a   : > { %s269_s20 = sand.u32 1, %s9605_s26   ;;  %s7880_s21 = sshll.u32 %s9609_s27, 11 }
  0x5b   : > { %s7484_s16 = sshll.u32 %s269_s20, 7  ;;  %s9824_s10 = scalar_lea.hbm %s11562_s0, %s7880_s21 }
  0x5c   : > { %s273_s11 = scalar_lea.vmem [#allocation3], %s7484_s16  ;;  %p9826_p11 = pnand %p9111_p6, %p41_p10 }
  0x5d   : > { %s281_s14 = sshll.u32 %s273_s11, 4  ;;  %s9832_s12 = scalar_lea.sflag [#allocation4], %s269_s20  ;;  %s9830_s14 = int_to_ptr.vmem [resolvable:$true] %s281_s14 }
  0x5e   : > { %s9505_s17 = scalar_lea.hbm %s9824_s10, 2048  ;;  %p9507_p9 = pneg %p9826_p11 }
  0x5f   : > { %p9506_p7 = scmp.ne.s32.totalorder %s9824_s10, %s9505_s17  ;;  %s9510_s23 = scalar_lea.hbm %s11562_s0, 4096 }
  0x60   : > { %p9511_p1 = scmp.lt.u32.totalorder %s9824_s10, %s11562_s0  ;;  %p9512_p2 = scmp.lt.u32.totalorder %s9510_s23, %s9505_s17 }
  0x61   : > { %p9508_p12 = pnand %p9507_p9, %p9506_p7  ;;  %p9514_p8 = scmp.lt.u32.totalorder %s9505_s17, %s9824_s10 }
  0x62   : > { %p9513_p4 = por %p9512_p2, %p9511_p1 }
  0x63   : > { %p9509_p0 = pneg %p9508_p12 }
  0x64   : > { %p9515_p13 = por %p9514_p8, %p9513_p4 }
  0x66   : > { %p9516_p6 = pnand %p9515_p13, %p9509_p0 }
  0x68   : > { %9519 = shalt.err (!%p9516_p6)
}
  0x69   : > { %s9520_s20 = scalar_lea.vmem %s9830_s14, 2048  ;;  %s9616_s21 = smov [#allocation3]  }
  0x6a   : > { %p9521_p10 = scmp.ne.s32.totalorder %s9830_s14, %s9520_s20  ;;  %s9525_s16 = sshll.u32 %s9616_s21, 4  ;;  %s9526_s16 = int_to_ptr.vmem [resolvable:$false] %s9525_s16 }
  0x6b   : > { %s9527_s29 = scalar_lea.vmem %s9526_s16, 4096  ;;  %p9528_p12 = scmp.lt.s32.totalorder %s9830_s14, %s9526_s16 }
  0x6c   : > { %p9523_p3 = pnand %p9521_p10, %p9507_p9  ;;  %p9529_p1 = scmp.lt.s32.totalorder %s9527_s29, %s9520_s20 }
  0x6e   : > { %p9524_p7 = pneg %p9523_p3  ;;  %p9530_p2 = por %p9529_p1, %p9528_p12 }
  0x70   : > { %p9531_p4 = pnand %p9530_p2, %p9524_p7 }
  0x72   : > { %9534 = shalt.err (!%p9531_p4)
}
  0x73   : > { %9103 = dma.hbm_to_vmem [thread:$0]  (!%p9826_p11), %s9824_s10, 2048, %s9830_s14, %s9832_s12, %s9614_s13, %s9614_s13, %s9615_s15  }
  0x74   : > { %p11593_p9 = scmp.ne.s32.totalorder %s11587_s9, 0 }
  0x76   : > { %293 = sbr.rel (%p11593_p9) target bundleno = 1344 (0x540), region = 48 }
  0x7d   : > { %s9866_s17 = sand.u32 1, %s9601_s25   ;;  %p11594_p0 = scmp.ne.s32.totalorder %s11584_s30, 0 }
  0x7e   : > { %s7489_s23 = sshll.u32 %s9866_s17, 7  ;;  %s296_s11 = scalar_lea.sflag [#allocation4], %s9866_s17 }
  0x7f   : > { %s9872_s8 = scalar_lea.vmem [#allocation3], %s7489_s23 }
  0x80   : > { %9580 = dma.done.wait (%p11594_p0), %s296_s11, 2048  }
  0x81   : > { %9582 = vsyncadd (%p11594_p0), %s296_s11, 4294965248  ;;  %p11595_p11 = scmp.eq.s32.totalorder %s9682_s28, 0 }
  0x83   : > { %9584 = dma.done.wait (%p11595_p11), [#allocation7], 10240   ;;  %p11596_p8 = pmov %p11595_p11 }
  0x85   : > { %9586 = vsyncadd (%p11596_p8), [#allocation7], 4294957056  ;;  %p11597_p13 = pmov %p11596_p8 }
  0x86   : > { %p11598_p6 = pmov %p11596_p8 }
  0x87   : > { %9588 = dma.done.wait (%p11597_p13), [#allocation10], 1024  }
  0x88   : > { %9590 = vsyncadd (%p11598_p6), [#allocation10], 4294966272  ;;  %v9156_v0 = vld [vmem:[#allocation6] sm:$0xff]   ;;  %v9157_v1 = vld [vmem:[#allocation6 + $0x8] sm:$0xff]   ;;  %vm754_vm0 = vcmask 1040384   ;;  %v9617_v53 = vmov 0  }
  0x89   : > { %8274 = vmatprep.subr.bf16.mxu0 %v9156_v0  ;;  %v9158_v2 = vld [vmem:[#allocation6 + $0x10] sm:$0xff]   ;;  %v9159_v3 = vld [vmem:[#allocation6 + $0x18] sm:$0xff]   ;;  %v345_v4 = vld [vmem:[%s9872_s8] sm:$0xff]   ;;  %vm755_vm1 = vsmask.f32 256  ;;  %vm1448_vm8 = vcmask 1043456  }
  0x8a   : > { %8275 = vmatpush3.bf16.msra.mxu0 %v9156_v0  ;;  %8290 = vmatprep.mubr.bf16.mxu0 %v345_v4  ;;  %v9160_v5 = vld [vmem:[#allocation6 + $0x20] sm:$0xff]   ;;  %v9161_v6 = vld [vmem:[#allocation6 + $0x28] sm:$0xff]   ;;  %v9162_v7 = vld [vmem:[#allocation6 + $0x30] sm:$0xff]   ;;  %vm877_vm2 = vsmask.f32 7938  ;;  %vm2864_vm10 = vcmask 1042432  }
  0x8b   : > { %8276 = vmatprep.subr.bf16.mxu0 %v9157_v1  ;;  %v9163_v8 = vld [vmem:[#allocation6 + $0x38] sm:$0xff]   ;;  %v347_v9 = vld [vmem:[%s9872_s8 + $0x8] sm:$0xff]   ;;  %v349_v10 = vld [vmem:[%s9872_s8 + $0x10] sm:$0xff]   ;;  %737 = vst [vmem:[#allocation2] sm:$0xf] %v9617_v53  ;;  %vm2865_vm11 = vcmask 1046532  }
  0x8c   : > { %v351_v11 = vld [vmem:[%s9872_s8 + $0x18] sm:$0xff]   ;;  %v353_v12 = vld [vmem:[%s9872_s8 + $0x20] sm:$0xff]   ;;  %v355_v13 = vld [vmem:[%s9872_s8 + $0x28] sm:$0xff]   ;;  %738 = vst [vmem:[#allocation2 + $0x4] sm:$0x1] %v9617_v53  ;;  %s11457_s21 = scalar_lea.vmem [#allocation11], %s7489_s23 }
  0x8d   : > { %v357_v14 = vld [vmem:[%s9872_s8 + $0x30] sm:$0xff]   ;;  %v359_v15 = vld [vmem:[%s9872_s8 + $0x38] sm:$0xff]   ;;  %v361_v16 = vld [vmem:[%s9872_s8 + $0x40] sm:$0xff]   ;;  %739 = vst [vmem:[#allocation2 + $0x50] sm:$0xf] %v9617_v53  ;;  %s7914_s16 = sshll.u32 %s9682_s28, 11 }
  0x8e   : > { %8277 = vmatpush3.bf16.msra.mxu0 %v9157_v1  ;;  %v363_v17 = vld [vmem:[%s9872_s8 + $0x48] sm:$0xff]   ;;  %v365_v18 = vld [vmem:[%s9872_s8 + $0x50] sm:$0xff]   ;;  %v367_v19 = vld [vmem:[%s9872_s8 + $0x58] sm:$0xff]   ;;  %740 = vst [vmem:[#allocation2 + $0x54] sm:$0x1] %v9617_v53  ;;  %s7376_s29 = sshll.u32 %s11457_s21, 4  ;;  %s11516_s29 = int_to_ptr.vmem [resolvable:$true] %s7376_s29 }
  0x8f   : > { %8278 = vmatprep.subr.bf16.mxu0 %v9158_v2  ;;  %v369_v20 = vld [vmem:[%s9872_s8 + $0x60] sm:$0xff]   ;;  %v371_v21 = vld [vmem:[%s9872_s8 + $0x68] sm:$0xff]   ;;  %v373_v22 = vld [vmem:[%s9872_s8 + $0x70] sm:$0xff]   ;;  %741 = vst [vmem:[#allocation2 + $0xa0] sm:$0xf] %v9617_v53  ;;  %s7362_s28 = scalar_lea.sflag [#allocation5], %s9866_s17 }
  0x90   : > { %v375_v23 = vld [vmem:[%s9872_s8 + $0x78] sm:$0xff]   ;;  %v9180_v24 = vld [vmem:[#allocation8 + $0x40] sm:$0xff]   ;;  %vm9902_vm3 = vmand %vm754_vm0, %vm755_vm1  ;;  %742 = vst [vmem:[#allocation2 + $0xa4] sm:$0x1] %v9617_v53  ;;  %vm1722_vm5 = vsmask.f32 3328 }
  0x91   : > { %v766_v26 = vld [vmem:[#allocation2 + $0x18] sm:$0x1]  ;;  %v888_v27 = vld [vmem:[#allocation2 + $0x1c] sm:$0x1]  ;;  %vm9909_vm4 = vmand %vm754_vm0, %vm877_vm2  ;;  %743 = vst [vmem:[#allocation2 + $0xf0] sm:$0xf] %v9617_v53 }
  0x92   : > { %8279 = vmatpush3.bf16.msra.mxu0 %v9158_v2  ;;  %v767_v28 = vsel %vm9902_vm3, 0, %v766_v26  ;;  %v760_v30 = vld [vmem:[#allocation2 + $0x8] sm:$0x1]  ;;  %v882_v31 = vld [vmem:[#allocation2 + $0xc] sm:$0x1]  ;;  %v889_v32 = vsel %vm9909_vm4, 0, %v888_v27  ;;  %vm10103_vm9 = vmand %vm1448_vm8, %vm877_vm2 }
  0x93   : > { %8280 = vmatprep.subr.bf16.mxu0 %v9159_v3  ;;  %768 = vst [vmem:[#allocation2 + $0x18] sm:$0x1] %v767_v28  ;;  %v761_v33 = vsel %vm9902_vm3, 0, %v760_v30  ;;  %v883_v34 = vsel %vm9909_vm4, 0, %v882_v31  ;;  %v769_v35 = vld [vmem:[#allocation2 + $0x20] sm:$0x1]  ;;  %vm10586_vm12 = vmor %vm2864_vm10, %vm2865_vm11 }
  0x94   : > { %890 = vst [vmem:[#allocation2 + $0x1c] sm:$0x1] %v889_v32  ;;  %762 = vst [vmem:[#allocation2 + $0x8] sm:$0x1] %v761_v33  ;;  %v770_v36 = vsel %vm9902_vm3, 0, %v769_v35  ;;  %v9181_v43 = vld [vmem:[#allocation8 + $0x48] sm:$0xff]  }
  0x95   : > { %884 = vst [vmem:[#allocation2 + $0xc] sm:$0x1] %v883_v34  ;;  %v891_v37 = vld [vmem:[#allocation2 + $0x24] sm:$0x1]  ;;  %v763_v38 = vld [vmem:[#allocation2 + $0x10] sm:$0x1] }
  0x96   : > { %8281 = vmatpush3.bf16.msra.mxu0 %v9159_v3  ;;  %771 = vst [vmem:[#allocation2 + $0x20] sm:$0x1] %v770_v36  ;;  %v892_v39 = vsel %vm9909_vm4, 0, %v891_v37  ;;  %v764_v40 = vsel %vm9902_vm3, 0, %v763_v38  ;;  %v885_v41 = vld [vmem:[#allocation2 + $0x14] sm:$0x1] }
  0x97   : > { %8282 = vmatprep.subr.bf16.mxu0 %v9160_v5  ;;  %893 = vst [vmem:[#allocation2 + $0x24] sm:$0x1] %v892_v39  ;;  %765 = vst [vmem:[#allocation2 + $0x10] sm:$0x1] %v764_v40  ;;  %v886_v42 = vsel %vm9909_vm4, 0, %v885_v41  ;;  %v9182_v52 = vld [vmem:[#allocation8 + $0x50] sm:$0xff]  }
  0x98   : > { %887 = vst [vmem:[#allocation2 + $0x14] sm:$0x1] %v886_v42  ;;  %v778_v44 = vld [vmem:[#allocation2 + $0x38] sm:$0x1]  ;;  %v900_v45 = vld [vmem:[#allocation2 + $0x3c] sm:$0x1] }
  0x99   : > { %v779_v46 = vsel %vm9902_vm3, 0, %v778_v44  ;;  %v901_v47 = vsel %vm9909_vm4, 0, %v900_v45  ;;  %v772_v48 = vld [vmem:[#allocation2 + $0x28] sm:$0x1]  ;;  %v894_v49 = vld [vmem:[#allocation2 + $0x2c] sm:$0x1] }
  0x9a   : > { %8283 = vmatpush3.bf16.msra.mxu0 %v9160_v5  ;;  %780 = vst [vmem:[#allocation2 + $0x38] sm:$0x1] %v779_v46  ;;  %902 = vst [vmem:[#allocation2 + $0x3c] sm:$0x1] %v901_v47  ;;  %v773_v50 = vsel %vm9902_vm3, 0, %v772_v48  ;;  %v895_v51 = vsel %vm9909_vm4, 0, %v894_v49 }
  0x9b   : > { %8284 = vmatprep.subr.bf16.mxu0 %v9161_v6  ;;  %774 = vst [vmem:[#allocation2 + $0x28] sm:$0x1] %v773_v50  ;;  %896 = vst [vmem:[#allocation2 + $0x2c] sm:$0x1] %v895_v51  ;;  %v781_v54 = vld [vmem:[#allocation2 + $0x40] sm:$0x1] }
  0x9c   : > { %744 = vst [vmem:[#allocation2 + $0xf4] sm:$0x1] %v9617_v53  ;;  %746 = vst [vmem:[#allocation2 + $0x48] sm:$0xf] %v9617_v53  ;;  %v903_v55 = vld [vmem:[#allocation2 + $0x44] sm:$0x1] }
  0x9d   : > { %747 = vst [vmem:[#allocation2 + $0x4c] sm:$0x1] %v9617_v53  ;;  %748 = vst [vmem:[#allocation2 + $0x98] sm:$0xf] %v9617_v53  ;;  %v782_v56 = vsel %vm9902_vm3, 0, %v781_v54  ;;  %v904_v57 = vsel %vm9909_vm4, 0, %v903_v55 }
  0x9e   : > { %8285 = vmatpush3.bf16.msra.mxu0 %v9161_v6  ;;  %749 = vst [vmem:[#allocation2 + $0x9c] sm:$0x1] %v9617_v53  ;;  %750 = vst [vmem:[#allocation2 + $0xe8] sm:$0xf] %v9617_v53  ;;  %v775_v58 = vld [vmem:[#allocation2 + $0x30] sm:$0x1] }
  0x9f   : > { %8286 = vmatprep.subr.bf16.mxu0 %v9162_v7  ;;  %751 = vst [vmem:[#allocation2 + $0xec] sm:$0x1] %v9617_v53  ;;  %752 = vst [vmem:[#allocation2 + $0x138] sm:$0xf] %v9617_v53  ;;  %v897_v59 = vld [vmem:[#allocation2 + $0x34] sm:$0x1] }
  0xa0   : > { %753 = vst [vmem:[#allocation2 + $0x13c] sm:$0x1] %v9617_v53  ;;  %783 = vst [vmem:[#allocation2 + $0x40] sm:$0x1] %v782_v56  ;;  %v776_v60 = vsel %vm9902_vm3, 0, %v775_v58  ;;  %v898_v61 = vsel %vm9909_vm4, 0, %v897_v59 }
  0xa1   : > { %905 = vst [vmem:[#allocation2 + $0x44] sm:$0x1] %v904_v57  ;;  %v9183_v62 = vld [vmem:[#allocation8 + $0x58] sm:$0xff]   ;;  %777 = vst [vmem:[#allocation2 + $0x30] sm:$0x1] %v776_v60  ;;  %v9188_v32 = vld [vmem:[#allocation8 + $0xc8] sm:$0xff]  }
  0xa2   : > { %8287 = vmatpush3.bf16.msra.mxu0 %v9162_v7  ;;  %899 = vst [vmem:[#allocation2 + $0x34] sm:$0x1] %v898_v61  ;;  %v796_v63 = vld [vmem:[#allocation2 + $0x68] sm:$0x1]  ;;  %v918_v0 = vld [vmem:[#allocation2 + $0x6c] sm:$0x1] }
  0xa3   : > { %8288 = vmatprep.subr.bf16.mxu0 %v9163_v8  ;;  %v757_v1 = vld [vmem:[#allocation2] sm:$0x1]  ;;  %v797_v2 = vsel %vm9902_vm3, 0, %v796_v63  ;;  %v919_v3 = vsel %vm9909_vm4, 0, %v918_v0  ;;  %v790_v4 = vld [vmem:[#allocation2 + $0x58] sm:$0x1] }
  0xa4   : > { %v912_v5 = vld [vmem:[#allocation2 + $0x5c] sm:$0x1]  ;;  %798 = vst [vmem:[#allocation2 + $0x68] sm:$0x1] %v797_v2  ;;  %920 = vst [vmem:[#allocation2 + $0x6c] sm:$0x1] %v919_v3 }
  0xa5   : > { %v791_v6 = vsel %vm9902_vm3, 0, %v790_v4  ;;  %v913_v7 = vsel %vm9909_vm4, 0, %v912_v5  ;;  %v802_v28 = vld [vmem:[#allocation2 + $0x78] sm:$0x1]  ;;  %v924_v31 = vld [vmem:[#allocation2 + $0x7c] sm:$0x1] }
  0xa6   : > { %8289 = vmatpush3.bf16.msra.mxu0 %v9163_v8  ;;  %v799_v8 = vld [vmem:[#allocation2 + $0x70] sm:$0x1]  ;;  %792 = vst [vmem:[#allocation2 + $0x58] sm:$0x1] %v791_v6  ;;  %914 = vst [vmem:[#allocation2 + $0x5c] sm:$0x1] %v913_v7 }
  0xa7   : > { %8322 = vmatprep.subr.bf16.mxu0 %v9180_v24  ;;  %v803_v30 = vsel %vm9902_vm3, 0, %v802_v28  ;;  %v925_v33 = vsel %vm9909_vm4, 0, %v924_v31  ;;  %v811_v34 = vld [vmem:[#allocation2 + $0x90] sm:$0x1]  ;;  %v933_v35 = vld [vmem:[#allocation2 + $0x94] sm:$0x1] }
  0xa8   : > { %804 = vst [vmem:[#allocation2 + $0x78] sm:$0x1] %v803_v30  ;;  %v9189_v36 = vld [vmem:[#allocation8 + $0x78] sm:$0xff]   ;;  %926 = vst [vmem:[#allocation2 + $0x7c] sm:$0x1] %v925_v33  ;;  %v812_v37 = vsel %vm9902_vm3, 0, %v811_v34 }
  0xa9   : > { %8291 = vmatmul.mubr.bf16.vlgmr.msra.gmra.mrb[0].mxu0 %v347_v9  ;;  %v921_v9 = vld [vmem:[#allocation2 + $0x74] sm:$0x1]  ;;  %v934_v38 = vsel %vm9909_vm4, 0, %v933_v35  ;;  %813 = vst [vmem:[#allocation2 + $0x90] sm:$0x1] %v812_v37  ;;  %v9191_v60 = vld [vmem:[#allocation8 + $0xd8] sm:$0xff]  }
  0xaa   : > { %8294 = vmatprep.mubr.bf16.mxu0 %v349_v10  ;;  %8323 = vmatpush3.bf16.msra.mxu0 %v9180_v24  ;;  %v800_v10 = vsel %vm9902_vm3, 0, %v799_v8  ;;  %v930_v24 = vld [vmem:[#allocation2 + $0x8c] sm:$0x1]  ;;  %935 = vst [vmem:[#allocation2 + $0x94] sm:$0x1] %v934_v38  ;;  %v9190_v55 = vld [vmem:[#allocation8 + $0xd0] sm:$0xff]  }
  0xab   : > { %8324 = vmatprep.subr.bf16.mxu0 %v9181_v43  ;;  %801 = vst [vmem:[#allocation2 + $0x70] sm:$0x1] %v800_v10  ;;  %v931_v27 = vsel %vm9909_vm4, 0, %v930_v24  ;;  %v805_v39 = vld [vmem:[#allocation2 + $0x80] sm:$0x1]  ;;  %v9195_v38 = vld [vmem:[#allocation8 + $0xf8] sm:$0xff]  }
  0xac   : > { %932 = vst [vmem:[#allocation2 + $0x8c] sm:$0x1] %v931_v27  ;;  %v927_v40 = vld [vmem:[#allocation2 + $0x84] sm:$0x1]  ;;  %v806_v41 = vsel %vm9902_vm3, 0, %v805_v39  ;;  %s9535_s30 = scalar_lea.vmem %s11516_s29, 2048 }
  0xad   : > { %v928_v42 = vsel %vm9909_vm4, 0, %v927_v40  ;;  %807 = vst [vmem:[#allocation2 + $0x80] sm:$0x1] %v806_v41  ;;  %v948_v44 = vld [vmem:[#allocation2 + $0xbc] sm:$0x1]  ;;  %p9536_p10 = scmp.ne.s32.totalorder %s11516_s29, %s9535_s30  ;;  %s9618_s9 = smov [#allocation11]  }
  0xae   : > { %8325 = vmatpush3.bf16.msra.mxu0 %v9181_v43  ;;  %929 = vst [vmem:[#allocation2 + $0x84] sm:$0x1] %v928_v42  ;;  %v826_v43 = vld [vmem:[#allocation2 + $0xb8] sm:$0x1]  ;;  %v949_v46 = vsel %vm9909_vm4, 0, %v948_v44  ;;  %s9539_s13 = sshll.u32 %s9618_s9, 4  ;;  %s9540_s13 = int_to_ptr.vmem [resolvable:$false] %s9539_s13 }
  0xaf   : > { %8326 = vmatprep.subr.bf16.mxu0 %v9182_v52  ;;  %v827_v45 = vsel %vm9902_vm3, 0, %v826_v43  ;;  %950 = vst [vmem:[#allocation2 + $0xbc] sm:$0x1] %v949_v46  ;;  %v820_v47 = vld [vmem:[#allocation2 + $0xa8] sm:$0x1]  ;;  %p9537_p3 = pnand %p9536_p10, %p9815_p5  ;;  %s9541_s15 = scalar_lea.vmem %s9540_s13, 4096 }
  0xb0   : > { %828 = vst [vmem:[#allocation2 + $0xb8] sm:$0x1] %v827_v45  ;;  %v942_v48 = vld [vmem:[#allocation2 + $0xac] sm:$0x1]  ;;  %v821_v49 = vsel %vm9902_vm3, 0, %v820_v47  ;;  %p9542_p12 = scmp.lt.s32.totalorder %s11516_s29, %s9540_s13  ;;  %p9543_p1 = scmp.lt.s32.totalorder %s9541_s15, %s9535_s30 }
  0xb1   : > { %8295 = vmatmul.mubr.bf16.gmra.mrb[4].mxu0 %v351_v11  ;;  %v922_v11 = vsel %vm9909_vm4, 0, %v921_v9  ;;  %v943_v50 = vsel %vm9909_vm4, 0, %v942_v48  ;;  %822 = vst [vmem:[#allocation2 + $0xa8] sm:$0x1] %v821_v49  ;;  %v829_v51 = vld [vmem:[#allocation2 + $0xc0] sm:$0x1]  ;;  %p9538_p7 = pneg %p9537_p3 }
  0xb2   : > { %8298 = vmatprep.mubr.bf16.mxu0 %v353_v12  ;;  %8327 = vmatpush3.bf16.msra.mxu0 %v9182_v52  ;;  %923 = vst [vmem:[#allocation2 + $0x74] sm:$0x1] %v922_v11  ;;  %v9184_v12 = vld [vmem:[#allocation8 + $0x60] sm:$0xff]   ;;  %944 = vst [vmem:[#allocation2 + $0xac] sm:$0x1] %v943_v50  ;;  %v830_v52 = vsel %vm9902_vm3, 0, %v829_v51  ;;  %p9544_p2 = por %p9543_p1, %p9542_p12 }
  0xb3   : > { %8328 = vmatprep.subr.bf16.mxu0 %v9183_v62  ;;  %v951_v53 = vld [vmem:[#allocation2 + $0xc4] sm:$0x1]  ;;  %831 = vst [vmem:[#allocation2 + $0xc0] sm:$0x1] %v830_v52  ;;  %v823_v56 = vld [vmem:[#allocation2 + $0xb0] sm:$0x1] }
  0xb4   : > { %v952_v54 = vsel %vm9909_vm4, 0, %v951_v53  ;;  %v945_v57 = vld [vmem:[#allocation2 + $0xb4] sm:$0x1]  ;;  %v824_v58 = vsel %vm9902_vm3, 0, %v823_v56  ;;  %v838_v61 = vld [vmem:[#allocation2 + $0xd8] sm:$0x1]  ;;  %p9545_p4 = pnand %p9544_p2, %p9538_p7 }
  0xb5   : > { %953 = vst [vmem:[#allocation2 + $0xc4] sm:$0x1] %v952_v54  ;;  %v946_v59 = vsel %vm9909_vm4, 0, %v945_v57  ;;  %825 = vst [vmem:[#allocation2 + $0xb0] sm:$0x1] %v824_v58  ;;  %v839_v63 = vsel %vm9902_vm3, 0, %v838_v61 }
  0xb6   : > { %8329 = vmatpush3.bf16.msra.mxu0 %v9183_v62  ;;  %947 = vst [vmem:[#allocation2 + $0xb4] sm:$0x1] %v946_v59  ;;  %v960_v62 = vld [vmem:[#allocation2 + $0xdc] sm:$0x1]  ;;  %840 = vst [vmem:[#allocation2 + $0xd8] sm:$0x1] %v839_v63 }
  0xb7   : > { %8330 = vmatprep.subr.bf16.mxu0 %v9184_v12  ;;  %v961_v0 = vsel %vm9909_vm4, 0, %v960_v62  ;;  %v954_v2 = vld [vmem:[#allocation2 + $0xcc] sm:$0x1]  ;;  %v841_v3 = vld [vmem:[#allocation2 + $0xe0] sm:$0x1] }
  0xb8   : > { %962 = vst [vmem:[#allocation2 + $0xdc] sm:$0x1] %v961_v0  ;;  %v955_v5 = vsel %vm9909_vm4, 0, %v954_v2  ;;  %v842_v6 = vsel %vm9902_vm3, 0, %v841_v3  ;;  %v963_v7 = vld [vmem:[#allocation2 + $0xe4] sm:$0x1] }
  0xb9   : > { %8299 = vmatmul.mubr.bf16.gmra.mrb[8].mxu0 %v355_v13  ;;  %v758_v13 = vsel %vm9902_vm3, 0, %v757_v1  ;;  %v832_v1 = vld [vmem:[#allocation2 + $0xc8] sm:$0x1]  ;;  %956 = vst [vmem:[#allocation2 + $0xcc] sm:$0x1] %v955_v5  ;;  %v964_v8 = vsel %vm9909_vm4, 0, %v963_v7 }
  0xba   : > { %8302 = vmatprep.mubr.bf16.mxu0 %v357_v14  ;;  %v793_v14 = vld [vmem:[#allocation2 + $0x60] sm:$0x1]  ;;  %759 = vst [vmem:[#allocation2] sm:$0x1] %v758_v13  ;;  %8331 = vmatpush3.bf16.msra.mxu0 %v9184_v12  ;;  %v833_v4 = vsel %vm9902_vm3, 0, %v832_v1 }
  0xbb   : > { %834 = vst [vmem:[#allocation2 + $0xc8] sm:$0x1] %v833_v4  ;;  %843 = vst [vmem:[#allocation2 + $0xe0] sm:$0x1] %v842_v6  ;;  %v787_v9 = vld [vmem:[#allocation2 + $0x50] sm:$0x1] }
  0xbc   : > { %965 = vst [vmem:[#allocation2 + $0xe4] sm:$0x1] %v964_v8  ;;  %v909_v10 = vld [vmem:[#allocation2 + $0x54] sm:$0x1]  ;;  %v788_v11 = vsel %vm9902_vm3, 0, %v787_v9  ;;  %v10051_v1 = vld [vmem:[#allocation8 + $0x100] sm:$0xff]  }
  0xbd   : > { %v910_v12 = vsel %vm9909_vm4, 0, %v909_v10  ;;  %789 = vst [vmem:[#allocation2 + $0x50] sm:$0x1] %v788_v11  ;;  %v835_v13 = vld [vmem:[#allocation2 + $0xd0] sm:$0x1] }
  0xbe   : > { %911 = vst [vmem:[#allocation2 + $0x54] sm:$0x1] %v910_v12  ;;  %v859_v27 = vld [vmem:[#allocation2 + $0x110] sm:$0x1]  ;;  %v981_v31 = vld [vmem:[#allocation2 + $0x114] sm:$0x1] }
  0xbf   : > { %v860_v30 = vsel %vm9902_vm3, 0, %v859_v27  ;;  %v853_v33 = vld [vmem:[#allocation2 + $0x100] sm:$0x1]  ;;  %v975_v35 = vld [vmem:[#allocation2 + $0x104] sm:$0x1] }
  0xc0   : > { %861 = vst [vmem:[#allocation2 + $0x110] sm:$0x1] %v860_v30  ;;  %v854_v34 = vsel %vm9902_vm3, 0, %v853_v33  ;;  %v976_v37 = vsel %vm9909_vm4, 0, %v975_v35  ;;  %v868_v39 = vld [vmem:[#allocation2 + $0x128] sm:$0x1] }
  0xc1   : > { %8303 = vmatmul.mubr.bf16.gmra.mrb[12].mxu0 %v359_v15  ;;  %v915_v15 = vld [vmem:[#allocation2 + $0x64] sm:$0x1]  ;;  %855 = vst [vmem:[#allocation2 + $0x100] sm:$0x1] %v854_v34  ;;  %977 = vst [vmem:[#allocation2 + $0x104] sm:$0x1] %v976_v37 }
  0xc2   : > { %8306 = vmatprep.mubr.bf16.mxu0 %v361_v16  ;;  %v879_v16 = vld [vmem:[#allocation2 + $0x4] sm:$0x1]  ;;  %v869_v40 = vsel %vm9902_vm3, 0, %v868_v39  ;;  %v990_v41 = vld [vmem:[#allocation2 + $0x12c] sm:$0x1] }
  0xc3   : > { %870 = vst [vmem:[#allocation2 + $0x128] sm:$0x1] %v869_v40  ;;  %v991_v42 = vsel %vm9909_vm4, 0, %v990_v41  ;;  %v862_v43 = vld [vmem:[#allocation2 + $0x118] sm:$0x1] }
  0xc4   : > { %992 = vst [vmem:[#allocation2 + $0x12c] sm:$0x1] %v991_v42  ;;  %v984_v44 = vld [vmem:[#allocation2 + $0x11c] sm:$0x1]  ;;  %v871_v45 = vld [vmem:[#allocation2 + $0x130] sm:$0x1] }
  0xc5   : > { %v863_v46 = vsel %vm9902_vm3, 0, %v862_v43  ;;  %v985_v47 = vsel %vm9909_vm4, 0, %v984_v44  ;;  %v872_v48 = vsel %vm9902_vm3, 0, %v871_v45  ;;  %v993_v49 = vld [vmem:[#allocation2 + $0x134] sm:$0x1]  ;;  %v10083_v45 = vld [vmem:[#allocation8] sm:$0xff]  }
  0xc6   : > { %864 = vst [vmem:[#allocation2 + $0x118] sm:$0x1] %v863_v46  ;;  %986 = vst [vmem:[#allocation2 + $0x11c] sm:$0x1] %v985_v47  ;;  %v994_v50 = vsel %vm9909_vm4, 0, %v993_v49 }
  0xc7   : > { %873 = vst [vmem:[#allocation2 + $0x130] sm:$0x1] %v872_v48  ;;  %995 = vst [vmem:[#allocation2 + $0x134] sm:$0x1] %v994_v50  ;;  %v1642_v51 = vld [vmem:[#allocation2] sm:$0xf] }
  0xc8   : > { %v1650_v52 = vld [vmem:[#allocation2 + $0x50] sm:$0xf]  ;;  %v817_v53 = vld [vmem:[#allocation2 + $0xa0] sm:$0x1]  ;;  %v939_v54 = vld [vmem:[#allocation2 + $0xa4] sm:$0x1] }
  0xc9   : > { %8307 = vmatmul.mubr.bf16.gmra.mrb[16].mxu0 %v363_v17  ;;  %v794_v17 = vsel %vm9902_vm3, 0, %v793_v14  ;;  %v957_v14 = vld [vmem:[#allocation2 + $0xd4] sm:$0x1]  ;;  %v940_v56 = vsel %vm9909_vm4, 0, %v939_v54  ;;  %v1726_v57 = vshrl.u32 %v1642_v51, 16  ;;  %v1729_v58 = vshll.u32 %v1642_v51, 16 }
  0xca   : > { %8310 = vmatprep.mubr.bf16.mxu0 %v365_v18  ;;  %v916_v18 = vsel %vm9909_vm4, 0, %v915_v15  ;;  %795 = vst [vmem:[#allocation2 + $0x60] sm:$0x1] %v794_v17  ;;  %v836_v15 = vsel %vm9902_vm3, 0, %v835_v13  ;;  %v9192_v17 = vld [vmem:[#allocation8 + $0xe0] sm:$0xff]   ;;  %v1838_v59 = vshrl.u32 %v1650_v52, 16 }
  0xcb   : > { %917 = vst [vmem:[#allocation2 + $0x64] sm:$0x1] %v916_v18  ;;  %837 = vst [vmem:[#allocation2 + $0xd0] sm:$0x1] %v836_v15  ;;  %v9193_v18 = vld [vmem:[#allocation8 + $0xe8] sm:$0xff]   ;;  %v1728_v2 = vrot.slane %v1726_v57, 4 }
  0xcc   : > { %941 = vst [vmem:[#allocation2 + $0xa4] sm:$0x1] %v940_v56  ;;  %v865_v61 = vld [vmem:[#allocation2 + $0x120] sm:$0x1]  ;;  %v987_v62 = vld [vmem:[#allocation2 + $0x124] sm:$0x1] }
  0xcd   : > { %v866_v63 = vsel %vm9902_vm3, 0, %v865_v61  ;;  %v988_v0 = vsel %vm9909_vm4, 0, %v987_v62  ;;  %v1731_v3 = vrot.slane %v1729_v58, 5  ;;  %v1840_v4 = vrot.slane %v1838_v59, 4  ;;  %v1698_v12 = vld [vmem:[#allocation2 + $0x54] sm:$0x1] }
  0xce   : > { %867 = vst [vmem:[#allocation2 + $0x120] sm:$0x1] %v866_v63  ;;  %989 = vst [vmem:[#allocation2 + $0x124] sm:$0x1] %v988_v0  ;;  %v10057_v15 = vld [vmem:[%s11564_s2] ss:$0 sm:$0xff] }
  0xcf   : > { %v1732_v10 = vor.u32 %v1731_v3, %v1728_v2  ;;  %vm1723_vm6 = vsmask.f32 7440  ;;  %v969_v39 = vld [vmem:[#allocation2 + $0xf4] sm:$0x1]  ;;  %v1465_v56 = vld [vmem:[#allocation2 + $0x1c] sm:$0x1] }
  0xd0   : > { %vm10076_vm7 = vmor %vm1722_vm5, %vm1723_vm6  ;;  %v970_v46 = vsel %vm9909_vm4, 0, %v969_v39  ;;  %v1450_v62 = vld [vmem:[#allocation2 + $0x8] sm:$0xf] }
  0xd1   : > { %8311 = vmatmul.mubr.bf16.gmra.mrb[20].mxu0 %v367_v19  ;;  %v9185_v19 = vld [vmem:[#allocation8 + $0x68] sm:$0xff]   ;;  %971 = vst [vmem:[#allocation2 + $0xf4] sm:$0x1] %v970_v46 }
  0xd2   : > { %8314 = vmatprep.mubr.bf16.mxu0 %v369_v20  ;;  %v880_v20 = vsel %vm9909_vm4, 0, %v879_v16  ;;  %8332 = vmatprep.subr.bf16.mxu0 %v9185_v19  ;;  %v958_v16 = vsel %vm9909_vm4, 0, %v957_v14 }
  0xd3   : > { %881 = vst [vmem:[#allocation2 + $0x4] sm:$0x1] %v880_v20  ;;  %8333 = vmatpush3.bf16.msra.mxu0 %v9185_v19  ;;  %959 = vst [vmem:[#allocation2 + $0xd4] sm:$0x1] %v958_v16  ;;  %v856_v19 = vld [vmem:[#allocation2 + $0x108] sm:$0x1] }
  0xd4   : > { %v978_v20 = vld [vmem:[#allocation2 + $0x10c] sm:$0x1]  ;;  %v1706_v14 = vld [vmem:[#allocation2 + $0xa4] sm:$0x1]  ;;  %v1847_v16 = vshll.u32 %v1698_v12, 16 }
  0xd9   : > { %8315 = vmatmul.mubr.bf16.gmra.mrb[24].mxu0 %v371_v21  ;;  %v9186_v21 = vld [vmem:[#allocation8 + $0xc0] sm:$0xff]  }
  0xda   : > { %8318 = vmatprep.mubr.bf16.mxu0 %v373_v22  ;;  %v9187_v22 = vld [vmem:[#allocation8 + $0x70] sm:$0xff]   ;;  %8802 = vmatprep.subr.bf16.mxu1 %v9186_v21  ;;  %v1690_v7 = vld [vmem:[#allocation2 + $0x4] sm:$0x1] }
  0xdb   : > { %8334 = vmatprep.subr.bf16.mxu0 %v9187_v22  ;;  %8810 = vmatpush3.bf16.msra.mxu1 %v9186_v21  ;;  %v857_v21 = vsel %vm9902_vm3, 0, %v856_v19  ;;  %v1735_v11 = vshll.u32 %v1690_v7, 16  ;;  %v1959_v19 = vshll.u32 %v1706_v14, 16  ;;  %v1468_v14 = vld [vmem:[#allocation2 + $0x20] sm:$0xf] }
  0xdc   : > { %8335 = vmatpush3.bf16.msra.mxu0 %v9187_v22  ;;  %8803 = vmatprep.subr.bf16.mxu1 %v9188_v32  ;;  %v979_v22 = vsel %vm9909_vm4, 0, %v978_v20  ;;  %858 = vst [vmem:[#allocation2 + $0x108] sm:$0x1] %v857_v21 }
  0xdd   : > { %8336 = vmatprep.subr.bf16.mxu0 %v9189_v36  ;;  %980 = vst [vmem:[#allocation2 + $0x10c] sm:$0x1] %v979_v22  ;;  %v10071_v33 = vrot.slane %v1959_v19, 5 }
  0xdf   : > { %8811 = vmatpush3.bf16.msra.mxu1 %v9188_v32  ;;  %v982_v32 = vsel %vm9909_vm4, 0, %v981_v31  ;;  %v10067_v31 = vrot.slane %v1847_v16, 5 }
  0xe0   : > { %8337 = vmatpush3.bf16.msra.mxu0 %v9189_v36  ;;  %8804 = vmatprep.subr.bf16.mxu1 %v9190_v55  ;;  %983 = vst [vmem:[#allocation2 + $0x114] sm:$0x1] %v982_v32  ;;  %v9194_v36 = vld [vmem:[#allocation8 + $0xf0] sm:$0xff]  }
  0xe1   : > { %8319 = vmatmul.mubr.bf16.gmra.mrb[28].mxu0 %v375_v23  ;;  %v808_v23 = vld [vmem:[#allocation2 + $0x88] sm:$0x1]  ;;  %8370 = vmatprep.subr.bf16.mxu0 %v10083_v45 }
  0xe2   : > { %v809_v26 = vsel %vm9902_vm3, 0, %v808_v23  ;;  %v850_v23 = vld [vmem:[#allocation2 + $0xf8] sm:$0x1] }
  0xe3   : > { %810 = vst [vmem:[#allocation2 + $0x88] sm:$0x1] %v809_v26  ;;  %8812 = vmatpush3.bf16.msra.mxu1 %v9190_v55  ;;  %v851_v24 = vsel %vm9902_vm3, 0, %v850_v23  ;;  %v972_v26 = vld [vmem:[#allocation2 + $0xfc] sm:$0x1]  ;;  %v818_v55 = vsel %vm9902_vm3, 0, %v817_v53 }
  0xe4   : > { %8805 = vmatprep.subr.bf16.mxu1 %v9191_v60  ;;  %852 = vst [vmem:[#allocation2 + $0xf8] sm:$0x1] %v851_v24  ;;  %v973_v28 = vsel %vm9909_vm4, 0, %v972_v26  ;;  %819 = vst [vmem:[#allocation2 + $0xa0] sm:$0x1] %v818_v55  ;;  %v10060_v24 = vrot.slane %v1732_v10, 4 }
  0xe5   : > { %974 = vst [vmem:[#allocation2 + $0xfc] sm:$0x1] %v973_v28  ;;  %v10062_v26 = vrot.slane %v1735_v11, 5  ;;  %v1462_v55 = vld [vmem:[#allocation2 + $0x18] sm:$0xf] }
  0xe7   : > { %8813 = vmatpush3.bf16.msra.mxu1 %v9191_v60  ;;  %v1841_v60 = vshll.u32 %v1650_v52, 16  ;;  %v1738_v49 = vsel %vm10076_vm7, %v10060_v24, %v10062_v26 }
  0xe8   : > { %8806 = vmatprep.subr.bf16.mxu1 %v9192_v17 }
  0xe9   : > { %v1843_v5 = vrot.slane %v1841_v60, 5 }
  0xeb   : > { %8814 = vmatpush3.bf16.msra.mxu1 %v9192_v17  ;;  %v1658_v6 = vld [vmem:[#allocation2 + $0xa0] sm:$0xf]  ;;  %v1844_v13 = vor.u32 %v1843_v5, %v1840_v4 }
  0xec   : > { %8807 = vmatprep.subr.bf16.mxu1 %v9193_v18  ;;  %v1950_v8 = vshrl.u32 %v1658_v6, 16  ;;  %v1953_v9 = vshll.u32 %v1658_v6, 16  ;;  %v1453_v6 = vld [vmem:[#allocation2 + $0xc] sm:$0x1] }
  0xed   : > { %v10064_v27 = vrot.slane %v1844_v13, 4 }
  0xee   : > { %v1952_v17 = vrot.slane %v1950_v8, 4 }
  0xef   : > { %8815 = vmatpush3.bf16.msra.mxu1 %v9193_v18  ;;  %v1955_v18 = vrot.slane %v1953_v9, 5  ;;  %v1850_v52 = vsel %vm10076_vm7, %v10064_v27, %v10067_v31 }
  0xf0   : > { %8808 = vmatprep.subr.bf16.mxu1 %v9194_v36 }
  0xf1   : > { %v1956_v21 = vor.u32 %v1955_v18, %v1952_v17 }
  0xf3   : > { %8816 = vmatpush3.bf16.msra.mxu1 %v9194_v36  ;;  %v10069_v32 = vrot.slane %v1956_v21, 4 }
  0xf4   : > { %8809 = vmatprep.subr.bf16.mxu1 %v9195_v38 }
  0xf5   : > { %v1962_v53 = vsel %vm10076_vm7, %v10069_v32, %v10071_v33 }
  0xf7   : > { %8817 = vmatpush3.bf16.msra.mxu1 %v9195_v38  ;;  %v847_v38 = vld [vmem:[#allocation2 + $0xf0] sm:$0x1] }
  0xf8   : > { %8514 = vmatprep.subr.bf16.mxu1 %v10051_v1  ;;  %v848_v42 = vsel %vm9902_vm3, 0, %v847_v38 }
  0xf9   : > { %849 = vst [vmem:[#allocation2 + $0xf0] sm:$0x1] %v848_v42 }
 0x17c   : > { %v8292_v20 = vpop.f32.mrb[0].mxu0 }
 0x17d   : > { %v587_v22 = vadd.f32 %v8292_v20, %v10057_v15  ;;  %v578_v23 = vpop.f32.mrb[1].mxu0  ;;  %v1471_v20 = vld [vmem:[#allocation2 + $0x24] sm:$0x1] }
 0x17e   : > { %v579_v28 = vadd.f32 %v10057_v15, %v578_v23  ;;  %v8293_v30 = vpop.f32.mrb[2].mxu0 }
 0x17f   : > { %v707_v34 = vmax.f32 %v587_v22, 0.0  ;;  %v590_v35 = vadd.f32 %v8293_v30, %v10057_v15  ;;  %v581_v36 = vpop.f32.mrb[3].mxu0 }
 0x180   : > { %v705_v40 = vmax.f32 %v579_v28, 0.0  ;;  %v582_v41 = vadd.f32 %v10057_v15, %v581_v36  ;;  %v1459_v36 = vld [vmem:[#allocation2 + $0x14] sm:$0x1] }
 0x181   : > { %v7883_v43 = vpack.c.bf16 %v707_v34, %v707_v34  ;;  %v708_v44 = vmax.f32 %v590_v35, 0.0  ;;  %v1456_v35 = vld [vmem:[#allocation2 + $0x10] sm:$0xf] }
 0x182   : > { %v7881_v47 = vpack.c.bf16 %v705_v40, %v705_v40  ;;  %v706_v48 = vmax.f32 %v582_v41, 0.0 }
 0x183   : > { %v1144_v50 = vshrl.u32 %v7883_v43, 16  ;;  %v7884_v51 = vpack.c.bf16 %v708_v44, %v708_v44  ;;  %v1147_v54 = vshll.u32 %v7883_v43, 16 }
 0x184   : > { %v1128_v57 = vshrl.u32 %v7881_v47, 16  ;;  %v1131_v58 = vshll.u32 %v7881_v47, 16  ;;  %v7882_v59 = vpack.c.bf16 %v706_v48, %v706_v48  ;;  %v8296_v60 = vpop.f32.mrb[4].mxu0 }
 0x185   : > { %v1146_v61 = vrot.slane %v1144_v50, 7  ;;  %v1152_v63 = vshrl.u32 %v7884_v51, 16  ;;  %v1155_v0 = vshll.u32 %v7884_v51, 16  ;;  %v603_v2 = vadd.f32 %v8296_v60, %v10057_v15  ;;  %v594_v3 = vpop.f32.mrb[5].mxu0 }
 0x186   : > { %v1130_v5 = vrot.slane %v1128_v57, 7  ;;  %v1136_v7 = vshrl.u32 %v7882_v59, 16  ;;  %v1139_v8 = vshll.u32 %v7882_v59, 16  ;;  %v595_v9 = vadd.f32 %v10057_v15, %v594_v3  ;;  %v8297_v10 = vpop.f32.mrb[6].mxu0 }
 0x187   : > { %v1149_v11 = vor.u32 %v1147_v54, %v1146_v61  ;;  %v1150_v12 = vrot.slane %v1146_v61, 4  ;;  %v1154_v13 = vrot.slane %v1152_v63, 7  ;;  %v711_v16 = vmax.f32 %v603_v2, 0.0  ;;  %v597_v17 = vpop.f32.mrb[7].mxu0  ;;  %v1486_v61 = vld [vmem:[#allocation2 + $0x38] sm:$0xf] }
 0x188   : > { %v1133_v18 = vor.u32 %v1131_v58, %v1130_v5  ;;  %v1134_v19 = vrot.slane %v1130_v5, 4  ;;  %v1138_v21 = vrot.slane %v1136_v7, 7  ;;  %v709_v22 = vmax.f32 %v595_v9, 0.0 }
 0x189   : > { %v1463_v23 = vsel %vm10103_vm9, %v1149_v11, %v1462_v55  ;;  %v1466_v28 = vsel %vm9902_vm3, %v1150_v12, %v1465_v56  ;;  %v1157_v30 = vor.u32 %v1155_v0, %v1154_v13  ;;  %v1158_v34 = vrot.slane %v1154_v13, 4  ;;  %v10126_v55 = vld [vmem:[#allocation2 + $0xf0] sm:$0xf]  ;;  %v1474_v11 = vld [vmem:[#allocation2 + $0x28] sm:$0xf] }
 0x18a   : > { %1464 = vst [vmem:[#allocation2 + $0x18] sm:$0xf] %v1463_v23  ;;  %1467 = vst [vmem:[#allocation2 + $0x1c] sm:$0x1] %v1466_v28  ;;  %v1451_v38 = vsel %vm10103_vm9, %v1133_v18, %v1450_v62  ;;  %v1454_v39 = vsel %vm9902_vm3, %v1134_v19, %v1453_v6  ;;  %v1141_v40 = vor.u32 %v1139_v8, %v1138_v21  ;;  %v1142_v41 = vrot.slane %v1138_v21, 4 }
 0x18b   : > { %1452 = vst [vmem:[#allocation2 + $0x8] sm:$0xf] %v1451_v38  ;;  %1455 = vst [vmem:[#allocation2 + $0xc] sm:$0x1] %v1454_v39  ;;  %v1469_v42 = vsel %vm10103_vm9, %v1157_v30, %v1468_v14  ;;  %v1472_v43 = vsel %vm9902_vm3, %v1158_v34, %v1471_v20  ;;  %v7887_v44 = vpack.c.bf16 %v711_v16, %v711_v16  ;;  %v1489_v6 = vld [vmem:[#allocation2 + $0x3c] sm:$0x1] }
 0x18c   : > { %v7885_v46 = vpack.c.bf16 %v709_v22, %v709_v22  ;;  %1470 = vst [vmem:[#allocation2 + $0x20] sm:$0xf] %v1469_v42  ;;  %1473 = vst [vmem:[#allocation2 + $0x24] sm:$0x1] %v1472_v43  ;;  %v1457_v47 = vsel %vm10103_vm9, %v1141_v40, %v1456_v35  ;;  %v1460_v48 = vsel %vm9902_vm3, %v1142_v41, %v1459_v36  ;;  %v8300_v54 = vpop.f32.mrb[8].mxu0 }
 0x18d   : > { %v606_v50 = vadd.f32 %v8297_v10, %v10057_v15  ;;  %v598_v51 = vadd.f32 %v10057_v15, %v597_v17  ;;  %1458 = vst [vmem:[#allocation2 + $0x10] sm:$0xf] %v1457_v47  ;;  %1461 = vst [vmem:[#allocation2 + $0x14] sm:$0x1] %v1460_v48  ;;  %v1176_v56 = vshrl.u32 %v7887_v44, 16  ;;  %v1179_v57 = vshll.u32 %v7887_v44, 16 }
 0x18e   : > { %v1160_v58 = vshrl.u32 %v7885_v46, 16  ;;  %v1163_v59 = vshll.u32 %v7885_v46, 16  ;;  %v610_v60 = vpop.f32.mrb[9].mxu0  ;;  %v619_v0 = vadd.f32 %v8300_v54, %v10057_v15  ;;  %v2062_v10 = vshrl.u32 %v10126_v55, 16  ;;  %v1477_v12 = vld [vmem:[#allocation2 + $0x2c] sm:$0x1] }
 0x18f   : > { %v712_v62 = vmax.f32 %v606_v50, 0.0  ;;  %v710_v63 = vmax.f32 %v598_v51, 0.0  ;;  %v611_v2 = vadd.f32 %v10057_v15, %v610_v60  ;;  %v8301_v3 = vpop.f32.mrb[10].mxu0  ;;  %v1178_v5 = vrot.slane %v1176_v56, 7  ;;  %v1492_v40 = vld [vmem:[#allocation2 + $0x40] sm:$0xf] }
 0x190   : > { %v1162_v7 = vrot.slane %v1160_v58, 7  ;;  %v10131_v8 = vadd.f32 %v8301_v3, %v10057_v15  ;;  %v613_v9 = vpop.f32.mrb[11].mxu0  ;;  %v715_v16 = vmax.f32 %v619_v0, 0.0  ;;  %v1495_v41 = vld [vmem:[#allocation2 + $0x44] sm:$0x1] }
 0x191   : > { %v7888_v13 = vpack.c.bf16 %v712_v62, %v712_v62  ;;  %v7886_v14 = vpack.c.bf16 %v710_v63, %v710_v63  ;;  %v713_v17 = vmax.f32 %v611_v2, 0.0  ;;  %v1181_v18 = vor.u32 %v1179_v57, %v1178_v5  ;;  %v1480_v44 = vld [vmem:[#allocation2 + $0x30] sm:$0xf]  ;;  %v1483_v50 = vld [vmem:[#allocation2 + $0x34] sm:$0x1] }
 0x192   : > { %v1182_v19 = vrot.slane %v1178_v5, 4  ;;  %v1165_v20 = vor.u32 %v1163_v59, %v1162_v7  ;;  %v1166_v21 = vrot.slane %v1162_v7, 4  ;;  %v10134_v34 = vld [vmem:[#allocation2 + $0x8] sm:$0xf]  ;;  %v7891_v46 = vpack.c.bf16 %v715_v16, %v715_v16 }
 0x193   : > { %v1184_v22 = vshrl.u32 %v7888_v13, 16  ;;  %v1187_v23 = vshll.u32 %v7888_v13, 16  ;;  %v1168_v28 = vshrl.u32 %v7886_v14, 16  ;;  %v1171_v30 = vshll.u32 %v7886_v14, 16  ;;  %v1513_v14 = vld [vmem:[#allocation2 + $0x6c] sm:$0x1] }
 0x194   : > { %v1487_v35 = vsel %vm10103_vm9, %v1181_v18, %v1486_v61  ;;  %v1490_v36 = vsel %vm9902_vm3, %v1182_v19, %v1489_v6  ;;  %v1475_v38 = vsel %vm10103_vm9, %v1165_v20, %v1474_v11  ;;  %v1478_v39 = vsel %vm9902_vm3, %v1166_v21, %v1477_v12  ;;  %v8304_v48 = vpop.f32.mrb[12].mxu0  ;;  %v1510_v12 = vld [vmem:[#allocation2 + $0x68] sm:$0xf]  ;;  %v1498_v19 = vld [vmem:[#allocation2 + $0x58] sm:$0xf] }
 0x195   : > { %1488 = vst [vmem:[#allocation2 + $0x38] sm:$0xf] %v1487_v35  ;;  %1491 = vst [vmem:[#allocation2 + $0x3c] sm:$0x1] %v1490_v36  ;;  %v1186_v42 = vrot.slane %v1184_v22, 7  ;;  %v1170_v43 = vrot.slane %v1168_v28, 7  ;;  %v7889_v47 = vpack.c.bf16 %v713_v17, %v713_v17  ;;  %v614_v54 = vadd.f32 %v10057_v15, %v613_v9 }
 0x196   : > { %1476 = vst [vmem:[#allocation2 + $0x28] sm:$0xf] %v1475_v38  ;;  %1479 = vst [vmem:[#allocation2 + $0x2c] sm:$0x1] %v1478_v39  ;;  %v716_v51 = vmax.f32 %v10131_v8, 0.0  ;;  %v635_v56 = vadd.f32 %v8304_v48, %v10057_v15  ;;  %v626_v57 = vpop.f32.mrb[13].mxu0 }
 0x197   : > { %v1740_v58 = vshrl.u32 %v10134_v34, 16  ;;  %v1189_v59 = vor.u32 %v1187_v23, %v1186_v42  ;;  %v1190_v60 = vrot.slane %v1186_v42, 4  ;;  %v1173_v61 = vor.u32 %v1171_v30, %v1170_v43  ;;  %v8305_v63 = vpop.f32.mrb[14].mxu0  ;;  %v1501_v20 = vld [vmem:[#allocation2 + $0x5c] sm:$0x1] }
 0x198   : > { %v1174_v62 = vrot.slane %v1170_v43, 4  ;;  %v1208_v0 = vshrl.u32 %v7891_v46, 16  ;;  %v1211_v2 = vshll.u32 %v7891_v46, 16  ;;  %v1192_v3 = vshrl.u32 %v7889_v47, 16  ;;  %v629_v6 = vpop.f32.mrb[15].mxu0 }
 0x199   : > { %v1195_v5 = vshll.u32 %v7889_v47, 16  ;;  %v1493_v7 = vsel %vm10103_vm9, %v1189_v59, %v1492_v40  ;;  %v1496_v8 = vsel %vm9902_vm3, %v1190_v60, %v1495_v41  ;;  %v1481_v9 = vsel %vm10103_vm9, %v1173_v61, %v1480_v44 }
 0x19a   : > { %v1484_v11 = vsel %vm9902_vm3, %v1174_v62, %v1483_v50  ;;  %1494 = vst [vmem:[#allocation2 + $0x40] sm:$0xf] %v1493_v7  ;;  %1497 = vst [vmem:[#allocation2 + $0x44] sm:$0x1] %v1496_v8  ;;  %v1210_v13 = vrot.slane %v1208_v0, 7  ;;  %v1194_v16 = vrot.slane %v1192_v3, 7  ;;  %v7892_v17 = vpack.c.bf16 %v716_v51, %v716_v51 }
 0x19b   : > { %1482 = vst [vmem:[#allocation2 + $0x30] sm:$0xf] %v1481_v9  ;;  %1485 = vst [vmem:[#allocation2 + $0x34] sm:$0x1] %v1484_v11  ;;  %v714_v18 = vmax.f32 %v614_v54, 0.0  ;;  %v719_v21 = vmax.f32 %v635_v56, 0.0  ;;  %v627_v22 = vadd.f32 %v10057_v15, %v626_v57  ;;  %v638_v23 = vadd.f32 %v8305_v63, %v10057_v15 }
 0x19c   : > { %v630_v28 = vadd.f32 %v10057_v15, %v629_v6  ;;  %v1213_v30 = vor.u32 %v1211_v2, %v1210_v13  ;;  %v1214_v35 = vrot.slane %v1210_v13, 4  ;;  %v1197_v36 = vor.u32 %v1195_v5, %v1194_v16  ;;  %v8308_v43 = vpop.f32.mrb[16].mxu0  ;;  %v1516_v50 = vld [vmem:[#allocation2 + $0x70] sm:$0xf]  ;;  %v1519_v51 = vld [vmem:[#allocation2 + $0x74] sm:$0x1] }
 0x19d   : > { %v1198_v38 = vrot.slane %v1194_v16, 4  ;;  %v1216_v39 = vshrl.u32 %v7892_v17, 16  ;;  %v1219_v40 = vshll.u32 %v7892_v17, 16  ;;  %v7890_v41 = vpack.c.bf16 %v714_v18, %v714_v18  ;;  %v642_v54 = vpop.f32.mrb[17].mxu0  ;;  %v1504_v62 = vld [vmem:[#allocation2 + $0x60] sm:$0xf] }
 0x19e   : > { %v7895_v42 = vpack.c.bf16 %v719_v21, %v719_v21  ;;  %v1511_v44 = vsel %vm10103_vm9, %v1213_v30, %v1510_v12  ;;  %v1514_v46 = vsel %vm9902_vm3, %v1214_v35, %v1513_v14  ;;  %v1499_v47 = vsel %vm10103_vm9, %v1197_v36, %v1498_v19  ;;  %v8309_v61 = vpop.f32.mrb[18].mxu0  ;;  %v1507_v9 = vld [vmem:[#allocation2 + $0x64] sm:$0x1]  ;;  %v1534_v12 = vld [vmem:[#allocation2 + $0x88] sm:$0xf] }
 0x19f   : > { %v1502_v48 = vsel %vm9902_vm3, %v1198_v38, %v1501_v20  ;;  %1512 = vst [vmem:[#allocation2 + $0x68] sm:$0xf] %v1511_v44  ;;  %1515 = vst [vmem:[#allocation2 + $0x6c] sm:$0x1] %v1514_v46  ;;  %v1218_v56 = vrot.slane %v1216_v39, 7  ;;  %v1200_v57 = vshrl.u32 %v7890_v41, 16  ;;  %v651_v18 = vadd.f32 %v8308_v43, %v10057_v15 }
 0x1a0   : > { %1500 = vst [vmem:[#allocation2 + $0x58] sm:$0xf] %v1499_v47  ;;  %1503 = vst [vmem:[#allocation2 + $0x5c] sm:$0x1] %v1502_v48  ;;  %v1203_v59 = vshll.u32 %v7890_v41, 16  ;;  %v1240_v60 = vshrl.u32 %v7895_v42, 16 }
 0x1a1   : > { %v1243_v63 = vshll.u32 %v7895_v42, 16  ;;  %v717_v0 = vmax.f32 %v627_v22, 0.0  ;;  %v720_v2 = vmax.f32 %v638_v23, 0.0  ;;  %v718_v3 = vmax.f32 %v630_v28, 0.0  ;;  %v10167_v5 = vpop.f32.mrb[19].mxu0 }
 0x1a2   : > { %v1221_v6 = vor.u32 %v1219_v40, %v1218_v56  ;;  %v1222_v7 = vrot.slane %v1218_v56, 4  ;;  %v1202_v8 = vrot.slane %v1200_v57, 7  ;;  %v1242_v11 = vrot.slane %v1240_v60, 7  ;;  %v1537_v13 = vld [vmem:[#allocation2 + $0x8c] sm:$0x1] }
 0x1a3   : > { %v7893_v14 = vpack.c.bf16 %v717_v0, %v717_v0  ;;  %v7896_v16 = vpack.c.bf16 %v720_v2, %v720_v2  ;;  %v7894_v17 = vpack.c.bf16 %v718_v3, %v718_v3  ;;  %v1522_v39 = vld [vmem:[#allocation2 + $0x78] sm:$0xf]  ;;  %v1525_v47 = vld [vmem:[#allocation2 + $0x7c] sm:$0x1]  ;;  %v1540_v56 = vld [vmem:[#allocation2 + $0x90] sm:$0xf]  ;;  %v643_v60 = vadd.f32 %v10057_v15, %v642_v54 }
 0x1a4   : > { %v1517_v19 = vsel %vm10103_vm9, %v1221_v6, %v1516_v50  ;;  %v1520_v20 = vsel %vm9902_vm3, %v1222_v7, %v1519_v51  ;;  %v1205_v21 = vor.u32 %v1203_v59, %v1202_v8  ;;  %v1206_v22 = vrot.slane %v1202_v8, 4  ;;  %v10178_v42 = vpop.f32.mrb[20].mxu0  ;;  %v1543_v2 = vld [vmem:[#allocation2 + $0x94] sm:$0x1] }
 0x1a5   : > { %1518 = vst [vmem:[#allocation2 + $0x70] sm:$0xf] %v1517_v19  ;;  %1521 = vst [vmem:[#allocation2 + $0x74] sm:$0x1] %v1520_v20  ;;  %v1245_v23 = vor.u32 %v1243_v63, %v1242_v11  ;;  %v1246_v28 = vrot.slane %v1242_v11, 4  ;;  %v1224_v30 = vshrl.u32 %v7893_v14, 16  ;;  %v654_v6 = vadd.f32 %v8309_v61, %v10057_v15 }
 0x1a6   : > { %v1227_v35 = vshll.u32 %v7893_v14, 16  ;;  %v1505_v36 = vsel %vm10103_vm9, %v1205_v21, %v1504_v62  ;;  %v1508_v38 = vsel %vm9902_vm3, %v1206_v22, %v1507_v9  ;;  %v1248_v40 = vshrl.u32 %v7896_v16, 16  ;;  %v10184_v50 = vpop.f32.mrb[21].mxu0  ;;  %v1528_v11 = vld [vmem:[#allocation2 + $0x80] sm:$0xf] }
 0x1a7   : > { %v1251_v41 = vshll.u32 %v7896_v16, 16  ;;  %1506 = vst [vmem:[#allocation2 + $0x60] sm:$0xf] %v1505_v36  ;;  %1509 = vst [vmem:[#allocation2 + $0x64] sm:$0x1] %v1508_v38  ;;  %v1535_v43 = vsel %vm10103_vm9, %v1245_v23, %v1534_v12  ;;  %v1538_v44 = vsel %vm9902_vm3, %v1246_v28, %v1537_v13  ;;  %v1226_v46 = vrot.slane %v1224_v30, 7 }
 0x1a8   : > { %v1232_v48 = vshrl.u32 %v7894_v17, 16  ;;  %1536 = vst [vmem:[#allocation2 + $0x88] sm:$0xf] %v1535_v43  ;;  %1539 = vst [vmem:[#allocation2 + $0x8c] sm:$0x1] %v1538_v44  ;;  %v1250_v51 = vrot.slane %v1248_v40, 7  ;;  %v659_v24 = vadd.f32 %v10057_v15, %v10184_v50 }
 0x1a9   : > { %v1235_v57 = vshll.u32 %v7894_v17, 16  ;;  %v723_v59 = vmax.f32 %v651_v18, 0.0  ;;  %v10187_v62 = vpop.f32.mrb[22].mxu0  ;;  %v1229_v63 = vor.u32 %v1227_v35, %v1226_v46  ;;  %v1230_v0 = vrot.slane %v1226_v46, 4  ;;  %v1531_v12 = vld [vmem:[#allocation2 + $0x84] sm:$0x1] }
 0x1aa   : > { %v1234_v3 = vrot.slane %v1232_v48, 7  ;;  %v10190_v7 = vpop.f32.mrb[23].mxu0  ;;  %v1253_v8 = vor.u32 %v1251_v41, %v1250_v51  ;;  %v1254_v9 = vrot.slane %v1250_v51, 4  ;;  %v721_v14 = vmax.f32 %v643_v60, 0.0  ;;  %v1691_v19 = vld [vmem:[#allocation2 + $0xc] sm:$0x1] }
 0x1ab   : > { %v7899_v13 = vpack.c.bf16 %v723_v59, %v723_v59  ;;  %v1523_v16 = vsel %vm10103_vm9, %v1229_v63, %v1522_v39  ;;  %v1526_v54 = vsel %vm9902_vm3, %v1230_v0, %v1525_v47  ;;  %v1558_v30 = vld [vmem:[#allocation2 + $0xb8] sm:$0xf]  ;;  %v1561_v35 = vld [vmem:[#allocation2 + $0xbc] sm:$0x1]  ;;  %v724_v38 = vmax.f32 %v654_v6, 0.0 }
 0x1ac   : > { %v1237_v17 = vor.u32 %v1235_v57, %v1234_v3  ;;  %v1238_v18 = vrot.slane %v1234_v3, 4  ;;  %1524 = vst [vmem:[#allocation2 + $0x78] sm:$0xf] %v1523_v16  ;;  %1527 = vst [vmem:[#allocation2 + $0x7c] sm:$0x1] %v1526_v54  ;;  %v1541_v61 = vsel %vm10103_vm9, %v1253_v8, %v1540_v56  ;;  %v1544_v20 = vsel %vm9902_vm3, %v1254_v9, %v1543_v2  ;;  %v10207_v44 = vpop.f32.mrb[24].mxu0 }
 0x1ad   : > { %v1272_v21 = vshrl.u32 %v7899_v13, 16  ;;  %v1275_v22 = vshll.u32 %v7899_v13, 16  ;;  %1542 = vst [vmem:[#allocation2 + $0x90] sm:$0xf] %v1541_v61  ;;  %1545 = vst [vmem:[#allocation2 + $0x94] sm:$0x1] %v1544_v20  ;;  %v7897_v36 = vpack.c.bf16 %v721_v14, %v721_v14  ;;  %v7900_v48 = vpack.c.bf16 %v724_v38, %v724_v38 }
 0x1ae   : > { %v1529_v23 = vsel %vm10103_vm9, %v1237_v17, %v1528_v11  ;;  %v1532_v28 = vsel %vm9902_vm3, %v1238_v18, %v1531_v12  ;;  %v1742_v40 = vrot.slane %v1740_v58, 4  ;;  %v1743_v41 = vshll.u32 %v10134_v34, 16  ;;  %v1644_v56 = vld [vmem:[#allocation2 + $0x10] sm:$0xf]  ;;  %v10211_v57 = vpop.f32.mrb[25].mxu0 }
 0x1af   : > { %1530 = vst [vmem:[#allocation2 + $0x80] sm:$0xf] %v1529_v23  ;;  %1533 = vst [vmem:[#allocation2 + $0x84] sm:$0x1] %v1532_v28  ;;  %v1274_v39 = vrot.slane %v1272_v21, 7  ;;  %v1749_v43 = vshll.u32 %v1691_v19, 16  ;;  %v646_v51 = vadd.f32 %v10057_v15, %v10167_v5  ;;  %v670_v26 = vadd.f32 %v10187_v62, %v10057_v15 }
 0x1b0   : > { %v1256_v46 = vshrl.u32 %v7897_v36, 16  ;;  %v1259_v47 = vshll.u32 %v7897_v36, 16  ;;  %v1745_v63 = vrot.slane %v1743_v41, 5  ;;  %v1692_v2 = vld [vmem:[#allocation2 + $0x14] sm:$0x1]  ;;  %v10213_v58 = vpop.f32.mrb[26].mxu0 }
 0x1b1   : > { %v1277_v59 = vor.u32 %v1275_v22, %v1274_v39  ;;  %v1278_v60 = vrot.slane %v1274_v39, 4  ;;  %v1751_v0 = vrot.slane %v1749_v43, 5  ;;  %v1280_v3 = vshrl.u32 %v7900_v48, 16  ;;  %v10215_v9 = vpop.f32.mrb[27].mxu0  ;;  %v1546_v12 = vld [vmem:[#allocation2 + $0xa8] sm:$0xf] }
 0x1b2   : > { %v1258_v34 = vrot.slane %v1256_v46, 7  ;;  %v1283_v6 = vshll.u32 %v7900_v48, 16  ;;  %v722_v8 = vmax.f32 %v646_v51, 0.0  ;;  %v1549_v13 = vld [vmem:[#allocation2 + $0xac] sm:$0x1]  ;;  %v1746_v14 = vor.u32 %v1745_v63, %v1742_v40 }
 0x1b3   : > { %v1559_v11 = vsel %vm10103_vm9, %v1277_v59, %v1558_v30  ;;  %v1562_v5 = vsel %vm9902_vm3, %v1278_v60, %v1561_v35  ;;  %v1754_v16 = vshrl.u32 %v1644_v56, 16  ;;  %v1282_v18 = vrot.slane %v1280_v3, 7  ;;  %v1564_v19 = vld [vmem:[#allocation2 + $0xc0] sm:$0xf]  ;;  %v1567_v20 = vld [vmem:[#allocation2 + $0xc4] sm:$0x1] }
 0x1b4   : > { %1560 = vst [vmem:[#allocation2 + $0xb8] sm:$0xf] %v1559_v11  ;;  %1563 = vst [vmem:[#allocation2 + $0xbc] sm:$0x1] %v1562_v5  ;;  %v1261_v54 = vor.u32 %v1259_v47, %v1258_v34  ;;  %v1262_v17 = vrot.slane %v1258_v34, 4  ;;  %v7898_v61 = vpack.c.bf16 %v722_v8, %v722_v8  ;;  %v1747_v21 = vrot.slane %v1746_v14, 4 }
 0x1b5   : > { %v1756_v22 = vrot.slane %v1754_v16, 4  ;;  %v1757_v23 = vshll.u32 %v1644_v56, 16  ;;  %v1763_v28 = vshll.u32 %v1692_v2, 16  ;;  %v1285_v36 = vor.u32 %v1283_v6, %v1282_v18  ;;  %v1645_v39 = vld [vmem:[#allocation2 + $0x18] sm:$0xf]  ;;  %v10227_v48 = vpop.f32.mrb[28].mxu0 }
 0x1b6   : > { %v1547_v30 = vsel %vm10103_vm9, %v1261_v54, %v1546_v12  ;;  %v1550_v35 = vsel %vm9902_vm3, %v1262_v17, %v1549_v13  ;;  %v1286_v38 = vrot.slane %v1282_v18, 4  ;;  %v1752_v40 = vsel %vm10076_vm7, %v1747_v21, %v1751_v0  ;;  %v1693_v46 = vld [vmem:[#allocation2 + $0x1c] sm:$0x1]  ;;  %v1552_v60 = vld [vmem:[#allocation2 + $0xb0] sm:$0xf]  ;;  %v10238_v0 = vpop.f32.mrb[29].mxu0 }
 0x1b7   : > { %1548 = vst [vmem:[#allocation2 + $0xa8] sm:$0xf] %v1547_v30  ;;  %1551 = vst [vmem:[#allocation2 + $0xac] sm:$0x1] %v1550_v35  ;;  %v1264_v41 = vshrl.u32 %v7898_v61, 16  ;;  %v1267_v43 = vshll.u32 %v7898_v61, 16  ;;  %v1565_v51 = vsel %vm10103_vm9, %v1285_v36, %v1564_v19  ;;  %v7551_v59 = vcombine.low %v1738_v49, %v1752_v40 }
 0x1b8   : > { %v1759_v47 = vrot.slane %v1757_v23, 5  ;;  %v1568_v56 = vsel %vm9902_vm3, %v1286_v38, %v1567_v20  ;;  %v1765_v63 = vrot.slane %v1763_v28, 5  ;;  %1566 = vst [vmem:[#allocation2 + $0xc0] sm:$0xf] %v1565_v51  ;;  %v1555_v34 = vld [vmem:[#allocation2 + $0xb4] sm:$0x1]  ;;  %v667_v12 = vadd.f32 %v10178_v42, %v10057_v15 }
 0x1b9   : > { %1569 = vst [vmem:[#allocation2 + $0xc4] sm:$0x1] %v1568_v56  ;;  %v1266_v2 = vrot.slane %v1264_v41, 7  ;;  %v1768_v6 = vshrl.u32 %v1645_v39, 16  ;;  %v1771_v8 = vshll.u32 %v1645_v39, 16  ;;  %v10240_v11 = vpop.f32.mrb[30].mxu0  ;;  %8338 = vmatprep.mubr.bf16.mxu0 %v7551_v59 }
 0x1ba   : > { %v1760_v3 = vor.u32 %v1759_v47, %v1756_v22  ;;  %v1777_v5 = vshll.u32 %v1693_v46, 16  ;;  %v1646_v49 = vld [vmem:[#allocation2 + $0x20] sm:$0xf]  ;;  %v1694_v13 = vld [vmem:[#allocation2 + $0x24] sm:$0x1]  ;;  %v10248_v14 = vpop.f32.mrb[31].mxu0 }
 0x1bb   : > { %v1269_v16 = vor.u32 %v1267_v43, %v1266_v2  ;;  %v1270_v54 = vrot.slane %v1266_v2, 4  ;;  %v1770_v18 = vrot.slane %v1768_v6, 4  ;;  %v1773_v19 = vrot.slane %v1771_v8, 5  ;;  %v10250_v22 = vld [vmem:[#allocation2 + $0x28] sm:$0xf] }
 0x1bc   : > { %v1761_v17 = vrot.slane %v1760_v3, 4  ;;  %v1779_v61 = vrot.slane %v1777_v5, 5  ;;  %v727_v20 = vmax.f32 %v667_v12, 0.0  ;;  %v725_v21 = vmax.f32 %v659_v24, 0.0  ;;  %v1582_v56 = vld [vmem:[#allocation2 + $0xd8] sm:$0xf] }
 0x1bd   : > { %v1553_v42 = vsel %vm10103_vm9, %v1269_v16, %v1552_v60  ;;  %v1556_v50 = vsel %vm9902_vm3, %v1270_v54, %v1555_v34  ;;  %v728_v23 = vmax.f32 %v670_v26, 0.0  ;;  %v1774_v28 = vor.u32 %v1773_v19, %v1770_v18  ;;  %v1585_v59 = vld [vmem:[#allocation2 + $0xdc] sm:$0x1]  ;;  %v1573_v2 = vld [vmem:[#allocation2 + $0xcc] sm:$0x1] }
 0x1be   : > { %v1766_v62 = vsel %vm10076_vm7, %v1761_v17, %v1765_v63  ;;  %1554 = vst [vmem:[#allocation2 + $0xb0] sm:$0xf] %v1553_v42  ;;  %1557 = vst [vmem:[#allocation2 + $0xb4] sm:$0x1] %v1556_v50  ;;  %v7903_v30 = vpack.c.bf16 %v727_v20, %v727_v20  ;;  %v7901_v35 = vpack.c.bf16 %v725_v21, %v725_v21  ;;  %v1782_v36 = vshrl.u32 %v1646_v49, 16  ;;  %v9205_v18 = vld [vmem:[#allocation8 + $0x8] sm:$0xff]  }
 0x1bf   : > { %v7904_v38 = vpack.c.bf16 %v728_v23, %v728_v23  ;;  %v1785_v39 = vshll.u32 %v1646_v49, 16  ;;  %v1791_v40 = vshll.u32 %v1694_v13, 16  ;;  %v1796_v41 = vshrl.u32 %v10250_v22, 16  ;;  %v1570_v63 = vld [vmem:[#allocation2 + $0xc8] sm:$0xf] }
 0x1c0   : > { %v1775_v43 = vrot.slane %v1774_v28, 4  ;;  %v1304_v46 = vshrl.u32 %v7903_v30, 16  ;;  %v1307_v47 = vshll.u32 %v7903_v30, 16  ;;  %v1288_v51 = vshrl.u32 %v7901_v35, 16  ;;  %v1588_v24 = vld [vmem:[#allocation2 + $0xe0] sm:$0xf] }
 0x1c1   : > { %v1291_v60 = vshll.u32 %v7901_v35, 16  ;;  %v1312_v34 = vshrl.u32 %v7904_v38, 16  ;;  %v1315_v3 = vshll.u32 %v7904_v38, 16  ;;  %v1784_v6 = vrot.slane %v1782_v36, 4  ;;  %v1591_v16 = vld [vmem:[#allocation2 + $0xe4] sm:$0x1] }
 0x1c2   : > { %v1780_v8 = vsel %vm10076_vm7, %v1775_v43, %v1779_v61  ;;  %v1306_v5 = vrot.slane %v1304_v46, 7  ;;  %v1290_v12 = vrot.slane %v1288_v51, 7  ;;  %v1787_v26 = vrot.slane %v1785_v39, 5  ;;  %v1695_v50 = vld [vmem:[#allocation2 + $0x2c] sm:$0x1] }
 0x1c3   : > { %v7552_v49 = vcombine.low %v1766_v62, %v1780_v8  ;;  %v1314_v13 = vrot.slane %v1312_v34, 7  ;;  %v10261_v54 = vrot.slane %v1791_v40, 5  ;;  %v1798_v17 = vrot.slane %v1796_v41, 4  ;;  %v1648_v23 = vld [vmem:[#allocation2 + $0x30] sm:$0xf]  ;;  %v9199_v28 = vld [vmem:[#allocation8 + $0x108] sm:$0xff]  }
 0x1c4   : > { %v1309_v19 = vor.u32 %v1307_v47, %v1306_v5  ;;  %v1310_v20 = vrot.slane %v1306_v5, 4  ;;  %v1293_v21 = vor.u32 %v1291_v60, %v1290_v12  ;;  %v1294_v42 = vrot.slane %v1290_v12, 4  ;;  %v1649_v43 = vld [vmem:[#allocation2 + $0x38] sm:$0xf]  ;;  %v1696_v46 = vld [vmem:[#allocation2 + $0x34] sm:$0x1] }
 0x1c5   : > { %8339 = vmatmul.mubr.bf16.vlgmr.msra.gmra.mrb[32].mxu0 %v7552_v49  ;;  %v1317_v61 = vor.u32 %v1315_v3, %v1314_v13  ;;  %v1318_v30 = vrot.slane %v1314_v13, 4  ;;  %v1788_v35 = vor.u32 %v1787_v26, %v1784_v6  ;;  %v1799_v36 = vshll.u32 %v10250_v22, 16  ;;  %v9196_v62 = vld [vmem:[#allocation2 + $0xa8] ss:$8 sps:$4 sm:$0xff]   ;;  %v9198_v47 = vld [vmem:[#allocation2 + $0xb8] ss:$8 sps:$4 sm:$0xff]  }
 0x1c6   : > { %v1583_v38 = vsel %vm10103_vm9, %v1309_v19, %v1582_v56  ;;  %v1586_v39 = vsel %vm9902_vm3, %v1310_v20, %v1585_v59  ;;  %v1571_v40 = vsel %vm10103_vm9, %v1293_v21, %v1570_v63  ;;  %v1574_v41 = vsel %vm9902_vm3, %v1294_v42, %v1573_v2  ;;  %8371 = vmatpush3.bf16.msra.mxu0 %v10083_v45  ;;  %v9208_v60 = vld [vmem:[#allocation8 + $0x10] sm:$0xff]   ;;  %v1697_v8 = vld [vmem:[#allocation2 + $0x3c] sm:$0x1] }
 0x1c7   : > { %1584 = vst [vmem:[#allocation2 + $0xd8] sm:$0xf] %v1583_v38  ;;  %1587 = vst [vmem:[#allocation2 + $0xdc] sm:$0x1] %v1586_v39  ;;  %v1589_v22 = vsel %vm10103_vm9, %v1317_v61, %v1588_v24  ;;  %v1592_v51 = vsel %vm9902_vm3, %v1318_v30, %v1591_v16  ;;  %v1789_v56 = vrot.slane %v1788_v35, 4  ;;  %v1801_v59 = vrot.slane %v1799_v36, 5  ;;  %8498 = vmatprep.mubr.bf16.mxu1 %v9196_v62 }
 0x1c8   : > { %1572 = vst [vmem:[#allocation2 + $0xc8] sm:$0xf] %v1571_v40  ;;  %1575 = vst [vmem:[#allocation2 + $0xcc] sm:$0x1] %v1574_v41  ;;  %8372 = vmatprep.subr.bf16.mxu0 %v9205_v18  ;;  %v1805_v63 = vshll.u32 %v1695_v50, 16  ;;  %v662_v45 = vadd.f32 %v10057_v15, %v10190_v7  ;;  %v1810_v2 = vshrl.u32 %v1648_v23, 16  ;;  %8499 = vmatmul.mubr.bf16.vlgmr.msra.gmra.mrb[0].mxu1 %v9198_v47 }
 0x1c9   : > { %1590 = vst [vmem:[#allocation2 + $0xe0] sm:$0xf] %v1589_v22  ;;  %1593 = vst [vmem:[#allocation2 + $0xe4] sm:$0x1] %v1592_v51  ;;  %v1813_v34 = vshll.u32 %v1648_v23, 16  ;;  %v1794_v3 = vsel %vm10076_vm7, %v1789_v56, %v10261_v54  ;;  %v1802_v6 = vor.u32 %v1801_v59, %v1798_v17  ;;  %v1819_v5 = vshll.u32 %v1696_v46, 16  ;;  %8515 = vmatpush3.bf16.msra.mxu1 %v10051_v1 }
 0x1ca   : > { %v1824_v12 = vshrl.u32 %v1649_v43, 16  ;;  %v1807_v24 = vrot.slane %v1805_v63, 5  ;;  %v726_v26 = vmax.f32 %v662_v45, 0.0  ;;  %v1812_v49 = vrot.slane %v1810_v2, 4  ;;  %8516 = vmatprep.subr.bf16.mxu1 %v9199_v28  ;;  %v9201_v16 = vld [vmem:[#allocation8 + $0x110] sm:$0xff]   ;;  %8373 = vmatpush3.bf16.msra.mxu0 %v9205_v18  ;;  %v9211_v42 = vld [vmem:[#allocation8 + $0x18] sm:$0xff]  }
 0x1cb   : > { %v1815_v13 = vrot.slane %v1813_v34, 5  ;;  %v1803_v7 = vrot.slane %v1802_v6, 4  ;;  %v1821_v19 = vrot.slane %v1819_v5, 5  ;;  %v1827_v21 = vshll.u32 %v1649_v43, 16  ;;  %8374 = vmatprep.subr.bf16.mxu0 %v9208_v60  ;;  %v1651_v35 = vld [vmem:[#allocation2 + $0x58] sm:$0xf] }
 0x1cc   : > { %v1826_v20 = vrot.slane %v1824_v12, 4  ;;  %v7902_v54 = vpack.c.bf16 %v726_v26, %v726_v26  ;;  %v1833_v50 = vshll.u32 %v1697_v8, 16  ;;  %v683_v23 = vadd.f32 %v10207_v44, %v10057_v15  ;;  %v9204_v40 = vld [vmem:[#allocation8 + $0x118] sm:$0xff]   ;;  %v9214_v47 = vld [vmem:[#allocation8 + $0x20] sm:$0xff]   ;;  %v1576_v22 = vld [vmem:[#allocation2 + $0xd0] sm:$0xf] }
 0x1cd   : > { %v1816_v17 = vor.u32 %v1815_v13, %v1812_v49  ;;  %v1808_v1 = vsel %vm10076_vm7, %v1803_v7, %v1807_v24  ;;  %v1829_v61 = vrot.slane %v1827_v21, 5  ;;  %v675_v30 = vadd.f32 %v10057_v15, %v10211_v57  ;;  %8517 = vmatpush3.bf16.msra.mxu1 %v9199_v28  ;;  %v1579_v51 = vld [vmem:[#allocation2 + $0xd4] sm:$0x1]  ;;  %v9207_v8 = vld [vmem:[#allocation8 + $0x120] sm:$0xff]  }
 0x1ce   : > { %v686_v18 = vadd.f32 %v10213_v58, %v10057_v15  ;;  %v7553_v36 = vcombine.low %v1794_v3, %v1808_v1  ;;  %v1296_v62 = vshrl.u32 %v7902_v54, 16  ;;  %v1299_v38 = vshll.u32 %v7902_v54, 16  ;;  %8518 = vmatprep.subr.bf16.mxu1 %v9201_v16  ;;  %8375 = vmatpush3.bf16.msra.mxu0 %v9208_v60  ;;  %v1699_v3 = vld [vmem:[#allocation2 + $0x5c] sm:$0x1]  ;;  %v10295_v49 = vld [vmem:[#allocation2 + $0x60] sm:$0xf] }
 0x1cf   : > { %v1817_v39 = vrot.slane %v1816_v17, 4  ;;  %v1830_v44 = vor.u32 %v1829_v61, %v1826_v20  ;;  %v1835_v41 = vrot.slane %v1833_v50, 5  ;;  %v731_v43 = vmax.f32 %v683_v23, 0.0  ;;  %8376 = vmatprep.subr.bf16.mxu0 %v9211_v42  ;;  %v1609_v20 = vld [vmem:[#allocation2 + $0x10c] sm:$0x1] }
 0x1d0   : > { %v729_v46 = vmax.f32 %v675_v30, 0.0  ;;  %8342 = vmatprep.mubr.bf16.mxu0 %v7553_v36  ;;  %v1298_v57 = vrot.slane %v1296_v62, 7  ;;  %v732_v58 = vmax.f32 %v686_v18, 0.0  ;;  %v1852_v28 = vshrl.u32 %v1651_v35, 16  ;;  %v1594_v50 = vld [vmem:[#allocation2 + $0xf8] sm:$0xf] }
 0x1d1   : > { %v1822_v15 = vsel %vm10076_vm7, %v1817_v39, %v1821_v19  ;;  %v1831_v56 = vrot.slane %v1830_v44, 4  ;;  %v7907_v59 = vpack.c.bf16 %v731_v43, %v731_v43  ;;  %v1855_v45 = vshll.u32 %v1651_v35, 16  ;;  %8519 = vmatpush3.bf16.msra.mxu1 %v9201_v16  ;;  %v1606_v19 = vld [vmem:[#allocation2 + $0x108] sm:$0xf]  ;;  %v1597_v61 = vld [vmem:[#allocation2 + $0xfc] sm:$0x1] }
 0x1d2   : > { %v7905_v63 = vpack.c.bf16 %v729_v46, %v729_v46  ;;  %v1301_v60 = vor.u32 %v1299_v38, %v1298_v57  ;;  %v1302_v2 = vrot.slane %v1298_v57, 4  ;;  %v7908_v34 = vpack.c.bf16 %v732_v58, %v732_v58  ;;  %8520 = vmatprep.subr.bf16.mxu1 %v9204_v40  ;;  %8377 = vmatpush3.bf16.msra.mxu0 %v9211_v42  ;;  %v9217_v42 = vld [vmem:[#allocation8 + $0x28] sm:$0xff]   ;;  %v10304_v35 = vld [vmem:[%s11564_s2] ss:$0 sm:$0xff] }
 0x1d3   : > { %v1854_v6 = vrot.slane %v1852_v28, 4  ;;  %v1836_v5 = vsel %vm10076_vm7, %v1831_v56, %v1835_v41  ;;  %v1336_v12 = vshrl.u32 %v7907_v59, 16  ;;  %v1339_v24 = vshll.u32 %v7907_v59, 16  ;;  %8378 = vmatprep.subr.bf16.mxu0 %v9214_v47  ;;  %v9210_v38 = vld [vmem:[#allocation8 + $0x128] sm:$0xff]   ;;  %v1700_v28 = vld [vmem:[#allocation2 + $0x64] sm:$0x1] }
 0x1d4   : > { %v1320_v26 = vshrl.u32 %v7905_v63, 16  ;;  %v1577_v13 = vsel %vm10103_vm9, %v1301_v60, %v1576_v22  ;;  %v1580_v16 = vsel %vm9902_vm3, %v1302_v2, %v1579_v51  ;;  %v7554_v7 = vcombine.low %v1822_v15, %v1836_v5  ;;  %v10309_v43 = vld [vmem:[#allocation2 + $0x68] sm:$0xf]  ;;  %v9219_v22 = vld [vmem:[#allocation8 + $0x30] sm:$0xff]  }
 0x1d5   : > { %v1323_v21 = vshll.u32 %v7905_v63, 16  ;;  %1578 = vst [vmem:[#allocation2 + $0xd0] sm:$0xf] %v1577_v13  ;;  %1581 = vst [vmem:[#allocation2 + $0xd4] sm:$0x1] %v1580_v16  ;;  %v1338_v54 = vrot.slane %v1336_v12, 7  ;;  %8521 = vmatpush3.bf16.msra.mxu1 %v9204_v40  ;;  %v678_v36 = vadd.f32 %v10304_v35, %v10215_v9  ;;  %v699_v31 = vadd.f32 %v10304_v35, %v10227_v48 }
 0x1d6   : > { %v1322_v17 = vrot.slane %v1320_v26, 7  ;;  %v1344_v23 = vshrl.u32 %v7908_v34, 16  ;;  %v1347_v1 = vshll.u32 %v7908_v34, 16  ;;  %8343 = vmatmul.mubr.bf16.gmra.mrb[36].mxu0 %v7554_v7  ;;  %v1857_v30 = vrot.slane %v1855_v45, 5  ;;  %8522 = vmatprep.subr.bf16.mxu1 %v9207_v8  ;;  %v1615_v63 = vld [vmem:[#allocation2 + $0x114] sm:$0x1] }
 0x1d7   : > { %v1861_v18 = vshll.u32 %v1699_v3, 16  ;;  %v1866_v62 = vshrl.u32 %v10295_v49, 16  ;;  %v1341_v39 = vor.u32 %v1339_v24, %v1338_v54  ;;  %v1342_v44 = vrot.slane %v1338_v54, 4  ;;  %8379 = vmatpush3.bf16.msra.mxu0 %v9214_v47  ;;  %v1612_v47 = vld [vmem:[#allocation2 + $0x110] sm:$0xf] }
 0x1d8   : > { %v1325_v41 = vor.u32 %v1323_v21, %v1322_v17  ;;  %v1326_v40 = vrot.slane %v1322_v17, 4  ;;  %v1346_v46 = vrot.slane %v1344_v23, 7  ;;  %v1858_v57 = vor.u32 %v1857_v30, %v1854_v6  ;;  %8380 = vmatprep.subr.bf16.mxu0 %v9217_v42  ;;  %v1701_v3 = vld [vmem:[#allocation2 + $0x6c] sm:$0x1]  ;;  %v9213_v6 = vld [vmem:[#allocation8 + $0x130] sm:$0xff]   ;;  %v9221_v23 = vld [vmem:[#allocation8 + $0x38] sm:$0xff]  }
 0x1d9   : > { %v1863_v15 = vrot.slane %v1861_v18, 5  ;;  %v730_v58 = vmax.f32 %v678_v36, 0.0  ;;  %v1607_v9 = vsel %vm10103_vm9, %v1341_v39, %v1606_v19  ;;  %v1610_v51 = vsel %vm9902_vm3, %v1342_v44, %v1609_v20  ;;  %8523 = vmatpush3.bf16.msra.mxu1 %v9207_v8  ;;  %v1600_v21 = vld [vmem:[#allocation2 + $0x100] sm:$0xf]  ;;  %v1702_v39 = vld [vmem:[#allocation2 + $0x74] sm:$0x1] }
 0x1da   : > { %v1595_v56 = vsel %vm10103_vm9, %v1325_v41, %v1594_v50  ;;  %v1598_v59 = vsel %vm9902_vm3, %v1326_v40, %v1597_v61  ;;  %1608 = vst [vmem:[#allocation2 + $0x108] sm:$0xf] %v1607_v9  ;;  %1611 = vst [vmem:[#allocation2 + $0x10c] sm:$0x1] %v1610_v51  ;;  %v1349_v45 = vor.u32 %v1347_v1, %v1346_v46  ;;  %v1350_v60 = vrot.slane %v1346_v46, 4  ;;  %v9216_v50 = vld [vmem:[#allocation8 + $0x138] sm:$0xff]  }
 0x1db   : > { %1596 = vst [vmem:[#allocation2 + $0xf8] sm:$0xf] %v1595_v56  ;;  %1599 = vst [vmem:[#allocation2 + $0xfc] sm:$0x1] %v1598_v59  ;;  %v1859_v2 = vrot.slane %v1858_v57, 4  ;;  %v7906_v34 = vpack.c.bf16 %v730_v58, %v730_v58  ;;  %8524 = vmatprep.subr.bf16.mxu1 %v9210_v38  ;;  %v1868_v5 = vrot.slane %v1866_v62, 4  ;;  %8381 = vmatpush3.bf16.msra.mxu0 %v9217_v42 }
 0x1dc   : > { %v1869_v12 = vshll.u32 %v10295_v49, 16  ;;  %v1875_v24 = vshll.u32 %v1700_v28, 16  ;;  %v1880_v26 = vshrl.u32 %v10309_v43, 16  ;;  %v1613_v8 = vsel %vm10103_vm9, %v1349_v45, %v1612_v47  ;;  %v9200_v19 = vld [vmem:[#allocation2 + $0xc8] ss:$8 sps:$4 sm:$0xff]   ;;  %8382 = vmatprep.subr.bf16.mxu0 %v9219_v22  ;;  %v10341_v46 = vld [vmem:[#allocation8 + $0x80] sm:$0xff]  }
 0x1dd   : > { %v1616_v13 = vsel %vm9902_vm3, %v1350_v60, %v1615_v63  ;;  %v1864_v16 = vsel %vm10076_vm7, %v1859_v2, %v1863_v15  ;;  %v1328_v7 = vshrl.u32 %v7906_v34, 16  ;;  %1614 = vst [vmem:[#allocation2 + $0x110] sm:$0xf] %v1613_v8  ;;  %v1331_v20 = vshll.u32 %v7906_v34, 16  ;;  %v1603_v42 = vld [vmem:[#allocation2 + $0x104] sm:$0x1]  ;;  %8525 = vmatpush3.bf16.msra.mxu1 %v9210_v38  ;;  %8502 = vmatprep.mubr.bf16.mxu1 %v9200_v19 }
 0x1de   : > { %1617 = vst [vmem:[#allocation2 + $0x114] sm:$0x1] %v1616_v13  ;;  %v7555_v49 = vcombine.low %v1850_v52, %v1864_v16  ;;  %v1871_v54 = vrot.slane %v1869_v12, 5  ;;  %v10332_v17 = vrot.slane %v1875_v24, 5  ;;  %v1882_v61 = vrot.slane %v1880_v26, 4  ;;  %8526 = vmatprep.subr.bf16.mxu1 %v9213_v6  ;;  %v10347_v51 = vld [vmem:[#allocation8 + $0x140] sm:$0xff]  }
 0x1df   : > { %v1330_v1 = vrot.slane %v1328_v7, 7  ;;  %v1883_v30 = vshll.u32 %v10309_v43, 16  ;;  %v1889_v18 = vshll.u32 %v1701_v3, 16  ;;  %v9203_v36 = vld [vmem:[#allocation2 + $0xd8] ss:$8 sps:$4 sm:$0xff]   ;;  %v691_v52 = vadd.f32 %v10304_v35, %v10238_v0  ;;  %8383 = vmatpush3.bf16.msra.mxu0 %v9219_v22 }
 0x1e0   : > { %8346 = vmatprep.mubr.bf16.mxu0 %v7555_v49  ;;  %v1872_v27 = vor.u32 %v1871_v54, %v1868_v5  ;;  %v702_v62 = vadd.f32 %v10304_v35, %v10240_v11  ;;  %v1654_v38 = vld [vmem:[#allocation2 + $0x70] sm:$0xf]  ;;  %8503 = vmatmul.mubr.bf16.gmra.mrb[4].mxu1 %v9203_v36  ;;  %v735_v15 = vmax.f32 %v699_v31, 0.0  ;;  %v1903_v2 = vshll.u32 %v1702_v39, 16  ;;  %v1655_v12 = vld [vmem:[#allocation2 + $0x78] sm:$0xf] }
 0x1e1   : > { %v1333_v44 = vor.u32 %v1331_v20, %v1330_v1  ;;  %v1334_v41 = vrot.slane %v1330_v1, 4  ;;  %v1885_v40 = vrot.slane %v1883_v30, 5  ;;  %v1891_v43 = vrot.slane %v1889_v18, 5  ;;  %8527 = vmatpush3.bf16.msra.mxu1 %v9213_v6  ;;  %8384 = vmatprep.subr.bf16.mxu0 %v9221_v23  ;;  %v1630_v26 = vld [vmem:[#allocation2 + $0x128] sm:$0xf] }
 0x1e2   : > { %v1873_v57 = vrot.slane %v1872_v27, 4  ;;  %v733_v58 = vmax.f32 %v691_v52, 0.0  ;;  %v736_v48 = vmax.f32 %v702_v62, 0.0  ;;  %v1894_v9 = vshrl.u32 %v1654_v38, 16  ;;  %8528 = vmatprep.subr.bf16.mxu1 %v9216_v50  ;;  %v1633_v8 = vld [vmem:[#allocation2 + $0x12c] sm:$0x1] }
 0x1e3   : > { %v1601_v0 = vsel %vm10103_vm9, %v1333_v44, %v1600_v21  ;;  %v1604_v11 = vsel %vm9902_vm3, %v1334_v41, %v1603_v42  ;;  %v1886_v28 = vor.u32 %v1885_v40, %v1882_v61  ;;  %v7911_v56 = vpack.c.bf16 %v735_v15, %v735_v15  ;;  %8385 = vmatpush3.bf16.msra.mxu0 %v9221_v23  ;;  %v1618_v13 = vld [vmem:[#allocation2 + $0x118] sm:$0xf]  ;;  %v1621_v16 = vld [vmem:[#allocation2 + $0x11c] sm:$0x1]  ;;  %v1636_v54 = vld [vmem:[#allocation2 + $0x130] sm:$0xf] }
 0x1e4   : > { %1602 = vst [vmem:[#allocation2 + $0x100] sm:$0xf] %v1601_v0  ;;  %1605 = vst [vmem:[#allocation2 + $0x104] sm:$0x1] %v1604_v11  ;;  %v1878_v22 = vsel %vm10076_vm7, %v1873_v57, %v10332_v17  ;;  %v7909_v59 = vpack.c.bf16 %v733_v58, %v733_v58  ;;  %v7912_v47 = vpack.c.bf16 %v736_v48, %v736_v48  ;;  %v1896_v45 = vrot.slane %v1894_v9, 4 }
 0x1e5   : > { %v1887_v63 = vrot.slane %v1886_v28, 4  ;;  %v1897_v60 = vshll.u32 %v1654_v38, 16  ;;  %v1368_v34 = vshrl.u32 %v7911_v56, 16  ;;  %v1371_v3 = vshll.u32 %v7911_v56, 16  ;;  %8529 = vmatpush3.bf16.msra.mxu1 %v9216_v50  ;;  %8418 = vmatprep.subr.bf16.mxu0 %v10341_v46  ;;  %v1639_v23 = vld [vmem:[#allocation2 + $0x134] sm:$0x1] }
 0x1e6   : > { %v1352_v6 = vshrl.u32 %v7909_v59, 16  ;;  %v1355_v5 = vshll.u32 %v7909_v59, 16  ;;  %v1376_v7 = vshrl.u32 %v7912_v47, 16  ;;  %v1379_v19 = vshll.u32 %v7912_v47, 16  ;;  %8562 = vmatprep.subr.bf16.mxu1 %v10347_v51  ;;  %v1703_v52 = vld [vmem:[#allocation2 + $0x7c] sm:$0x1] }
 0x1e7   : > { %v1892_v24 = vsel %vm10076_vm7, %v1887_v63, %v1891_v43  ;;  %v1899_v49 = vrot.slane %v1897_v60, 5  ;;  %v1370_v21 = vrot.slane %v1368_v34, 7  ;;  %v10356_v17 = vrot.slane %v1903_v2, 5  ;;  %v1656_v62 = vld [vmem:[#allocation2 + $0x80] sm:$0xf] }
 0x1e8   : > { %v7556_v20 = vcombine.low %v1878_v22, %v1892_v24  ;;  %v1354_v42 = vrot.slane %v1352_v6, 7  ;;  %v1378_v50 = vrot.slane %v1376_v7, 7  ;;  %v1908_v61 = vshrl.u32 %v1655_v12, 16  ;;  %v1657_v58 = vld [vmem:[#allocation2 + $0x88] sm:$0xf] }
 0x1e9   : > { %v1900_v1 = vor.u32 %v1899_v49, %v1896_v45  ;;  %v1911_v30 = vshll.u32 %v1655_v12, 16  ;;  %v1373_v18 = vor.u32 %v1371_v3, %v1370_v21  ;;  %v1374_v36 = vrot.slane %v1370_v21, 4  ;;  %v1704_v48 = vld [vmem:[#allocation2 + $0x84] sm:$0x1]  ;;  %v9209_v56 = vld [vmem:[#allocation2 + $0x108] ss:$8 sps:$4 sm:$0xff]  }
 0x1ea   : > { %8347 = vmatmul.mubr.bf16.gmra.mrb[40].mxu0 %v7556_v20  ;;  %v1357_v27 = vor.u32 %v1355_v5, %v1354_v42  ;;  %v1358_v31 = vrot.slane %v1354_v42, 4  ;;  %v1381_v38 = vor.u32 %v1379_v19, %v1378_v50  ;;  %v1382_v39 = vrot.slane %v1378_v50, 4  ;;  %v1705_v63 = vld [vmem:[#allocation2 + $0x8c] sm:$0x1]  ;;  %v1659_v5 = vld [vmem:[#allocation2 + $0xa8] sm:$0xf] }
 0x1eb   : > { %v1901_v44 = vrot.slane %v1900_v1, 4  ;;  %v1910_v41 = vrot.slane %v1908_v61, 4  ;;  %v1631_v40 = vsel %vm10103_vm9, %v1373_v18, %v1630_v26  ;;  %v1634_v43 = vsel %vm9902_vm3, %v1374_v36, %v1633_v8  ;;  %v9206_v0 = vld [vmem:[#allocation2 + $0xf8] ss:$8 sps:$4 sm:$0xff]   ;;  %v1708_v1 = vld [vmem:[#allocation2 + $0xb4] sm:$0x1] }
 0x1ec   : > { %v1619_v57 = vsel %vm10103_vm9, %v1357_v27, %v1618_v13  ;;  %v1622_v15 = vsel %vm9902_vm3, %v1358_v31, %v1621_v16  ;;  %1632 = vst [vmem:[#allocation2 + $0x128] sm:$0xf] %v1631_v40  ;;  %1635 = vst [vmem:[#allocation2 + $0x12c] sm:$0x1] %v1634_v43  ;;  %v1637_v11 = vsel %vm10103_vm9, %v1381_v38, %v1636_v54  ;;  %v1913_v22 = vrot.slane %v1911_v30, 5 }
 0x1ed   : > { %1620 = vst [vmem:[#allocation2 + $0x118] sm:$0xf] %v1619_v57  ;;  %1623 = vst [vmem:[#allocation2 + $0x11c] sm:$0x1] %v1622_v15  ;;  %v1640_v28 = vsel %vm9902_vm3, %v1382_v39, %v1639_v23  ;;  %v1906_v9 = vsel %vm10076_vm7, %v1901_v44, %v10356_v17  ;;  %v1917_v59 = vshll.u32 %v1703_v52, 16  ;;  %v694_v47 = vadd.f32 %v10304_v35, %v10248_v14 }
 0x1ee   : > { %1638 = vst [vmem:[#allocation2 + $0x130] sm:$0xf] %v1637_v11  ;;  %1641 = vst [vmem:[#allocation2 + $0x134] sm:$0x1] %v1640_v28  ;;  %v1922_v45 = vshrl.u32 %v1656_v62, 16  ;;  %v1925_v60 = vshll.u32 %v1656_v62, 16  ;;  %8506 = vmatprep.mubr.bf16.mxu1 %v9206_v0  ;;  %v1914_v2 = vor.u32 %v1913_v22, %v1910_v41 }
 0x1ef   : > { %v1931_v34 = vshll.u32 %v1704_v48, 16  ;;  %v1936_v3 = vshrl.u32 %v1657_v58, 16  ;;  %v1939_v6 = vshll.u32 %v1657_v58, 16  ;;  %8507 = vmatmul.mubr.bf16.gmra.mrb[8].mxu1 %v9209_v56  ;;  %v1919_v12 = vrot.slane %v1917_v59, 5  ;;  %v1707_v13 = vld [vmem:[#allocation2 + $0xac] sm:$0x1] }
 0x1f0   : > { %v734_v24 = vmax.f32 %v694_v47, 0.0  ;;  %v1924_v26 = vrot.slane %v1922_v45, 4  ;;  %v1927_v8 = vrot.slane %v1925_v60, 5  ;;  %v1915_v16 = vrot.slane %v1914_v2, 4  ;;  %v1660_v23 = vld [vmem:[#allocation2 + $0xb0] sm:$0xf] }
 0x1f1   : > { %v1933_v7 = vrot.slane %v1931_v34, 5  ;;  %v1938_v19 = vrot.slane %v1936_v3, 4  ;;  %v1941_v49 = vrot.slane %v1939_v6, 5  ;;  %v1945_v20 = vshll.u32 %v1705_v63, 16  ;;  %v1661_v27 = vld [vmem:[#allocation2 + $0xb8] sm:$0xf] }
 0x1f2   : > { %v7910_v14 = vpack.c.bf16 %v734_v24, %v734_v24  ;;  %v1928_v35 = vor.u32 %v1927_v8, %v1924_v26  ;;  %v1964_v21 = vshrl.u32 %v1659_v5, 16  ;;  %v1920_v42 = vsel %vm10076_vm7, %v1915_v16, %v1919_v12  ;;  %v1624_v31 = vld [vmem:[#allocation2 + $0x120] sm:$0xf]  ;;  %v1627_v57 = vld [vmem:[#allocation2 + $0x124] sm:$0x1] }
 0x1f3   : > { %v1942_v54 = vor.u32 %v1941_v49, %v1938_v19  ;;  %v1967_v17 = vshll.u32 %v1659_v5, 16  ;;  %v1973_v50 = vshll.u32 %v1707_v13, 16  ;;  %v7557_v61 = vcombine.low %v1906_v9, %v1920_v42  ;;  %v1709_v48 = vld [vmem:[#allocation2 + $0xbc] sm:$0x1]  ;;  %v1662_v59 = vld [vmem:[#allocation2 + $0xc0] sm:$0xf] }
 0x1f4   : > { %v1360_v30 = vshrl.u32 %v7910_v14, 16  ;;  %v1363_v18 = vshll.u32 %v7910_v14, 16  ;;  %v1929_v36 = vrot.slane %v1928_v35, 4  ;;  %v1947_v62 = vrot.slane %v1945_v20, 5  ;;  %v1663_v5 = vld [vmem:[#allocation2 + $0xc8] sm:$0xf] }
 0x1f5   : > { %v1943_v52 = vrot.slane %v1942_v54, 4  ;;  %v1966_v38 = vrot.slane %v1964_v21, 4  ;;  %v1969_v39 = vrot.slane %v1967_v17, 5  ;;  %8350 = vmatprep.mubr.bf16.mxu0 %v7557_v61  ;;  %v1975_v40 = vrot.slane %v1973_v50, 5  ;;  %v1710_v12 = vld [vmem:[#allocation2 + $0xc4] sm:$0x1] }
 0x1f6   : > { %v1362_v44 = vrot.slane %v1360_v30, 7  ;;  %v1934_v41 = vsel %vm10076_vm7, %v1929_v36, %v1933_v7  ;;  %v1978_v43 = vshrl.u32 %v1660_v23, 16  ;;  %v1981_v0 = vshll.u32 %v1660_v23, 16  ;;  %v1711_v13 = vld [vmem:[#allocation2 + $0xcc] sm:$0x1] }
 0x1f7   : > { %v1948_v15 = vsel %vm10076_vm7, %v1943_v52, %v1947_v62  ;;  %v1970_v58 = vor.u32 %v1969_v39, %v1966_v38  ;;  %v1987_v11 = vshll.u32 %v1708_v1, 16  ;;  %v1992_v60 = vshrl.u32 %v1661_v27, 16  ;;  %v1664_v14 = vld [vmem:[#allocation2 + $0xd0] sm:$0xf]  ;;  %v1665_v54 = vld [vmem:[#allocation2 + $0xd8] sm:$0xf] }
 0x1f8   : > { %v1365_v28 = vor.u32 %v1363_v18, %v1362_v44  ;;  %v1366_v9 = vrot.slane %v1362_v44, 4  ;;  %v7558_v22 = vcombine.low %v1934_v41, %v1948_v15  ;;  %v1980_v56 = vrot.slane %v1978_v43, 4  ;;  %v1712_v61 = vld [vmem:[#allocation2 + $0xd4] sm:$0x1]  ;;  %v1713_v52 = vld [vmem:[#allocation2 + $0xdc] sm:$0x1] }
 0x1f9   : > { %v1971_v47 = vrot.slane %v1970_v58, 4  ;;  %v1983_v63 = vrot.slane %v1981_v0, 5  ;;  %v1989_v45 = vrot.slane %v1987_v11, 5  ;;  %v1995_v3 = vshll.u32 %v1661_v27, 16  ;;  %v1667_v41 = vld [vmem:[#allocation2 + $0xf8] sm:$0xf] }
 0x1fa   : > { %v1625_v2 = vsel %vm10103_vm9, %v1365_v28, %v1624_v31  ;;  %v1628_v34 = vsel %vm9902_vm3, %v1366_v9, %v1627_v57  ;;  %8351 = vmatmul.mubr.bf16.gmra.mrb[44].mxu0 %v7558_v22  ;;  %v2001_v6 = vshll.u32 %v1709_v48, 16  ;;  %v1994_v8 = vrot.slane %v1992_v60, 4  ;;  %v9215_v9 = vld [vmem:[#allocation2 + $0x128] ss:$8 sps:$4 sm:$0xff]   ;;  %v1715_v60 = vld [vmem:[#allocation2 + $0xfc] sm:$0x1] }
 0x1fb   : > { %1626 = vst [vmem:[#allocation2 + $0x120] sm:$0xf] %v1625_v2  ;;  %1629 = vst [vmem:[#allocation2 + $0x124] sm:$0x1] %v1628_v34  ;;  %v1976_v24 = vsel %vm10076_vm7, %v1971_v47, %v1975_v40  ;;  %v1984_v26 = vor.u32 %v1983_v63, %v1980_v56  ;;  %v2006_v16 = vshrl.u32 %v1662_v59, 16  ;;  %v1997_v7 = vrot.slane %v1995_v3, 5 }
 0x1fc   : > { %v7559_v4 = vcombine.low %v1962_v53, %v1976_v24  ;;  %v2003_v19 = vrot.slane %v2001_v6, 5  ;;  %v2009_v49 = vshll.u32 %v1662_v59, 16  ;;  %v2015_v21 = vshll.u32 %v1710_v12, 16  ;;  %v1714_v63 = vld [vmem:[#allocation2 + $0xf4] sm:$0x1] }
 0x1fd   : > { %v1985_v35 = vrot.slane %v1984_v26, 4  ;;  %v2008_v20 = vrot.slane %v2006_v16, 4  ;;  %v2020_v42 = vshrl.u32 %v1663_v5, 16  ;;  %v1998_v17 = vor.u32 %v1997_v7, %v1994_v8  ;;  %v9325_v34 = vld [vmem:[#allocation2 + $0xf0] sm:$0xf] }
 0x1fe   : > { %8354 = vmatprep.mubr.bf16.mxu0 %v7559_v4  ;;  %v2011_v50 = vrot.slane %v2009_v49, 5  ;;  %v2023_v23 = vshll.u32 %v1663_v5, 16  ;;  %v2029_v1 = vshll.u32 %v1711_v13, 16  ;;  %v2017_v32 = vrot.slane %v2015_v21, 5  ;;  %v1668_v8 = vld [vmem:[#allocation2 + $0x100] sm:$0xf] }
 0x1ff   : > { %v1990_v30 = vsel %vm10076_vm7, %v1985_v35, %v1989_v45  ;;  %v2022_v33 = vrot.slane %v2020_v42, 4  ;;  %v2034_v53 = vshrl.u32 %v1664_v14, 16  ;;  %v1999_v18 = vrot.slane %v1998_v17, 4  ;;  %v1669_v21 = vld [vmem:[#allocation2 + $0x108] sm:$0xf] }
 0x200   : > { %v2012_v36 = vor.u32 %v2011_v50, %v2008_v20  ;;  %v2025_v27 = vrot.slane %v2023_v23, 5  ;;  %v2031_v31 = vrot.slane %v2029_v1, 5  ;;  %v2037_v38 = vshll.u32 %v1664_v14, 16  ;;  %v1717_v23 = vld [vmem:[#allocation2 + $0x10c] sm:$0x1] }
 0x201   : > { %v2036_v62 = vrot.slane %v2034_v53, 4  ;;  %v2043_v39 = vshll.u32 %v1712_v61, 16  ;;  %v2048_v44 = vshrl.u32 %v1665_v54, 16  ;;  %v2004_v40 = vsel %vm10076_vm7, %v1999_v18, %v2003_v19  ;;  %v1716_v19 = vld [vmem:[#allocation2 + $0x104] sm:$0x1] }
 0x202   : > { %v2013_v43 = vrot.slane %v2012_v36, 4  ;;  %v2026_v57 = vor.u32 %v2025_v27, %v2022_v33  ;;  %v2051_v15 = vshll.u32 %v1665_v54, 16  ;;  %v9212_v58 = vld [vmem:[#allocation2 + $0x118] ss:$8 sps:$4 sm:$0xff]   ;;  %v7560_v48 = vcombine.low %v1990_v30, %v2004_v40  ;;  %v3703_v61 = vld [vmem:[#allocation2 + $0x8] sm:$0xf] }
 0x203   : > { %v2039_v0 = vrot.slane %v2037_v38, 5  ;;  %v2045_v11 = vrot.slane %v2043_v39, 5  ;;  %v2050_v28 = vrot.slane %v2048_v44, 4  ;;  %v2057_v47 = vshll.u32 %v1713_v52, 16  ;;  %8510 = vmatprep.mubr.bf16.mxu1 %v9212_v58  ;;  %v3705_v39 = vld [vmem:[#allocation2 + $0x10] sm:$0xf] }
 0x204   : > { %v2018_v22 = vsel %vm10076_vm7, %v2013_v43, %v2017_v32  ;;  %v2027_v56 = vrot.slane %v2026_v57, 4  ;;  %v2053_v59 = vrot.slane %v2051_v15, 5  ;;  %8355 = vmatmul.mubr.bf16.gmra.mrb[48].mxu0 %v7560_v48  ;;  %v2064_v2 = vrot.slane %v2062_v10, 4  ;;  %8511 = vmatmul.mubr.bf16.gmra.mrb[12].mxu1 %v9215_v9  ;;  %v3704_v57 = vld [vmem:[#allocation2 + $0xc] sm:$0x1] }
 0x205   : > { %v2040_v45 = vor.u32 %v2039_v0, %v2036_v62  ;;  %v2065_v3 = vshll.u32 %v9325_v34, 16  ;;  %v2071_v6 = vshll.u32 %v1714_v63, 16  ;;  %v2059_v24 = vrot.slane %v2057_v47, 5  ;;  %v1670_v47 = vld [vmem:[#allocation2 + $0x110] sm:$0xf] }
 0x206   : > { %v2032_v5 = vsel %vm10076_vm7, %v2027_v56, %v2031_v31  ;;  %v2054_v12 = vor.u32 %v2053_v59, %v2050_v28  ;;  %v2076_v26 = vshrl.u32 %v1667_v41, 16  ;;  %v2079_v55 = vshll.u32 %v1667_v41, 16  ;;  %v1671_v34 = vld [vmem:[#allocation2 + $0x118] sm:$0xf] }
 0x207   : > { %v7561_v13 = vcombine.low %v2018_v22, %v2032_v5  ;;  %v2041_v16 = vrot.slane %v2040_v45, 4  ;;  %v2067_v4 = vrot.slane %v2065_v3, 5  ;;  %v2073_v7 = vrot.slane %v2071_v6, 5  ;;  %v1718_v3 = vld [vmem:[#allocation2 + $0x114] sm:$0x1] }
 0x208   : > { %v2055_v49 = vrot.slane %v2054_v12, 4  ;;  %v2078_v14 = vrot.slane %v2076_v26, 4  ;;  %v2085_v10 = vshll.u32 %v1715_v60, 16  ;;  %v2090_v42 = vshrl.u32 %v1668_v8, 16 }
 0x209   : > { %8358 = vmatprep.mubr.bf16.mxu0 %v7561_v13  ;;  %v2046_v35 = vsel %vm10076_vm7, %v2041_v16, %v2045_v11  ;;  %v2068_v20 = vor.u32 %v2067_v4, %v2064_v2  ;;  %v2093_v54 = vshll.u32 %v1668_v8, 16  ;;  %v2081_v50 = vrot.slane %v2079_v55, 5  ;;  %v3706_v11 = vld [vmem:[#allocation2 + $0x14] sm:$0x1]  ;;  %v1719_v8 = vld [vmem:[#allocation2 + $0x11c] sm:$0x1] }
 0x20a   : > { %v2060_v17 = vsel %vm10076_vm7, %v2055_v49, %v2059_v24  ;;  %v2099_v1 = vshll.u32 %v1716_v19, 16  ;;  %v2092_v33 = vrot.slane %v2090_v42, 4  ;;  %v2087_v36 = vrot.slane %v2085_v10, 5 }
 0x20b   : > { %v7562_v30 = vcombine.low %v2046_v35, %v2060_v17  ;;  %v2069_v32 = vrot.slane %v2068_v20, 4  ;;  %v2095_v53 = vrot.slane %v2093_v54, 5  ;;  %v2082_v18 = vor.u32 %v2081_v50, %v2078_v14  ;;  %v1672_v14 = vld [vmem:[#allocation2 + $0x120] sm:$0xf] }
 0x20c   : > { %v2104_v27 = vshrl.u32 %v1669_v21, 16  ;;  %v2107_v31 = vshll.u32 %v1669_v21, 16  ;;  %v2113_v38 = vshll.u32 %v1717_v23, 16  ;;  %v3768_v44 = vshrl.u32 %v3703_v61, 16  ;;  %v1673_v21 = vld [vmem:[#allocation2 + $0x128] sm:$0xf] }
 0x20d   : > { %8359 = vmatmul.mubr.bf16.gmra.mrb[52].mxu0 %v7562_v30  ;;  %v2074_v52 = vsel %vm10076_vm7, %v2069_v32, %v2073_v7  ;;  %v2096_v62 = vor.u32 %v2095_v53, %v2092_v33  ;;  %v2083_v41 = vrot.slane %v2082_v18, 4  ;;  %v3771_v15 = vshll.u32 %v3703_v61, 16  ;;  %v1720_v30 = vld [vmem:[#allocation2 + $0x124] sm:$0x1]  ;;  %v1721_v18 = vld [vmem:[#allocation2 + $0x12c] sm:$0x1] }
 0x20e   : > { %v2106_v40 = vrot.slane %v2104_v27, 4  ;;  %v2109_v43 = vrot.slane %v2107_v31, 5  ;;  %v2101_v48 = vrot.slane %v2099_v1, 5  ;;  %v2115_v0 = vrot.slane %v2113_v38, 5 }
 0x20f   : > { %v2097_v58 = vrot.slane %v2096_v62, 4  ;;  %v3770_v28 = vrot.slane %v3768_v44, 4  ;;  %v2088_v9 = vsel %vm10076_vm7, %v2083_v41, %v2087_v36  ;;  %v3773_v56 = vrot.slane %v3771_v15, 5  ;;  %v3709_v15 = vld [vmem:[#allocation2 + $0x20] sm:$0xf] }
 0x210   : > { %v2110_v22 = vor.u32 %v2109_v43, %v2106_v40  ;;  %v3782_v59 = vshrl.u32 %v3705_v39, 16  ;;  %v7563_v63 = vcombine.low %v2074_v52, %v2088_v9  ;;  %v3777_v60 = vshll.u32 %v3704_v57, 16  ;;  %v10418_v57 = vld [vmem:[#allocation2 + $0x1c] sm:$0x1] }
 0x211   : > { %v2102_v45 = vsel %vm10076_vm7, %v2097_v58, %v2101_v48  ;;  %v3785_v2 = vshll.u32 %v3705_v39, 16  ;;  %v3774_v5 = vor.u32 %v3773_v56, %v3770_v28  ;;  %v3791_v24 = vshll.u32 %v3706_v11, 16  ;;  %v3707_v39 = vld [vmem:[#allocation2 + $0x18] sm:$0xf] }
 0x212   : > { %v2111_v6 = vrot.slane %v2110_v22, 4  ;;  %v3784_v12 = vrot.slane %v3782_v59, 4  ;;  %8362 = vmatprep.mubr.bf16.mxu0 %v7563_v63  ;;  %v2118_v13 = vshrl.u32 %v1670_v47, 16  ;;  %v2121_v16 = vshll.u32 %v1670_v47, 16  ;;  %v10422_v63 = vld [vmem:[#allocation2 + $0x24] sm:$0x1] }
 0x213   : > { %v3787_v26 = vrot.slane %v3785_v2, 5  ;;  %v3775_v7 = vrot.slane %v3774_v5, 4  ;;  %v2127_v19 = vshll.u32 %v1718_v3, 16  ;;  %v2132_v49 = vshrl.u32 %v1671_v34, 16  ;;  %v3711_v5 = vld [vmem:[#allocation2 + $0x28] sm:$0xf] }
 0x214   : > { %v2116_v4 = vsel %vm10076_vm7, %v2111_v6, %v2115_v0  ;;  %v2120_v35 = vrot.slane %v2118_v13, 4  ;;  %v2123_v20 = vrot.slane %v2121_v16, 5  ;;  %v3779_v42 = vrot.slane %v3777_v60, 5  ;;  %v10427_v13 = vld [vmem:[#allocation2 + $0x2c] sm:$0x1] }
 0x215   : > { %v7564_v55 = vcombine.low %v2102_v45, %v2116_v4  ;;  %v3788_v10 = vor.u32 %v3787_v26, %v3784_v12  ;;  %v3793_v54 = vrot.slane %v3791_v24, 5  ;;  %v2134_v17 = vrot.slane %v2132_v49, 4  ;;  %v3713_v49 = vld [vmem:[#allocation2 + $0x30] sm:$0xf] }
 0x216   : > { %v2135_v50 = vshll.u32 %v1671_v34, 16  ;;  %v2124_v1 = vor.u32 %v2123_v20, %v2120_v35  ;;  %v2141_v61 = vshll.u32 %v1719_v8, 16  ;;  %v2146_v32 = vshrl.u32 %v1672_v14, 16 }
 0x217   : > { %8363 = vmatmul.mubr.bf16.gmra.mrb[56].mxu0 %v7564_v55  ;;  %v3789_v23 = vrot.slane %v3788_v10, 4  ;;  %v3780_v33 = vsel %vm10076_vm7, %v3775_v7, %v3779_v42  ;;  %v2149_v36 = vshll.u32 %v1672_v14, 16  ;;  %v2160_v27 = vshrl.u32 %v1673_v21, 16 }
 0x218   : > { %v2137_v53 = vrot.slane %v2135_v50, 5  ;;  %v2125_v52 = vrot.slane %v2124_v1, 4  ;;  %v2129_v62 = vrot.slane %v2127_v19, 5  ;;  %v2148_v38 = vrot.slane %v2146_v32, 4 }
 0x219   : > { %v3794_v31 = vsel %vm10076_vm7, %v3789_v23, %v3793_v54  ;;  %v2151_v40 = vrot.slane %v2149_v36, 5  ;;  %v2155_v43 = vshll.u32 %v1720_v30, 16  ;;  %v2143_v58 = vrot.slane %v2141_v61, 5  ;;  %v10432_v54 = vld [vmem:[#allocation2 + $0x34] sm:$0x1] }
 0x21a   : > { %v7679_v44 = vcombine.low %v3780_v33, %v3794_v31  ;;  %v2138_v41 = vor.u32 %v2137_v53, %v2134_v17  ;;  %v2162_v48 = vrot.slane %v2160_v27, 4  ;;  %v2163_v0 = vshll.u32 %v1673_v21, 16  ;;  %v3715_v30 = vld [vmem:[#allocation2 + $0x38] sm:$0xf]  ;;  %v9327_v36 = vld [vmem:[#allocation2 + $0x8] sm:$0xf] }
 0x21b   : > { %v2169_v11 = vshll.u32 %v1721_v18, 16  ;;  %v2152_v9 = vor.u32 %v2151_v40, %v2148_v38  ;;  %v3796_v22 = vshrl.u32 %v3707_v39, 16  ;;  %v3799_v56 = vshll.u32 %v3707_v39, 16  ;;  %v9326_v18 = vld [vmem:[#allocation2] sm:$0xf] }
 0x21c   : > { %8530 = vmatprep.mubr.bf16.mxu1 %v7679_v44  ;;  %v2139_v28 = vrot.slane %v2138_v41, 4  ;;  %v2130_v59 = vsel %vm10076_vm7, %v2125_v52, %v2129_v62  ;;  %v2165_v47 = vrot.slane %v2163_v0, 5  ;;  %v3805_v45 = vshll.u32 %v10418_v57, 16  ;;  %v3717_v39 = vld [vmem:[#allocation2 + $0x40] sm:$0xf] }
 0x21d   : > { %v3810_v60 = vshrl.u32 %v3709_v15, 16  ;;  %v2153_v34 = vrot.slane %v2152_v9, 4  ;;  %v3798_v3 = vrot.slane %v3796_v22, 4  ;;  %v3801_v6 = vrot.slane %v3799_v56, 5  ;;  %v10440_v40 = vld [vmem:[#allocation2 + $0x3c] sm:$0x1] }
 0x21e   : > { %v2144_v2 = vsel %vm10076_vm7, %v2139_v28, %v2143_v58  ;;  %v2157_v24 = vrot.slane %v2155_v43, 5  ;;  %v2166_v26 = vor.u32 %v2165_v47, %v2162_v48  ;;  %v2171_v8 = vrot.slane %v2169_v11, 5  ;;  %v9328_v11 = vld [vmem:[#allocation2 + $0x10] sm:$0xf]  ;;  %v9329_v28 = vld [vmem:[#allocation2 + $0x18] sm:$0xf] }
 0x21f   : > { %v7565_v12 = vcombine.low %v2130_v59, %v2144_v2  ;;  %v3802_v16 = vor.u32 %v3801_v6, %v3798_v3  ;;  %v3812_v4 = vrot.slane %v3810_v60, 4  ;;  %v3813_v7 = vshll.u32 %v3709_v15, 16  ;;  %v10442_v22 = vld [vmem:[#allocation2 + $0x44] sm:$0x1]  ;;  %v3719_v60 = vld [vmem:[#allocation2 + $0x58] sm:$0xf] }
 0x220   : > { %v3819_v19 = vshll.u32 %v10422_v63, 16  ;;  %v2158_v14 = vsel %vm10076_vm7, %v2153_v34, %v2157_v24  ;;  %v2167_v55 = vrot.slane %v2166_v26, 4  ;;  %v3824_v10 = vshrl.u32 %v3711_v5, 16  ;;  %v9222_v6 = vld [vmem:[#allocation8 + $0x148] sm:$0xff]  }
 0x221   : > { %8366 = vmatprep.mubr.bf16.mxu0 %v7565_v12  ;;  %v3827_v35 = vshll.u32 %v3711_v5, 16  ;;  %v3803_v20 = vrot.slane %v3802_v16, 4  ;;  %v3807_v21 = vrot.slane %v3805_v45, 5  ;;  %v3815_v42 = vrot.slane %v3813_v7, 5  ;;  %v10447_v12 = vld [vmem:[#allocation2 + $0x5c] sm:$0x1] }
 0x222   : > { %v3833_v17 = vshll.u32 %v10427_v13, 16  ;;  %v2172_v50 = vsel %vm10076_vm7, %v2167_v55, %v2171_v8  ;;  %v3826_v23 = vrot.slane %v3824_v10, 4  ;;  %v3838_v61 = vshrl.u32 %v3713_v49, 16 }
 0x223   : > { %v3829_v1 = vrot.slane %v3827_v35, 5  ;;  %v7566_v32 = vcombine.low %v2158_v14, %v2172_v50  ;;  %v3816_v33 = vor.u32 %v3815_v42, %v3812_v4  ;;  %v3821_v53 = vrot.slane %v3819_v19, 5  ;;  %v3721_v4 = vld [vmem:[#allocation2 + $0x60] sm:$0xf]  ;;  %v10453_v42 = vld [vmem:[#allocation2 + $0x64] sm:$0x1] }
 0x224   : > { %v7575_v27 = vcombine.low %v9326_v18, %v9327_v36  ;;  %v3840_v52 = vrot.slane %v3838_v61, 4  ;;  %v3841_v62 = vshll.u32 %v3713_v49, 16  ;;  %v3847_v38 = vshll.u32 %v10432_v54, 16  ;;  %v9330_v35 = vld [vmem:[#allocation2 + $0x20] sm:$0xf]  ;;  %v9225_v50 = vld [vmem:[#allocation8 + $0x150] sm:$0xff]  }
 0x225   : > { %v3830_v31 = vor.u32 %v3829_v1, %v3826_v23  ;;  %8367 = vmatmul.mubr.bf16.gmra.mrb[60].mxu0 %v7566_v32  ;;  %v3808_v44 = vsel %vm10076_vm7, %v3803_v20, %v3807_v21  ;;  %v3817_v41 = vrot.slane %v3816_v33, 4  ;;  %v3852_v43 = vshrl.u32 %v3715_v30, 16  ;;  %v9331_v20 = vld [vmem:[#allocation2 + $0x28] sm:$0xf] }
 0x226   : > { %v3855_v15 = vshll.u32 %v3715_v30, 16  ;;  %8386 = vmatprep.mubr.bf16.mxu0 %v7575_v27  ;;  %v3835_v48 = vrot.slane %v3833_v17, 5  ;;  %v3843_v0 = vrot.slane %v3841_v62, 5  ;;  %v7576_v9 = vcombine.low %v9328_v11, %v9329_v28  ;;  %v3723_v32 = vld [vmem:[#allocation2 + $0x68] sm:$0xf] }
 0x227   : > { %v3831_v58 = vrot.slane %v3830_v31, 4  ;;  %v3822_v56 = vsel %vm10076_vm7, %v3817_v41, %v3821_v53  ;;  %v3854_v59 = vrot.slane %v3852_v43, 4  ;;  %v3866_v45 = vshrl.u32 %v3717_v39, 16  ;;  %v9238_v33 = vld [vmem:[#allocation8 + $0x88] sm:$0xff]   ;;  %v9332_v28 = vld [vmem:[#allocation2 + $0x30] sm:$0xf] }
 0x228   : > { %v3857_v47 = vrot.slane %v3855_v15, 5  ;;  %v7680_v2 = vcombine.low %v3808_v44, %v3822_v56  ;;  %v3844_v34 = vor.u32 %v3843_v0, %v3840_v52  ;;  %v3849_v3 = vrot.slane %v3847_v38, 5  ;;  %v3725_v38 = vld [vmem:[#allocation2 + $0x70] sm:$0xf]  ;;  %v10462_v41 = vld [vmem:[#allocation2 + $0x6c] sm:$0x1] }
 0x229   : > { %v3861_v5 = vshll.u32 %v10440_v40, 16  ;;  %v3868_v26 = vrot.slane %v3866_v45, 4  ;;  %v3869_v8 = vshll.u32 %v3717_v39, 16  ;;  %v3875_v16 = vshll.u32 %v10442_v22, 16 }
 0x22a   : > { %v3858_v24 = vor.u32 %v3857_v47, %v3854_v59  ;;  %8531 = vmatmul.mubr.bf16.vlgmr.msra.gmra.mrb[16].mxu1 %v7680_v2  ;;  %v3836_v7 = vsel %vm10076_vm7, %v3831_v58, %v3835_v48  ;;  %v3845_v19 = vrot.slane %v3844_v34, 4  ;;  %v3880_v49 = vshrl.u32 %v3719_v60, 16  ;;  %v9241_v58 = vld [vmem:[#allocation8 + $0x90] sm:$0xff]   ;;  %v3727_v34 = vld [vmem:[#allocation2 + $0x78] sm:$0xf] }
 0x22b   : > { %v3883_v14 = vshll.u32 %v3719_v60, 16  ;;  %8563 = vmatpush3.bf16.msra.mxu1 %v10347_v51  ;;  %v3871_v10 = vrot.slane %v3869_v8, 5  ;;  %v7577_v21 = vcombine.low %v9330_v35, %v9331_v20  ;;  %v3889_v17 = vshll.u32 %v10447_v12, 16  ;;  %v10464_v59 = vld [vmem:[#allocation2 + $0x74] sm:$0x1] }
 0x22c   : > { %v3859_v55 = vrot.slane %v3858_v24, 4  ;;  %v3850_v23 = vsel %vm10076_vm7, %v3845_v19, %v3849_v3  ;;  %8564 = vmatprep.subr.bf16.mxu1 %v9222_v6  ;;  %v3882_v1 = vrot.slane %v3880_v49, 4  ;;  %v3894_v30 = vshrl.u32 %v3721_v4, 16  ;;  %v3729_v8 = vld [vmem:[#allocation2 + $0x80] sm:$0xf] }
 0x22d   : > { %v3885_v61 = vrot.slane %v3883_v14, 5  ;;  %v7681_v51 = vcombine.low %v3836_v7, %v3850_v23  ;;  %8387 = vmatmul.mubr.bf16.vlgmr.msra.gmra.mrb[32].mxu0 %v7576_v9  ;;  %v3863_v53 = vrot.slane %v3861_v5, 5  ;;  %v3872_v18 = vor.u32 %v3871_v10, %v3868_v26  ;;  %v9333_v9 = vld [vmem:[#allocation2 + $0x38] sm:$0xf]  ;;  %v10469_v26 = vld [vmem:[#allocation2 + $0x7c] sm:$0x1] }
 0x22e   : > { %v3877_v36 = vrot.slane %v3875_v16, 5  ;;  %8390 = vmatprep.mubr.bf16.mxu0 %v7577_v21  ;;  %v3896_v31 = vrot.slane %v3894_v30, 4  ;;  %v3897_v52 = vshll.u32 %v3721_v4, 16  ;;  %v3903_v62 = vshll.u32 %v10453_v42, 16  ;;  %8419 = vmatpush3.bf16.msra.mxu0 %v10341_v46  ;;  %v9228_v46 = vld [vmem:[#allocation8 + $0x158] sm:$0xff]  }
 0x22f   : > { %v3886_v27 = vor.u32 %v3885_v61, %v3882_v1  ;;  %8534 = vmatprep.mubr.bf16.mxu1 %v7681_v51  ;;  %v3864_v39 = vsel %vm10076_vm7, %v3859_v55, %v3863_v53  ;;  %v3873_v44 = vrot.slane %v3872_v18, 4  ;;  %8565 = vmatpush3.bf16.msra.mxu1 %v9222_v6  ;;  %v3908_v43 = vshrl.u32 %v3723_v32, 16  ;;  %v10472_v49 = vld [vmem:[#allocation2 + $0x84] sm:$0x1]  ;;  %v9243_v14 = vld [vmem:[#allocation8 + $0x98] sm:$0xff]  }
 0x230   : > { %v3911_v15 = vshll.u32 %v3723_v32, 16  ;;  %v3891_v0 = vrot.slane %v3889_v17, 5  ;;  %v3899_v11 = vrot.slane %v3897_v52, 5  ;;  %8566 = vmatprep.subr.bf16.mxu1 %v9225_v50  ;;  %v7578_v56 = vcombine.low %v9332_v28, %v9333_v9  ;;  %8420 = vmatprep.subr.bf16.mxu0 %v9238_v33  ;;  %v9334_v10 = vld [vmem:[#allocation2 + $0x50] sm:$0xf]  ;;  %v9231_v1 = vld [vmem:[#allocation8 + $0x160] sm:$0xff]  }
 0x231   : > { %v3887_v48 = vrot.slane %v3886_v27, 4  ;;  %v3878_v47 = vsel %vm10076_vm7, %v3873_v44, %v3877_v36  ;;  %v3910_v45 = vrot.slane %v3908_v43, 4  ;;  %v3922_v2 = vshrl.u32 %v3725_v38, 16  ;;  %v9335_v35 = vld [vmem:[#allocation2 + $0x58] sm:$0xf]  ;;  %v9246_v27 = vld [vmem:[#allocation8 + $0xa0] sm:$0xff]  }
 0x232   : > { %v3913_v60 = vrot.slane %v3911_v15, 5  ;;  %v7682_v3 = vcombine.low %v3864_v39, %v3878_v47  ;;  %v3900_v6 = vor.u32 %v3899_v11, %v3896_v31  ;;  %v3905_v5 = vrot.slane %v3903_v62, 5  ;;  %8421 = vmatpush3.bf16.msra.mxu0 %v9238_v33  ;;  %v3731_v23 = vld [vmem:[#allocation2 + $0x88] sm:$0xf]  ;;  %v3733_v36 = vld [vmem:[#allocation2 + $0x90] sm:$0xf] }
 0x233   : > { %v3917_v24 = vshll.u32 %v10462_v41, 16  ;;  %v3924_v4 = vrot.slane %v3922_v2, 4  ;;  %v3925_v7 = vshll.u32 %v3725_v38, 16  ;;  %v3931_v19 = vshll.u32 %v10464_v59, 16  ;;  %8567 = vmatpush3.bf16.msra.mxu1 %v9225_v50  ;;  %8422 = vmatprep.subr.bf16.mxu0 %v9241_v58  ;;  %v10479_v39 = vld [vmem:[#allocation2 + $0x8c] sm:$0x1] }
 0x234   : > { %v3914_v16 = vor.u32 %v3913_v60, %v3910_v45  ;;  %8535 = vmatmul.mubr.bf16.gmra.mrb[20].mxu1 %v7682_v3  ;;  %v3901_v55 = vrot.slane %v3900_v6, 4  ;;  %v7579_v20 = vcombine.low %v9334_v10, %v9335_v35  ;;  %v3936_v21 = vshrl.u32 %v3727_v34, 16  ;;  %8568 = vmatprep.subr.bf16.mxu1 %v9228_v46  ;;  %v9234_v11 = vld [vmem:[#allocation8 + $0x168] sm:$0xff]   ;;  %v9336_v2 = vld [vmem:[#allocation2 + $0x60] sm:$0xf] }
 0x235   : > { %v3939_v17 = vshll.u32 %v3727_v34, 16  ;;  %v3892_v61 = vsel %vm10076_vm7, %v3887_v48, %v3891_v0  ;;  %8391 = vmatmul.mubr.bf16.gmra.mrb[36].mxu0 %v7578_v56  ;;  %v3927_v50 = vrot.slane %v3925_v7, 5  ;;  %v3945_v32 = vshll.u32 %v10469_v26, 16  ;;  %v10482_v0 = vld [vmem:[#allocation2 + $0x94] sm:$0x1]  ;;  %v9248_v7 = vld [vmem:[#allocation8 + $0xa8] sm:$0xff]  }
 0x236   : > { %v3915_v30 = vrot.slane %v3914_v16, 4  ;;  %v3906_v33 = vsel %vm10076_vm7, %v3901_v55, %v3905_v5  ;;  %8394 = vmatprep.mubr.bf16.mxu0 %v7579_v20  ;;  %v3938_v51 = vrot.slane %v3936_v21, 4  ;;  %v3950_v18 = vshrl.u32 %v3729_v8, 16  ;;  %8423 = vmatpush3.bf16.msra.mxu0 %v9241_v58  ;;  %v3735_v47 = vld [vmem:[#allocation2 + $0xa8] sm:$0xf]  ;;  %v9239_v20 = vld [vmem:[#allocation8 + $0x170] sm:$0xff]  }
 0x237   : > { %v3941_v53 = vrot.slane %v3939_v17, 5  ;;  %v7683_v31 = vcombine.low %v3892_v61, %v3906_v33  ;;  %v3919_v52 = vrot.slane %v3917_v24, 5  ;;  %v3928_v62 = vor.u32 %v3927_v50, %v3924_v4  ;;  %8569 = vmatpush3.bf16.msra.mxu1 %v9228_v46  ;;  %8424 = vmatprep.subr.bf16.mxu0 %v9243_v14  ;;  %v9337_v34 = vld [vmem:[#allocation2 + $0x68] sm:$0xf]  ;;  %v10486_v6 = vld [vmem:[#allocation2 + $0xac] sm:$0x1] }
 0x238   : > { %v3933_v38 = vrot.slane %v3931_v19, 5  ;;  %v3952_v43 = vrot.slane %v3950_v18, 4  ;;  %v3953_v15 = vshll.u32 %v3729_v8, 16  ;;  %v3959_v48 = vshll.u32 %v10472_v49, 16  ;;  %8570 = vmatprep.subr.bf16.mxu1 %v9231_v1  ;;  %v10490_v4 = vld [vmem:[#allocation2 + $0xb0] sm:$0xf] }
 0x239   : > { %v3942_v44 = vor.u32 %v3941_v53, %v3938_v51  ;;  %8538 = vmatprep.mubr.bf16.mxu1 %v7683_v31  ;;  %v3920_v58 = vsel %vm10076_vm7, %v3915_v30, %v3919_v52  ;;  %v3929_v28 = vrot.slane %v3928_v62, 4  ;;  %v3964_v9 = vshrl.u32 %v3731_v23, 16  ;;  %v10494_v61 = vld [vmem:[#allocation2 + $0xb4] sm:$0x1]  ;;  %v9339_v50 = vld [vmem:[#allocation2 + $0x78] sm:$0xf] }
 0x23a   : > { %v3967_v56 = vshll.u32 %v3731_v23, 16  ;;  %v3947_v46 = vrot.slane %v3945_v32, 5  ;;  %v3955_v60 = vrot.slane %v3953_v15, 5  ;;  %v7580_v3 = vcombine.low %v9336_v2, %v9337_v34  ;;  %8425 = vmatpush3.bf16.msra.mxu0 %v9243_v14  ;;  %v9244_v62 = vld [vmem:[#allocation8 + $0x178] sm:$0xff]   ;;  %v10506_v2 = vld [vmem:[#allocation2 + $0xc4] sm:$0x1] }
 0x23b   : > { %v3943_v45 = vrot.slane %v3942_v44, 4  ;;  %v3934_v5 = vsel %vm10076_vm7, %v3929_v28, %v3933_v38  ;;  %v3966_v24 = vrot.slane %v3964_v9, 4  ;;  %v3978_v16 = vshrl.u32 %v3733_v36, 16  ;;  %8571 = vmatpush3.bf16.msra.mxu1 %v9231_v1  ;;  %8426 = vmatprep.subr.bf16.mxu0 %v9246_v27  ;;  %v9338_v1 = vld [vmem:[#allocation2 + $0x70] sm:$0xf] }
 0x23c   : > { %v3969_v8 = vrot.slane %v3967_v56, 5  ;;  %v7684_v19 = vcombine.low %v3920_v58, %v3934_v5  ;;  %v3956_v55 = vor.u32 %v3955_v60, %v3952_v43  ;;  %v3961_v10 = vrot.slane %v3959_v48, 5  ;;  %8572 = vmatprep.subr.bf16.mxu1 %v9234_v11  ;;  %v10502_v56 = vld [vmem:[#allocation2 + $0xbc] sm:$0x1]  ;;  %v9341_v5 = vld [vmem:[#allocation2 + $0x88] sm:$0xf] }
 0x23d   : > { %v3973_v35 = vshll.u32 %v10479_v39, 16  ;;  %8395 = vmatmul.mubr.bf16.gmra.mrb[40].mxu0 %v7580_v3  ;;  %v3980_v21 = vrot.slane %v3978_v16, 4  ;;  %v3981_v17 = vshll.u32 %v3733_v36, 16  ;;  %v3987_v23 = vshll.u32 %v10482_v0, 16  ;;  %v3739_v36 = vld [vmem:[#allocation2 + $0xb8] sm:$0xf] }
 0x23e   : > { %v3970_v14 = vor.u32 %v3969_v8, %v3966_v24  ;;  %8539 = vmatmul.mubr.bf16.gmra.mrb[24].mxu1 %v7684_v19  ;;  %v3957_v30 = vrot.slane %v3956_v55, 4  ;;  %v7581_v32 = vcombine.low %v9338_v1, %v9339_v50  ;;  %v3992_v33 = vshrl.u32 %v3735_v47, 16  ;;  %8427 = vmatpush3.bf16.msra.mxu0 %v9246_v27  ;;  %v9251_v27 = vld [vmem:[#allocation8 + $0xb0] sm:$0xff]   ;;  %v9340_v3 = vld [vmem:[#allocation2 + $0x80] sm:$0xf]  ;;  %v9252_v55 = vld [vmem:[#allocation8 + $0xb8] sm:$0xff]  }
 0x23f   : > { %v3995_v51 = vshll.u32 %v3735_v47, 16  ;;  %v3948_v53 = vsel %vm10076_vm7, %v3943_v45, %v3947_v46  ;;  %v3983_v31 = vrot.slane %v3981_v17, 5  ;;  %v4001_v52 = vshll.u32 %v10486_v6, 16  ;;  %8573 = vmatpush3.bf16.msra.mxu1 %v9234_v11  ;;  %8428 = vmatprep.subr.bf16.mxu0 %v9248_v7  ;;  %v3741_v47 = vld [vmem:[#allocation2 + $0xc0] sm:$0xf] }
 0x240   : > { %v3971_v18 = vrot.slane %v3970_v14, 4  ;;  %v3962_v38 = vsel %vm10076_vm7, %v3957_v30, %v3961_v10  ;;  %8398 = vmatprep.mubr.bf16.mxu0 %v7581_v32  ;;  %v3994_v44 = vrot.slane %v3992_v33, 4  ;;  %v4006_v15 = vshrl.u32 %v10490_v4, 16  ;;  %8574 = vmatprep.subr.bf16.mxu1 %v9239_v20  ;;  %v3743_v19 = vld [vmem:[#allocation2 + $0xc8] sm:$0xf] }
 0x241   : > { %v3997_v43 = vrot.slane %v3995_v51, 5  ;;  %v7685_v48 = vcombine.low %v3948_v53, %v3962_v38  ;;  %v3975_v58 = vrot.slane %v3973_v35, 5  ;;  %v3984_v28 = vor.u32 %v3983_v31, %v3980_v21  ;;  %v10510_v21 = vld [vmem:[#allocation2 + $0xcc] sm:$0x1]  ;;  %v3745_v51 = vld [vmem:[#allocation2 + $0xd0] sm:$0xf] }
 0x242   : > { %v3989_v9 = vrot.slane %v3987_v23, 5  ;;  %v4008_v45 = vrot.slane %v4006_v15, 4  ;;  %v4009_v46 = vshll.u32 %v10490_v4, 16  ;;  %v4015_v60 = vshll.u32 %v10494_v61, 16  ;;  %8429 = vmatpush3.bf16.msra.mxu0 %v9248_v7  ;;  %v10512_v7 = vld [vmem:[#allocation8 + $0x180] sm:$0xff]  }
 0x243   : > { %v3998_v11 = vor.u32 %v3997_v43, %v3994_v44  ;;  %8542 = vmatprep.mubr.bf16.mxu1 %v7685_v48  ;;  %v3985_v34 = vrot.slane %v3984_v28, 4  ;;  %v7582_v24 = vcombine.low %v9340_v3, %v9341_v5  ;;  %v4020_v8 = vshrl.u32 %v3739_v36, 16  ;;  %8575 = vmatpush3.bf16.msra.mxu1 %v9239_v20  ;;  %v9342_v38 = vld [vmem:[#allocation2 + $0xa0] sm:$0xf]  ;;  %v9343_v44 = vld [vmem:[#allocation2 + $0xa8] sm:$0xf] }
 0x244   : > { %v4023_v16 = vshll.u32 %v3739_v36, 16  ;;  %v3976_v10 = vsel %vm10076_vm7, %v3971_v18, %v3975_v58  ;;  %v4003_v4 = vrot.slane %v4001_v52, 5  ;;  %v4011_v14 = vrot.slane %v4009_v46, 5  ;;  %8576 = vmatprep.subr.bf16.mxu1 %v9244_v62  ;;  %8430 = vmatprep.subr.bf16.mxu0 %v9251_v27  ;;  %v3747_v58 = vld [vmem:[#allocation2 + $0xd8] sm:$0xf] }
 0x245   : > { %v3999_v35 = vrot.slane %v3998_v11, 4  ;;  %v3990_v17 = vsel %vm10076_vm7, %v3985_v34, %v3989_v9  ;;  %8399 = vmatmul.mubr.bf16.gmra.mrb[44].mxu0 %v7582_v24  ;;  %v4022_v23 = vrot.slane %v4020_v8, 4  ;;  %v4034_v20 = vshrl.u32 %v3741_v47, 16  ;;  %v10526_v8 = vld [vmem:[#allocation2 + $0xdc] sm:$0x1] }
 0x246   : > { %v4025_v30 = vrot.slane %v4023_v16, 5  ;;  %v7686_v1 = vcombine.low %v3976_v10, %v3990_v17  ;;  %v4012_v50 = vor.u32 %v4011_v14, %v4008_v45  ;;  %v4017_v32 = vrot.slane %v4015_v60, 5  ;;  %8431 = vmatpush3.bf16.msra.mxu0 %v9251_v27  ;;  %v3749_v16 = vld [vmem:[#allocation2 + $0xe0] sm:$0xf]  ;;  %v10532_v17 = vld [vmem:[#allocation2 + $0xe4] sm:$0x1] }
 0x247   : > { %v4029_v33 = vshll.u32 %v10502_v56, 16  ;;  %v4036_v18 = vrot.slane %v4034_v20, 4  ;;  %v4037_v31 = vshll.u32 %v3741_v47, 16  ;;  %v4043_v52 = vshll.u32 %v10506_v2, 16  ;;  %8577 = vmatpush3.bf16.msra.mxu1 %v9244_v62  ;;  %8432 = vmatprep.subr.bf16.mxu0 %v9252_v55  ;;  %v10521_v47 = vld [vmem:[#allocation2 + $0xd4] sm:$0x1] }
 0x248   : > { %v4026_v53 = vor.u32 %v4025_v30, %v4022_v23  ;;  %8543 = vmatmul.mubr.bf16.gmra.mrb[28].mxu1 %v7686_v1  ;;  %v4013_v36 = vrot.slane %v4012_v50, 4  ;;  %v7583_v43 = vcombine.low %v9342_v38, %v9343_v44  ;;  %v4048_v15 = vshrl.u32 %v3743_v19, 16  ;;  %8610 = vmatprep.subr.bf16.mxu1 %v10512_v7  ;;  %v9345_v23 = vld [vmem:[#allocation2 + $0xb0] sm:$0xf]  ;;  %v9346_v30 = vld [vmem:[#allocation2 + $0xb8] sm:$0xf] }
 0x249   : > { %v4051_v48 = vshll.u32 %v3743_v19, 16  ;;  %v4004_v27 = vsel %vm10076_vm7, %v3999_v35, %v4003_v4  ;;  %v4039_v9 = vrot.slane %v4037_v31, 5  ;;  %v4057_v62 = vshll.u32 %v10510_v21, 16  ;;  %v10528_v19 = vld [vmem:[#allocation8 + $0xc0] sm:$0xff]  }
 0x24a   : > { %v4027_v28 = vrot.slane %v4026_v53, 4  ;;  %v4018_v11 = vsel %vm10076_vm7, %v4013_v36, %v4017_v32  ;;  %8402 = vmatprep.mubr.bf16.mxu0 %v7583_v43  ;;  %v4050_v45 = vrot.slane %v4048_v15, 4  ;;  %v4062_v60 = vshrl.u32 %v3745_v51, 16  ;;  %8433 = vmatpush3.bf16.msra.mxu0 %v9252_v55  ;;  %v3751_v32 = vld [vmem:[#allocation2 + $0xf8] sm:$0xf] }
 0x24b   : > { %v4053_v46 = vrot.slane %v4051_v48, 5  ;;  %v7687_v34 = vcombine.low %v4004_v27, %v4018_v11  ;;  %v4031_v3 = vrot.slane %v4029_v33, 5  ;;  %v4040_v5 = vor.u32 %v4039_v9, %v4036_v18  ;;  %8466 = vmatprep.subr.bf16.mxu0 %v10528_v19  ;;  %v3753_v27 = vld [vmem:[#allocation2 + $0x100] sm:$0xf] }
 0x24c   : > { %v4045_v24 = vrot.slane %v4043_v52, 5  ;;  %v4064_v35 = vrot.slane %v4062_v60, 4  ;;  %v4065_v4 = vshll.u32 %v3745_v51, 16  ;;  %v4071_v14 = vshll.u32 %v10521_v47, 16  ;;  %v10536_v52 = vld [vmem:[#allocation2 + $0xfc] sm:$0x1] }
 0x24d   : > { %v4054_v10 = vor.u32 %v4053_v46, %v4050_v45  ;;  %8546 = vmatprep.mubr.bf16.mxu1 %v7687_v34  ;;  %v4041_v55 = vrot.slane %v4040_v5, 4  ;;  %v7584_v20 = vcombine.low %v9345_v23, %v9346_v30  ;;  %v4076_v1 = vshrl.u32 %v3747_v58, 16  ;;  %v9347_v46 = vld [vmem:[#allocation2 + $0xc0] sm:$0xf]  ;;  %v9348_v60 = vld [vmem:[#allocation2 + $0xc8] sm:$0xf] }
 0x24e   : > { %v4079_v50 = vshll.u32 %v3747_v58, 16  ;;  %v4032_v33 = vsel %vm10076_vm7, %v4027_v28, %v4031_v3  ;;  %v4059_v18 = vrot.slane %v4057_v62, 5  ;;  %v4067_v31 = vrot.slane %v4065_v4, 5  ;;  %v10542_v3 = vld [vmem:[#allocation2 + $0x104] sm:$0x1] }
 0x24f   : > { %v4055_v53 = vrot.slane %v4054_v10, 4  ;;  %v4046_v51 = vsel %vm10076_vm7, %v4041_v55, %v4045_v24  ;;  %8403 = vmatmul.mubr.bf16.gmra.mrb[48].mxu0 %v7584_v20  ;;  %v4078_v36 = vrot.slane %v4076_v1, 4  ;;  %v4090_v44 = vshrl.u32 %v3749_v16, 16  ;;  %v3755_v10 = vld [vmem:[#allocation2 + $0x108] sm:$0xf] }
 0x250   : > { %v4081_v38 = vrot.slane %v4079_v50, 5  ;;  %v7688_v43 = vcombine.low %v4032_v33, %v4046_v51  ;;  %v4068_v15 = vor.u32 %v4067_v31, %v4064_v35  ;;  %v4073_v48 = vrot.slane %v4071_v14, 5  ;;  %v3757_v51 = vld [vmem:[#allocation2 + $0x110] sm:$0xf] }
 0x251   : > { %v4085_v58 = vshll.u32 %v10526_v8, 16  ;;  %v4092_v28 = vrot.slane %v4090_v44, 4  ;;  %v4093_v11 = vshll.u32 %v3749_v16, 16  ;;  %v4099_v62 = vshll.u32 %v10532_v17, 16  ;;  %v10552_v44 = vld [vmem:[#allocation2 + $0x114] sm:$0x1] }
 0x252   : > { %v4082_v9 = vor.u32 %v4081_v38, %v4078_v36  ;;  %8547 = vmatmul.mubr.bf16.gmra.mrb[0].mxu1 %v7688_v43  ;;  %v4069_v45 = vrot.slane %v4068_v15, 4  ;;  %v7585_v34 = vcombine.low %v9347_v46, %v9348_v60  ;;  %v4104_v5 = vshrl.u32 %v3751_v32, 16  ;;  %v9349_v15 = vld [vmem:[#allocation2 + $0xd0] sm:$0xf] }
 0x253   : > { %v4107_v24 = vshll.u32 %v3751_v32, 16  ;;  %v4060_v35 = vsel %vm10076_vm7, %v4055_v53, %v4059_v18  ;;  %v4095_v14 = vrot.slane %v4093_v11, 5  ;;  %v4113_v55 = vshll.u32 %v10536_v52, 16  ;;  %v10549_v32 = vld [vmem:[#allocation2 + $0x10c] sm:$0x1] }
 0x254   : > { %v4083_v4 = vrot.slane %v4082_v9, 4  ;;  %v4074_v16 = vsel %vm10076_vm7, %v4069_v45, %v4073_v48  ;;  %8406 = vmatprep.mubr.bf16.mxu0 %v7585_v34  ;;  %v4106_v23 = vrot.slane %v4104_v5, 4  ;;  %v4118_v20 = vshrl.u32 %v3753_v27, 16  ;;  %v9350_v48 = vld [vmem:[#allocation2 + $0xd8] sm:$0xf] }
 0x255   : > { %v4109_v30 = vrot.slane %v4107_v24, 5  ;;  %v7689_v1 = vcombine.low %v4060_v35, %v4074_v16  ;;  %v4087_v50 = vrot.slane %v4085_v58, 5  ;;  %v4096_v33 = vor.u32 %v4095_v14, %v4092_v28  ;;  %v3759_v58 = vld [vmem:[#allocation2 + $0x118] sm:$0xf] }
 0x256   : > { %v4101_v31 = vrot.slane %v4099_v62, 5  ;;  %v4120_v53 = vrot.slane %v4118_v20, 4  ;;  %v4121_v18 = vshll.u32 %v3753_v27, 16  ;;  %v4127_v38 = vshll.u32 %v10542_v3, 16 }
 0x257   : > { %v4110_v36 = vor.u32 %v4109_v30, %v4106_v23  ;;  %8550 = vmatprep.mubr.bf16.mxu1 %v7689_v1  ;;  %v4097_v43 = vrot.slane %v4096_v33, 4  ;;  %v7586_v9 = vcombine.low %v9349_v15, %v9350_v48  ;;  %v4132_v11 = vshrl.u32 %v3755_v10, 16  ;;  %v3761_v30 = vld [vmem:[#allocation2 + $0x120] sm:$0xf] }
 0x258   : > { %v4135_v45 = vshll.u32 %v3755_v10, 16  ;;  %v4088_v28 = vsel %vm10076_vm7, %v4083_v4, %v4087_v50  ;;  %v4115_v46 = vrot.slane %v4113_v55, 5  ;;  %v4123_v60 = vrot.slane %v4121_v18, 5  ;;  %v10559_v10 = vld [vmem:[#allocation2 + $0x11c] sm:$0x1] }
 0x259   : > { %v4111_v62 = vrot.slane %v4110_v36, 4  ;;  %v4102_v27 = vsel %vm10076_vm7, %v4097_v43, %v4101_v31  ;;  %8407 = vmatmul.mubr.bf16.gmra.mrb[52].mxu0 %v7586_v9  ;;  %v4134_v34 = vrot.slane %v4132_v11, 4  ;;  %v4146_v24 = vshrl.u32 %v3757_v51, 16  ;;  %v10562_v50 = vld [vmem:[#allocation2 + $0x124] sm:$0x1] }
 0x25a   : > { %v4137_v5 = vrot.slane %v4135_v45, 5  ;;  %v7690_v35 = vcombine.low %v4088_v28, %v4102_v27  ;;  %v4124_v14 = vor.u32 %v4123_v60, %v4120_v53  ;;  %v4129_v16 = vrot.slane %v4127_v38, 5  ;;  %v9351_v31 = vld [vmem:[#allocation2 + $0xf0] sm:$0xf]  ;;  %v9352_v36 = vld [vmem:[#allocation2 + $0xf8] sm:$0xf] }
 0x25b   : > { %v4141_v23 = vshll.u32 %v10549_v32, 16  ;;  %v4148_v4 = vrot.slane %v4146_v24, 4  ;;  %v4149_v1 = vshll.u32 %v3757_v51, 16  ;;  %v4155_v55 = vshll.u32 %v10552_v44, 16  ;;  %v3763_v38 = vld [vmem:[#allocation2 + $0x128] sm:$0xf] }
 0x25c   : > { %v4138_v20 = vor.u32 %v4137_v5, %v4134_v34  ;;  %8551 = vmatmul.mubr.bf16.gmra.mrb[4].mxu1 %v7690_v35  ;;  %v4125_v33 = vrot.slane %v4124_v14, 4  ;;  %v7587_v18 = vcombine.low %v9351_v31, %v9352_v36  ;;  %v4160_v43 = vshrl.u32 %v3759_v58, 16  ;;  %v3765_v27 = vld [vmem:[#allocation2 + $0x130] sm:$0xf]  ;;  %v10569_v35 = vld [vmem:[#allocation2 + $0x12c] sm:$0x1] }
 0x25d   : > { %v4163_v53 = vshll.u32 %v3759_v58, 16  ;;  %v4116_v15 = vsel %vm10076_vm7, %v4111_v62, %v4115_v46  ;;  %v4151_v9 = vrot.slane %v4149_v1, 5  ;;  %v4169_v11 = vshll.u32 %v10559_v10, 16  ;;  %v10572_v1 = vld [vmem:[#allocation2 + $0x134] sm:$0x1] }
 0x25e   : > { %v4139_v48 = vrot.slane %v4138_v20, 4  ;;  %v4130_v51 = vsel %vm10076_vm7, %v4125_v33, %v4129_v16  ;;  %8410 = vmatprep.mubr.bf16.mxu0 %v7587_v18  ;;  %v4162_v45 = vrot.slane %v4160_v43, 4  ;;  %v4174_v60 = vshrl.u32 %v3761_v30, 16  ;;  %v9353_v33 = vld [vmem:[#allocation2 + $0x100] sm:$0xf] }
 0x25f   : > { %v4165_v28 = vrot.slane %v4163_v53, 5  ;;  %v7691_v34 = vcombine.low %v4116_v15, %v4130_v51  ;;  %v4143_v5 = vrot.slane %v4141_v23, 5  ;;  %v4152_v24 = vor.u32 %v4151_v9, %v4148_v4  ;;  %v9354_v31 = vld [vmem:[#allocation2 + $0x108] sm:$0xf] }
 0x260   : > { %v4157_v58 = vrot.slane %v4155_v55, 5  ;;  %v4176_v62 = vrot.slane %v4174_v60, 4  ;;  %v4177_v46 = vshll.u32 %v3761_v30, 16  ;;  %v4183_v20 = vshll.u32 %v10562_v50, 16 }
 0x261   : > { %v4166_v14 = vor.u32 %v4165_v28, %v4162_v45  ;;  %8554 = vmatprep.mubr.bf16.mxu1 %v7691_v34  ;;  %v4153_v16 = vrot.slane %v4152_v24, 4  ;;  %v7588_v36 = vcombine.low %v9353_v33, %v9354_v31  ;;  %v4188_v18 = vshrl.u32 %v3763_v38, 16  ;;  %v4537_v24 = vld [vmem:[#allocation2 + $0x8] sm:$0xe] }
 0x262   : > { %v4191_v43 = vshll.u32 %v3763_v38, 16  ;;  %v4144_v23 = vsel %vm10076_vm7, %v4139_v48, %v4143_v5  ;;  %v4171_v55 = vrot.slane %v4169_v11, 5  ;;  %v4179_v53 = vrot.slane %v4177_v46, 5  ;;  %v4538_v11 = vld [vmem:[#allocation2 + $0x10] sm:$0xe] }
 0x263   : > { %v4167_v4 = vrot.slane %v4166_v14, 4  ;;  %v4158_v30 = vsel %vm10076_vm7, %v4153_v16, %v4157_v58  ;;  %8411 = vmatmul.mubr.bf16.gmra.mrb[56].mxu0 %v7588_v36  ;;  %v4190_v15 = vrot.slane %v4188_v18, 4  ;;  %v4202_v51 = vshrl.u32 %v3765_v27, 16  ;;  %v9355_v14 = vld [vmem:[#allocation2 + $0x110] sm:$0xf] }
 0x264   : > { %v4193_v9 = vrot.slane %v4191_v43, 5  ;;  %v7692_v45 = vcombine.low %v4144_v23, %v4158_v30  ;;  %v4180_v28 = vor.u32 %v4179_v53, %v4176_v62  ;;  %v4185_v60 = vrot.slane %v4183_v20, 5  ;;  %v9356_v58 = vld [vmem:[#allocation2 + $0x118] sm:$0xf]  ;;  %v9357_v43 = vld [vmem:[#allocation2 + $0xc] sm:$0x1] }
 0x265   : > { %v4197_v34 = vshll.u32 %v10569_v35, 16  ;;  %v4204_v33 = vrot.slane %v4202_v51, 4  ;;  %v4205_v31 = vshll.u32 %v3765_v27, 16  ;;  %v4211_v48 = vshll.u32 %v10572_v1, 16  ;;  %v4539_v18 = vld [vmem:[#allocation2 + $0x18] sm:$0xe] }
 0x266   : > { %v4194_v38 = vor.u32 %v4193_v9, %v4190_v15  ;;  %8555 = vmatmul.mubr.bf16.gmra.mrb[8].mxu1 %v7692_v45  ;;  %v4181_v5 = vrot.slane %v4180_v28, 4  ;;  %v7589_v46 = vcombine.low %v9355_v14, %v9356_v58  ;;  %v4172_v62 = vsel %vm10076_vm7, %v4167_v4, %v4171_v55  ;;  %v9358_v30 = vld [vmem:[#allocation2 + $0x14] sm:$0x1]  ;;  %v4540_v9 = vld [vmem:[#allocation2 + $0x20] sm:$0xe] }
 0x267   : > { %v4207_v16 = vrot.slane %v4205_v31, 5  ;;  %v7703_v36 = vrot.slane %v4537_v24, 9  ;;  %v4635_v23 = vrot.slane %v9357_v43, 5  ;;  %v7704_v53 = vrot.slane %v4538_v11, 9  ;;  %v9359_v55 = vld [vmem:[#allocation2 + $0x120] sm:$0xf] }
 0x268   : > { %v4195_v20 = vrot.slane %v4194_v38, 4  ;;  %v4186_v27 = vsel %vm10076_vm7, %v4181_v5, %v4185_v60  ;;  %8414 = vmatprep.mubr.bf16.mxu0 %v7589_v46  ;;  %v4639_v15 = vrot.slane %v9358_v30, 5  ;;  %v4199_v45 = vrot.slane %v4197_v34, 5  ;;  %v9360_v24 = vld [vmem:[#allocation2 + $0x128] sm:$0xf] }
 0x269   : > { %v7693_v51 = vcombine.low %v4172_v62, %v4186_v27  ;;  %v4208_v28 = vor.u32 %v4207_v16, %v4204_v33  ;;  %v7590_v38 = vcombine.low %v9359_v55, %v9360_v24  ;;  %v2768_v60 = vld [vmem:[#allocation2] sm:$0xe]  ;;  %v2769_v31 = vld [vmem:[#allocation2 + $0x8] sm:$0xe]  ;;  %v4213_v5 = vrot.slane %v4211_v48, 5 }
 0x26a   : > { %v4640_v11 = vsel %vm10586_vm12, %v7704_v53, %v4639_v15  ;;  %v7705_v14 = vrot.slane %v4539_v18, 9  ;;  %v4643_v58 = vrot.slane %v10418_v57, 5  ;;  %v4541_v34 = vld [vmem:[#allocation2 + $0x28] sm:$0xe]  ;;  %v4200_v33 = vsel %vm10076_vm7, %v4195_v20, %v4199_v45  ;;  %v4542_v27 = vld [vmem:[#allocation2 + $0x30] sm:$0xe] }
 0x26b   : > { %8558 = vmatprep.mubr.bf16.mxu1 %v7693_v51  ;;  %v4209_v46 = vrot.slane %v4208_v28, 4  ;;  %8415 = vmatmul.mubr.bf16.gmra.mrb[60].mxu0 %v7590_v38  ;;  %v7706_v62 = vrot.slane %v4540_v9, 9  ;;  %v4647_v16 = vrot.slane %v10422_v63, 5  ;;  %v4636_v48 = vsel %vm10586_vm12, %v7703_v36, %v4635_v23  ;;  %v9361_v30 = vld [vmem:[#allocation2 + $0x4] sm:$0x1] }
 0x26c   : > { %v7599_v43 = vrot.slane %v2768_v60, 9  ;;  %v2869_v53 = vrot.slane %v9361_v30, 5  ;;  %v7600_v18 = vrot.slane %v2769_v31, 9  ;;  %v2770_v15 = vld [vmem:[#allocation2 + $0x10] sm:$0xe]  ;;  %v7735_v51 = vcombine.low %v4636_v48, %v4640_v11 }
 0x26d   : > { %v4214_v57 = vsel %vm10076_vm7, %v4209_v46, %v4213_v5  ;;  %v10602_v20 = vsel %vm10586_vm12, %v7705_v14, %v4643_v58  ;;  %v9362_v9 = vld [vmem:[#allocation2 + $0xc] sm:$0x1]  ;;  %v2771_v63 = vld [vmem:[#allocation2 + $0x18] sm:$0xe]  ;;  %v4648_v36 = vsel %vm10586_vm12, %v7706_v62, %v4647_v16  ;;  %v7707_v55 = vrot.slane %v4541_v34, 9 }
 0x26e   : > { %v2873_v45 = vrot.slane %v9362_v9, 5  ;;  %v7694_v28 = vcombine.low %v4200_v33, %v4214_v57  ;;  %v2870_v23 = vsel %vm10586_vm12, %v7599_v43, %v2869_v53  ;;  %v4543_v24 = vld [vmem:[#allocation2 + $0x38] sm:$0xe]  ;;  %v7708_v60 = vrot.slane %v4542_v27, 9  ;;  %v4544_v11 = vld [vmem:[#allocation2 + $0x40] sm:$0xe] }
 0x26f   : > { %v4655_v31 = vrot.slane %v10432_v54, 5  ;;  %v7601_v5 = vrot.slane %v2770_v15, 9  ;;  %v4651_v58 = vrot.slane %v10427_v13, 5  ;;  %v9363_v33 = vld [vmem:[#allocation2 + $0x14] sm:$0x1]  ;;  %v7602_v62 = vrot.slane %v2771_v63, 9 }
 0x270   : > { %v2874_v38 = vsel %vm10586_vm12, %v7600_v18, %v2873_v45  ;;  %8559 = vmatmul.mubr.bf16.gmra.mrb[12].mxu1 %v7694_v28  ;;  %v2877_v46 = vrot.slane %v9363_v33, 5  ;;  %v2772_v16 = vld [vmem:[#allocation2 + $0x20] sm:$0xe]  ;;  %v7736_v34 = vcombine.low %v10602_v20, %v4648_v36  ;;  %v9364_v43 = vld [vmem:[#allocation2 + $0x1c] sm:$0x1]  ;;  %v7709_v18 = vrot.slane %v4543_v24, 9 }
 0x271   : > { %v7631_v14 = vcombine.low %v2870_v23, %v2874_v38  ;;  %8578 = vmatprep.mubr.bf16.mxu1 %v7735_v51  ;;  %v4656_v48 = vsel %vm10586_vm12, %v7708_v60, %v4655_v31  ;;  %v2881_v27 = vrot.slane %v9364_v43, 5  ;;  %v2773_v30 = vld [vmem:[#allocation2 + $0x28] sm:$0xe]  ;;  %v4545_v54 = vld [vmem:[#allocation2 + $0x58] sm:$0xe]  ;;  %v7710_v13 = vrot.slane %v4544_v11, 9 }
 0x272   : > { %v2878_v53 = vsel %vm10586_vm12, %v7601_v5, %v2877_v46  ;;  %v4663_v15 = vrot.slane %v10442_v22, 5  ;;  %v4546_v57 = vld [vmem:[#allocation2 + $0x60] sm:$0xe]  ;;  %v4659_v20 = vrot.slane %v10440_v40, 5  ;;  %v7603_v9 = vrot.slane %v2772_v16, 9 }
 0x273   : > { %8434 = vmatprep.mubr.bf16.mxu0 %v7631_v14  ;;  %v2882_v51 = vsel %vm10586_vm12, %v7602_v62, %v2881_v27  ;;  %v9365_v45 = vld [vmem:[#allocation2 + $0x24] sm:$0x1]  ;;  %v2774_v28 = vld [vmem:[#allocation2 + $0x30] sm:$0xe]  ;;  %v4652_v36 = vsel %vm10586_vm12, %v7707_v55, %v4651_v58  ;;  %v7604_v38 = vrot.slane %v2773_v30, 9  ;;  %v7711_v11 = vrot.slane %v4545_v54, 9 }
 0x274   : > { %v2885_v63 = vrot.slane %v9365_v45, 5  ;;  %v7632_v23 = vcombine.low %v2878_v53, %v2882_v51  ;;  %v9366_v60 = vld [vmem:[#allocation2 + $0x2c] sm:$0x1]  ;;  %v2775_v31 = vld [vmem:[#allocation2 + $0x38] sm:$0xe]  ;;  %v7737_v5 = vcombine.low %v4652_v36, %v4656_v48  ;;  %v10625_v22 = vsel %vm10586_vm12, %v7710_v13, %v4663_v15 }
 0x275   : > { %v2889_v24 = vrot.slane %v9366_v60, 5  ;;  %v4667_v40 = vrot.slane %v10447_v12, 5  ;;  %v9253_v14 = vld [vmem:[#allocation8 + $0x188] sm:$0xff]   ;;  %v7712_v46 = vrot.slane %v4546_v57, 9  ;;  %v4671_v55 = vrot.slane %v10453_v42, 5 }
 0x276   : > { %8435 = vmatmul.mubr.bf16.vlgmr.msra.gmra.mrb[32].mxu0 %v7632_v23  ;;  %v7605_v58 = vrot.slane %v2774_v28, 9  ;;  %v4548_v62 = vld [vmem:[#allocation2 + $0x70] sm:$0xe]  ;;  %v10633_v16 = vsel %vm10586_vm12, %v7709_v18, %v4659_v20  ;;  %v2886_v48 = vsel %vm10586_vm12, %v7603_v9, %v2885_v63  ;;  %v9367_v43 = vld [vmem:[#allocation2 + $0x34] sm:$0x1]  ;;  %v7606_v12 = vrot.slane %v2775_v31, 9 }
 0x277   : > { %v2890_v33 = vsel %vm10586_vm12, %v7604_v38, %v2889_v24  ;;  %v2893_v27 = vrot.slane %v9367_v43, 5  ;;  %v4547_v30 = vld [vmem:[#allocation2 + $0x68] sm:$0xe]  ;;  %v2776_v54 = vld [vmem:[#allocation2 + $0x50] sm:$0xe]  ;;  %8467 = vmatpush3.bf16.msra.mxu0 %v10528_v19  ;;  %v7738_v42 = vcombine.low %v10633_v16, %v10625_v22  ;;  %v10642_v13 = vsel %vm10586_vm12, %v7711_v11, %v4667_v40 }
 0x278   : > { %8579 = vmatmul.mubr.bf16.vlgmr.msra.gmra.mrb[16].mxu1 %v7736_v34  ;;  %v7633_v53 = vcombine.low %v2886_v48, %v2890_v33  ;;  %v9368_v18 = vld [vmem:[#allocation2 + $0x3c] sm:$0x1]  ;;  %v2777_v57 = vld [vmem:[#allocation2 + $0x58] sm:$0xe]  ;;  %v9369_v51 = vld [vmem:[#allocation8 + $0xc8] sm:$0xff]   ;;  %v4672_v19 = vsel %vm10586_vm12, %v7712_v46, %v4671_v55  ;;  %v7714_v20 = vrot.slane %v4548_v62, 9 }
 0x279   : > { %v2897_v15 = vrot.slane %v9368_v18, 5  ;;  %8468 = vmatprep.subr.bf16.mxu0 %v9369_v51  ;;  %8611 = vmatpush3.bf16.msra.mxu1 %v10512_v7  ;;  %v2894_v34 = vsel %vm10586_vm12, %v7605_v58, %v2893_v27  ;;  %v4679_v9 = vrot.slane %v10464_v59, 5  ;;  %v4549_v45 = vld [vmem:[#allocation2 + $0x78] sm:$0xe]  ;;  %v4550_v63 = vld [vmem:[#allocation2 + $0x80] sm:$0xe] }
 0x27a   : > { %8582 = vmatprep.mubr.bf16.mxu1 %v7737_v5  ;;  %8612 = vmatprep.subr.bf16.mxu1 %v9253_v14  ;;  %v9254_v28 = vld [vmem:[#allocation8 + $0x190] sm:$0xff]   ;;  %v7713_v23 = vrot.slane %v4547_v30, 9  ;;  %v7607_v7 = vrot.slane %v2776_v54, 9  ;;  %v2778_v24 = vld [vmem:[#allocation2 + $0x60] sm:$0xe]  ;;  %v4675_v5 = vrot.slane %v10462_v41, 5  ;;  %v7739_v30 = vcombine.low %v10642_v13, %v4672_v19 }
 0x27b   : > { %8438 = vmatprep.mubr.bf16.mxu0 %v7633_v53  ;;  %v2898_v36 = vsel %vm10586_vm12, %v7606_v12, %v2897_v15  ;;  %v9370_v38 = vld [vmem:[#allocation2 + $0x54] sm:$0x1]  ;;  %v7608_v22 = vrot.slane %v2777_v57, 9  ;;  %v9371_v11 = vld [vmem:[#allocation2 + $0x5c] sm:$0x1]  ;;  %8469 = vmatpush3.bf16.msra.mxu0 %v9369_v51  ;;  %v10655_v33 = vsel %vm10586_vm12, %v7714_v20, %v4679_v9  ;;  %v7715_v55 = vrot.slane %v4549_v45, 9 }
 0x27c   : > { %v2901_v60 = vrot.slane %v9370_v38, 5  ;;  %v7634_v31 = vcombine.low %v2894_v34, %v2898_v36  ;;  %v2905_v40 = vrot.slane %v9371_v11, 5  ;;  %v2779_v59 = vld [vmem:[#allocation2 + $0x68] sm:$0xe]  ;;  %v4683_v58 = vrot.slane %v10469_v26, 5  ;;  %v9372_v16 = vld [vmem:[#allocation8 + $0xd0] sm:$0xff]  }
 0x27d   : > { %v4551_v62 = vld [vmem:[#allocation2 + $0x88] sm:$0xe]  ;;  %8470 = vmatprep.subr.bf16.mxu0 %v9372_v16  ;;  %8613 = vmatpush3.bf16.msra.mxu1 %v9253_v14  ;;  %v7716_v48 = vrot.slane %v4550_v63, 9  ;;  %v4687_v43 = vrot.slane %v10472_v49, 5  ;;  %v7609_v27 = vrot.slane %v2778_v24, 9  ;;  %v9255_v53 = vld [vmem:[#allocation8 + $0x198] sm:$0xff]   ;;  %v10666_v14 = vsel %vm10586_vm12, %v7713_v23, %v4675_v5 }
 0x27e   : > { %v2902_v46 = vsel %vm10586_vm12, %v7607_v7, %v2901_v60  ;;  %v2906_v41 = vsel %vm10586_vm12, %v7608_v22, %v2905_v40  ;;  %v4552_v12 = vld [vmem:[#allocation2 + $0x90] sm:$0xe]  ;;  %8614 = vmatprep.subr.bf16.mxu1 %v9254_v28  ;;  %8439 = vmatmul.mubr.bf16.gmra.mrb[36].mxu0 %v7634_v31  ;;  %v9373_v18 = vld [vmem:[#allocation2 + $0x64] sm:$0x1]  ;;  %v7610_v15 = vrot.slane %v2779_v59, 9  ;;  %v7717_v20 = vrot.slane %v4551_v62, 9 }
 0x27f   : > { %v7635_v54 = vcombine.low %v2902_v46, %v2906_v41  ;;  %v2909_v26 = vrot.slane %v9373_v18, 5  ;;  %v2780_v57 = vld [vmem:[#allocation2 + $0x70] sm:$0xe]  ;;  %v9374_v51 = vld [vmem:[#allocation2 + $0x6c] sm:$0x1]  ;;  %v4691_v49 = vrot.slane %v10479_v39, 5  ;;  %8471 = vmatpush3.bf16.msra.mxu0 %v9372_v16  ;;  %v7740_v13 = vcombine.low %v10666_v14, %v10655_v33 }
 0x280   : > { %v2913_v34 = vrot.slane %v9374_v51, 5  ;;  %v2781_v9 = vld [vmem:[#allocation2 + $0x78] sm:$0xe]  ;;  %8583 = vmatmul.mubr.bf16.gmra.mrb[20].mxu1 %v7738_v42  ;;  %v7718_v45 = vrot.slane %v4552_v12, 9  ;;  %v4695_v63 = vrot.slane %v10482_v0, 5  ;;  %v10676_v23 = vsel %vm10586_vm12, %v7715_v55, %v4683_v58  ;;  %v9256_v24 = vld [vmem:[#allocation8 + $0x1a0] sm:$0xff]  }
 0x281   : > { %8442 = vmatprep.mubr.bf16.mxu0 %v7635_v54  ;;  %v2910_v19 = vsel %vm10586_vm12, %v7609_v27, %v2909_v26  ;;  %v4553_v36 = vld [vmem:[#allocation2 + $0xa8] sm:$0xe]  ;;  %8586 = vmatprep.mubr.bf16.mxu1 %v7739_v30  ;;  %v4688_v39 = vsel %vm10586_vm12, %v7716_v48, %v4687_v43  ;;  %v7611_v42 = vrot.slane %v2780_v57, 9  ;;  %v9375_v7 = vld [vmem:[#allocation2 + $0x74] sm:$0x1]  ;;  %v10684_v0 = vsel %vm10586_vm12, %v7717_v20, %v4691_v49  ;;  %v9377_v59 = vld [vmem:[#allocation8 + $0xd8] sm:$0xff]  }
 0x282   : > { %8615 = vmatpush3.bf16.msra.mxu1 %v9254_v28  ;;  %v2917_v38 = vrot.slane %v9375_v7, 5  ;;  %v4554_v60 = vld [vmem:[#allocation2 + $0xb0] sm:$0xe]  ;;  %v2914_v31 = vsel %vm10586_vm12, %v7610_v15, %v2913_v34  ;;  %v7612_v28 = vrot.slane %v2781_v9, 9  ;;  %v9376_v5 = vld [vmem:[#allocation2 + $0x7c] sm:$0x1]  ;;  %8472 = vmatprep.subr.bf16.mxu0 %v9377_v59  ;;  %v10688_v46 = vsel %vm10586_vm12, %v7718_v45, %v4695_v63 }
 0x283   : > { %8616 = vmatprep.subr.bf16.mxu1 %v9255_v53  ;;  %v2921_v22 = vrot.slane %v9376_v5, 5  ;;  %v2782_v11 = vld [vmem:[#allocation2 + $0x80] sm:$0xe]  ;;  %v2783_v40 = vld [vmem:[#allocation2 + $0x88] sm:$0xe]  ;;  %v7636_v33 = vcombine.low %v2910_v19, %v2914_v31  ;;  %v7719_v55 = vrot.slane %v4553_v36, 9  ;;  %8473 = vmatpush3.bf16.msra.mxu0 %v9377_v59  ;;  %v7741_v57 = vcombine.low %v10676_v23, %v4688_v39 }
 0x284   : > { %v4699_v58 = vrot.slane %v10486_v6, 5  ;;  %v2918_v62 = vsel %vm10586_vm12, %v7611_v42, %v2917_v38  ;;  %v7720_v41 = vrot.slane %v4554_v60, 9  ;;  %v4703_v48 = vrot.slane %v10494_v61, 5  ;;  %v4555_v43 = vld [vmem:[#allocation2 + $0xb8] sm:$0xe]  ;;  %v9378_v12 = vld [vmem:[#allocation8 + $0xe0] sm:$0xff]  }
 0x285   : > { %v2922_v16 = vsel %vm10586_vm12, %v7612_v28, %v2921_v22  ;;  %v4556_v27 = vld [vmem:[#allocation2 + $0xc0] sm:$0xe]  ;;  %8474 = vmatprep.subr.bf16.mxu0 %v9378_v12  ;;  %v7613_v54 = vrot.slane %v2782_v11, 9  ;;  %v9379_v18 = vld [vmem:[#allocation2 + $0x84] sm:$0x1]  ;;  %v7614_v6 = vrot.slane %v2783_v40, 9  ;;  %v7742_v14 = vcombine.low %v10684_v0, %v10688_v46 }
 0x286   : > { %8617 = vmatpush3.bf16.msra.mxu1 %v9255_v53  ;;  %v7637_v30 = vcombine.low %v2918_v62, %v2922_v16  ;;  %v2925_v26 = vrot.slane %v9379_v18, 5  ;;  %v2784_v15 = vld [vmem:[#allocation2 + $0xa0] sm:$0xe]  ;;  %8443 = vmatmul.mubr.bf16.gmra.mrb[40].mxu0 %v7636_v33  ;;  %v10701_v61 = vsel %vm10586_vm12, %v7720_v41, %v4703_v48  ;;  %v9380_v51 = vld [vmem:[#allocation2 + $0x8c] sm:$0x1]  ;;  %v10705_v9 = vsel %vm10586_vm12, %v7719_v55, %v4699_v58  ;;  %v9258_v58 = vld [vmem:[#allocation8 + $0x1b0] sm:$0xff]  }
 0x287   : > { %8618 = vmatprep.subr.bf16.mxu1 %v9256_v24  ;;  %v2929_v34 = vrot.slane %v9380_v51, 5  ;;  %v2785_v53 = vld [vmem:[#allocation2 + $0xa8] sm:$0xe]  ;;  %v7721_v19 = vrot.slane %v4555_v43, 9  ;;  %v7722_v45 = vrot.slane %v4556_v27, 9  ;;  %v4711_v63 = vrot.slane %v10506_v2, 5  ;;  %8475 = vmatpush3.bf16.msra.mxu0 %v9378_v12 }
 0x288   : > { %v4557_v20 = vld [vmem:[#allocation2 + $0xc8] sm:$0xe]  ;;  %8446 = vmatprep.mubr.bf16.mxu0 %v7637_v30  ;;  %v4558_v36 = vld [vmem:[#allocation2 + $0xd0] sm:$0xe]  ;;  %8587 = vmatmul.mubr.bf16.gmra.mrb[24].mxu1 %v7740_v13  ;;  %v7743_v23 = vcombine.low %v10705_v9, %v10701_v61  ;;  %v4707_v39 = vrot.slane %v10502_v56, 5  ;;  %v7615_v42 = vrot.slane %v2784_v15, 9  ;;  %v2926_v28 = vsel %vm10586_vm12, %v7613_v54, %v2925_v26 }
 0x289   : > { %v9257_v49 = vld [vmem:[#allocation8 + $0x1a8] sm:$0xff]   ;;  %v9381_v7 = vld [vmem:[#allocation2 + $0xa4] sm:$0x1]  ;;  %v2786_v60 = vld [vmem:[#allocation2 + $0xb0] sm:$0xe]  ;;  %8590 = vmatprep.mubr.bf16.mxu1 %v7741_v57  ;;  %v2930_v2 = vsel %vm10586_vm12, %v7614_v6, %v2929_v34  ;;  %v7616_v13 = vrot.slane %v2785_v53, 9  ;;  %v10717_v56 = vsel %vm10586_vm12, %v7722_v45, %v4711_v63 }
 0x28a   : > { %v2933_v38 = vrot.slane %v9381_v7, 5  ;;  %v9382_v31 = vld [vmem:[#allocation8 + $0xe8] sm:$0xff]   ;;  %8619 = vmatpush3.bf16.msra.mxu1 %v9256_v24  ;;  %v2787_v11 = vld [vmem:[#allocation2 + $0xb8] sm:$0xe]  ;;  %v7723_v59 = vrot.slane %v4557_v20, 9  ;;  %v4715_v33 = vrot.slane %v10510_v21, 5  ;;  %v7638_v43 = vcombine.low %v2926_v28, %v2930_v2 }
 0x28b   : > { %8476 = vmatprep.subr.bf16.mxu0 %v9382_v31  ;;  %v9383_v5 = vld [vmem:[#allocation2 + $0xac] sm:$0x1]  ;;  %8620 = vmatprep.subr.bf16.mxu1 %v9257_v49  ;;  %v4559_v55 = vld [vmem:[#allocation2 + $0xd8] sm:$0xe]  ;;  %v7724_v62 = vrot.slane %v4558_v36, 9  ;;  %v4719_v16 = vrot.slane %v10521_v47, 5  ;;  %v10727_v27 = vsel %vm10586_vm12, %v7721_v19, %v4707_v39 }
 0x28c   : > { %v2937_v22 = vrot.slane %v9383_v5, 5  ;;  %v2934_v40 = vsel %vm10586_vm12, %v7615_v42, %v2933_v38  ;;  %v7617_v41 = vrot.slane %v2786_v60, 9  ;;  %v4560_v48 = vld [vmem:[#allocation2 + $0xe0] sm:$0xe]  ;;  %8477 = vmatpush3.bf16.msra.mxu0 %v9382_v31  ;;  %v9384_v30 = vld [vmem:[#allocation2 + $0xb4] sm:$0x1]  ;;  %v7744_v34 = vcombine.low %v10727_v27, %v10717_v56 }
 0x28d   : > { %v2941_v21 = vrot.slane %v9384_v30, 5  ;;  %v2788_v54 = vld [vmem:[#allocation2 + $0xc0] sm:$0xe]  ;;  %v9385_v18 = vld [vmem:[#allocation8 + $0xf0] sm:$0xff]   ;;  %v7618_v26 = vrot.slane %v2787_v11, 9  ;;  %v7725_v57 = vrot.slane %v4559_v55, 9  ;;  %v10734_v53 = vsel %vm10586_vm12, %v7723_v59, %v4715_v33 }
 0x28e   : > { %v2938_v24 = vsel %vm10586_vm12, %v7616_v13, %v2937_v22  ;;  %8478 = vmatprep.subr.bf16.mxu0 %v9385_v18  ;;  %v9386_v6 = vld [vmem:[#allocation2 + $0xbc] sm:$0x1]  ;;  %v4723_v47 = vrot.slane %v10526_v8, 5  ;;  %8621 = vmatpush3.bf16.msra.mxu1 %v9257_v49  ;;  %v2789_v51 = vld [vmem:[#allocation2 + $0xc8] sm:$0xe]  ;;  %v7726_v20 = vrot.slane %v4560_v48, 9  ;;  %v10739_v8 = vsel %vm10586_vm12, %v7724_v62, %v4719_v16 }
 0x28f   : > { %v7639_v12 = vcombine.low %v2934_v40, %v2938_v24  ;;  %v2945_v15 = vrot.slane %v9386_v6, 5  ;;  %8447 = vmatmul.mubr.bf16.gmra.mrb[44].mxu0 %v7638_v43  ;;  %v4727_v19 = vrot.slane %v10532_v17, 5  ;;  %v4561_v45 = vld [vmem:[#allocation2 + $0xf8] sm:$0xe]  ;;  %8622 = vmatprep.subr.bf16.mxu1 %v9258_v58  ;;  %v2942_v49 = vsel %vm10586_vm12, %v7617_v41, %v2941_v21  ;;  %v9387_v39 = vld [vmem:[#allocation2 + $0xc4] sm:$0x1] }
 0x290   : > { %v9259_v63 = vld [vmem:[#allocation8 + $0x1b8] sm:$0xff]   ;;  %v7619_v36 = vrot.slane %v2788_v54, 9  ;;  %v2949_v42 = vrot.slane %v9387_v39, 5  ;;  %v4562_v7 = vld [vmem:[#allocation2 + $0x100] sm:$0xe]  ;;  %8479 = vmatpush3.bf16.msra.mxu0 %v9385_v18  ;;  %8591 = vmatmul.mubr.bf16.gmra.mrb[28].mxu1 %v7742_v14  ;;  %v10748_v17 = vsel %vm10586_vm12, %v7725_v57, %v4723_v47  ;;  %v7620_v60 = vrot.slane %v2789_v51, 9 }
 0x291   : > { %8450 = vmatprep.mubr.bf16.mxu0 %v7639_v12  ;;  %v10752_v38 = vsel %vm10586_vm12, %v7726_v20, %v4727_v19  ;;  %v9388_v31 = vld [vmem:[#allocation2 + $0xcc] sm:$0x1]  ;;  %v2790_v2 = vld [vmem:[#allocation2 + $0xd0] sm:$0xe]  ;;  %v9389_v13 = vld [vmem:[#allocation8 + $0xf8] sm:$0xff]   ;;  %8594 = vmatprep.mubr.bf16.mxu1 %v7743_v23  ;;  %v2946_v0 = vsel %vm10586_vm12, %v7618_v26, %v2945_v15  ;;  %v7727_v14 = vrot.slane %v4561_v45, 9  ;;  %v7745_v33 = vcombine.low %v10734_v53, %v10739_v8 }
 0x292   : > { %v2953_v28 = vrot.slane %v9388_v31, 5  ;;  %8480 = vmatprep.subr.bf16.mxu0 %v9389_v13  ;;  %v7746_v46 = vcombine.low %v10748_v17, %v10752_v38  ;;  %v4731_v5 = vrot.slane %v10536_v52, 5  ;;  %v4563_v22 = vld [vmem:[#allocation2 + $0x108] sm:$0xe]  ;;  %8623 = vmatpush3.bf16.msra.mxu1 %v9258_v58  ;;  %v2950_v11 = vsel %vm10586_vm12, %v7619_v36, %v2949_v42  ;;  %v4564_v9 = vld [vmem:[#allocation2 + $0x110] sm:$0xe] }
 0x293   : > { %v7728_v59 = vrot.slane %v4562_v7, 9  ;;  %v4735_v61 = vrot.slane %v10542_v3, 5  ;;  %8624 = vmatprep.subr.bf16.mxu1 %v9259_v63  ;;  %v10767_v23 = vld [vmem:[#allocation8 + $0x1c0] sm:$0xff]   ;;  %v7640_v55 = vcombine.low %v2942_v49, %v2946_v0  ;;  %v2791_v24 = vld [vmem:[#allocation2 + $0xd8] sm:$0xe]  ;;  %v7621_v58 = vrot.slane %v2790_v2, 9 }
 0x294   : > { %v2954_v40 = vsel %vm10586_vm12, %v7620_v60, %v2953_v28  ;;  %v2792_v62 = vld [vmem:[#allocation2 + $0xf0] sm:$0xe]  ;;  %8481 = vmatpush3.bf16.msra.mxu0 %v9389_v13  ;;  %v10773_v16 = vsel %vm10586_vm12, %v7727_v14, %v4731_v5  ;;  %v7729_v41 = vrot.slane %v4563_v22, 9  ;;  %v4739_v48 = vrot.slane %v10549_v32, 5  ;;  %v2793_v43 = vld [vmem:[#allocation2 + $0xf8] sm:$0xe] }
 0x295   : > { %v7641_v52 = vcombine.low %v2950_v11, %v2954_v40  ;;  %v10777_v3 = vsel %vm10586_vm12, %v7728_v59, %v4735_v61  ;;  %v9390_v30 = vld [vmem:[#allocation2 + $0xd4] sm:$0x1]  ;;  %v7730_v54 = vrot.slane %v4564_v9, 9  ;;  %v4743_v18 = vrot.slane %v10552_v44, 5  ;;  %v4565_v26 = vld [vmem:[#allocation2 + $0x118] sm:$0xe] }
 0x296   : > { %v7747_v12 = vcombine.low %v10773_v16, %v10777_v3  ;;  %v2957_v21 = vrot.slane %v9390_v30, 5  ;;  %8625 = vmatpush3.bf16.msra.mxu1 %v9259_v63  ;;  %v7622_v6 = vrot.slane %v2791_v24, 9  ;;  %v9391_v15 = vld [vmem:[#allocation2 + $0xdc] sm:$0x1]  ;;  %v7623_v47 = vrot.slane %v2792_v62, 9 }
 0x297   : > { %8451 = vmatmul.mubr.bf16.gmra.mrb[48].mxu0 %v7640_v55  ;;  %v2961_v57 = vrot.slane %v9391_v15, 5  ;;  %v9392_v51 = vld [vmem:[#allocation2 + $0xf4] sm:$0x1]  ;;  %v4566_v20 = vld [vmem:[#allocation2 + $0x120] sm:$0xe]  ;;  %8658 = vmatprep.subr.bf16.mxu1 %v10767_v23  ;;  %v10786_v32 = vsel %vm10586_vm12, %v7729_v41, %v4739_v48  ;;  %v10790_v44 = vsel %vm10586_vm12, %v7730_v54, %v4743_v18  ;;  %v7624_v19 = vrot.slane %v2793_v43, 9 }
 0x298   : > { %v2965_v53 = vrot.slane %v9392_v51, 5  ;;  %8454 = vmatprep.mubr.bf16.mxu0 %v7641_v52  ;;  %v9393_v45 = vld [vmem:[#allocation2 + $0xfc] sm:$0x1]  ;;  %8595 = vmatmul.mubr.bf16.gmra.mrb[0].mxu1 %v7744_v34  ;;  %v7748_v8 = vcombine.low %v10786_v32, %v10790_v44  ;;  %v7731_v49 = vrot.slane %v4565_v26, 9  ;;  %v4747_v36 = vrot.slane %v10559_v10, 5 }
 0x299   : > { %v2969_v63 = vrot.slane %v9393_v45, 5  ;;  %v4567_v39 = vld [vmem:[#allocation2 + $0x128] sm:$0xe]  ;;  %8598 = vmatprep.mubr.bf16.mxu1 %v7745_v33  ;;  %v2958_v42 = vsel %vm10586_vm12, %v7621_v58, %v2957_v21  ;;  %v7732_v7 = vrot.slane %v4566_v20, 9  ;;  %v4751_v60 = vrot.slane %v10562_v50, 5 }
 0x29a   : > { %v4568_v31 = vld [vmem:[#allocation2 + $0x130] sm:$0xe]  ;;  %v2962_v28 = vsel %vm10586_vm12, %v7622_v6, %v2961_v57  ;;  %v2966_v56 = vsel %vm10586_vm12, %v7623_v47, %v2965_v53  ;;  %v2794_v34 = vld [vmem:[#allocation2 + $0x100] sm:$0xe]  ;;  %v4748_v10 = vsel %vm10586_vm12, %v7731_v49, %v4747_v36  ;;  %v7733_v13 = vrot.slane %v4567_v39, 9 }
 0x29b   : > { %v2970_v27 = vsel %vm10586_vm12, %v7624_v19, %v2969_v63  ;;  %v4752_v2 = vsel %vm10586_vm12, %v7732_v7, %v4751_v60  ;;  %v4755_v50 = vrot.slane %v10569_v35, 5  ;;  %v2797_v0 = vld [vmem:[#allocation2 + $0x118] sm:$0xe]  ;;  %v7642_v14 = vcombine.low %v2958_v42, %v2962_v28  ;;  %v2795_v22 = vld [vmem:[#allocation2 + $0x108] sm:$0xe] }
 0x29c   : > { %v7749_v5 = vcombine.low %v4748_v10, %v4752_v2  ;;  %v7734_v11 = vrot.slane %v4568_v31, 9  ;;  %v4759_v40 = vrot.slane %v10572_v1, 5  ;;  %v7643_v59 = vcombine.low %v2966_v56, %v2970_v27  ;;  %v9394_v9 = vld [vmem:[#allocation2 + $0x104] sm:$0x1]  ;;  %v2796_v55 = vld [vmem:[#allocation2 + $0x110] sm:$0xe] }
 0x29d   : > { %v7625_v61 = vrot.slane %v2794_v34, 9  ;;  %v2973_v33 = vrot.slane %v9394_v9, 5  ;;  %v784_v52 = vld [vmem:[#allocation2 + $0x48] sm:$0x1]  ;;  %v4756_v24 = vsel %vm10586_vm12, %v7733_v13, %v4755_v50  ;;  %v7628_v58 = vrot.slane %v2797_v0, 9  ;;  %v9270_v2 = vld [vmem:[#allocation8 + $0x1d0] sm:$0xff]  }
 0x29e   : > { %v4760_v35 = vsel %vm10586_vm12, %v7734_v11, %v4759_v40  ;;  %v9395_v62 = vld [vmem:[#allocation2 + $0x11c] sm:$0x1]  ;;  %v814_v48 = vld [vmem:[#allocation2 + $0x98] sm:$0x1]  ;;  %v844_v43 = vld [vmem:[#allocation2 + $0xe8] sm:$0x1] }
 0x29f   : > { %8455 = vmatmul.mubr.bf16.gmra.mrb[52].mxu0 %v7642_v14  ;;  %v2985_v41 = vrot.slane %v9395_v62, 5  ;;  %v7626_v1 = vrot.slane %v2795_v22, 9  ;;  %v9396_v30 = vld [vmem:[#allocation2 + $0x10c] sm:$0x1]  ;;  %v7750_v54 = vcombine.low %v4756_v24, %v4760_v35  ;;  %v874_v18 = vld [vmem:[#allocation2 + $0x138] sm:$0x1]  ;;  %v2974_v47 = vsel %vm10586_vm12, %v7625_v61, %v2973_v33 }
 0x2a0   : > { %8458 = vmatprep.mubr.bf16.mxu0 %v7643_v59  ;;  %v2977_v21 = vrot.slane %v9396_v30, 5  ;;  %8599 = vmatmul.mubr.bf16.gmra.mrb[4].mxu1 %v7746_v46  ;;  %v7627_v26 = vrot.slane %v2796_v55, 9  ;;  %v9397_v6 = vld [vmem:[#allocation2 + $0x114] sm:$0x1]  ;;  %v785_v57 = vsel %vm9902_vm3, 0, %v784_v52  ;;  %v815_v51 = vsel %vm9902_vm3, 0, %v814_v48 }
 0x2a1   : > { %v2981_v15 = vrot.slane %v9397_v6, 5  ;;  %8602 = vmatprep.mubr.bf16.mxu1 %v7747_v12  ;;  %786 = vst [vmem:[#allocation2 + $0x48] sm:$0x1] %v785_v57  ;;  %v845_v17 = vsel %vm9902_vm3, 0, %v844_v43  ;;  %v2986_v38 = vsel %vm10586_vm12, %v7628_v58, %v2985_v41  ;;  %v2798_v46 = vld [vmem:[#allocation2 + $0x120] sm:$0xe] }
 0x2a2   : > { %816 = vst [vmem:[#allocation2 + $0x98] sm:$0x1] %v815_v51  ;;  %846 = vst [vmem:[#allocation2 + $0xe8] sm:$0x1] %v845_v17  ;;  %v875_v16 = vsel %vm9902_vm3, 0, %v874_v18  ;;  %v2978_v3 = vsel %vm10586_vm12, %v7626_v1, %v2977_v21  ;;  %v7629_v45 = vrot.slane %v2798_v46, 9 }
 0x2a3   : > { %876 = vst [vmem:[#allocation2 + $0x138] sm:$0x1] %v875_v16  ;;  %v7644_v12 = vcombine.low %v2974_v47, %v2978_v3  ;;  %v2982_v53 = vsel %vm10586_vm12, %v7627_v26, %v2981_v15  ;;  %v2799_v20 = vld [vmem:[#allocation2 + $0x128] sm:$0xe]  ;;  %v9398_v63 = vld [vmem:[#allocation2 + $0x124] sm:$0x1] }
 0x2a4   : > { %v7645_v19 = vcombine.low %v2982_v53, %v2986_v38  ;;  %v2989_v49 = vrot.slane %v9398_v63, 5  ;;  %v7630_v36 = vrot.slane %v2799_v20, 9  ;;  %v9399_v39 = vld [vmem:[#allocation2 + $0x12c] sm:$0x1]  ;;  %v9263_v31 = vld [vmem:[#allocation2 + $0x8] ss:$8 sps:$4 sm:$0xff]  }
 0x2a5   : > { %v2993_v42 = vrot.slane %v9399_v39, 5  ;;  %v906_v28 = vld [vmem:[#allocation2 + $0x4c] sm:$0x1]  ;;  %v9260_v56 = vld [vmem:[#allocation2 + $0x10] ss:$8 sps:$4 sm:$0xff]   ;;  %v9280_v9 = vld [vmem:[#allocation8 + $0x1e0] sm:$0xff]  }
 0x2a6   : > { %v2990_v25 = vsel %vm10586_vm12, %v7629_v45, %v2989_v49  ;;  %v907_v27 = vsel %vm9909_vm4, 0, %v906_v28  ;;  %v9266_v32 = vld [vmem:[#allocation2 + $0x18] ss:$8 sps:$4 sm:$0xff]   ;;  %v9268_v44 = vld [vmem:[#allocation2 + $0x28] ss:$8 sps:$4 sm:$0xff]  }
 0x2a7   : > { %8459 = vmatmul.mubr.bf16.gmra.mrb[56].mxu0 %v7644_v12  ;;  %v2994_v7 = vsel %vm10586_vm12, %v7630_v36, %v2993_v42  ;;  %908 = vst [vmem:[#allocation2 + $0x4c] sm:$0x1] %v907_v27  ;;  %v9265_v34 = vld [vmem:[#allocation8 + $0x1c8] sm:$0xff]   ;;  %v9264_v10 = vld [vmem:[#allocation2 + $0x30] ss:$8 sps:$4 sm:$0xff]  }
 0x2a8   : > { %8462 = vmatprep.mubr.bf16.mxu0 %v7645_v19  ;;  %8603 = vmatmul.mubr.bf16.gmra.mrb[8].mxu1 %v7748_v8  ;;  %v7646_v60 = vcombine.low %v2990_v25, %v2994_v7  ;;  %v9262_v8 = vld [vmem:[#allocation2 + $0x20] ss:$8 sps:$4 sm:$0xff]   ;;  %v9275_v14 = vld [vmem:[#allocation8 + $0x1d8] sm:$0xff]   ;;  %v5471_v40 = vld [vmem:[#allocation2 + $0x14] sm:$0x1] }
 0x2a9   : > { %8606 = vmatprep.mubr.bf16.mxu1 %v7749_v5  ;;  %v9271_v13 = vld [vmem:[#allocation2 + $0x38] ss:$8 sps:$4 sm:$0xff]   ;;  %v5470_v5 = vld [vmem:[#allocation2 + $0x10] sm:$0xf]  ;;  %v936_v11 = vld [vmem:[#allocation2 + $0x9c] sm:$0x1] }
 0x2aa   : > { %v9273_v50 = vld [vmem:[#allocation2 + $0x58] ss:$8 sps:$4 sm:$0xff]   ;;  %v5535_v59 = vshrl.u32 %v5470_v5, 16  ;;  %v9276_v61 = vld [vmem:[#allocation2 + $0x68] ss:$8 sps:$4 sm:$0xff]   ;;  %v937_v24 = vsel %vm9909_vm4, 0, %v936_v11 }
 0x2ab   : > { %v9267_v0 = vld [vmem:[#allocation2 + $0x40] ss:$8 sps:$4 sm:$0xff]   ;;  %v5472_v33 = vld [vmem:[#allocation2 + $0x18] sm:$0xf]  ;;  %v5544_v62 = vshll.u32 %v5471_v40, 16  ;;  %v9287_v3 = vld [vmem:[#allocation8 + $0x1f0] sm:$0xff]  }
 0x2ac   : > { %v9269_v22 = vld [vmem:[#allocation2 + $0x60] ss:$8 sps:$4 sm:$0xff]   ;;  %v9272_v35 = vld [vmem:[#allocation2 + $0x70] ss:$8 sps:$4 sm:$0xff]   ;;  %938 = vst [vmem:[#allocation2 + $0x9c] sm:$0x1] %v937_v24 }
 0x2ad   : > { %v5474_v55 = vld [vmem:[#allocation2 + $0x20] sm:$0xf]  ;;  %v5476_v52 = vld [vmem:[#allocation2 + $0x28] sm:$0xf]  ;;  %v5478_v41 = vld [vmem:[#allocation2 + $0x30] sm:$0xf] }
 0x2ae   : > { %v9278_v58 = vld [vmem:[#allocation2 + $0x78] ss:$8 sps:$4 sm:$0xff]   ;;  %v10851_v48 = vld [vmem:[#allocation2 + $0x1c] sm:$0x1]  ;;  %v5537_v43 = vrot.slane %v5535_v59, 4  ;;  %v5549_v30 = vshrl.u32 %v5472_v33, 16 }
 0x2af   : > { %8463 = vmatmul.mubr.bf16.gmra.mrb[60].mxu0 %v7646_v60  ;;  %v5552_v21 = vshll.u32 %v5472_v33, 16  ;;  %v5563_v18 = vshrl.u32 %v5474_v55, 16  ;;  %v5566_v26 = vshll.u32 %v5474_v55, 16  ;;  %v5577_v6 = vshrl.u32 %v5476_v52, 16  ;;  %v9274_v57 = vld [vmem:[#allocation2 + $0x80] ss:$8 sps:$4 sm:$0xff]  }
 0x2b0   : > { %8482 = vmatprep.mubr.bf16.mxu0 %v9263_v31  ;;  %8607 = vmatmul.mubr.bf16.gmra.mrb[12].mxu1 %v7750_v54  ;;  %v9284_v54 = vld [vmem:[#allocation8 + $0x1e8] sm:$0xff]   ;;  %v5580_v15 = vshll.u32 %v5476_v52, 16  ;;  %v5591_v47 = vshrl.u32 %v5478_v41, 16  ;;  %v5594_v51 = vshll.u32 %v5478_v41, 16  ;;  %v5558_v17 = vshll.u32 %v10851_v48, 16 }
 0x2b1   : > { %8626 = vmatprep.mubr.bf16.mxu1 %v9260_v56  ;;  %v10854_v38 = vld [vmem:[#allocation2 + $0x24] sm:$0x1]  ;;  %v5480_v46 = vld [vmem:[#allocation2 + $0x38] sm:$0xf]  ;;  %v5482_v16 = vld [vmem:[#allocation2 + $0x40] sm:$0xf] }
 0x2b2   : > { %v10856_v53 = vrot.slane %v5544_v62, 5  ;;  %v5551_v20 = vrot.slane %v5549_v30, 4  ;;  %v5554_v19 = vrot.slane %v5552_v21, 5  ;;  %v5477_v45 = vld [vmem:[#allocation2 + $0x2c] sm:$0x1]  ;;  %v5565_v49 = vrot.slane %v5563_v18, 4 }
 0x2b3   : > { %v5484_v63 = vld [vmem:[#allocation2 + $0x48] sm:$0xf]  ;;  %v5568_v36 = vrot.slane %v5566_v26, 5  ;;  %v5579_v39 = vrot.slane %v5577_v6, 4  ;;  %v5582_v42 = vrot.slane %v5580_v15, 5  ;;  %v5593_v60 = vrot.slane %v5591_v47, 4 }
 0x2b4   : > { %v5486_v25 = vld [vmem:[#allocation2 + $0x60] sm:$0xf]  ;;  %v5479_v7 = vld [vmem:[#allocation2 + $0x34] sm:$0x1]  ;;  %v5596_v31 = vrot.slane %v5594_v51, 5  ;;  %v5605_v28 = vshrl.u32 %v5480_v46, 16 }
 0x2b5   : > { %v5608_v56 = vshll.u32 %v5480_v46, 16  ;;  %v9281_v27 = vld [vmem:[#allocation2 + $0x88] ss:$8 sps:$4 sm:$0xff]   ;;  %v5569_v11 = vor.u32 %v5568_v36, %v5565_v49  ;;  %v5586_v40 = vshll.u32 %v5477_v45, 16  ;;  %v5600_v59 = vshll.u32 %v5479_v7, 16  ;;  %v10869_v26 = vld [vmem:[#allocation8 + $0x200] sm:$0xff]  }
 0x2b6   : > { %v5607_v33 = vrot.slane %v5605_v28, 4  ;;  %v10861_v62 = vld [vmem:[#allocation2 + $0x3c] sm:$0x1]  ;;  %v5560_v18 = vrot.slane %v5558_v17, 5  ;;  %v5490_v15 = vld [vmem:[#allocation2 + $0x70] sm:$0xf] }
 0x2b7   : > { %8483 = vmatmul.mubr.bf16.vlgmr.msra.gmra.mrb[32].mxu0 %v9266_v32  ;;  %v5619_v32 = vshrl.u32 %v5482_v16, 16  ;;  %v5610_v55 = vrot.slane %v5608_v56, 5  ;;  %v5588_v51 = vrot.slane %v5586_v40, 5  ;;  %v966_v46 = vld [vmem:[#allocation2 + $0xec] sm:$0x1]  ;;  %v5678_v7 = vshll.u32 %v5490_v15, 16 }
 0x2b8   : > { %8486 = vmatprep.mubr.bf16.mxu0 %v9268_v44  ;;  %8627 = vmatmul.mubr.bf16.vlgmr.msra.gmra.mrb[16].mxu1 %v9262_v8  ;;  %v5622_v44 = vshll.u32 %v5482_v16, 16  ;;  %v5633_v8 = vshrl.u32 %v5484_v63, 16  ;;  %v9282_v16 = vld [vmem:[#allocation2 + $0xc0] ss:$8 sps:$4 sm:$0xff]   ;;  %v10874_v48 = vld [vmem:[#allocation2 + $0x4c] sm:$0x1] }
 0x2b9   : > { %8659 = vmatpush3.bf16.msra.mxu1 %v10767_v23  ;;  %8630 = vmatprep.mubr.bf16.mxu1 %v9264_v10  ;;  %v5538_v23 = vshll.u32 %v5470_v5, 16  ;;  %v5555_v10 = vor.u32 %v5554_v19, %v5551_v20  ;;  %v9290_v5 = vld [vmem:[#allocation8 + $0x1f8] sm:$0xff]   ;;  %v5621_v52 = vrot.slane %v5619_v32, 4  ;;  %v5614_v20 = vshll.u32 %v10861_v62, 16  ;;  %v10872_v19 = vld [vmem:[#allocation2 + $0x44] sm:$0x1] }
 0x2ba   : > { %8660 = vmatprep.subr.bf16.mxu1 %v9265_v34  ;;  %v5624_v24 = vrot.slane %v5622_v44, 5  ;;  %v10876_v45 = vld [vmem:[#allocation2 + $0x64] sm:$0x1]  ;;  %v5628_v32 = vshll.u32 %v10872_v19, 16  ;;  %v5492_v44 = vld [vmem:[#allocation2 + $0x78] sm:$0xf] }
 0x2bb   : > { %v5540_v1 = vrot.slane %v5538_v23, 5  ;;  %v9279_v23 = vld [vmem:[#allocation2 + $0xb0] ss:$8 sps:$4 sm:$0xff]   ;;  %v5680_v40 = vrot.slane %v5678_v7, 5 }
 0x2bd   : > { %8661 = vmatpush3.bf16.msra.mxu1 %v9265_v34  ;;  %v5541_v12 = vor.u32 %v5540_v1, %v5537_v43  ;;  %v5636_v34 = vshll.u32 %v5484_v63, 16 }
 0x2be   : > { %8662 = vmatprep.subr.bf16.mxu1 %v9270_v2 }
 0x2bf   : > { %8487 = vmatmul.mubr.bf16.gmra.mrb[36].mxu0 %v9271_v13  ;;  %v5488_v13 = vld [vmem:[#allocation2 + $0x68] sm:$0xf] }
 0x2c0   : > { %8490 = vmatprep.mubr.bf16.mxu0 %v9273_v50  ;;  %8631 = vmatmul.mubr.bf16.gmra.mrb[20].mxu1 %v9267_v0  ;;  %v5647_v50 = vshrl.u32 %v5486_v25, 16  ;;  %v5650_v0 = vshll.u32 %v5486_v25, 16  ;;  %v5661_v1 = vshrl.u32 %v5488_v13, 16  ;;  %v5664_v30 = vshll.u32 %v5488_v13, 16 }
 0x2c1   : > { %8634 = vmatprep.mubr.bf16.mxu1 %v9269_v22  ;;  %8663 = vmatpush3.bf16.msra.mxu1 %v9270_v2  ;;  %v5572_v2 = vshll.u32 %v10854_v38, 16  ;;  %v10859_v22 = vrot.slane %v5541_v12, 4  ;;  %v5611_v38 = vor.u32 %v5610_v55, %v5607_v33  ;;  %v5602_v12 = vrot.slane %v5600_v59, 5  ;;  %v10899_v33 = vld [vmem:[#allocation2 + $0x7c] sm:$0x1] }
 0x2c2   : > { %8664 = vmatprep.subr.bf16.mxu1 %v9275_v14  ;;  %v5649_v41 = vrot.slane %v5647_v50, 4  ;;  %v5652_v43 = vrot.slane %v5650_v0, 5  ;;  %v5663_v49 = vrot.slane %v5661_v1, 4  ;;  %v5666_v36 = vrot.slane %v5664_v30, 5  ;;  %v9286_v1 = vld [vmem:[#allocation2 + $0x100] ss:$8 sps:$4 sm:$0xff]  }
 0x2c3   : > { %v5547_v21 = vsel %vm10076_vm7, %v10859_v22, %v10856_v53  ;;  %v5574_v6 = vrot.slane %v5572_v2, 5  ;;  %v5625_v53 = vor.u32 %v5624_v24, %v5621_v52  ;;  %v5675_v25 = vshrl.u32 %v5490_v15, 16  ;;  %v10893_v22 = vld [vmem:[#allocation2 + $0x74] sm:$0x1]  ;;  %v5498_v15 = vld [vmem:[#allocation2 + $0x90] sm:$0xf] }
 0x2c4   : > { %v5653_v63 = vor.u32 %v5652_v43, %v5649_v41  ;;  %v5656_v2 = vshll.u32 %v10876_v45, 16  ;;  %v5667_v0 = vor.u32 %v5666_v36, %v5663_v49  ;;  %v5689_v59 = vshrl.u32 %v5492_v44, 16  ;;  %v5494_v41 = vld [vmem:[#allocation2 + $0x80] sm:$0xf]  ;;  %v5496_v43 = vld [vmem:[#allocation2 + $0x88] sm:$0xf] }
 0x2c5   : > { %8665 = vmatpush3.bf16.msra.mxu1 %v9275_v14  ;;  %v9277_v14 = vld [vmem:[#allocation2 + $0x90] ss:$8 sps:$4 sm:$0xff]   ;;  %v5692_v55 = vshll.u32 %v5492_v44, 16  ;;  %v5731_v49 = vshrl.u32 %v5498_v15, 16  ;;  %v5734_v36 = vshll.u32 %v5498_v15, 16 }
 0x2c6   : > { %8666 = vmatprep.subr.bf16.mxu1 %v9280_v9  ;;  %v5654_v50 = vrot.slane %v5653_v63, 4  ;;  %v5720_v63 = vshll.u32 %v5496_v43, 16  ;;  %v5502_v44 = vld [vmem:[#allocation2 + $0xb0] sm:$0xf] }
 0x2c7   : > { %8491 = vmatmul.mubr.bf16.gmra.mrb[40].mxu0 %v9276_v61  ;;  %v5583_v61 = vor.u32 %v5582_v42, %v5579_v39  ;;  %v5642_v39 = vshll.u32 %v10874_v48, 16  ;;  %v10880_v42 = vld [vmem:[#allocation2 + $0x6c] sm:$0x1] }
 0x2c8   : > { %8494 = vmatprep.mubr.bf16.mxu0 %v9278_v58  ;;  %8635 = vmatmul.mubr.bf16.gmra.mrb[24].mxu1 %v9272_v35  ;;  %v5635_v35 = vrot.slane %v5633_v8, 4  ;;  %v5638_v58 = vrot.slane %v5636_v34, 5  ;;  %v5616_v34 = vrot.slane %v5614_v20, 5  ;;  %v5703_v20 = vshrl.u32 %v5494_v41, 16 }
 0x2c9   : > { %8638 = vmatprep.mubr.bf16.mxu1 %v9274_v57  ;;  %8667 = vmatpush3.bf16.msra.mxu1 %v9280_v9  ;;  %v5597_v9 = vor.u32 %v5596_v31, %v5593_v60  ;;  %v5570_v57 = vrot.slane %v5569_v11, 4  ;;  %v5584_v47 = vrot.slane %v5583_v61, 4  ;;  %v967_v60 = vsel %vm9909_vm4, 0, %v966_v46  ;;  %v9283_v31 = vld [vmem:[#allocation2 + $0xd0] ss:$8 sps:$4 sm:$0xff]  }
 0x2ca   : > { %8668 = vmatprep.subr.bf16.mxu1 %v9284_v54  ;;  %v5639_v17 = vor.u32 %v5638_v58, %v5635_v35  ;;  %968 = vst [vmem:[#allocation2 + $0xec] sm:$0x1] %v967_v60  ;;  %v5677_v11 = vrot.slane %v5675_v25, 4  ;;  %v5658_v58 = vrot.slane %v5656_v2, 5  ;;  %v5500_v46 = vld [vmem:[#allocation2 + $0x98] sm:$0xf] }
 0x2cb   : > { %v5589_v56 = vsel %vm10076_vm7, %v5584_v47, %v5588_v51  ;;  %v5745_v7 = vshrl.u32 %v5500_v46, 16  ;;  %v5748_v60 = vshll.u32 %v5500_v46, 16 }
 0x2cc   : > { %v5640_v13 = vrot.slane %v5639_v17, 4  ;;  %v5659_v47 = vsel %vm10076_vm7, %v5654_v50, %v5658_v58  ;;  %v5681_v51 = vor.u32 %v5680_v40, %v5677_v11  ;;  %v5717_v17 = vshrl.u32 %v5496_v43, 16  ;;  %v9288_v50 = vld [vmem:[#allocation2 + $0x110] ss:$8 sps:$4 sm:$0xff]   ;;  %v5508_v58 = vld [vmem:[#allocation2 + $0xc8] sm:$0xf] }
 0x2cd   : > { %8669 = vmatpush3.bf16.msra.mxu1 %v9284_v54  ;;  %v5556_v54 = vrot.slane %v5555_v10, 4  ;;  %v5626_v10 = vrot.slane %v5625_v53, 4  ;;  %v5706_v53 = vshll.u32 %v5494_v41, 16  ;;  %v5733_v11 = vrot.slane %v5731_v49, 4 }
 0x2ce   : > { %8670 = vmatprep.subr.bf16.mxu1 %v9287_v3  ;;  %v5736_v40 = vrot.slane %v5734_v36, 5  ;;  %v5801_v46 = vshrl.u32 %v5508_v58, 16  ;;  %v10951_v36 = vld [vmem:[#allocation2 + $0xbc] sm:$0x1] }
 0x2cf   : > { %8495 = vmatmul.mubr.bf16.gmra.mrb[44].mxu0 %v9281_v27  ;;  %v5561_v28 = vsel %vm10076_vm7, %v5556_v54, %v5560_v18  ;;  %v5612_v27 = vrot.slane %v5611_v38, 4  ;;  %v5668_v54 = vrot.slane %v5667_v0, 4  ;;  %v5691_v38 = vrot.slane %v5689_v59, 4  ;;  %v9289_v59 = vld [vmem:[#allocation2 + $0x120] ss:$8 sps:$4 sm:$0xff]  }
 0x2d0   : > { %8639 = vmatmul.mubr.bf16.gmra.mrb[28].mxu1 %v9277_v14  ;;  %v5670_v14 = vshll.u32 %v10880_v42, 16  ;;  %v10901_v52 = vcombine.low %v5547_v21, %v5561_v28  ;;  %v5708_v2 = vrot.slane %v5706_v53, 5  ;;  %v5719_v0 = vrot.slane %v5717_v17, 4 }
 0x2d1   : > { %8642 = vmatprep.mubr.bf16.mxu1 %v9279_v23  ;;  %8671 = vmatpush3.bf16.msra.mxu1 %v9287_v3  ;;  %v5598_v3 = vrot.slane %v5597_v9, 4  ;;  %v5575_v23 = vsel %vm10076_vm7, %v5570_v57, %v5574_v6  ;;  %v5617_v61 = vsel %vm10076_vm7, %v5612_v27, %v5616_v34  ;;  %v5630_v9 = vrot.slane %v5628_v32, 5  ;;  %v9285_v57 = vld [vmem:[#allocation2 + $0xe0] ss:$8 sps:$4 sm:$0xff]   ;;  %v10927_v27 = vld [vmem:[#allocation2 + $0x8c] sm:$0x1] }
 0x2d2   : > { %8672 = vmatprep.subr.bf16.mxu1 %v9290_v5  ;;  %v10903_v24 = vcombine.low %v5575_v23, %v5589_v56  ;;  %v5672_v18 = vrot.slane %v5670_v14, 5  ;;  %v5684_v6 = vshll.u32 %v10893_v22, 16  ;;  %v10925_v56 = vrot.slane %v5681_v51, 4 }
 0x2d3   : > { %v5603_v8 = vsel %vm10076_vm7, %v5598_v3, %v5602_v12  ;;  %v5631_v30 = vsel %vm10076_vm7, %v5626_v10, %v5630_v9  ;;  %v5698_v3 = vshll.u32 %v10899_v33, 16  ;;  %v10915_v12 = vld [vmem:[#allocation2 + $0x84] sm:$0x1]  ;;  %v5705_v10 = vrot.slane %v5703_v20, 4 }
 0x2d4   : > { %v10905_v35 = vcombine.low %v5603_v8, %v5617_v61  ;;  %v10919_v25 = vrot.slane %v5684_v6, 5  ;;  %v5712_v32 = vshll.u32 %v10915_v12, 16  ;;  %v5722_v14 = vrot.slane %v5720_v63, 5 }
 0x2d5   : > { %8673 = vmatpush3.bf16.msra.mxu1 %v9290_v5  ;;  %v5644_v5 = vrot.slane %v5642_v39, 5  ;;  %v5673_v39 = vsel %vm10076_vm7, %v5668_v54, %v5672_v18  ;;  %v10930_v34 = vrot.slane %v5698_v3, 5  ;;  %v5747_v23 = vrot.slane %v5745_v7, 4  ;;  %v996_v54 = vld [vmem:[#allocation2 + $0x13c] sm:$0x1] }
 0x2d6   : > { %8706 = vmatprep.subr.bf16.mxu1 %v10869_v26  ;;  %v10923_v28 = vcombine.low %v5659_v47, %v5673_v39  ;;  %v5750_v61 = vrot.slane %v5748_v60, 5  ;;  %v5759_v9 = vshrl.u32 %v5502_v44, 16  ;;  %v5687_v41 = vsel %vm10076_vm7, %v10925_v56, %v10919_v25  ;;  %v10946_v3 = vld [vmem:[#allocation2 + $0x9c] sm:$0x1]  ;;  %v6324_v25 = vld [vmem:[#allocation2 + $0xd0] sm:$0xe] }
 0x2d7   : > { %v5645_v21 = vsel %vm10076_vm7, %v5640_v13, %v5644_v5  ;;  %v5504_v13 = vld [vmem:[#allocation2 + $0xb8] sm:$0xf]  ;;  %v10932_v5 = vld [vmem:[#allocation2 + $0x94] sm:$0x1]  ;;  %v10938_v43 = vrot.slane %v5712_v32, 5  ;;  %v5709_v6 = vor.u32 %v5708_v2, %v5705_v10  ;;  %v5726_v15 = vshll.u32 %v10927_v27, 16 }
 0x2d8   : > { %8643 = vmatmul.mubr.bf16.gmra.mrb[0].mxu1 %v9282_v16  ;;  %v5694_v16 = vrot.slane %v5692_v55, 5  ;;  %v5762_v55 = vshll.u32 %v5502_v44, 16  ;;  %v5723_v47 = vor.u32 %v5722_v14, %v5719_v0  ;;  %v5737_v51 = vor.u32 %v5736_v40, %v5733_v11  ;;  %v5510_v2 = vld [vmem:[#allocation2 + $0xd0] sm:$0xf]  ;;  %v5512_v14 = vld [vmem:[#allocation2 + $0xd8] sm:$0xf] }
 0x2d9   : > { %8646 = vmatprep.mubr.bf16.mxu1 %v9283_v31  ;;  %v10921_v31 = vcombine.low %v5631_v30, %v5645_v21  ;;  %v5776_v30 = vshll.u32 %v5504_v13, 16  ;;  %v5506_v21 = vld [vmem:[#allocation2 + $0xc0] sm:$0xf]  ;;  %v5751_v20 = vor.u32 %v5750_v61, %v5747_v23  ;;  %v5761_v53 = vrot.slane %v5759_v9, 4  ;;  %v10958_v61 = vld [vmem:[#allocation2 + $0xc4] sm:$0x1] }
 0x2da   : > { %v5695_v8 = vor.u32 %v5694_v16, %v5691_v38  ;;  %v10944_v38 = vld [vmem:[#allocation2 + $0xb4] sm:$0x1]  ;;  %v5804_v16 = vshll.u32 %v5508_v58, 16  ;;  %v5764_v17 = vrot.slane %v5762_v55, 5  ;;  %v997_v63 = vsel %vm9909_vm4, 0, %v996_v54 }
 0x2db   : > { %v5754_v49 = vshll.u32 %v10946_v3, 16  ;;  %v5778_v7 = vrot.slane %v5776_v30, 5  ;;  %v5787_v60 = vshrl.u32 %v5506_v21, 16  ;;  %998 = vst [vmem:[#allocation2 + $0x13c] sm:$0x1] %v997_v63  ;;  %v5710_v44 = vrot.slane %v5709_v6, 4 }
 0x2dc   : > { %v10940_v18 = vrot.slane %v5695_v8, 4  ;;  %v5728_v8 = vrot.slane %v5726_v15, 5  ;;  %v5790_v10 = vshll.u32 %v5506_v21, 16  ;;  %v5806_v0 = vrot.slane %v5804_v16, 5  ;;  %v9291_v9 = vld [vmem:[#allocation2 + $0x130] ss:$8 sps:$4 sm:$0xff]  }
 0x2dd   : > { %v5738_v11 = vrot.slane %v5737_v51, 4  ;;  %v5752_v40 = vrot.slane %v5751_v20, 4  ;;  %v5768_v23 = vshll.u32 %v10944_v38, 16  ;;  %v5756_v55 = vrot.slane %v5754_v49, 5  ;;  %v10961_v30 = vld [vmem:[#allocation2 + $0xcc] sm:$0x1] }
 0x2de   : > { %v5701_v32 = vsel %vm10076_vm7, %v10940_v18, %v10930_v34  ;;  %v5782_v34 = vshll.u32 %v10951_v36, 16  ;;  %v5792_v54 = vrot.slane %v5790_v10, 5  ;;  %v5815_v18 = vshrl.u32 %v5510_v2, 16 }
 0x2df   : > { %v5818_v6 = vshll.u32 %v5510_v2, 16  ;;  %v5829_v15 = vshrl.u32 %v5512_v14, 16  ;;  %v5832_v51 = vshll.u32 %v5512_v14, 16  ;;  %v10973_v20 = vrot.slane %v5768_v23, 5  ;;  %v9293_v14 = vld [vmem:[#allocation8 + $0x208] sm:$0xff]  }
 0x2e0   : > { %8647 = vmatmul.mubr.bf16.gmra.mrb[4].mxu1 %v9285_v57  ;;  %v5740_v57 = vshll.u32 %v10932_v5, 16  ;;  %v10980_v49 = vrot.slane %v5782_v34, 5 }
 0x2e1   : > { %8650 = vmatprep.mubr.bf16.mxu1 %v9286_v1  ;;  %v5773_v1 = vshrl.u32 %v5504_v13, 16  ;;  %v5724_v13 = vrot.slane %v5723_v47, 4  ;;  %v10991_v10 = vrot.slane %v5829_v15, 4  ;;  %v9294_v15 = vld [vmem:[#allocation8 + $0x210] sm:$0xff]  }
 0x2e2   : > { %v5742_v29 = vrot.slane %v5740_v57, 5  ;;  %v5715_v57 = vsel %vm10076_vm7, %v5710_v44, %v10938_v43  ;;  %v5757_v43 = vsel %vm10076_vm7, %v5752_v40, %v5756_v55  ;;  %v10987_v44 = vrot.slane %v5815_v18, 4 }
 0x2e3   : > { %v5775_v39 = vrot.slane %v5773_v1, 4  ;;  %v5789_v1 = vrot.slane %v5787_v60, 4  ;;  %v5729_v21 = vsel %vm10076_vm7, %v5724_v13, %v5728_v8  ;;  %v10985_v60 = vld [vmem:[#allocation2 + $0xd4] sm:$0x1]  ;;  %v10989_v8 = vrot.slane %v5818_v6, 5 }
 0x2e4   : > { %v10995_v13 = vld [vmem:[#allocation2 + $0xdc] sm:$0x1]  ;;  %v11006_v40 = vcombine.low %v5715_v57, %v5729_v21  ;;  %v6315_v6 = vld [vmem:[#allocation2 + $0x78] sm:$0xe]  ;;  %v6450_v21 = vrot.slane %v10915_v12, 5 }
 0x2e5   : > { %v5779_v58 = vor.u32 %v5778_v7, %v5775_v39  ;;  %v5810_v39 = vshll.u32 %v10961_v30, 16  ;;  %v5793_v7 = vor.u32 %v5792_v54, %v5789_v1  ;;  %v7818_v18 = vrot.slane %v6315_v6, 9  ;;  %v6319_v57 = vld [vmem:[#allocation2 + $0x98] sm:$0xe] }
 0x2e6   : > { %v6446_v54 = vrot.slane %v10899_v33, 5  ;;  %v6454_v33 = vrot.slane %v10927_v27, 5  ;;  %v7822_v27 = vrot.slane %v6319_v57, 9  ;;  %v9296_v57 = vld [vmem:[#allocation8 + $0x220] sm:$0xff]  }
 0x2e7   : > { %v10978_v63 = vrot.slane %v5779_v58, 4  ;;  %v6314_v58 = vld [vmem:[#allocation2 + $0x70] sm:$0xe]  ;;  %v11027_v34 = vrot.slane %v5793_v7, 4 }
 0x2e8   : > { %8651 = vmatmul.mubr.bf16.gmra.mrb[8].mxu1 %v9288_v50  ;;  %v5803_v50 = vrot.slane %v5801_v46, 4  ;;  %v5743_v46 = vsel %vm10076_vm7, %v5738_v11, %v5742_v29  ;;  %v10997_v29 = vrot.slane %v5832_v51, 5  ;;  %v11004_v11 = vcombine.low %v5687_v41, %v5701_v32  ;;  %v11025_v32 = vld [vmem:[#allocation2 + $0x108] sm:$0xf]  ;;  %v6318_v7 = vld [vmem:[#allocation2 + $0x90] sm:$0xe] }
 0x2e9   : > { %8654 = vmatprep.mubr.bf16.mxu1 %v9289_v59  ;;  %v5765_v59 = vor.u32 %v5764_v17, %v5761_v53  ;;  %v5796_v53 = vshll.u32 %v10958_v61, 16  ;;  %v5514_v17 = vld [vmem:[#allocation2 + $0xe0] sm:$0xf]  ;;  %v11015_v55 = vcombine.low %v5743_v46, %v5757_v43  ;;  %v11023_v41 = vrot.slane %v5810_v39, 5 }
 0x2ea   : > { %v5807_v47 = vor.u32 %v5806_v0, %v5803_v50  ;;  %v5843_v50 = vshrl.u32 %v5514_v17, 16  ;;  %v5846_v0 = vshll.u32 %v5514_v17, 16  ;;  %v6316_v46 = vld [vmem:[#allocation2 + $0x80] sm:$0xe]  ;;  %v7817_v43 = vrot.slane %v6314_v58, 9 }
 0x2eb   : > { %v10971_v16 = vrot.slane %v5765_v59, 4  ;;  %v11021_v56 = vrot.slane %v5796_v53, 5  ;;  %v6317_v53 = vld [vmem:[#allocation2 + $0x88] sm:$0xe]  ;;  %v6442_v39 = vrot.slane %v10893_v22, 5  ;;  %v11062_v1 = vsel %vm10586_vm12, %v7818_v18, %v6446_v54 }
 0x2ec   : > { %v10993_v2 = vrot.slane %v5807_v47, 4  ;;  %v11040_v47 = vrot.slane %v5843_v50, 4  ;;  %v11042_v51 = vrot.slane %v5846_v0, 5  ;;  %v6320_v58 = vld [vmem:[#allocation2 + $0xb0] sm:$0xe]  ;;  %v7820_v6 = vrot.slane %v6317_v53, 9 }
 0x2ed   : > { %v11058_v22 = vsel %vm10586_vm12, %v7817_v43, %v6442_v39  ;;  %v6321_v59 = vld [vmem:[#allocation2 + $0xb8] sm:$0xe]  ;;  %v6458_v43 = vrot.slane %v10932_v5, 5  ;;  %v6322_v39 = vld [vmem:[#allocation2 + $0xc0] sm:$0xe]  ;;  %v7823_v18 = vrot.slane %v6320_v58, 9 }
 0x2ee   : > { %v11074_v54 = vsel %vm10586_vm12, %v7820_v6, %v6454_v33  ;;  %v6323_v53 = vld [vmem:[#allocation2 + $0xc8] sm:$0xe]  ;;  %v6470_v58 = vrot.slane %v10951_v36, 5  ;;  %v7825_v6 = vrot.slane %v6322_v39, 9  ;;  %v6474_v33 = vrot.slane %v10958_v61, 5 }
 0x2ef   : > { %v6326_v36 = vld [vmem:[#allocation2 + $0xe0] sm:$0xe]  ;;  %v6327_v39 = vld [vmem:[#allocation2 + $0xe8] sm:$0xe]  ;;  %v11103_v61 = vld [vmem:[#allocation2 + $0xec] sm:$0x1] }
 0x2f0   : > { %8655 = vmatmul.mubr.bf16.gmra.mrb[12].mxu1 %v9291_v9  ;;  %v11013_v9 = vld [vmem:[#allocation2 + $0x100] sm:$0xf]  ;;  %v11127_v17 = vld [vmem:[#allocation2 + $0x124] sm:$0x1] }
 0x2f1   : > { %8674 = vmatprep.mubr.bf16.mxu1 %v10901_v52  ;;  %v10983_v52 = vld [vmem:[#allocation2 + $0xe8] sm:$0xf] }
 0x2f2   : > { %v5857_v23 = vshrl.u32 %v10983_v52, 16 }
 0x2f8   : > { %8675 = vmatmul.mubr.bf16.vlgmr.msra.gmra.mrb[16].mxu1 %v10903_v24  ;;  %v11046_v24 = vrot.slane %v5857_v23, 4  ;;  %v7819_v23 = vrot.slane %v6316_v46, 9  ;;  %v7821_v46 = vrot.slane %v6318_v7, 9  ;;  %v6466_v7 = vrot.slane %v10944_v38, 5 }
 0x2f9   : > { %8707 = vmatpush3.bf16.msra.mxu1 %v10869_v26  ;;  %8678 = vmatprep.mubr.bf16.mxu1 %v10905_v35  ;;  %v9295_v26 = vld [vmem:[#allocation8 + $0x218] sm:$0xff]   ;;  %v11077_v35 = vld [vmem:[#allocation2 + $0xe4] sm:$0x1] }
 0x2fa   : > { %8708 = vmatprep.subr.bf16.mxu1 %v9293_v14  ;;  %v11069_v12 = vsel %vm10586_vm12, %v7819_v23, %v6450_v21  ;;  %v11083_v5 = vsel %vm10586_vm12, %v7821_v46, %v6458_v43  ;;  %v7824_v23 = vrot.slane %v6321_v59, 9  ;;  %v6325_v21 = vld [vmem:[#allocation2 + $0xd8] sm:$0xe]  ;;  %v11094_v46 = vld [vmem:[#allocation2 + $0x104] sm:$0x1]  ;;  %v7826_v59 = vrot.slane %v6323_v53, 9 }
 0x2fb   : > { %11609 = vst [vmem:[#allocation17_spill] sm:$0xff] %v11083_v5  ;;  %v6478_v43 = vrot.slane %v10961_v30, 5  ;;  %v6482_v30 = vrot.slane %v10985_v60, 5  ;;  %v6328_v53 = vld [vmem:[#allocation2 + $0x100] sm:$0xe]  ;;  %v7828_v50 = vrot.slane %v6325_v21, 9 }
 0x2fc   : > { %v6490_v38 = vrot.slane %v11077_v35, 5  ;;  %v6333_v5 = vld [vmem:[#allocation2 + $0x128] sm:$0xe] }
 0x2fd   : > { %8709 = vmatpush3.bf16.msra.mxu1 %v9293_v14  ;;  %v6462_v14 = vrot.slane %v10946_v3, 5  ;;  %v11124_v0 = vsel %vm10586_vm12, %v7826_v59, %v6478_v43  ;;  %v11136_v59 = vld [vmem:[#allocation2 + $0x12c] sm:$0x1]  ;;  %v7830_v43 = vrot.slane %v6327_v39, 9 }
 0x2fe   : > { %8710 = vmatprep.subr.bf16.mxu1 %v9294_v15  ;;  %11614 = vst [vmem:[#allocation22_spill] sm:$0xff] %v11124_v0  ;;  %v9297_v0 = vld [vmem:[#allocation8 + $0x228] sm:$0xff]  }
 0x2ff   : > { %v11089_v3 = vsel %vm10586_vm12, %v7822_v27, %v6462_v14  ;;  %v11105_v27 = vld [vmem:[#allocation2 + $0x10c] sm:$0x1]  ;;  %v11115_v14 = vsel %vm10586_vm12, %v7825_v6, %v6474_v33  ;;  %v7829_v33 = vrot.slane %v6326_v36, 9  ;;  %v11157_v36 = vld [vmem:[#allocation2 + $0x134] sm:$0x1] }
 0x300   : > { %8679 = vmatmul.mubr.bf16.gmra.mrb[20].mxu1 %v10921_v31  ;;  %11610 = vst [vmem:[#allocation18_spill] sm:$0xff] %v11089_v3  ;;  %v11100_v31 = vsel %vm10586_vm12, %v7823_v18, %v6466_v7  ;;  %11613 = vst [vmem:[#allocation21_spill] sm:$0xff] %v11115_v14  ;;  %v7827_v18 = vrot.slane %v6324_v25, 9  ;;  %v11118_v7 = vld [vmem:[#allocation2 + $0x11c] sm:$0x1]  ;;  %v7831_v3 = vrot.slane %v6328_v53, 9 }
 0x301   : > { %8682 = vmatprep.mubr.bf16.mxu1 %v10923_v28  ;;  %8711 = vmatpush3.bf16.msra.mxu1 %v9294_v15  ;;  %11611 = vst [vmem:[#allocation19_spill] sm:$0xff] %v11100_v31  ;;  %v11107_v28 = vld [vmem:[#allocation2 + $0x114] sm:$0x1]  ;;  %v11111_v15 = vsel %vm10586_vm12, %v7824_v23, %v6470_v58  ;;  %v6486_v23 = vrot.slane %v10995_v13, 5  ;;  %v6329_v58 = vld [vmem:[#allocation2 + $0x108] sm:$0xe] }
 0x302   : > { %8712 = vmatprep.subr.bf16.mxu1 %v9295_v26  ;;  %11612 = vst [vmem:[#allocation20_spill] sm:$0xff] %v11111_v15  ;;  %v11133_v6 = vsel %vm10586_vm12, %v7827_v18, %v6482_v30  ;;  %v6330_v15 = vld [vmem:[#allocation2 + $0x110] sm:$0xe]  ;;  %v6494_v31 = vrot.slane %v11103_v61, 5  ;;  %v6331_v25 = vld [vmem:[#allocation2 + $0x118] sm:$0xe]  ;;  %v11147_v18 = vsel %vm10586_vm12, %v7829_v33, %v6490_v38 }
 0x303   : > { %v11140_v21 = vsel %vm10586_vm12, %v7828_v50, %v6486_v23  ;;  %11616 = vst [vmem:[#allocation24_spill] sm:$0xff] %v11147_v18  ;;  %v7832_v30 = vrot.slane %v6329_v58, 9  ;;  %v6332_v14 = vld [vmem:[#allocation2 + $0x120] sm:$0xe]  ;;  %v6502_v39 = vrot.slane %v11105_v27, 5  ;;  %v7833_v53 = vrot.slane %v6330_v15, 9 }
 0x304   : > { %11615 = vst [vmem:[#allocation23_spill] sm:$0xff] %v11140_v21  ;;  %v11152_v50 = vsel %vm10586_vm12, %v7830_v43, %v6494_v31  ;;  %v6506_v23 = vrot.slane %v11107_v28, 5  ;;  %v7834_v33 = vrot.slane %v6331_v25, 9  ;;  %v6510_v31 = vrot.slane %v11118_v7, 5  ;;  %v6334_v43 = vld [vmem:[#allocation2 + $0x130] sm:$0xe] }
 0x305   : > { %8713 = vmatpush3.bf16.msra.mxu1 %v9295_v26  ;;  %v6498_v26 = vrot.slane %v11094_v46, 5  ;;  %11617 = vst [vmem:[#allocation25_spill] sm:$0xff] %v11152_v50  ;;  %v11167_v15 = vld [vmem:[#allocation2 + $0x13c] sm:$0x1]  ;;  %v7835_v50 = vrot.slane %v6332_v14, 9  ;;  %v7836_v18 = vrot.slane %v6333_v5, 9 }
 0x306   : > { %8714 = vmatprep.subr.bf16.mxu1 %v9296_v57  ;;  %v11175_v38 = vsel %vm10586_vm12, %v7833_v53, %v6506_v23  ;;  %v6335_v25 = vld [vmem:[#allocation2 + $0x138] sm:$0xe]  ;;  %v7837_v53 = vrot.slane %v6334_v43, 9  ;;  %v6522_v23 = vrot.slane %v11157_v36, 5  ;;  %v11619_v21 = vshll.u32 %v10983_v52, 16 }
 0x307   : > { %v11163_v58 = vsel %vm10586_vm12, %v7831_v3, %v6498_v26  ;;  %v6514_v3 = vrot.slane %v11127_v17, 5  ;;  %v9298_v26 = vld [vmem:[#allocation8 + $0x230] sm:$0xff]   ;;  %v7838_v5 = vrot.slane %v6335_v25, 9  ;;  %v11639_v4 = vld [vmem:[#allocation21_spill] sm:$0xff] }
 0x308   : > { %8683 = vmatmul.mubr.bf16.gmra.mrb[24].mxu1 %v11004_v11  ;;  %v11171_v11 = vsel %vm10586_vm12, %v7832_v30, %v6502_v39  ;;  %v6518_v30 = vrot.slane %v11136_v59, 5  ;;  %v11620_v39 = vshrl.u32 %v11013_v9, 16  ;;  %v11207_v52 = vsel %vm10586_vm12, %v7837_v53, %v6522_v23 }
 0x309   : > { %8686 = vmatprep.mubr.bf16.mxu1 %v11006_v40  ;;  %8715 = vmatpush3.bf16.msra.mxu1 %v9296_v57  ;;  %v11182_v57 = vsel %vm10586_vm12, %v7834_v33, %v6510_v31  ;;  %v11189_v14 = vsel %vm10586_vm12, %v7835_v50, %v6514_v3  ;;  %v5862_v40 = vrot.slane %v11619_v21, 5  ;;  %v6526_v31 = vrot.slane %v11167_v15, 5 }
 0x30a   : > { %8716 = vmatprep.subr.bf16.mxu1 %v9297_v0  ;;  %11618 = vst [vmem:[#allocation26_spill] sm:$0xff] %v11182_v57  ;;  %v11196_v33 = vsel %vm10586_vm12, %v7836_v18, %v6518_v30  ;;  %v5873_v57 = vrot.slane %v11620_v39, 4  ;;  %v11621_v50 = vshll.u32 %v11013_v9, 16  ;;  %v11622_v21 = vsel %vm10076_vm7, %v10978_v63, %v10980_v49  ;;  %v9299_v39 = vld [vmem:[#allocation8 + $0x238] sm:$0xff]  }
 0x30b   : > { %v7853_v43 = vcombine.low %v11189_v14, %v11196_v33  ;;  %v11624_v9 = vor.u32 %v10989_v8, %v10987_v44  ;;  %v5852_v30 = vshll.u32 %v11077_v35, 16  ;;  %v11225_v53 = vsel %vm10586_vm12, %v7838_v5, %v6526_v31  ;;  %v5524_v44 = vld [vmem:[#allocation2 + $0x118] sm:$0xf] }
 0x30c   : > { %v5876_v3 = vrot.slane %v11621_v50, 5  ;;  %v5799_v63 = vsel %vm10076_vm7, %v11027_v34, %v11021_v56  ;;  %v5849_v49 = vor.u32 %v11042_v51, %v11040_v47  ;;  %v7854_v8 = vcombine.low %v11207_v52, %v11225_v53 }
 0x30d   : > { %8717 = vmatpush3.bf16.msra.mxu1 %v9297_v0  ;;  %v11623_v0 = vsel %vm10076_vm7, %v10971_v16, %v10973_v20  ;;  %v5822_v25 = vrot.slane %v11624_v9, 4  ;;  %v11625_v16 = vor.u32 %v10997_v29, %v10991_v10  ;;  %v11626_v35 = vsel %vm10076_vm7, %v10993_v2, %v11023_v41  ;;  %v5522_v2 = vld [vmem:[#allocation2 + $0x110] sm:$0xf]  ;;  %v5526_v41 = vld [vmem:[#allocation2 + $0x120] sm:$0xf] }
 0x30e   : > { %v7791_v18 = vcombine.low %v11623_v0, %v11622_v21  ;;  %8718 = vmatprep.subr.bf16.mxu1 %v9298_v26  ;;  %v7792_v23 = vcombine.low %v5799_v63, %v11626_v35  ;;  %v11627_v56 = vshll.u32 %v10985_v60, 16  ;;  %v11628_v10 = vshll.u32 %v10995_v13, 16 }
 0x30f   : > { %v5836_v20 = vrot.slane %v11625_v16, 4  ;;  %v11629_v47 = vshrl.u32 %v11025_v32, 16  ;;  %v5863_v5 = vor.u32 %v5862_v40, %v11046_v24  ;;  %v5877_v31 = vor.u32 %v5876_v3, %v5873_v57 }
 0x310   : > { %8687 = vmatmul.mubr.bf16.gmra.mrb[28].mxu1 %v11015_v55  ;;  %v5826_v34 = vrot.slane %v11627_v56, 5  ;;  %v5840_v29 = vrot.slane %v11628_v10, 5  ;;  %v5866_v55 = vshll.u32 %v11103_v61, 16  ;;  %v11630_v50 = vshll.u32 %v11025_v32, 16  ;;  %v5528_v32 = vld [vmem:[#allocation2 + $0x128] sm:$0xf] }
 0x311   : > { %v5887_v51 = vrot.slane %v11629_v47, 4  ;;  %8690 = vmatprep.mubr.bf16.mxu1 %v7791_v18  ;;  %8719 = vmatpush3.bf16.msra.mxu1 %v9298_v26  ;;  %v5854_v13 = vrot.slane %v5852_v30, 5  ;;  %v5913_v0 = vshrl.u32 %v5524_v44, 16  ;;  %v5916_v9 = vshll.u32 %v5524_v44, 16 }
 0x312   : > { %v5890_v21 = vrot.slane %v11630_v50, 5  ;;  %v5827_v60 = vsel %vm10076_vm7, %v5822_v25, %v5826_v34  ;;  %8720 = vmatprep.subr.bf16.mxu1 %v9299_v39  ;;  %v5841_v18 = vsel %vm10076_vm7, %v5836_v20, %v5840_v29  ;;  %v5850_v24 = vrot.slane %v5849_v49, 4  ;;  %v5530_v29 = vld [vmem:[#allocation2 + $0x130] sm:$0xf] }
 0x313   : > { %v5880_v61 = vshll.u32 %v11094_v46, 16  ;;  %v5894_v40 = vshll.u32 %v11105_v27, 16  ;;  %v5899_v57 = vshrl.u32 %v5522_v2, 16  ;;  %v5902_v3 = vshll.u32 %v5522_v2, 16  ;;  %v5532_v2 = vld [vmem:[#allocation2 + $0x138] sm:$0xf] }
 0x314   : > { %v5927_v26 = vshrl.u32 %v5526_v41, 16  ;;  %v5930_v63 = vshll.u32 %v5526_v41, 16  ;;  %v5864_v16 = vrot.slane %v5863_v5, 4  ;;  %v5868_v35 = vrot.slane %v5866_v55, 5 }
 0x315   : > { %v5878_v25 = vrot.slane %v5877_v31, 4  ;;  %v5891_v30 = vor.u32 %v5890_v21, %v5887_v51  ;;  %8721 = vmatpush3.bf16.msra.mxu1 %v9299_v39  ;;  %v5915_v44 = vrot.slane %v5913_v0, 4  ;;  %v5918_v56 = vrot.slane %v5916_v9, 5 }
 0x316   : > { %v5941_v34 = vshrl.u32 %v5528_v32, 16  ;;  %v5944_v10 = vshll.u32 %v5528_v32, 16  ;;  %v7793_v20 = vcombine.low %v5827_v60, %v5841_v18  ;;  %v5882_v49 = vrot.slane %v5880_v61, 5 }
 0x317   : > { %v5855_v46 = vsel %vm10076_vm7, %v5850_v24, %v5854_v13  ;;  %v5896_v27 = vrot.slane %v5894_v40, 5  ;;  %v5929_v47 = vrot.slane %v5927_v26, 4  ;;  %v5932_v50 = vrot.slane %v5930_v63, 5 }
 0x318   : > { %8691 = vmatmul.mubr.bf16.gmra.mrb[0].mxu1 %v7792_v23  ;;  %v5869_v51 = vsel %vm10076_vm7, %v5864_v16, %v5868_v35  ;;  %v5892_v39 = vrot.slane %v5891_v30, 4  ;;  %v5901_v5 = vrot.slane %v5899_v57, 4  ;;  %v5904_v55 = vrot.slane %v5902_v3, 5 }
 0x319   : > { %8694 = vmatprep.mubr.bf16.mxu1 %v7793_v20  ;;  %v5883_v31 = vsel %vm10076_vm7, %v5878_v25, %v5882_v49  ;;  %v5919_v21 = vor.u32 %v5918_v56, %v5915_v44  ;;  %v5943_v41 = vrot.slane %v5941_v34, 4  ;;  %v5946_v23 = vrot.slane %v5944_v10, 5 }
 0x31a   : > { %v5955_v60 = vshrl.u32 %v5530_v29, 16  ;;  %v5958_v0 = vshll.u32 %v5530_v29, 16  ;;  %v5969_v13 = vshrl.u32 %v5532_v2, 16  ;;  %v5972_v9 = vshll.u32 %v5532_v2, 16  ;;  %v9300_v2 = vld [vmem:[#allocation9] sm:$0xff]  }
 0x31b   : > { %v5908_v18 = vshll.u32 %v11107_v28, 16  ;;  %v5933_v24 = vor.u32 %v5932_v50, %v5929_v47  ;;  %v7794_v61 = vcombine.low %v5855_v46, %v5869_v51  ;;  %v5897_v40 = vsel %vm10076_vm7, %v5892_v39, %v5896_v27  ;;  %v9301_v51 = vld [vmem:[#allocation9 + $0x8] sm:$0xff]   ;;  %8754 = vmatprep.subr.bf16.mxu0 %v9300_v2 }
 0x31c   : > { %v5905_v32 = vor.u32 %v5904_v55, %v5901_v5  ;;  %v5922_v57 = vshll.u32 %v11118_v7, 16  ;;  %v7795_v3 = vcombine.low %v5883_v31, %v5897_v40  ;;  %v5920_v26 = vrot.slane %v5919_v21, 4  ;;  %v6304_v5 = vld [vmem:[#allocation2 + $0x10] sm:$0xe]  ;;  %8755 = vmatpush3.bf16.msra.mxu0 %v9300_v2  ;;  %v6310_v2 = vld [vmem:[#allocation2 + $0x40] sm:$0xe] }
 0x31d   : > { %v5936_v63 = vshll.u32 %v11127_v17, 16  ;;  %v5947_v16 = vor.u32 %v5946_v23, %v5943_v41  ;;  %v5957_v35 = vrot.slane %v5955_v60, 4  ;;  %v5960_v25 = vrot.slane %v5958_v0, 5  ;;  %v6305_v60 = vld [vmem:[#allocation2 + $0x18] sm:$0xe]  ;;  %8756 = vmatprep.subr.bf16.mxu0 %v9301_v51 }
 0x31e   : > { %v5971_v30 = vrot.slane %v5969_v13, 4  ;;  %v5974_v44 = vrot.slane %v5972_v9, 5  ;;  %v5934_v56 = vrot.slane %v5933_v24, 4  ;;  %v5950_v28 = vshll.u32 %v11136_v59, 16  ;;  %v9400_v13 = vld [vmem:[#allocation2 + $0x14] sm:$0x1] }
 0x31f   : > { %v5906_v34 = vrot.slane %v5905_v32, 4  ;;  %v5924_v10 = vrot.slane %v5922_v57, 5  ;;  %v5910_v20 = vrot.slane %v5908_v18, 5  ;;  %v5938_v49 = vrot.slane %v5936_v63, 5  ;;  %v9302_v18 = vld [vmem:[#allocation9 + $0x10] sm:$0xff]   ;;  %v9303_v63 = vld [vmem:[#allocation9 + $0x18] sm:$0xff]  }
 0x320   : > { %8695 = vmatmul.mubr.bf16.gmra.mrb[4].mxu1 %v7794_v61  ;;  %v5948_v29 = vrot.slane %v5947_v16, 4  ;;  %v5961_v46 = vor.u32 %v5960_v25, %v5957_v35  ;;  %v5975_v17 = vor.u32 %v5974_v44, %v5971_v30  ;;  %v5978_v27 = vshll.u32 %v11167_v15, 16  ;;  %v9401_v61 = vld [vmem:[#allocation2 + $0x1c] sm:$0x1]  ;;  %8757 = vmatpush3.bf16.msra.mxu0 %v9301_v51  ;;  %v6308_v16 = vld [vmem:[#allocation2 + $0x30] sm:$0xe] }
 0x321   : > { %8698 = vmatprep.mubr.bf16.mxu1 %v7795_v3  ;;  %v5925_v7 = vsel %vm10076_vm7, %v5920_v26, %v5924_v10  ;;  %v5939_v47 = vsel %vm10076_vm7, %v5934_v56, %v5938_v49  ;;  %v5952_v50 = vrot.slane %v5950_v28, 5  ;;  %v5911_v59 = vsel %vm10076_vm7, %v5906_v34, %v5910_v20  ;;  %v6307_v26 = vld [vmem:[#allocation2 + $0x28] sm:$0xe]  ;;  %8758 = vmatprep.subr.bf16.mxu0 %v9302_v18  ;;  %v6306_v30 = vld [vmem:[#allocation2 + $0x20] sm:$0xe] }
 0x322   : > { %v5964_v39 = vshll.u32 %v11157_v36, 16  ;;  %v7796_v55 = vcombine.low %v5911_v59, %v5925_v7  ;;  %v5962_v41 = vrot.slane %v5961_v46, 4  ;;  %v5976_v15 = vrot.slane %v5975_v17, 4  ;;  %v9402_v28 = vld [vmem:[#allocation2 + $0x2c] sm:$0x1] }
 0x323   : > { %v5953_v31 = vsel %vm10076_vm7, %v5948_v29, %v5952_v50  ;;  %v5980_v23 = vrot.slane %v5978_v27, 5  ;;  %v7807_v0 = vrot.slane %v6304_v5, 9  ;;  %v6402_v9 = vrot.slane %v9400_v13, 5  ;;  %v6309_v10 = vld [vmem:[#allocation2 + $0x38] sm:$0xe]  ;;  %v9304_v29 = vld [vmem:[#allocation9 + $0x20] sm:$0xff]  }
 0x324   : > { %v7797_v21 = vcombine.low %v5939_v47, %v5953_v31  ;;  %v5966_v36 = vrot.slane %v5964_v39, 5  ;;  %v7808_v24 = vrot.slane %v6305_v60, 9  ;;  %v6406_v40 = vrot.slane %v9401_v61, 5  ;;  %8759 = vmatpush3.bf16.msra.mxu0 %v9302_v18  ;;  %v9403_v20 = vld [vmem:[#allocation2 + $0x34] sm:$0x1] }
 0x325   : > { %v5981_v57 = vsel %vm10076_vm7, %v5976_v15, %v5980_v23  ;;  %v6403_v3 = vsel %vm10586_vm12, %v7807_v0, %v6402_v9  ;;  %v7810_v56 = vrot.slane %v6307_v26, 9  ;;  %v6414_v34 = vrot.slane %v9402_v28, 5  ;;  %8760 = vmatprep.subr.bf16.mxu0 %v9303_v63  ;;  %v9404_v46 = vld [vmem:[#allocation2 + $0x24] sm:$0x1]  ;;  %v6311_v59 = vld [vmem:[#allocation2 + $0x48] sm:$0xe] }
 0x326   : > { %v5967_v32 = vsel %vm10076_vm7, %v5962_v41, %v5966_v36  ;;  %v6407_v25 = vsel %vm10586_vm12, %v7808_v24, %v6406_v40  ;;  %v7811_v37 = vrot.slane %v6308_v16, 9  ;;  %v6418_v49 = vrot.slane %v9403_v20, 5  ;;  %v6312_v5 = vld [vmem:[#allocation2 + $0x60] sm:$0xe]  ;;  %v6313_v60 = vld [vmem:[#allocation2 + $0x68] sm:$0xe] }
 0x327   : > { %v7798_v35 = vcombine.low %v5967_v32, %v5981_v57  ;;  %v7839_v44 = vcombine.low %v6403_v3, %v6407_v25  ;;  %v7809_v7 = vrot.slane %v6306_v30, 9  ;;  %v6410_v17 = vrot.slane %v9404_v46, 5  ;;  %v11633_v32 = vld [vmem:[#allocation17_spill] sm:$0xff]  ;;  %v11634_v57 = vld [vmem:[#allocation18_spill] sm:$0xff]  ;;  %v11636_v26 = vld [vmem:[#allocation19_spill] sm:$0xff] }
 0x328   : > { %8699 = vmatmul.mubr.bf16.gmra.mrb[8].mxu1 %v7796_v55  ;;  %v7812_v27 = vrot.slane %v6309_v10, 9  ;;  %v6422_v47 = vrot.slane %v10861_v62, 5  ;;  %v6415_v50 = vsel %vm10586_vm12, %v7810_v56, %v6414_v34  ;;  %8761 = vmatpush3.bf16.msra.mxu0 %v9303_v63  ;;  %v6419_v51 = vsel %vm10586_vm12, %v7811_v37, %v6418_v49  ;;  %v11637_v63 = vld [vmem:[#allocation20_spill] sm:$0xff]  ;;  %v11642_v30 = vld [vmem:[#allocation23_spill] sm:$0xff]  ;;  %v11648_v56 = vld [vmem:[#allocation26_spill] sm:$0xff] }
 0x329   : > { %8702 = vmatprep.mubr.bf16.mxu1 %v7797_v21  ;;  %8762 = vmatprep.subr.bf16.mxu0 %v9304_v29  ;;  %v6411_v39 = vsel %vm10586_vm12, %v7809_v7, %v6410_v17  ;;  %v7813_v21 = vrot.slane %v6310_v2, 9  ;;  %v6426_v41 = vrot.slane %v10872_v19, 5  ;;  %v7814_v15 = vrot.slane %v6311_v59, 9 }
 0x32a   : > { %v7840_v55 = vcombine.low %v6411_v39, %v6415_v50  ;;  %v6423_v31 = vsel %vm10586_vm12, %v7812_v27, %v6422_v47  ;;  %v6430_v23 = vrot.slane %v10874_v48, 5  ;;  %v7815_v0 = vrot.slane %v6312_v5, 9  ;;  %v9305_v47 = vld [vmem:[#allocation9 + $0x28] sm:$0xff]   ;;  %v9306_v39 = vld [vmem:[#allocation9 + $0x30] sm:$0xff]   ;;  %v9307_v5 = vld [vmem:[#allocation9 + $0x38] sm:$0xff]  }
 0x32b   : > { %v7841_v62 = vcombine.low %v6419_v51, %v6423_v31  ;;  %v6434_v13 = vrot.slane %v10876_v45, 5  ;;  %v7816_v9 = vrot.slane %v6313_v60, 9  ;;  %v6438_v18 = vrot.slane %v10880_v42, 5 }
 0x32c   : > { %8763 = vmatpush3.bf16.msra.mxu0 %v9304_v29  ;;  %v6427_v36 = vsel %vm10586_vm12, %v7813_v21, %v6426_v41  ;;  %v6431_v24 = vsel %vm10586_vm12, %v7814_v15, %v6430_v23  ;;  %v11631_v45 = vcombine.low %v11058_v22, %v11062_v1  ;;  %v11632_v42 = vcombine.low %v11069_v12, %v11074_v54  ;;  %v11644_v22 = vld [vmem:[#allocation24_spill] sm:$0xff] }
 0x32d   : > { %v6435_v19 = vsel %vm10586_vm12, %v7815_v0, %v6434_v13  ;;  %v7842_v48 = vcombine.low %v6427_v36, %v6431_v24  ;;  %v6439_v61 = vsel %vm10586_vm12, %v7816_v9, %v6438_v18  ;;  %v11635_v3 = vcombine.low %v11633_v32, %v11634_v57  ;;  %8764 = vmatprep.subr.bf16.mxu0 %v9305_v47  ;;  %v11385_v13 = vld [vmem:[%s11566_s4] ss:$0 sm:$0xff] }
 0x32e   : > { %v7843_v40 = vcombine.low %v6435_v19, %v6439_v61  ;;  %v11638_v16 = vcombine.low %v11636_v26, %v11637_v63  ;;  %v11643_v1 = vcombine.low %v11133_v6, %v11642_v30  ;;  %v11647_v54 = vcombine.low %v11163_v58, %v11171_v11 }
 0x32f   : > { %v11649_v28 = vcombine.low %v11175_v38, %v11648_v56 }
 0x330   : > { %8703 = vmatmul.mubr.bf16.gmra.mrb[12].mxu1 %v7798_v35  ;;  %v11640_v35 = vld [vmem:[#allocation22_spill] sm:$0xff]  ;;  %8765 = vmatpush3.bf16.msra.mxu0 %v9305_v47 }
 0x331   : > { %8722 = vmatprep.mubr.bf16.mxu1 %v7839_v44  ;;  %v11641_v25 = vcombine.low %v11639_v4, %v11640_v35  ;;  %v11645_v44 = vld [vmem:[#allocation25_spill] sm:$0xff]  ;;  %8766 = vmatprep.subr.bf16.mxu0 %v9306_v39 }
 0x332   : > { %v11646_v12 = vcombine.low %v11644_v22, %v11645_v44 }
 0x334   : > { %8767 = vmatpush3.bf16.msra.mxu0 %v9306_v39 }
 0x335   : > { %8768 = vmatprep.subr.bf16.mxu0 %v9307_v5 }
 0x338   : > { %8723 = vmatmul.mubr.bf16.vlgmr.msra.gmra.mrb[16].mxu1 %v7840_v55  ;;  %8769 = vmatpush3.bf16.msra.mxu0 %v9307_v5 }
 0x339   : > { %8726 = vmatprep.mubr.bf16.mxu1 %v7841_v62 }
 0x340   : > { %8727 = vmatmul.mubr.bf16.gmra.mrb[20].mxu1 %v7842_v48 }
 0x341   : > { %8730 = vmatprep.mubr.bf16.mxu1 %v7843_v40 }
 0x348   : > { %8731 = vmatmul.mubr.bf16.gmra.mrb[24].mxu1 %v11631_v45 }
 0x349   : > { %8734 = vmatprep.mubr.bf16.mxu1 %v11632_v42 }
 0x350   : > { %8735 = vmatmul.mubr.bf16.gmra.mrb[28].mxu1 %v11635_v3 }
 0x351   : > { %8738 = vmatprep.mubr.bf16.mxu1 %v11638_v16 }
 0x358   : > { %8739 = vmatmul.mubr.bf16.gmra.mrb[0].mxu1 %v11641_v25 }
 0x359   : > { %8742 = vmatprep.mubr.bf16.mxu1 %v11643_v1 }
 0x360   : > { %8743 = vmatmul.mubr.bf16.gmra.mrb[4].mxu1 %v11646_v12 }
 0x361   : > { %8746 = vmatprep.mubr.bf16.mxu1 %v11647_v54 }
 0x368   : > { %8747 = vmatmul.mubr.bf16.gmra.mrb[8].mxu1 %v11649_v28 }
 0x369   : > { %8750 = vmatprep.mubr.bf16.mxu1 %v7853_v43 }
 0x36a   : > { %v11341_v34 = vpop.f32.mrb[48].mxu0 }
 0x36b   : > { %v11343_v6 = vpop.f32.mrb[49].mxu0 }
 0x36c   : > { %v11345_v10 = vpop.f32.mrb[50].mxu0 }
 0x36d   : > { %v11347_v37 = vpop.f32.mrb[51].mxu0 }
 0x370   : > { %8751 = vmatmul.mubr.bf16.gmra.mrb[12].mxu1 %v7854_v8 }
 0x372   : > { %v11352_v58 = vpop.f32.mrb[52].mxu0 }
 0x373   : > { %v11354_v38 = vpop.f32.mrb[53].mxu0 }
 0x374   : > { %v11356_v11 = vpop.f32.mrb[54].mxu0 }
 0x375   : > { %v11358_v14 = vpop.f32.mrb[55].mxu0 }
 0x37a   : > { %v11360_v33 = vpop.f32.mrb[56].mxu0 }
 0x37b   : > { %v11362_v43 = vpop.f32.mrb[57].mxu0 }
 0x37c   : > { %v11364_v20 = vpop.f32.mrb[58].mxu0 }
 0x37d   : > { %v11366_v49 = vpop.f32.mrb[59].mxu0 }
 0x382   : > { %v11368_v29 = vpop.f32.mrb[60].mxu0 }
 0x383   : > { %v11370_v52 = vpop.f32.mrb[61].mxu0 }
 0x384   : > { %v11372_v53 = vpop.f32.mrb[62].mxu0 }
 0x385   : > { %v11374_v8 = vpop.f32.mrb[63].mxu0 }
 0x38a   : > { %v8484_v7 = vpop.f32.mrb[32].mxu0 }
 0x38b   : > { %v3544_v46 = vpop.f32.mrb[33].mxu0 }
 0x38c   : > { %v8485_v17 = vpop.f32.mrb[34].mxu0 }
 0x38d   : > { %v3547_v27 = vpop.f32.mrb[35].mxu0 }
 0x392   : > { %v8488_v50 = vpop.f32.mrb[36].mxu0 }
 0x393   : > { %v3560_v2 = vpop.f32.mrb[37].mxu0 }
 0x394   : > { %v8489_v51 = vpop.f32.mrb[38].mxu0 }
 0x395   : > { %v3563_v59 = vpop.f32.mrb[39].mxu0 }
 0x39a   : > { %v8492_v55 = vpop.f32.mrb[40].mxu0 }
 0x39b   : > { %v3576_v31 = vpop.f32.mrb[41].mxu0 }
 0x39c   : > { %v8493_v21 = vpop.f32.mrb[42].mxu0 }
 0x39d   : > { %v3579_v62 = vpop.f32.mrb[43].mxu0 }
 0x3a2   : > { %v8496_v41 = vpop.f32.mrb[44].mxu0 }
 0x3a3   : > { %v11376_v15 = vpop.f32.mrb[45].mxu0 }
 0x3a4   : > { %v11378_v23 = vpop.f32.mrb[46].mxu0 }
 0x3a5   : > { %v11380_v60 = vpop.f32.mrb[47].mxu0 }
 0x40b   : > { %v8724_v0 = vpop.f32.mrb[16].mxu1 }
 0x40c   : > { %v8818_v9 = vadd.f32 %v8724_v0, %v8484_v7  ;;  %v6691_v18 = vpop.f32.mrb[17].mxu1 }
 0x40d   : > { %v8819_v36 = vadd.f32 %v6691_v18, %v3544_v46  ;;  %v8725_v24 = vpop.f32.mrb[18].mxu1 }
 0x40e   : > { %v6859_v19 = vadd.f32 %v8818_v9, %v11385_v13  ;;  %v8820_v48 = vadd.f32 %v8725_v24, %v8485_v17  ;;  %v6694_v61 = vpop.f32.mrb[19].mxu1 }
 0x40f   : > { %v6857_v40 = vadd.f32 %v8819_v36, %v11385_v13  ;;  %v8821_v45 = vadd.f32 %v6694_v61, %v3547_v27 }
 0x410   : > { %v6860_v42 = vadd.f32 %v8820_v48, %v11385_v13  ;;  %v6891_v57 = vmax.f32 %v6859_v19, 0.0 }
 0x411   : > { %v6858_v32 = vadd.f32 %v8821_v45, %v11385_v13  ;;  %v6889_v26 = vmax.f32 %v6857_v40, 0.0 }
 0x412   : > { %v6892_v3 = vmax.f32 %v6860_v42, 0.0 }
 0x413   : > { %v6890_v63 = vmax.f32 %v6858_v32, 0.0  ;;  %v8728_v16 = vpop.f32.mrb[20].mxu1 }
 0x414   : > { %v6922_v4 = vpack.c.bf16 %v6892_v3, %v6891_v57  ;;  %v8822_v35 = vadd.f32 %v8728_v16, %v8488_v50  ;;  %v6707_v25 = vpop.f32.mrb[21].mxu1 }
 0x415   : > { %v8823_v30 = vadd.f32 %v6707_v25, %v3560_v2  ;;  %v8729_v1 = vpop.f32.mrb[22].mxu1  ;;  %v6921_v22 = vpack.c.bf16 %v6890_v63, %v6889_v26 }
 0x416   : > { %v6863_v44 = vadd.f32 %v8822_v35, %v11385_v13  ;;  %v8824_v12 = vadd.f32 %v8729_v1, %v8489_v51  ;;  %v6710_v54 = vpop.f32.mrb[23].mxu1 }
 0x417   : > { %v6861_v56 = vadd.f32 %v8823_v30, %v11385_v13  ;;  %v8825_v28 = vadd.f32 %v6710_v54, %v3563_v59  ;;  %8770 = vmatprep.mubr.bf16.mxu0 %v6921_v22 }
 0x418   : > { %v6864_v7 = vadd.f32 %v8824_v12, %v11385_v13  ;;  %8771 = vmatmul.mubr.bf16.vlgmr.msra.gmra.mrb[64].mxu0 %v6922_v4  ;;  %v6895_v17 = vmax.f32 %v6863_v44, 0.0 }
 0x419   : > { %v6862_v46 = vadd.f32 %v8825_v28, %v11385_v13  ;;  %v6893_v47 = vmax.f32 %v6861_v56, 0.0 }
 0x41a   : > { %v6896_v27 = vmax.f32 %v6864_v7, 0.0 }
 0x41b   : > { %v6894_v50 = vmax.f32 %v6862_v46, 0.0  ;;  %v8732_v2 = vpop.f32.mrb[24].mxu1 }
 0x41c   : > { %v8826_v39 = vadd.f32 %v8732_v2, %v8492_v55  ;;  %v6723_v5 = vpop.f32.mrb[25].mxu1  ;;  %v6924_v0 = vpack.c.bf16 %v6896_v27, %v6895_v17 }
 0x41d   : > { %v8827_v9 = vadd.f32 %v6723_v5, %v3576_v31  ;;  %v8733_v51 = vpop.f32.mrb[26].mxu1  ;;  %v6923_v18 = vpack.c.bf16 %v6894_v50, %v6893_v47 }
 0x41e   : > { %v6867_v36 = vadd.f32 %v8826_v39, %v11385_v13  ;;  %v8828_v59 = vadd.f32 %v8733_v51, %v8493_v21  ;;  %v6726_v24 = vpop.f32.mrb[27].mxu1 }
 0x41f   : > { %v6865_v19 = vadd.f32 %v8827_v9, %v11385_v13  ;;  %v8829_v48 = vadd.f32 %v6726_v24, %v3579_v62  ;;  %8774 = vmatprep.mubr.bf16.mxu0 %v6923_v18 }
 0x420   : > { %v6868_v61 = vadd.f32 %v8828_v59, %v11385_v13  ;;  %8775 = vmatmul.mubr.bf16.gmra.mrb[68].mxu0 %v6924_v0  ;;  %v6899_v45 = vmax.f32 %v6867_v36, 0.0 }
 0x421   : > { %v6866_v40 = vadd.f32 %v8829_v48, %v11385_v13  ;;  %v6897_v42 = vmax.f32 %v6865_v19, 0.0 }
 0x422   : > { %v6900_v55 = vmax.f32 %v6868_v61, 0.0 }
 0x423   : > { %v6898_v32 = vmax.f32 %v6866_v40, 0.0  ;;  %v8736_v31 = vpop.f32.mrb[28].mxu1 }
 0x424   : > { %v8830_v57 = vadd.f32 %v8736_v31, %v8496_v41  ;;  %v6739_v3 = vpop.f32.mrb[29].mxu1  ;;  %v6926_v26 = vpack.c.bf16 %v6900_v55, %v6899_v45 }
 0x425   : > { %v8831_v21 = vadd.f32 %v6739_v3, %v11376_v15  ;;  %v8737_v63 = vpop.f32.mrb[30].mxu1  ;;  %v6925_v16 = vpack.c.bf16 %v6898_v32, %v6897_v42 }
 0x426   : > { %v6871_v62 = vadd.f32 %v8830_v57, %v11385_v13  ;;  %v8832_v4 = vadd.f32 %v8737_v63, %v11378_v23  ;;  %v6742_v35 = vpop.f32.mrb[31].mxu1 }
 0x427   : > { %v6869_v25 = vadd.f32 %v8831_v21, %v11385_v13  ;;  %v8833_v30 = vadd.f32 %v6742_v35, %v11380_v60  ;;  %8778 = vmatprep.mubr.bf16.mxu0 %v6925_v16 }
 0x428   : > { %v6872_v1 = vadd.f32 %v8832_v4, %v11385_v13  ;;  %8779 = vmatmul.mubr.bf16.gmra.mrb[72].mxu0 %v6926_v26  ;;  %v6903_v22 = vmax.f32 %v6871_v62, 0.0 }
 0x429   : > { %v6870_v41 = vadd.f32 %v8833_v30, %v11385_v13  ;;  %v6901_v15 = vmax.f32 %v6869_v25, 0.0 }
 0x42a   : > { %v6904_v44 = vmax.f32 %v6872_v1, 0.0 }
 0x42b   : > { %v6902_v12 = vmax.f32 %v6870_v41, 0.0  ;;  %v8740_v54 = vpop.f32.mrb[0].mxu1 }
 0x42c   : > { %v8834_v56 = vadd.f32 %v8740_v54, %v11341_v34  ;;  %v6755_v28 = vpop.f32.mrb[1].mxu1  ;;  %v6928_v23 = vpack.c.bf16 %v6904_v44, %v6903_v22 }
 0x42d   : > { %v8835_v7 = vadd.f32 %v6755_v28, %v11343_v6  ;;  %v8741_v46 = vpop.f32.mrb[2].mxu1  ;;  %v6927_v17 = vpack.c.bf16 %v6902_v12, %v6901_v15 }
 0x42e   : > { %v6875_v60 = vadd.f32 %v8834_v56, %v11385_v13  ;;  %v8836_v27 = vadd.f32 %v8741_v46, %v11345_v10  ;;  %v6758_v47 = vpop.f32.mrb[3].mxu1 }
 0x42f   : > { %v6873_v50 = vadd.f32 %v8835_v7, %v11385_v13  ;;  %v8837_v2 = vadd.f32 %v6758_v47, %v11347_v37  ;;  %8782 = vmatprep.mubr.bf16.mxu0 %v6927_v17 }
 0x430   : > { %v6876_v39 = vadd.f32 %v8836_v27, %v11385_v13  ;;  %8783 = vmatmul.mubr.bf16.gmra.mrb[76].mxu0 %v6928_v23  ;;  %v6907_v5 = vmax.f32 %v6875_v60, 0.0 }
 0x431   : > { %v6874_v34 = vadd.f32 %v8837_v2, %v11385_v13  ;;  %v6905_v6 = vmax.f32 %v6873_v50, 0.0 }
 0x432   : > { %v6908_v0 = vmax.f32 %v6876_v39, 0.0 }
 0x433   : > { %v6906_v9 = vmax.f32 %v6874_v34, 0.0  ;;  %v8744_v51 = vpop.f32.mrb[4].mxu1 }
 0x434   : > { %v8838_v18 = vadd.f32 %v8744_v51, %v11352_v58  ;;  %v6771_v36 = vpop.f32.mrb[5].mxu1  ;;  %v6930_v10 = vpack.c.bf16 %v6908_v0, %v6907_v5  ;;  %v9405_v5 = vld [vmem:[%s9872_s8 + $0x8] sm:$0xff]  }
 0x435   : > { %v8839_v59 = vadd.f32 %v6771_v36, %v11354_v38  ;;  %v8745_v24 = vpop.f32.mrb[6].mxu1  ;;  %v6929_v19 = vpack.c.bf16 %v6906_v9, %v6905_v6  ;;  %v7203_v0 = vunpack.c.l.bf16 %v9405_v5 }
 0x436   : > { %v6879_v37 = vadd.f32 %v8838_v18, %v11385_v13  ;;  %v8840_v48 = vadd.f32 %v8745_v24, %v11356_v11  ;;  %v6774_v61 = vpop.f32.mrb[7].mxu1 }
 0x437   : > { %v6877_v40 = vadd.f32 %v8839_v59, %v11385_v13  ;;  %v8841_v45 = vadd.f32 %v6774_v61, %v11358_v14  ;;  %8786 = vmatprep.mubr.bf16.mxu0 %v6929_v19  ;;  %v7204_v59 = vunpack.c.h.bf16 %v9405_v5 }
 0x438   : > { %v6880_v55 = vadd.f32 %v8840_v48, %v11385_v13  ;;  %8787 = vmatmul.mubr.bf16.gmra.mrb[80].mxu0 %v6930_v10  ;;  %v6911_v42 = vmax.f32 %v6879_v37, 0.0 }
 0x439   : > { %v6878_v58 = vadd.f32 %v8841_v45, %v11385_v13  ;;  %v6909_v38 = vmax.f32 %v6877_v40, 0.0 }
 0x43a   : > { %v6912_v32 = vmax.f32 %v6880_v55, 0.0 }
 0x43b   : > { %v6910_v31 = vmax.f32 %v6878_v58, 0.0  ;;  %v8748_v57 = vpop.f32.mrb[8].mxu1 }
 0x43c   : > { %v8842_v3 = vadd.f32 %v8748_v57, %v11360_v33  ;;  %v6787_v26 = vpop.f32.mrb[9].mxu1  ;;  %v6932_v11 = vpack.c.bf16 %v6912_v32, %v6911_v42 }
 0x43d   : > { %v8843_v21 = vadd.f32 %v6787_v26, %v11362_v43  ;;  %v8749_v63 = vpop.f32.mrb[10].mxu1  ;;  %v6931_v16 = vpack.c.bf16 %v6910_v31, %v6909_v38 }
 0x43e   : > { %v6883_v14 = vadd.f32 %v8842_v3, %v11385_v13  ;;  %v8844_v62 = vadd.f32 %v8749_v63, %v11364_v20  ;;  %v6790_v4 = vpop.f32.mrb[11].mxu1  ;;  %v9407_v3 = vld [vmem:[%s9872_s8 + $0x18] sm:$0xff]  }
 0x43f   : > { %v6881_v35 = vadd.f32 %v8843_v21, %v11385_v13  ;;  %v8845_v25 = vadd.f32 %v6790_v4, %v11366_v49  ;;  %8790 = vmatprep.mubr.bf16.mxu0 %v6931_v16  ;;  %v7207_v26 = vunpack.c.l.bf16 %v9407_v3 }
 0x440   : > { %v6884_v30 = vadd.f32 %v8844_v62, %v11385_v13  ;;  %8791 = vmatmul.mubr.bf16.gmra.mrb[84].mxu0 %v6932_v11  ;;  %v6915_v1 = vmax.f32 %v6883_v14, 0.0  ;;  %v9408_v14 = vld [vmem:[%s9872_s8 + $0x10] sm:$0xff]  }
 0x441   : > { %v6882_v33 = vadd.f32 %v8845_v25, %v11385_v13  ;;  %v6913_v43 = vmax.f32 %v6881_v35, 0.0  ;;  %v7205_v62 = vunpack.c.l.bf16 %v9408_v14 }
 0x442   : > { %v6916_v41 = vmax.f32 %v6884_v30, 0.0 }
 0x443   : > { %v6914_v22 = vmax.f32 %v6882_v33, 0.0  ;;  %v8752_v44 = vpop.f32.mrb[12].mxu1  ;;  %v7208_v33 = vunpack.c.h.bf16 %v9407_v3 }
 0x444   : > { %v8846_v15 = vadd.f32 %v8752_v44, %v11368_v29  ;;  %v6803_v12 = vpop.f32.mrb[13].mxu1  ;;  %v6934_v20 = vpack.c.bf16 %v6916_v41, %v6915_v1  ;;  %v7206_v44 = vunpack.c.h.bf16 %v9408_v14 }
 0x445   : > { %v8847_v54 = vadd.f32 %v6803_v12, %v11370_v52  ;;  %v8753_v56 = vpop.f32.mrb[14].mxu1  ;;  %v6933_v28 = vpack.c.bf16 %v6914_v22, %v6913_v43 }
 0x446   : > { %v6887_v49 = vadd.f32 %v8846_v15, %v11385_v13  ;;  %v8848_v23 = vadd.f32 %v8753_v56, %v11372_v53  ;;  %v6806_v7 = vpop.f32.mrb[15].mxu1  ;;  %v11441_v53 = vld [vmem:[%s11568_s6] ss:$0 sm:$0xff] }
 0x447   : > { %v6885_v46 = vadd.f32 %v8847_v54, %v11385_v13  ;;  %v8849_v17 = vadd.f32 %v6806_v7, %v11374_v8  ;;  %8794 = vmatprep.mubr.bf16.mxu0 %v6933_v28 }
 0x448   : > { %v6888_v60 = vadd.f32 %v8848_v23, %v11385_v13  ;;  %8795 = vmatmul.mubr.bf16.gmra.mrb[88].mxu0 %v6934_v20  ;;  %v6919_v52 = vmax.f32 %v6887_v49, 0.0 }
 0x449   : > { %v6886_v29 = vadd.f32 %v8849_v17, %v11385_v13  ;;  %v6917_v47 = vmax.f32 %v6885_v46, 0.0  ;;  %v9406_v13 = vld [vmem:[%s9872_s8] sm:$0xff]   ;;  %v9409_v17 = vld [vmem:[%s9872_s8 + $0x28] sm:$0xff]  }
 0x44a   : > { %v6920_v27 = vmax.f32 %v6888_v60, 0.0  ;;  %v7201_v9 = vunpack.c.l.bf16 %v9406_v13  ;;  %v7202_v19 = vunpack.c.h.bf16 %v9406_v13  ;;  %v7211_v60 = vunpack.c.l.bf16 %v9409_v17 }
 0x44b   : > { %v6918_v50 = vmax.f32 %v6886_v29, 0.0 }
 0x44c   : > { %v6936_v2 = vpack.c.bf16 %v6920_v27, %v6919_v52 }
 0x44d   : > { %v6935_v39 = vpack.c.bf16 %v6918_v50, %v6917_v47  ;;  %v9410_v50 = vld [vmem:[%s9872_s8 + $0x20] sm:$0xff]  }
 0x44f   : > { %8798 = vmatprep.mubr.bf16.mxu0 %v6935_v39 }
 0x450   : > { %8799 = vmatmul.mubr.bf16.gmra.mrb[92].mxu0 %v6936_v2  ;;  %v7209_v2 = vunpack.c.l.bf16 %v9410_v50 }
 0x4eb   : > { %v8772_v8 = vpop.f32.mrb[64].mxu0 }
 0x4ec   : > { %v7051_v34 = vadd.f32 %v8772_v8, %v11441_v53  ;;  %v7042_v6 = vpop.f32.mrb[65].mxu0 }
 0x4ed   : > { %v7043_v51 = vadd.f32 %v11441_v53, %v7042_v6  ;;  %v8773_v18 = vpop.f32.mrb[66].mxu0 }
 0x4ee   : > { %v7171_v36 = vmax.f32 %v7051_v34, 0.0  ;;  %v7054_v10 = vadd.f32 %v8773_v18, %v11441_v53  ;;  %v7045_v24 = vpop.f32.mrb[67].mxu0  ;;  %v7210_v18 = vunpack.c.h.bf16 %v9410_v50 }
 0x4ef   : > { %v7169_v37 = vmax.f32 %v7043_v51, 0.0  ;;  %v7046_v48 = vadd.f32 %v11441_v53, %v7045_v24 }
 0x4f0   : > { %v7235_v61 = vadd.f32 %v7203_v0, %v7171_v36  ;;  %v7172_v40 = vmax.f32 %v7054_v10, 0.0  ;;  %v7212_v0 = vunpack.c.h.bf16 %v9409_v17 }
 0x4f1   : > { %v7233_v45 = vadd.f32 %v7201_v9, %v7169_v37  ;;  %v7170_v55 = vmax.f32 %v7046_v48, 0.0 }
 0x4f2   : > { %v7236_v58 = vadd.f32 %v7204_v59, %v7172_v40  ;;  %v7267_v38 = vmax.f32 %v7235_v61, 0.0 }
 0x4f3   : > { %v7234_v42 = vadd.f32 %v7202_v19, %v7170_v55  ;;  %v8776_v32 = vpop.f32.mrb[68].mxu0  ;;  %v7265_v21 = vmax.f32 %v7233_v45, 0.0  ;;  %v9411_v55 = vld [vmem:[%s9872_s8 + $0x38] sm:$0xff]  }
 0x4f4   : > { %v7268_v31 = vmax.f32 %v7236_v58, 0.0  ;;  %v7067_v57 = vadd.f32 %v8776_v32, %v11441_v53  ;;  %v7058_v11 = vpop.f32.mrb[69].mxu0  ;;  %v7215_v58 = vunpack.c.l.bf16 %v9411_v55 }
 0x4f5   : > { %v7266_v63 = vmax.f32 %v7234_v42, 0.0  ;;  %v7059_v16 = vadd.f32 %v11441_v53, %v7058_v11  ;;  %v8777_v4 = vpop.f32.mrb[70].mxu0 }
 0x4f6   : > { %v7923_v35 = vpack.c.bf16 %v7268_v31, %v7267_v38  ;;  %v7175_v25 = vmax.f32 %v7067_v57, 0.0  ;;  %v7070_v30 = vadd.f32 %v8777_v4, %v11441_v53  ;;  %v7061_v1 = vpop.f32.mrb[71].mxu0  ;;  %v9412_v57 = vld [vmem:[%s9872_s8 + $0x30] sm:$0xff]  }
 0x4f7   : > { %v7918_v41 = vpack.c.bf16 %v7266_v63, %v7265_v21  ;;  %v7173_v43 = vmax.f32 %v7059_v16, 0.0  ;;  %v7062_v22 = vadd.f32 %v11441_v53, %v7061_v1  ;;  %v7213_v3 = vunpack.c.l.bf16 %v9412_v57 }
 0x4f8   : > { %7995 = vst [vmem:[%s11457_s21 + $0x8] sm:$0xff] %v7923_v35   ;;  %v7239_v15 = vadd.f32 %v7207_v26, %v7175_v25  ;;  %v7176_v12 = vmax.f32 %v7070_v30, 0.0  ;;  %v7216_v16 = vunpack.c.h.bf16 %v9411_v55  ;;  %v7214_v25 = vunpack.c.h.bf16 %v9412_v57 }
 0x4f9   : > { %7919 = vst [vmem:[%s11457_s21] sm:$0xff] %v7918_v41   ;;  %v7237_v20 = vadd.f32 %v7205_v62, %v7173_v43  ;;  %v7174_v54 = vmax.f32 %v7062_v22, 0.0 }
 0x4fa   : > { %v7240_v56 = vadd.f32 %v7208_v33, %v7176_v12  ;;  %v7271_v23 = vmax.f32 %v7239_v15, 0.0 }
 0x4fb   : > { %v7238_v28 = vadd.f32 %v7206_v44, %v7174_v54  ;;  %v8780_v49 = vpop.f32.mrb[72].mxu0  ;;  %v7269_v52 = vmax.f32 %v7237_v20, 0.0  ;;  %v9413_v54 = vld [vmem:[%s9872_s8 + $0x48] sm:$0xff]  }
 0x4fc   : > { %v7272_v7 = vmax.f32 %v7240_v56, 0.0  ;;  %v7083_v46 = vadd.f32 %v8780_v49, %v11441_v53  ;;  %v7074_v29 = vpop.f32.mrb[73].mxu0  ;;  %v7219_v56 = vunpack.c.l.bf16 %v9413_v54 }
 0x4fd   : > { %v7270_v27 = vmax.f32 %v7238_v28, 0.0  ;;  %v7075_v47 = vadd.f32 %v11441_v53, %v7074_v29  ;;  %v8781_v39 = vpop.f32.mrb[74].mxu0 }
 0x4fe   : > { %v7933_v8 = vpack.c.bf16 %v7272_v7, %v7271_v23  ;;  %v7179_v34 = vmax.f32 %v7083_v46, 0.0  ;;  %v7086_v5 = vadd.f32 %v8781_v39, %v11441_v53  ;;  %v7077_v6 = vpop.f32.mrb[75].mxu0  ;;  %v9414_v46 = vld [vmem:[%s9872_s8 + $0x40] sm:$0xff]  }
 0x4ff   : > { %v7928_v13 = vpack.c.bf16 %v7270_v27, %v7269_v52  ;;  %v7177_v9 = vmax.f32 %v7075_v47, 0.0  ;;  %v7078_v51 = vadd.f32 %v11441_v53, %v7077_v6  ;;  %v7217_v17 = vunpack.c.l.bf16 %v9414_v46 }
 0x500   : > { %7997 = vst [vmem:[%s11457_s21 + $0x18] sm:$0xff] %v7933_v8   ;;  %v7243_v36 = vadd.f32 %v7211_v60, %v7179_v34  ;;  %v7180_v10 = vmax.f32 %v7086_v5, 0.0  ;;  %v7220_v47 = vunpack.c.h.bf16 %v9413_v54  ;;  %v7218_v34 = vunpack.c.h.bf16 %v9414_v46 }
 0x501   : > { %7996 = vst [vmem:[%s11457_s21 + $0x10] sm:$0xff] %v7928_v13   ;;  %v7241_v59 = vadd.f32 %v7209_v2, %v7177_v9  ;;  %v7178_v24 = vmax.f32 %v7078_v51, 0.0 }
 0x502   : > { %v7244_v19 = vadd.f32 %v7212_v0, %v7180_v10  ;;  %v7275_v61 = vmax.f32 %v7243_v36, 0.0 }
 0x503   : > { %v7242_v37 = vadd.f32 %v7210_v18, %v7178_v24  ;;  %v8784_v48 = vpop.f32.mrb[76].mxu0  ;;  %v7273_v32 = vmax.f32 %v7241_v59, 0.0  ;;  %v9415_v24 = vld [vmem:[%s9872_s8 + $0x58] sm:$0xff]  }
 0x504   : > { %v7276_v40 = vmax.f32 %v7244_v19, 0.0  ;;  %v7099_v45 = vadd.f32 %v8784_v48, %v11441_v53  ;;  %v7090_v42 = vpop.f32.mrb[77].mxu0  ;;  %v7223_v19 = vunpack.c.l.bf16 %v9415_v24 }
 0x505   : > { %v7274_v38 = vmax.f32 %v7242_v37, 0.0  ;;  %v7091_v31 = vadd.f32 %v11441_v53, %v7090_v42  ;;  %v8785_v26 = vpop.f32.mrb[78].mxu0 }
 0x506   : > { %v7943_v11 = vpack.c.bf16 %v7276_v40, %v7275_v61  ;;  %v7183_v21 = vmax.f32 %v7099_v45, 0.0  ;;  %v7102_v63 = vadd.f32 %v8785_v26, %v11441_v53  ;;  %v7093_v14 = vpop.f32.mrb[79].mxu0  ;;  %v9416_v45 = vld [vmem:[%s9872_s8 + $0x50] sm:$0xff]  }
 0x507   : > { %v7938_v62 = vpack.c.bf16 %v7274_v38, %v7273_v32  ;;  %v7181_v4 = vmax.f32 %v7091_v31, 0.0  ;;  %v7094_v35 = vadd.f32 %v11441_v53, %v7093_v14  ;;  %v7221_v55 = vunpack.c.l.bf16 %v9416_v45 }
 0x508   : > { %7999 = vst [vmem:[%s11457_s21 + $0x28] sm:$0xff] %v7943_v11   ;;  %v7247_v30 = vadd.f32 %v7215_v58, %v7183_v21  ;;  %v7184_v33 = vmax.f32 %v7102_v63, 0.0  ;;  %v7224_v31 = vunpack.c.h.bf16 %v9415_v24  ;;  %v7222_v21 = vunpack.c.h.bf16 %v9416_v45 }
 0x509   : > { %7998 = vst [vmem:[%s11457_s21 + $0x20] sm:$0xff] %v7938_v62   ;;  %v7245_v1 = vadd.f32 %v7213_v3, %v7181_v4  ;;  %v7182_v41 = vmax.f32 %v7094_v35, 0.0 }
 0x50a   : > { %v7248_v43 = vadd.f32 %v7216_v16, %v7184_v33  ;;  %v7279_v15 = vmax.f32 %v7247_v30, 0.0 }
 0x50b   : > { %v7246_v22 = vadd.f32 %v7214_v25, %v7182_v41  ;;  %v8788_v44 = vpop.f32.mrb[80].mxu0  ;;  %v7277_v49 = vmax.f32 %v7245_v1, 0.0  ;;  %v9417_v41 = vld [vmem:[%s9872_s8 + $0x68] sm:$0xff]  }
 0x50c   : > { %v7280_v12 = vmax.f32 %v7248_v43, 0.0  ;;  %v7115_v20 = vadd.f32 %v8788_v44, %v11441_v53  ;;  %v7106_v28 = vpop.f32.mrb[81].mxu0  ;;  %v7227_v43 = vunpack.c.l.bf16 %v9417_v41 }
 0x50d   : > { %v7278_v23 = vmax.f32 %v7246_v22, 0.0  ;;  %v7107_v7 = vadd.f32 %v11441_v53, %v7106_v28  ;;  %v8789_v60 = vpop.f32.mrb[82].mxu0 }
 0x50e   : > { %v7953_v29 = vpack.c.bf16 %v7280_v12, %v7279_v15  ;;  %v7187_v52 = vmax.f32 %v7115_v20, 0.0  ;;  %v7118_v27 = vadd.f32 %v8789_v60, %v11441_v53  ;;  %v7109_v50 = vpop.f32.mrb[83].mxu0  ;;  %v9418_v20 = vld [vmem:[%s9872_s8 + $0x60] sm:$0xff]  }
 0x50f   : > { %v7948_v2 = vpack.c.bf16 %v7278_v23, %v7277_v49  ;;  %v7185_v39 = vmax.f32 %v7107_v7, 0.0  ;;  %v7110_v8 = vadd.f32 %v11441_v53, %v7109_v50  ;;  %v7225_v54 = vunpack.c.l.bf16 %v9418_v20 }
 0x510   : > { %8001 = vst [vmem:[%s11457_s21 + $0x38] sm:$0xff] %v7953_v29   ;;  %v7251_v5 = vadd.f32 %v7219_v56, %v7187_v52  ;;  %v7188_v0 = vmax.f32 %v7118_v27, 0.0  ;;  %v7228_v7 = vunpack.c.h.bf16 %v9417_v41  ;;  %v7226_v52 = vunpack.c.h.bf16 %v9418_v20 }
 0x511   : > { %8000 = vst [vmem:[%s11457_s21 + $0x30] sm:$0xff] %v7948_v2   ;;  %v7249_v6 = vadd.f32 %v7217_v17, %v7185_v39  ;;  %v7186_v13 = vmax.f32 %v7110_v8, 0.0 }
 0x512   : > { %v7252_v9 = vadd.f32 %v7220_v47, %v7188_v0  ;;  %v7283_v36 = vmax.f32 %v7251_v5, 0.0 }
 0x513   : > { %v7250_v51 = vadd.f32 %v7218_v34, %v7186_v13  ;;  %v8792_v18 = vpop.f32.mrb[84].mxu0  ;;  %v7281_v48 = vmax.f32 %v7249_v6, 0.0  ;;  %v9419_v13 = vld [vmem:[%s9872_s8 + $0x78] sm:$0xff]  }
 0x514   : > { %v7284_v10 = vmax.f32 %v7252_v9, 0.0  ;;  %v7131_v59 = vadd.f32 %v8792_v18, %v11441_v53  ;;  %v7122_v37 = vpop.f32.mrb[85].mxu0  ;;  %v7231_v9 = vunpack.c.l.bf16 %v9419_v13 }
 0x515   : > { %v7282_v61 = vmax.f32 %v7250_v51, 0.0  ;;  %v7123_v40 = vadd.f32 %v11441_v53, %v7122_v37  ;;  %v8793_v58 = vpop.f32.mrb[86].mxu0 }
 0x516   : > { %v7963_v42 = vpack.c.bf16 %v7284_v10, %v7283_v36  ;;  %v7191_v32 = vmax.f32 %v7131_v59, 0.0  ;;  %v7134_v38 = vadd.f32 %v8793_v58, %v11441_v53  ;;  %v7125_v57 = vpop.f32.mrb[87].mxu0  ;;  %v9420_v59 = vld [vmem:[%s9872_s8 + $0x70] sm:$0xff]   ;;  %s11514_s8 = scalar_lea.hbm %s11569_s7, %s7914_s16 }
 0x517   : > { %v7958_v3 = vpack.c.bf16 %v7282_v61, %v7281_v48  ;;  %v7189_v26 = vmax.f32 %v7123_v40, 0.0  ;;  %v7126_v11 = vadd.f32 %v11441_v53, %v7125_v57  ;;  %v7229_v24 = vunpack.c.l.bf16 %v9420_v59 }
 0x518   : > { %8003 = vst [vmem:[%s11457_s21 + $0x48] sm:$0xff] %v7963_v42   ;;  %v7255_v63 = vadd.f32 %v7223_v19, %v7191_v32  ;;  %v7192_v16 = vmax.f32 %v7134_v38, 0.0  ;;  %v7232_v40 = vunpack.c.h.bf16 %v9419_v13  ;;  %v7230_v32 = vunpack.c.h.bf16 %v9420_v59 }
 0x519   : > { %8002 = vst [vmem:[%s11457_s21 + $0x40] sm:$0xff] %v7958_v3   ;;  %v7253_v14 = vadd.f32 %v7221_v55, %v7189_v26  ;;  %v7190_v62 = vmax.f32 %v7126_v11, 0.0 }
 0x51a   : > { %v7256_v4 = vadd.f32 %v7224_v31, %v7192_v16  ;;  %v7287_v30 = vmax.f32 %v7255_v63, 0.0 }
 0x51b   : > { %v7254_v35 = vadd.f32 %v7222_v21, %v7190_v62  ;;  %v8796_v25 = vpop.f32.mrb[88].mxu0  ;;  %v7285_v44 = vmax.f32 %v7253_v14, 0.0 }
 0x51c   : > { %v7288_v33 = vmax.f32 %v7256_v4, 0.0  ;;  %v7147_v1 = vadd.f32 %v8796_v25, %v11441_v53  ;;  %v7138_v22 = vpop.f32.mrb[89].mxu0 }
 0x51d   : > { %v7286_v15 = vmax.f32 %v7254_v35, 0.0  ;;  %v7139_v12 = vadd.f32 %v11441_v53, %v7138_v22  ;;  %v8797_v56 = vpop.f32.mrb[90].mxu0 }
 0x51e   : > { %v7973_v28 = vpack.c.bf16 %v7288_v33, %v7287_v30  ;;  %v7195_v49 = vmax.f32 %v7147_v1, 0.0  ;;  %v7150_v23 = vadd.f32 %v8797_v56, %v11441_v53  ;;  %v7141_v46 = vpop.f32.mrb[91].mxu0 }
 0x51f   : > { %v7968_v17 = vpack.c.bf16 %v7286_v15, %v7285_v44  ;;  %v7193_v60 = vmax.f32 %v7139_v12, 0.0  ;;  %v7142_v29 = vadd.f32 %v11441_v53, %v7141_v46 }
 0x520   : > { %8005 = vst [vmem:[%s11457_s21 + $0x58] sm:$0xff] %v7973_v28   ;;  %v7259_v27 = vadd.f32 %v7227_v43, %v7195_v49  ;;  %v7196_v47 = vmax.f32 %v7150_v23, 0.0 }
 0x521   : > { %8004 = vst [vmem:[%s11457_s21 + $0x50] sm:$0xff] %v7968_v17   ;;  %v7257_v50 = vadd.f32 %v7225_v54, %v7193_v60  ;;  %v7194_v2 = vmax.f32 %v7142_v29, 0.0 }
 0x522   : > { %v7260_v39 = vadd.f32 %v7228_v7, %v7196_v47  ;;  %v7291_v5 = vmax.f32 %v7259_v27, 0.0 }
 0x523   : > { %v7258_v8 = vadd.f32 %v7226_v52, %v7194_v2  ;;  %v8800_v34 = vpop.f32.mrb[92].mxu0  ;;  %v7289_v18 = vmax.f32 %v7257_v50, 0.0 }
 0x524   : > { %v7292_v0 = vmax.f32 %v7260_v39, 0.0  ;;  %v7163_v6 = vadd.f32 %v8800_v34, %v11441_v53  ;;  %v7154_v51 = vpop.f32.mrb[93].mxu0 }
 0x525   : > { %v7290_v36 = vmax.f32 %v7258_v8, 0.0  ;;  %v7155_v10 = vadd.f32 %v11441_v53, %v7154_v51  ;;  %v8801_v19 = vpop.f32.mrb[94].mxu0 }
 0x526   : > { %v7983_v37 = vpack.c.bf16 %v7292_v0, %v7291_v5  ;;  %v7199_v48 = vmax.f32 %v7163_v6, 0.0  ;;  %v7166_v61 = vadd.f32 %v8801_v19, %v11441_v53  ;;  %v7157_v45 = vpop.f32.mrb[95].mxu0 }
 0x527   : > { %v7978_v55 = vpack.c.bf16 %v7290_v36, %v7289_v18  ;;  %v7197_v58 = vmax.f32 %v7155_v10, 0.0  ;;  %v7158_v42 = vadd.f32 %v11441_v53, %v7157_v45 }
 0x528   : > { %8007 = vst [vmem:[%s11457_s21 + $0x68] sm:$0xff] %v7983_v37   ;;  %v7263_v38 = vadd.f32 %v7231_v9, %v7199_v48  ;;  %v7200_v31 = vmax.f32 %v7166_v61, 0.0 }
 0x529   : > { %8006 = vst [vmem:[%s11457_s21 + $0x60] sm:$0xff] %v7978_v55   ;;  %v7261_v57 = vadd.f32 %v7229_v24, %v7197_v58  ;;  %v7198_v3 = vmax.f32 %v7158_v42, 0.0 }
 0x52a   : > { %v7264_v26 = vadd.f32 %v7232_v40, %v7200_v31  ;;  %v7295_v21 = vmax.f32 %v7263_v38, 0.0 }
 0x52b   : > { %v7262_v11 = vadd.f32 %v7230_v32, %v7198_v3  ;;  %v7293_v16 = vmax.f32 %v7261_v57, 0.0 }
 0x52c   : > { %v7296_v63 = vmax.f32 %v7264_v26, 0.0 }
 0x52d   : > { %v7294_v14 = vmax.f32 %v7262_v11, 0.0 }
 0x52e   : > { %v7993_v53 = vpack.c.bf16 %v7296_v63, %v7295_v21 }
 0x52f   : > { %v7988_v62 = vpack.c.bf16 %v7294_v14, %v7293_v16 }
 0x530   : > { %8009 = vst [vmem:[%s11457_s21 + $0x78] sm:$0xff] %v7993_v53  }
 0x531   : > { %8008 = vst [vmem:[%s11457_s21 + $0x70] sm:$0xff] %v7988_v62  }
 0x532   : > { %9548 = shalt.err (!%p9545_p4)
}
 0x533   : > { %s9549_s10 = scalar_lea.hbm %s11514_s8, 2048  ;;  %s9553_s20 = scalar_lea.hbm %s11569_s7, 4096 }
 0x534   : > { %p9550_p9 = scmp.ne.s32.totalorder %s11514_s8, %s9549_s10  ;;  %p9554_p8 = scmp.lt.u32.totalorder %s11514_s8, %s11569_s7 }
 0x535   : > { %p9555_p13 = scmp.lt.u32.totalorder %s9553_s20, %s9549_s10  ;;  %p9557_p10 = scmp.lt.u32.totalorder %s9549_s10, %s11514_s8 }
 0x536   : > { %p9551_p0 = pnand %p9550_p9, %p9815_p5 }
 0x537   : > { %p9556_p6 = por %p9555_p13, %p9554_p8 }
 0x538   : > { %p9552_p11 = pneg %p9551_p0 }
 0x539   : > { %p9558_p3 = por %p9557_p10, %p9556_p6 }
 0x53b   : > { %p9559_p7 = pnand %p9558_p3, %p9552_p11 }
 0x53d   : > { %9562 = shalt.err (!%p9559_p7)
}
 0x53e   : > { %s9619_s23 = smov 64   ;;  %s9620_s11 = smov 4  }
 0x53f   : > { %9088 = dma.vmem_to_hbm [thread:$0]  (%p9815_p5), %s11516_s29, 2048, %s11514_s8, %s7362_s28, %s9619_s23, %s9619_s23, %s9620_s11  }
 0x540 PF: > { %s11650_s30 = sld [smem:[#allocation16_spill]]  ;;  %s7391_s9 = sand.u32 1, %s9597_s24  }
 0x541   : > { %p11652_p1 = scmp.ge.s32.totalorder %s9609_s27, 2  ;;  %s7392_s13 = scalar_lea.sflag [#allocation5], %s7391_s9 }
 0x546   : > { %p11651_p12 = scmp.ne.s32.totalorder %s11650_s30, 0 }
 0x548   : > { %p9105_p2 = pnand %p11652_p1, %p11651_p12 }
 0x54a   : > { %9592 = dma.done.wait (!%p9105_p2), %s7392_s13, 2048  }
 0x54b   : > { %9594 = vsyncadd (!%p9105_p2), %s7392_s13, 4294965248  ;;  %p22_p4 = scmp.ge.s32.totalorder %s9801_s22, 4   ;;  %s11653_s24 = smov %s9601_s25 }
 0x54c   : > { %s11654_s25 = smov %s9605_s26  ;;  %s11655_s26 = smov %s9811_s18 }
 0x54d   : > { %s11656_s27 = smov %s9801_s22  ;;  %24 = sbr.rel (!%p22_p4) target bundleno = 7 (0x7), region = 116 }
 0x554   :  { %7397 = vsyncpa [#allocation4], 1 }
 0x555   :  { %7399 = vsyncpa [#allocation4 + $0x1], 1 }
 0x556   :  { %7400 = vsyncpa [#allocation7], 1 }
 0x557   :  { %7401 = vsyncpa [#allocation10], 1 }
 0x558   :  { %7402 = vsyncpa [#allocation5], 1 }
 0x559   :  { %7404 = vsyncpa [#allocation5 + $0x1], 1 }

</bundles_post_ra>
